<compile_context>
chip_gen: v7x
topology: tpu7x:2x2x1
jax: 0.10.0
libtpu: 0.0.40
codegen_flags: <defaults>
</compile_context>

<pallas_src>
import math

import jax
import jax.numpy as jnp
from jax import lax
from jax.experimental import pallas as pl
from jax.experimental.pallas import tpu as pltpu

# Module hyper-parameters (hard-coded in the PyTorch file).
D_MODEL = 512
D_FF = D_MODEL * 4
N_HEADS = 8
D_K = 64          # d_model / n_heads (standard choice implied by the module)
D_V = 64
EPS = 1e-5        # nn.LayerNorm default eps
NEG_INF = -1.0e9  # masked_fill_ value


def _layernorm(y, gamma, beta):
    """y: (T, D) f32; gamma/beta: (1, D) f32. Biased variance (torch default)."""
    mu = jnp.mean(y, axis=-1, keepdims=True)
    d = y - mu
    var = jnp.mean(d * d, axis=-1, keepdims=True)
    return d * lax.rsqrt(var + EPS) * gamma + beta


# ---------------------------------------------------------------------------
# Fused encoder-layer kernel.
# grid = (batch, num_query_tiles); each step handles TQ query rows of one
# batch element end-to-end (attention + both LayerNorms + FFN).  The K/V
# projection for the whole sequence is computed once per batch element at
# query-tile 0 and cached in a persistent VMEM scratch (kv_ref).
# ---------------------------------------------------------------------------
def encoder_layer_kernel(x_ref, mask_ref, wq_ref, wkv_ref, wo_ref,
                         g1_ref, b1_ref, w1_ref, w2_ref, g2_ref, b2_ref,
                         out_ref, attn_ref, kv_ref):
    TQ = out_ref.shape[1]
    qt = pl.program_id(1)
    row0 = pl.multiple_of(qt * TQ, TQ)

    # ---- K/V projection: once per batch element, cached across query tiles --
    @pl.when(qt == 0)
    def _():
        kv = jnp.dot(x_ref[0], wkv_ref[...],
                     preferred_element_type=jnp.float32)        # (S, 2*H*dk)
        kv_ref[...] = kv.astype(jnp.bfloat16)

    x_tile = x_ref[0, pl.ds(row0, TQ), :]          # (TQ, D) bf16 (residual / query rows)

    # ---- Q projection for this tile only (bf16 MXU, f32 accumulation) -------
    q = jnp.dot(x_tile, wq_ref[...], preferred_element_type=jnp.float32)  # (TQ, H*dk)
    q = q * jnp.float32(1.0 / math.sqrt(D_K))      # fold 1/sqrt(dk) into Q once
    q_b = q.astype(jnp.bfloat16)

    # mask bias hoisted out of the head loop; mask is int8 0/1 -> {0, -1e9}
    mask_bias = mask_ref[0].astype(jnp.float32) * jnp.float32(NEG_INF)     # (TQ, S)

    nt = (((1,), (1,)), ((), ()))  # contract last dims of both operands (A @ B^T)
    ctx_parts = []                 # per-head bf16 contexts, concatenated lane-aligned below
    for h in range(N_HEADS):       # unrolled; independent, well-formed 2-D MXU dots
        qh = q_b[:, h * D_K:(h + 1) * D_K]                       # (TQ, dk)
        kh = kv_ref[:, h * D_K:(h + 1) * D_K]                    # (S, dk) bf16
        vh = kv_ref[:, N_HEADS * D_K + h * D_V:
                       N_HEADS * D_K + (h + 1) * D_V]            # (S, dv) bf16

        score = lax.dot_general(qh, kh, nt,
                                preferred_element_type=jnp.float32)         # (TQ, S)
        score = score + mask_bias
        score = score - jnp.max(score, axis=-1, keepdims=True)
        e = jnp.exp(score)
        p = e * pl.reciprocal(jnp.sum(e, axis=-1, keepdims=True), approx=True)
        attn_ref[0, h] = p.astype(attn_ref.dtype)                            # bf16 writeback

        ctx_parts.append(jnp.dot(p.astype(jnp.bfloat16), vh,
                                 preferred_element_type=jnp.float32
                                 ).astype(jnp.bfloat16))                     # (TQ, dv)

    # pair heads first so every concatenated piece is a full 128-lane slab
    ctx = jnp.concatenate(
        [jnp.concatenate(ctx_parts[i:i + 2], axis=-1) for i in range(0, N_HEADS, 2)],
        axis=-1)                                                  # (TQ, H*dv) bf16

    # ---- output projection + residual + LayerNorm ---------------------------
    proj = jnp.dot(ctx, wo_ref[...], preferred_element_type=jnp.float32)     # (TQ, D)
    y1 = _layernorm(proj + x_tile.astype(jnp.float32), g1_ref[...], b1_ref[...])

    # ---- feed-forward: Linear -> ReLU -> Linear + residual + LayerNorm ------
    h1 = jnp.dot(y1.astype(jnp.bfloat16), w1_ref[...],
                 preferred_element_type=jnp.float32)                         # (TQ, d_ff)
    h1 = jnp.maximum(h1, 0.0)
    f = jnp.dot(h1.astype(jnp.bfloat16), w2_ref[...],
                preferred_element_type=jnp.float32)                          # (TQ, D)

    out_ref[0] = _layernorm(f + y1, g2_ref[...], b2_ref[...])


# ---------------------------------------------------------------------------
# Wrapper
# ---------------------------------------------------------------------------
def _vmem_capacity_bytes():
    try:
        return int(pltpu.get_tpu_info().vmem_capacity_bytes)
    except Exception:
        return 64 * 1024 * 1024   # conservative (v7x per-TensorCore)


def encoder_layer(x, mask, params, *, tq=None):
    """x: (B, S, D_MODEL) f32, mask: (B, S, S) (nonzero == masked).
    Returns (enc_out (B,S,D) f32, attn (B,H,S,S) bf16)."""
    (wq, wk, wv, wo, g1, b1, w1, w2, g2, b2) = params
    B, S, D = x.shape
    assert D == D_MODEL

    # Per-generation tiling policy: big-VMEM parts (v5e/v6e, 128 MiB) take
    # larger query tiles; 64 MiB parts (v7x) stay at 256 (128 for long S).
    vmem_cap = _vmem_capacity_bytes()
    big_vmem = vmem_cap >= 96 * 1024 * 1024
    if tq is None:
        cap = 512 if big_vmem else (256 if S < 2048 else 128)
        tq = S if S <= cap else cap
    assert S % tq == 0
    nq = S // tq
    vmem_limit = (100 if big_vmem else 48) * 1024 * 1024

    # bf16 copies for the MXU; LayerNorm params stay f32; mask shipped as int8.
    x_bf = x.astype(jnp.bfloat16)
    mask_i8 = (mask != 0).astype(jnp.int8)
    wq_bf = wq.astype(jnp.bfloat16)
    wkv_bf = jnp.concatenate([wk, wv], axis=1).astype(jnp.bfloat16)   # (512, 1024) fused K|V
    wo_bf = wo.astype(jnp.bfloat16)
    w1_bf = w1.astype(jnp.bfloat16)
    w2_bf = w2.astype(jnp.bfloat16)

    # Advisory cost estimate for XLA scheduling around the fused call.
    flops = int(2 * B * S * D_MODEL * D_MODEL * 4            # Q,K,V,Wo projections
                + 2 * B * N_HEADS * S * S * (D_K + D_V)       # QK^T + PV
                + 4 * B * S * D_MODEL * D_FF)                 # FFN
    transcendentals = int(B * N_HEADS * S * S)                # exp
    bytes_accessed = int(x_bf.size * 2 + mask_i8.size
                         + 2 * (wq_bf.size + wkv_bf.size + wo_bf.size
                                + w1_bf.size + w2_bf.size)
                         + B * S * D_MODEL * 4                # enc_out f32
                         + B * N_HEADS * S * S * 2)           # attn bf16
    cost = pl.CostEstimate(flops=flops, transcendentals=transcendentals,
                           bytes_accessed=bytes_accessed)

    # The query-tile axis carries the KV scratch -> must iterate sequentially.
    # Batch axis stays "parallel" so both TensorCores are fed on v7x when B>=2.
    # TODO(synk): if B == 1 on v7x, precompute KV in HBM instead and keep the
    # query-tile axis "parallel" so the second TensorCore is not idled.
    cparams = pltpu.CompilerParams(
        dimension_semantics=("parallel", "arbitrary"),
        vmem_limit_bytes=vmem_limit,
    )

    kernel = pl.pallas_call(
        encoder_layer_kernel,
        out_shape=(
            jax.ShapeDtypeStruct((B, S, D_MODEL), jnp.float32),
            jax.ShapeDtypeStruct((B, N_HEADS, S, S), jnp.bfloat16),
        ),
        grid=(B, nq),
        in_specs=[
            pl.BlockSpec((1, S, D_MODEL), lambda b, t: (b, 0, 0)),            # x (full seq)
            pl.BlockSpec((1, tq, S), lambda b, t: (b, t, 0)),                 # mask tile (i8)
            pl.BlockSpec((D_MODEL, N_HEADS * D_K), lambda b, t: (0, 0)),      # Wq
            pl.BlockSpec((D_MODEL, 2 * N_HEADS * D_K), lambda b, t: (0, 0)),  # Wk|Wv fused
            pl.BlockSpec((N_HEADS * D_V, D_MODEL), lambda b, t: (0, 0)),      # Wo
            pl.BlockSpec((1, D_MODEL), lambda b, t: (0, 0)),                  # gamma1
            pl.BlockSpec((1, D_MODEL), lambda b, t: (0, 0)),                  # beta1
            pl.BlockSpec((D_MODEL, D_FF), lambda b, t: (0, 0)),               # W1
            pl.BlockSpec((D_FF, D_MODEL), lambda b, t: (0, 0)),               # W2
            pl.BlockSpec((1, D_MODEL), lambda b, t: (0, 0)),                  # gamma2
            pl.BlockSpec((1, D_MODEL), lambda b, t: (0, 0)),                  # beta2
        ],
        out_specs=(
            pl.BlockSpec((1, tq, D_MODEL), lambda b, t: (b, t, 0)),
            pl.BlockSpec((1, N_HEADS, tq, S), lambda b, t: (b, 0, t, 0)),
        ),
        scratch_shapes=[
            pltpu.VMEM((S, 2 * N_HEADS * D_K), jnp.bfloat16),  # persistent K|V cache
        ],
        compiler_params=cparams,
        cost_estimate=cost,
    )
    enc_out, attn = kernel(x_bf, mask_i8, wq_bf, wkv_bf, wo_bf,
                           g1, b1, w1_bf, w2_bf, g2, b2)
    return enc_out, attn


# ---------------------------------------------------------------------------
# Pure-JAX reference (mirrors the PyTorch forward) for sanity checking.
# ---------------------------------------------------------------------------
def ref_encoder_layer(x, mask, params):
    (wq, wk, wv, wo, g1, b1, w1, w2, g2, b2) = params
    B, S, D = x.shape

    def layernorm(y, g, b):
        mu = y.mean(-1, keepdims=True)
        var = ((y - mu) ** 2).mean(-1, keepdims=True)
        return (y - mu) / jnp.sqrt(var + EPS) * g.reshape(1, 1, -1) + b.reshape(1, 1, -1)

    q = (x @ wq).reshape(B, S, N_HEADS, D_K).transpose(0, 2, 1, 3)
    k = (x @ wk).reshape(B, S, N_HEADS, D_K).transpose(0, 2, 1, 3)
    v = (x @ wv).reshape(B, S, N_HEADS, D_V).transpose(0, 2, 1, 3)
    score = jnp.einsum("bhqd,bhkd->bhqk", q, k) / math.sqrt(D_K)
    score = jnp.where(mask[:, None, :, :] != 0, NEG_INF, score)
    attn = jax.nn.softmax(score, axis=-1)
    ctx = jnp.einsum("bhqk,bhkd->bhqd", attn, v)
    ctx = ctx.transpose(0, 2, 1, 3).reshape(B, S, N_HEADS * D_V)
    enc = layernorm(ctx @ wo + x, g1, b1)
    f = jnp.maximum(enc @ w1, 0.0) @ w2
    enc2 = layernorm(f + enc, g2, b2)
    return enc2, attn


# ---------------------------------------------------------------------------
def make_params(key):
    ks = jax.random.split(key, 6)
    scale = 0.02
    wq = jax.random.normal(ks[0], (D_MODEL, N_HEADS * D_K), jnp.float32) * scale
    wk = jax.random.normal(ks[1], (D_MODEL, N_HEADS * D_K), jnp.float32) * scale
    wv = jax.random.normal(ks[2], (D_MODEL, N_HEADS * D_V), jnp.float32) * scale
    wo = jax.random.normal(ks[3], (N_HEADS * D_V, D_MODEL), jnp.float32) * scale
    w1 = jax.random.normal(ks[4], (D_MODEL, D_FF), jnp.float32) * scale
    w2 = jax.random.normal(ks[5], (D_FF, D_MODEL), jnp.float32) * scale
    # nn.LayerNorm default init: weight = 1, bias = 0
    g1 = jnp.ones((1, D_MODEL), jnp.float32)
    b1 = jnp.zeros((1, D_MODEL), jnp.float32)
    g2 = jnp.ones((1, D_MODEL), jnp.float32)
    b2 = jnp.zeros((1, D_MODEL), jnp.float32)
    return (wq, wk, wv, wo, g1, b1, w1, w2, g2, b2)


if __name__ == "__main__":
    B, S = 2, 8

    root = jax.random.PRNGKey(0)
    k_params, k_x = jax.random.split(root)
    params = make_params(k_params)

    x = jax.random.normal(k_x, (B, S, D_MODEL), jnp.float32)

    # Padding-style mask: key positions >= valid_len are masked (nonzero).
    valid_lens = jnp.array([S, S - 2], dtype=jnp.int32)
    key_mask = (jnp.arange(S)[None, :] >= valid_lens[:, None])        # (B, S)
    mask = jnp.broadcast_to(key_mask[:, None, :], (B, S, S)).astype(jnp.int32)

    enc_out, attn = jax.block_until_ready(encoder_layer(x, mask, params))

    # Sanity-check against the pure-JAX f32 reference of the PyTorch forward.
    ref_out, ref_attn = ref_encoder_layer(x, mask, params)
    assert enc_out.shape == (B, S, D_MODEL)
    assert attn.shape == (B, N_HEADS, S, S)
    assert bool(jnp.all(jnp.isfinite(enc_out)))
    assert jnp.allclose(attn.astype(jnp.float32), ref_attn, rtol=5e-2, atol=5e-2)
    assert jnp.allclose(enc_out, ref_out, rtol=5e-2, atol=5e-2)

    print("KERNEL_OK")
</pallas_src>

<mosaic_0001>
module attributes {stable_mosaic.version = 11 : i64} {
  func.func @encoder_layer_kernel(%arg0: i32, %arg1: i32, %arg2: memref<1x8x512xbf16, #tpu.memory_space<vmem>>, %arg3: memref<1x8x8xi8, #tpu.memory_space<vmem>>, %arg4: memref<512x512xbf16, #tpu.memory_space<vmem>>, %arg5: memref<512x1024xbf16, #tpu.memory_space<vmem>>, %arg6: memref<512x512xbf16, #tpu.memory_space<vmem>>, %arg7: memref<1x512xf32, #tpu.memory_space<vmem>>, %arg8: memref<1x512xf32, #tpu.memory_space<vmem>>, %arg9: memref<512x2048xbf16, #tpu.memory_space<vmem>>, %arg10: memref<2048x512xbf16, #tpu.memory_space<vmem>>, %arg11: memref<1x512xf32, #tpu.memory_space<vmem>>, %arg12: memref<1x512xf32, #tpu.memory_space<vmem>>, %arg13: memref<1x8x512xf32, #tpu.memory_space<vmem>>, %arg14: memref<1x8x8x8xbf16, #tpu.memory_space<vmem>>, %arg15: memref<8x1024xbf16, #tpu.memory_space<vmem>>) attributes {dimension_semantics = [#tpu.dimension_semantics<parallel>, #tpu.dimension_semantics<arbitrary>], iteration_bounds = array<i64: 2, 1>, scalar_prefetch = 0 : i64, scratch_operands = 1 : i64, tpu.core_type = #tpu.core_type<tc>, window_params = [{transform_indices = @transform_0, window_bounds = array<i64: 1, 8, 512>}, {transform_indices = @transform_1, window_bounds = array<i64: 1, 8, 8>}, {pipeline_mode = #tpu.pipeline_mode<synchronous>, transform_indices = @transform_2, window_bounds = array<i64: 512, 512>}, {pipeline_mode = #tpu.pipeline_mode<synchronous>, transform_indices = @transform_3, window_bounds = array<i64: 512, 1024>}, {pipeline_mode = #tpu.pipeline_mode<synchronous>, transform_indices = @transform_4, window_bounds = array<i64: 512, 512>}, {pipeline_mode = #tpu.pipeline_mode<synchronous>, transform_indices = @transform_5, window_bounds = array<i64: 1, 512>}, {pipeline_mode = #tpu.pipeline_mode<synchronous>, transform_indices = @transform_6, window_bounds = array<i64: 1, 512>}, {pipeline_mode = #tpu.pipeline_mode<synchronous>, transform_indices = @transform_7, window_bounds = array<i64: 512, 2048>}, {pipeline_mode = #tpu.pipeline_mode<synchronous>, transform_indices = @transform_8, window_bounds = array<i64: 2048, 512>}, {pipeline_mode = #tpu.pipeline_mode<synchronous>, transform_indices = @transform_9, window_bounds = array<i64: 1, 512>}, {pipeline_mode = #tpu.pipeline_mode<synchronous>, transform_indices = @transform_10, window_bounds = array<i64: 1, 512>}, {transform_indices = @transform_11, window_bounds = array<i64: 1, 8, 512>}, {transform_indices = @transform_12, window_bounds = array<i64: 1, 8, 8, 8>}]} {
    %c8_i32 = arith.constant 8 : i32
    %0 = arith.muli %arg1, %c8_i32 : i32
    %1 = tpu.assume_multiple %0, 8 : i32
    %c0_i32 = arith.constant 0 : i32
    %2 = arith.cmpi eq, %arg1, %c0_i32 : i32
    %3 = arith.extui %2 : i1 to i32
    %c0_i32_0 = arith.constant 0 : i32
    %4 = arith.cmpi ne, %3, %c0_i32_0 : i32
    scf.if %4 {
      %c0_114 = arith.constant 0 : index
      %c0_115 = arith.constant 0 : index
      %c0_116 = arith.constant 0 : index
      %259 = vector.load %arg2[%c0_114, %c0_115, %c0_116] : memref<1x8x512xbf16, #tpu.memory_space<vmem>>, vector<1x8x512xbf16>
      %260 = vector.shape_cast %259 : vector<1x8x512xbf16> to vector<8x512xbf16>
      %c0_117 = arith.constant 0 : index
      %c0_118 = arith.constant 0 : index
      %261 = vector.load %arg5[%c0_117, %c0_118] : memref<512x1024xbf16, #tpu.memory_space<vmem>>, vector<512x1024xbf16>
      %cst_119 = arith.constant dense<0.000000e+00> : vector<8x1024xf32>
      %262 = tpu.matmul %260, %261, %cst_119 {dimension_numbers = #tpu.dot_dimension_numbers<[1], [0], [0], [1], [0, 0, 1, 1], [], []>} : vector<8x512xbf16>, vector<512x1024xbf16>, vector<8x1024xf32> -> vector<8x1024xf32>
      %263 = arith.truncf %262 : vector<8x1024xf32> to vector<8x1024xbf16>
      %c0_120 = arith.constant 0 : index
      %c0_121 = arith.constant 0 : index
      %264 = vector.load %arg15[%c0_120, %c0_121] : memref<8x1024xbf16, #tpu.memory_space<vmem>>, vector<8x1024xbf16>
      tpu.vector_store %arg15[%c0_120, %c0_121], %263 {strides = array<i32>} : memref<8x1024xbf16, #tpu.memory_space<vmem>>, vector<8x1024xbf16>,
    } else {
    }
    %c0 = arith.constant 0 : index
    %5 = arith.index_cast %1 : i32 to index
    %c0_1 = arith.constant 0 : index
    %6 = vector.load %arg2[%c0, %5, %c0_1] : memref<1x8x512xbf16, #tpu.memory_space<vmem>>, vector<1x8x512xbf16>
    %7 = vector.shape_cast %6 : vector<1x8x512xbf16> to vector<8x512xbf16>
    %c0_2 = arith.constant 0 : index
    %c0_3 = arith.constant 0 : index
    %8 = vector.load %arg4[%c0_2, %c0_3] : memref<512x512xbf16, #tpu.memory_space<vmem>>, vector<512x512xbf16>
    %cst = arith.constant dense<0.000000e+00> : vector<8x512xf32>
    %9 = tpu.matmul %7, %8, %cst {dimension_numbers = #tpu.dot_dimension_numbers<[1], [0], [0], [1], [0, 0, 1, 1], [], []>} : vector<8x512xbf16>, vector<512x512xbf16>, vector<8x512xf32> -> vector<8x512xf32>
    %cst_4 = arith.constant 1.250000e-01 : f32
    %10 = vector.broadcast %cst_4 : f32 to vector<8x512xf32>
    %11 = arith.mulf %9, %10 : vector<8x512xf32>
    %12 = arith.truncf %11 : vector<8x512xf32> to vector<8x512xbf16>
    %c0_5 = arith.constant 0 : index
    %c0_6 = arith.constant 0 : index
    %c0_7 = arith.constant 0 : index
    %13 = vector.load %arg3[%c0_5, %c0_6, %c0_7] : memref<1x8x8xi8, #tpu.memory_space<vmem>>, vector<1x8x8xi8>
    %14 = vector.shape_cast %13 : vector<1x8x8xi8> to vector<8x8xi8>
    %15 = arith.sitofp %14 : vector<8x8xi8> to vector<8x8xf32>
    %cst_8 = arith.constant -1.000000e+09 : f32
    %16 = vector.broadcast %cst_8 : f32 to vector<8x8xf32>
    %17 = arith.mulf %15, %16 : vector<8x8xf32>
    %18 = vector.extract_strided_slice %12 {offsets = [0, 0], sizes = [8, 64], strides = [1, 1]} : vector<8x512xbf16> to vector<8x64xbf16>
    %c0_9 = arith.constant 0 : index
    %c0_10 = arith.constant 0 : index
    %19 = vector.load %arg15[%c0_9, %c0_10] : memref<8x1024xbf16, #tpu.memory_space<vmem>>, vector<8x64xbf16>
    %c0_11 = arith.constant 0 : index
    %c512 = arith.constant 512 : index
    %20 = vector.load %arg15[%c0_11, %c512] : memref<8x1024xbf16, #tpu.memory_space<vmem>>, vector<8x64xbf16>
    %cst_12 = arith.constant dense<0.000000e+00> : vector<8x8xf32>
    %21 = tpu.matmul %18, %19, %cst_12 {dimension_numbers = #tpu.dot_dimension_numbers<[1], [1], [0], [0], [0, 0, 1, 0], [], []>} : vector<8x64xbf16>, vector<8x64xbf16>, vector<8x8xf32> -> vector<8x8xf32>
    %22 = arith.addf %21, %17 : vector<8x8xf32>
    %cst_13 = arith.constant dense<0xFF800000> : vector<8xf32>
    %23 = vector.multi_reduction <maximumf>, %22, %cst_13 [1] : vector<8x8xf32> to vector<8xf32>
    %24 = vector.shape_cast %23 : vector<8xf32> to vector<8x1xf32>
    %25 = vector.broadcast %24 : vector<8x1xf32> to vector<8x8xf32>
    %26 = arith.subf %22, %25 : vector<8x8xf32>
    %27 = math.exp %26 : vector<8x8xf32>
    %cst_14 = arith.constant dense<0.000000e+00> : vector<8xf32>
    %28 = vector.multi_reduction <add>, %27, %cst_14 [1] : vector<8x8xf32> to vector<8xf32>
    %29 = vector.shape_cast %28 : vector<8xf32> to vector<8x1xf32>
    %30 = tpu.reciprocal %29 {approx = true} : vector<8x1xf32> -> vector<8x1xf32>
    %31 = vector.broadcast %30 : vector<8x1xf32> to vector<8x8xf32>
    %32 = arith.mulf %27, %31 : vector<8x8xf32>
    %33 = arith.truncf %32 : vector<8x8xf32> to vector<8x8xbf16>
    %c0_15 = arith.constant 0 : index
    %c0_16 = arith.constant 0 : index
    %c0_17 = arith.constant 0 : index
    %c0_18 = arith.constant 0 : index
    %34 = vector.load %arg14[%c0_15, %c0_16, %c0_17, %c0_18] : memref<1x8x8x8xbf16, #tpu.memory_space<vmem>>, vector<1x1x8x8xbf16>
    %35 = vector.shape_cast %34 : vector<1x1x8x8xbf16> to vector<8x8xbf16>
    %36 = vector.shape_cast %33 : vector<8x8xbf16> to vector<1x1x8x8xbf16>
    tpu.vector_store %arg14[%c0_15, %c0_16, %c0_17, %c0_18], %36 {strides = array<i32>} : memref<1x8x8x8xbf16, #tpu.memory_space<vmem>>, vector<1x1x8x8xbf16>,
    %37 = arith.truncf %32 : vector<8x8xf32> to vector<8x8xbf16>
    %cst_19 = arith.constant dense<0.000000e+00> : vector<8x64xf32>
    %38 = tpu.matmul %37, %20, %cst_19 {dimension_numbers = #tpu.dot_dimension_numbers<[1], [0], [0], [1], [0, 0, 1, 1], [], []>} : vector<8x8xbf16>, vector<8x64xbf16>, vector<8x64xf32> -> vector<8x64xf32>
    %39 = arith.truncf %38 : vector<8x64xf32> to vector<8x64xbf16>
    %40 = vector.extract_strided_slice %12 {offsets = [0, 64], sizes = [8, 64], strides = [1, 1]} : vector<8x512xbf16> to vector<8x64xbf16>
    %c0_20 = arith.constant 0 : index
    %c64 = arith.constant 64 : index
    %41 = vector.load %arg15[%c0_20, %c64] : memref<8x1024xbf16, #tpu.memory_space<vmem>>, vector<8x64xbf16>
    %c0_21 = arith.constant 0 : index
    %c576 = arith.constant 576 : index
    %42 = vector.load %arg15[%c0_21, %c576] : memref<8x1024xbf16, #tpu.memory_space<vmem>>, vector<8x64xbf16>
    %cst_22 = arith.constant dense<0.000000e+00> : vector<8x8xf32>
    %43 = tpu.matmul %40, %41, %cst_22 {dimension_numbers = #tpu.dot_dimension_numbers<[1], [1], [0], [0], [0, 0, 1, 0], [], []>} : vector<8x64xbf16>, vector<8x64xbf16>, vector<8x8xf32> -> vector<8x8xf32>
    %44 = arith.addf %43, %17 : vector<8x8xf32>
    %cst_23 = arith.constant dense<0xFF800000> : vector<8xf32>
    %45 = vector.multi_reduction <maximumf>, %44, %cst_23 [1] : vector<8x8xf32> to vector<8xf32>
    %46 = vector.shape_cast %45 : vector<8xf32> to vector<8x1xf32>
    %47 = vector.broadcast %46 : vector<8x1xf32> to vector<8x8xf32>
    %48 = arith.subf %44, %47 : vector<8x8xf32>
    %49 = math.exp %48 : vector<8x8xf32>
    %cst_24 = arith.constant dense<0.000000e+00> : vector<8xf32>
    %50 = vector.multi_reduction <add>, %49, %cst_24 [1] : vector<8x8xf32> to vector<8xf32>
    %51 = vector.shape_cast %50 : vector<8xf32> to vector<8x1xf32>
    %52 = tpu.reciprocal %51 {approx = true} : vector<8x1xf32> -> vector<8x1xf32>
    %53 = vector.broadcast %52 : vector<8x1xf32> to vector<8x8xf32>
    %54 = arith.mulf %49, %53 : vector<8x8xf32>
    %55 = arith.truncf %54 : vector<8x8xf32> to vector<8x8xbf16>
    %c0_25 = arith.constant 0 : index
    %c1 = arith.constant 1 : index
    %c0_26 = arith.constant 0 : index
    %c0_27 = arith.constant 0 : index
    %56 = vector.load %arg14[%c0_25, %c1, %c0_26, %c0_27] : memref<1x8x8x8xbf16, #tpu.memory_space<vmem>>, vector<1x1x8x8xbf16>
    %57 = vector.shape_cast %56 : vector<1x1x8x8xbf16> to vector<8x8xbf16>
    %58 = vector.shape_cast %55 : vector<8x8xbf16> to vector<1x1x8x8xbf16>
    tpu.vector_store %arg14[%c0_25, %c1, %c0_26, %c0_27], %58 {strides = array<i32>} : memref<1x8x8x8xbf16, #tpu.memory_space<vmem>>, vector<1x1x8x8xbf16>,
    %59 = arith.truncf %54 : vector<8x8xf32> to vector<8x8xbf16>
    %cst_28 = arith.constant dense<0.000000e+00> : vector<8x64xf32>
    %60 = tpu.matmul %59, %42, %cst_28 {dimension_numbers = #tpu.dot_dimension_numbers<[1], [0], [0], [1], [0, 0, 1, 1], [], []>} : vector<8x8xbf16>, vector<8x64xbf16>, vector<8x64xf32> -> vector<8x64xf32>
    %61 = arith.truncf %60 : vector<8x64xf32> to vector<8x64xbf16>
    %62 = vector.extract_strided_slice %12 {offsets = [0, 128], sizes = [8, 64], strides = [1, 1]} : vector<8x512xbf16> to vector<8x64xbf16>
    %c0_29 = arith.constant 0 : index
    %c128 = arith.constant 128 : index
    %63 = vector.load %arg15[%c0_29, %c128] : memref<8x1024xbf16, #tpu.memory_space<vmem>>, vector<8x64xbf16>
    %c0_30 = arith.constant 0 : index
    %c640 = arith.constant 640 : index
    %64 = vector.load %arg15[%c0_30, %c640] : memref<8x1024xbf16, #tpu.memory_space<vmem>>, vector<8x64xbf16>
    %cst_31 = arith.constant dense<0.000000e+00> : vector<8x8xf32>
    %65 = tpu.matmul %62, %63, %cst_31 {dimension_numbers = #tpu.dot_dimension_numbers<[1], [1], [0], [0], [0, 0, 1, 0], [], []>} : vector<8x64xbf16>, vector<8x64xbf16>, vector<8x8xf32> -> vector<8x8xf32>
    %66 = arith.addf %65, %17 : vector<8x8xf32>
    %cst_32 = arith.constant dense<0xFF800000> : vector<8xf32>
    %67 = vector.multi_reduction <maximumf>, %66, %cst_32 [1] : vector<8x8xf32> to vector<8xf32>
    %68 = vector.shape_cast %67 : vector<8xf32> to vector<8x1xf32>
    %69 = vector.broadcast %68 : vector<8x1xf32> to vector<8x8xf32>
    %70 = arith.subf %66, %69 : vector<8x8xf32>
    %71 = math.exp %70 : vector<8x8xf32>
    %cst_33 = arith.constant dense<0.000000e+00> : vector<8xf32>
    %72 = vector.multi_reduction <add>, %71, %cst_33 [1] : vector<8x8xf32> to vector<8xf32>
    %73 = vector.shape_cast %72 : vector<8xf32> to vector<8x1xf32>
    %74 = tpu.reciprocal %73 {approx = true} : vector<8x1xf32> -> vector<8x1xf32>
    %75 = vector.broadcast %74 : vector<8x1xf32> to vector<8x8xf32>
    %76 = arith.mulf %71, %75 : vector<8x8xf32>
    %77 = arith.truncf %76 : vector<8x8xf32> to vector<8x8xbf16>
    %c0_34 = arith.constant 0 : index
    %c2 = arith.constant 2 : index
    %c0_35 = arith.constant 0 : index
    %c0_36 = arith.constant 0 : index
    %78 = vector.load %arg14[%c0_34, %c2, %c0_35, %c0_36] : memref<1x8x8x8xbf16, #tpu.memory_space<vmem>>, vector<1x1x8x8xbf16>
    %79 = vector.shape_cast %78 : vector<1x1x8x8xbf16> to vector<8x8xbf16>
    %80 = vector.shape_cast %77 : vector<8x8xbf16> to vector<1x1x8x8xbf16>
    tpu.vector_store %arg14[%c0_34, %c2, %c0_35, %c0_36], %80 {strides = array<i32>} : memref<1x8x8x8xbf16, #tpu.memory_space<vmem>>, vector<1x1x8x8xbf16>,
    %81 = arith.truncf %76 : vector<8x8xf32> to vector<8x8xbf16>
    %cst_37 = arith.constant dense<0.000000e+00> : vector<8x64xf32>
    %82 = tpu.matmul %81, %64, %cst_37 {dimension_numbers = #tpu.dot_dimension_numbers<[1], [0], [0], [1], [0, 0, 1, 1], [], []>} : vector<8x8xbf16>, vector<8x64xbf16>, vector<8x64xf32> -> vector<8x64xf32>
    %83 = arith.truncf %82 : vector<8x64xf32> to vector<8x64xbf16>
    %84 = vector.extract_strided_slice %12 {offsets = [0, 192], sizes = [8, 64], strides = [1, 1]} : vector<8x512xbf16> to vector<8x64xbf16>
    %c0_38 = arith.constant 0 : index
    %c192 = arith.constant 192 : index
    %85 = vector.load %arg15[%c0_38, %c192] : memref<8x1024xbf16, #tpu.memory_space<vmem>>, vector<8x64xbf16>
    %c0_39 = arith.constant 0 : index
    %c704 = arith.constant 704 : index
    %86 = vector.load %arg15[%c0_39, %c704] : memref<8x1024xbf16, #tpu.memory_space<vmem>>, vector<8x64xbf16>
    %cst_40 = arith.constant dense<0.000000e+00> : vector<8x8xf32>
    %87 = tpu.matmul %84, %85, %cst_40 {dimension_numbers = #tpu.dot_dimension_numbers<[1], [1], [0], [0], [0, 0, 1, 0], [], []>} : vector<8x64xbf16>, vector<8x64xbf16>, vector<8x8xf32> -> vector<8x8xf32>
    %88 = arith.addf %87, %17 : vector<8x8xf32>
    %cst_41 = arith.constant dense<0xFF800000> : vector<8xf32>
    %89 = vector.multi_reduction <maximumf>, %88, %cst_41 [1] : vector<8x8xf32> to vector<8xf32>
    %90 = vector.shape_cast %89 : vector<8xf32> to vector<8x1xf32>
    %91 = vector.broadcast %90 : vector<8x1xf32> to vector<8x8xf32>
    %92 = arith.subf %88, %91 : vector<8x8xf32>
    %93 = math.exp %92 : vector<8x8xf32>
    %cst_42 = arith.constant dense<0.000000e+00> : vector<8xf32>
    %94 = vector.multi_reduction <add>, %93, %cst_42 [1] : vector<8x8xf32> to vector<8xf32>
    %95 = vector.shape_cast %94 : vector<8xf32> to vector<8x1xf32>
    %96 = tpu.reciprocal %95 {approx = true} : vector<8x1xf32> -> vector<8x1xf32>
    %97 = vector.broadcast %96 : vector<8x1xf32> to vector<8x8xf32>
    %98 = arith.mulf %93, %97 : vector<8x8xf32>
    %99 = arith.truncf %98 : vector<8x8xf32> to vector<8x8xbf16>
    %c0_43 = arith.constant 0 : index
    %c3 = arith.constant 3 : index
    %c0_44 = arith.constant 0 : index
    %c0_45 = arith.constant 0 : index
    %100 = vector.load %arg14[%c0_43, %c3, %c0_44, %c0_45] : memref<1x8x8x8xbf16, #tpu.memory_space<vmem>>, vector<1x1x8x8xbf16>
    %101 = vector.shape_cast %100 : vector<1x1x8x8xbf16> to vector<8x8xbf16>
    %102 = vector.shape_cast %99 : vector<8x8xbf16> to vector<1x1x8x8xbf16>
    tpu.vector_store %arg14[%c0_43, %c3, %c0_44, %c0_45], %102 {strides = array<i32>} : memref<1x8x8x8xbf16, #tpu.memory_space<vmem>>, vector<1x1x8x8xbf16>,
    %103 = arith.truncf %98 : vector<8x8xf32> to vector<8x8xbf16>
    %cst_46 = arith.constant dense<0.000000e+00> : vector<8x64xf32>
    %104 = tpu.matmul %103, %86, %cst_46 {dimension_numbers = #tpu.dot_dimension_numbers<[1], [0], [0], [1], [0, 0, 1, 1], [], []>} : vector<8x8xbf16>, vector<8x64xbf16>, vector<8x64xf32> -> vector<8x64xf32>
    %105 = arith.truncf %104 : vector<8x64xf32> to vector<8x64xbf16>
    %106 = vector.extract_strided_slice %12 {offsets = [0, 256], sizes = [8, 64], strides = [1, 1]} : vector<8x512xbf16> to vector<8x64xbf16>
    %c0_47 = arith.constant 0 : index
    %c256 = arith.constant 256 : index
    %107 = vector.load %arg15[%c0_47, %c256] : memref<8x1024xbf16, #tpu.memory_space<vmem>>, vector<8x64xbf16>
    %c0_48 = arith.constant 0 : index
    %c768 = arith.constant 768 : index
    %108 = vector.load %arg15[%c0_48, %c768] : memref<8x1024xbf16, #tpu.memory_space<vmem>>, vector<8x64xbf16>
    %cst_49 = arith.constant dense<0.000000e+00> : vector<8x8xf32>
    %109 = tpu.matmul %106, %107, %cst_49 {dimension_numbers = #tpu.dot_dimension_numbers<[1], [1], [0], [0], [0, 0, 1, 0], [], []>} : vector<8x64xbf16>, vector<8x64xbf16>, vector<8x8xf32> -> vector<8x8xf32>
    %110 = arith.addf %109, %17 : vector<8x8xf32>
    %cst_50 = arith.constant dense<0xFF800000> : vector<8xf32>
    %111 = vector.multi_reduction <maximumf>, %110, %cst_50 [1] : vector<8x8xf32> to vector<8xf32>
    %112 = vector.shape_cast %111 : vector<8xf32> to vector<8x1xf32>
    %113 = vector.broadcast %112 : vector<8x1xf32> to vector<8x8xf32>
    %114 = arith.subf %110, %113 : vector<8x8xf32>
    %115 = math.exp %114 : vector<8x8xf32>
    %cst_51 = arith.constant dense<0.000000e+00> : vector<8xf32>
    %116 = vector.multi_reduction <add>, %115, %cst_51 [1] : vector<8x8xf32> to vector<8xf32>
    %117 = vector.shape_cast %116 : vector<8xf32> to vector<8x1xf32>
    %118 = tpu.reciprocal %117 {approx = true} : vector<8x1xf32> -> vector<8x1xf32>
    %119 = vector.broadcast %118 : vector<8x1xf32> to vector<8x8xf32>
    %120 = arith.mulf %115, %119 : vector<8x8xf32>
    %121 = arith.truncf %120 : vector<8x8xf32> to vector<8x8xbf16>
    %c0_52 = arith.constant 0 : index
    %c4 = arith.constant 4 : index
    %c0_53 = arith.constant 0 : index
    %c0_54 = arith.constant 0 : index
    %122 = vector.load %arg14[%c0_52, %c4, %c0_53, %c0_54] : memref<1x8x8x8xbf16, #tpu.memory_space<vmem>>, vector<1x1x8x8xbf16>
    %123 = vector.shape_cast %122 : vector<1x1x8x8xbf16> to vector<8x8xbf16>
    %124 = vector.shape_cast %121 : vector<8x8xbf16> to vector<1x1x8x8xbf16>
    tpu.vector_store %arg14[%c0_52, %c4, %c0_53, %c0_54], %124 {strides = array<i32>} : memref<1x8x8x8xbf16, #tpu.memory_space<vmem>>, vector<1x1x8x8xbf16>,
    %125 = arith.truncf %120 : vector<8x8xf32> to vector<8x8xbf16>
    %cst_55 = arith.constant dense<0.000000e+00> : vector<8x64xf32>
    %126 = tpu.matmul %125, %108, %cst_55 {dimension_numbers = #tpu.dot_dimension_numbers<[1], [0], [0], [1], [0, 0, 1, 1], [], []>} : vector<8x8xbf16>, vector<8x64xbf16>, vector<8x64xf32> -> vector<8x64xf32>
    %127 = arith.truncf %126 : vector<8x64xf32> to vector<8x64xbf16>
    %128 = vector.extract_strided_slice %12 {offsets = [0, 320], sizes = [8, 64], strides = [1, 1]} : vector<8x512xbf16> to vector<8x64xbf16>
    %c0_56 = arith.constant 0 : index
    %c320 = arith.constant 320 : index
    %129 = vector.load %arg15[%c0_56, %c320] : memref<8x1024xbf16, #tpu.memory_space<vmem>>, vector<8x64xbf16>
    %c0_57 = arith.constant 0 : index
    %c832 = arith.constant 832 : index
    %130 = vector.load %arg15[%c0_57, %c832] : memref<8x1024xbf16, #tpu.memory_space<vmem>>, vector<8x64xbf16>
    %cst_58 = arith.constant dense<0.000000e+00> : vector<8x8xf32>
    %131 = tpu.matmul %128, %129, %cst_58 {dimension_numbers = #tpu.dot_dimension_numbers<[1], [1], [0], [0], [0, 0, 1, 0], [], []>} : vector<8x64xbf16>, vector<8x64xbf16>, vector<8x8xf32> -> vector<8x8xf32>
    %132 = arith.addf %131, %17 : vector<8x8xf32>
    %cst_59 = arith.constant dense<0xFF800000> : vector<8xf32>
    %133 = vector.multi_reduction <maximumf>, %132, %cst_59 [1] : vector<8x8xf32> to vector<8xf32>
    %134 = vector.shape_cast %133 : vector<8xf32> to vector<8x1xf32>
    %135 = vector.broadcast %134 : vector<8x1xf32> to vector<8x8xf32>
    %136 = arith.subf %132, %135 : vector<8x8xf32>
    %137 = math.exp %136 : vector<8x8xf32>
    %cst_60 = arith.constant dense<0.000000e+00> : vector<8xf32>
    %138 = vector.multi_reduction <add>, %137, %cst_60 [1] : vector<8x8xf32> to vector<8xf32>
    %139 = vector.shape_cast %138 : vector<8xf32> to vector<8x1xf32>
    %140 = tpu.reciprocal %139 {approx = true} : vector<8x1xf32> -> vector<8x1xf32>
    %141 = vector.broadcast %140 : vector<8x1xf32> to vector<8x8xf32>
    %142 = arith.mulf %137, %141 : vector<8x8xf32>
    %143 = arith.truncf %142 : vector<8x8xf32> to vector<8x8xbf16>
    %c0_61 = arith.constant 0 : index
    %c5 = arith.constant 5 : index
    %c0_62 = arith.constant 0 : index
    %c0_63 = arith.constant 0 : index
    %144 = vector.load %arg14[%c0_61, %c5, %c0_62, %c0_63] : memref<1x8x8x8xbf16, #tpu.memory_space<vmem>>, vector<1x1x8x8xbf16>
    %145 = vector.shape_cast %144 : vector<1x1x8x8xbf16> to vector<8x8xbf16>
    %146 = vector.shape_cast %143 : vector<8x8xbf16> to vector<1x1x8x8xbf16>
    tpu.vector_store %arg14[%c0_61, %c5, %c0_62, %c0_63], %146 {strides = array<i32>} : memref<1x8x8x8xbf16, #tpu.memory_space<vmem>>, vector<1x1x8x8xbf16>,
    %147 = arith.truncf %142 : vector<8x8xf32> to vector<8x8xbf16>
    %cst_64 = arith.constant dense<0.000000e+00> : vector<8x64xf32>
    %148 = tpu.matmul %147, %130, %cst_64 {dimension_numbers = #tpu.dot_dimension_numbers<[1], [0], [0], [1], [0, 0, 1, 1], [], []>} : vector<8x8xbf16>, vector<8x64xbf16>, vector<8x64xf32> -> vector<8x64xf32>
    %149 = arith.truncf %148 : vector<8x64xf32> to vector<8x64xbf16>
    %150 = vector.extract_strided_slice %12 {offsets = [0, 384], sizes = [8, 64], strides = [1, 1]} : vector<8x512xbf16> to vector<8x64xbf16>
    %c0_65 = arith.constant 0 : index
    %c384 = arith.constant 384 : index
    %151 = vector.load %arg15[%c0_65, %c384] : memref<8x1024xbf16, #tpu.memory_space<vmem>>, vector<8x64xbf16>
    %c0_66 = arith.constant 0 : index
    %c896 = arith.constant 896 : index
    %152 = vector.load %arg15[%c0_66, %c896] : memref<8x1024xbf16, #tpu.memory_space<vmem>>, vector<8x64xbf16>
    %cst_67 = arith.constant dense<0.000000e+00> : vector<8x8xf32>
    %153 = tpu.matmul %150, %151, %cst_67 {dimension_numbers = #tpu.dot_dimension_numbers<[1], [1], [0], [0], [0, 0, 1, 0], [], []>} : vector<8x64xbf16>, vector<8x64xbf16>, vector<8x8xf32> -> vector<8x8xf32>
    %154 = arith.addf %153, %17 : vector<8x8xf32>
    %cst_68 = arith.constant dense<0xFF800000> : vector<8xf32>
    %155 = vector.multi_reduction <maximumf>, %154, %cst_68 [1] : vector<8x8xf32> to vector<8xf32>
    %156 = vector.shape_cast %155 : vector<8xf32> to vector<8x1xf32>
    %157 = vector.broadcast %156 : vector<8x1xf32> to vector<8x8xf32>
    %158 = arith.subf %154, %157 : vector<8x8xf32>
    %159 = math.exp %158 : vector<8x8xf32>
    %cst_69 = arith.constant dense<0.000000e+00> : vector<8xf32>
    %160 = vector.multi_reduction <add>, %159, %cst_69 [1] : vector<8x8xf32> to vector<8xf32>
    %161 = vector.shape_cast %160 : vector<8xf32> to vector<8x1xf32>
    %162 = tpu.reciprocal %161 {approx = true} : vector<8x1xf32> -> vector<8x1xf32>
    %163 = vector.broadcast %162 : vector<8x1xf32> to vector<8x8xf32>
    %164 = arith.mulf %159, %163 : vector<8x8xf32>
    %165 = arith.truncf %164 : vector<8x8xf32> to vector<8x8xbf16>
    %c0_70 = arith.constant 0 : index
    %c6 = arith.constant 6 : index
    %c0_71 = arith.constant 0 : index
    %c0_72 = arith.constant 0 : index
    %166 = vector.load %arg14[%c0_70, %c6, %c0_71, %c0_72] : memref<1x8x8x8xbf16, #tpu.memory_space<vmem>>, vector<1x1x8x8xbf16>
    %167 = vector.shape_cast %166 : vector<1x1x8x8xbf16> to vector<8x8xbf16>
    %168 = vector.shape_cast %165 : vector<8x8xbf16> to vector<1x1x8x8xbf16>
    tpu.vector_store %arg14[%c0_70, %c6, %c0_71, %c0_72], %168 {strides = array<i32>} : memref<1x8x8x8xbf16, #tpu.memory_space<vmem>>, vector<1x1x8x8xbf16>,
    %169 = arith.truncf %164 : vector<8x8xf32> to vector<8x8xbf16>
    %cst_73 = arith.constant dense<0.000000e+00> : vector<8x64xf32>
    %170 = tpu.matmul %169, %152, %cst_73 {dimension_numbers = #tpu.dot_dimension_numbers<[1], [0], [0], [1], [0, 0, 1, 1], [], []>} : vector<8x8xbf16>, vector<8x64xbf16>, vector<8x64xf32> -> vector<8x64xf32>
    %171 = arith.truncf %170 : vector<8x64xf32> to vector<8x64xbf16>
    %172 = vector.extract_strided_slice %12 {offsets = [0, 448], sizes = [8, 64], strides = [1, 1]} : vector<8x512xbf16> to vector<8x64xbf16>
    %c0_74 = arith.constant 0 : index
    %c448 = arith.constant 448 : index
    %173 = vector.load %arg15[%c0_74, %c448] : memref<8x1024xbf16, #tpu.memory_space<vmem>>, vector<8x64xbf16>
    %c0_75 = arith.constant 0 : index
    %c960 = arith.constant 960 : index
    %174 = vector.load %arg15[%c0_75, %c960] : memref<8x1024xbf16, #tpu.memory_space<vmem>>, vector<8x64xbf16>
    %cst_76 = arith.constant dense<0.000000e+00> : vector<8x8xf32>
    %175 = tpu.matmul %172, %173, %cst_76 {dimension_numbers = #tpu.dot_dimension_numbers<[1], [1], [0], [0], [0, 0, 1, 0], [], []>} : vector<8x64xbf16>, vector<8x64xbf16>, vector<8x8xf32> -> vector<8x8xf32>
    %176 = arith.addf %175, %17 : vector<8x8xf32>
    %cst_77 = arith.constant dense<0xFF800000> : vector<8xf32>
    %177 = vector.multi_reduction <maximumf>, %176, %cst_77 [1] : vector<8x8xf32> to vector<8xf32>
    %178 = vector.shape_cast %177 : vector<8xf32> to vector<8x1xf32>
    %179 = vector.broadcast %178 : vector<8x1xf32> to vector<8x8xf32>
    %180 = arith.subf %176, %179 : vector<8x8xf32>
    %181 = math.exp %180 : vector<8x8xf32>
    %cst_78 = arith.constant dense<0.000000e+00> : vector<8xf32>
    %182 = vector.multi_reduction <add>, %181, %cst_78 [1] : vector<8x8xf32> to vector<8xf32>
    %183 = vector.shape_cast %182 : vector<8xf32> to vector<8x1xf32>
    %184 = tpu.reciprocal %183 {approx = true} : vector<8x1xf32> -> vector<8x1xf32>
    %185 = vector.broadcast %184 : vector<8x1xf32> to vector<8x8xf32>
    %186 = arith.mulf %181, %185 : vector<8x8xf32>
    %187 = arith.truncf %186 : vector<8x8xf32> to vector<8x8xbf16>
    %c0_79 = arith.constant 0 : index
    %c7 = arith.constant 7 : index
    %c0_80 = arith.constant 0 : index
    %c0_81 = arith.constant 0 : index
    %188 = vector.load %arg14[%c0_79, %c7, %c0_80, %c0_81] : memref<1x8x8x8xbf16, #tpu.memory_space<vmem>>, vector<1x1x8x8xbf16>
    %189 = vector.shape_cast %188 : vector<1x1x8x8xbf16> to vector<8x8xbf16>
    %190 = vector.shape_cast %187 : vector<8x8xbf16> to vector<1x1x8x8xbf16>
    tpu.vector_store %arg14[%c0_79, %c7, %c0_80, %c0_81], %190 {strides = array<i32>} : memref<1x8x8x8xbf16, #tpu.memory_space<vmem>>, vector<1x1x8x8xbf16>,
    %191 = arith.truncf %186 : vector<8x8xf32> to vector<8x8xbf16>
    %cst_82 = arith.constant dense<0.000000e+00> : vector<8x64xf32>
    %192 = tpu.matmul %191, %174, %cst_82 {dimension_numbers = #tpu.dot_dimension_numbers<[1], [0], [0], [1], [0, 0, 1, 1], [], []>} : vector<8x8xbf16>, vector<8x64xbf16>, vector<8x64xf32> -> vector<8x64xf32>
    %193 = arith.truncf %192 : vector<8x64xf32> to vector<8x64xbf16>
    %194 = tpu.concatenate %39, %61 in 1 : vector<8x64xbf16>, vector<8x64xbf16> -> vector<8x128xbf16>
    %195 = tpu.concatenate %83, %105 in 1 : vector<8x64xbf16>, vector<8x64xbf16> -> vector<8x128xbf16>
    %196 = tpu.concatenate %127, %149 in 1 : vector<8x64xbf16>, vector<8x64xbf16> -> vector<8x128xbf16>
    %197 = tpu.concatenate %171, %193 in 1 : vector<8x64xbf16>, vector<8x64xbf16> -> vector<8x128xbf16>
    %198 = tpu.concatenate %194, %195, %196, %197 in 1 : vector<8x128xbf16>, vector<8x128xbf16>, vector<8x128xbf16>, vector<8x128xbf16> -> vector<8x512xbf16>
    %c0_83 = arith.constant 0 : index
    %c0_84 = arith.constant 0 : index
    %199 = vector.load %arg6[%c0_83, %c0_84] : memref<512x512xbf16, #tpu.memory_space<vmem>>, vector<512x512xbf16>
    %cst_85 = arith.constant dense<0.000000e+00> : vector<8x512xf32>
    %200 = tpu.matmul %198, %199, %cst_85 {dimension_numbers = #tpu.dot_dimension_numbers<[1], [0], [0], [1], [0, 0, 1, 1], [], []>} : vector<8x512xbf16>, vector<512x512xbf16>, vector<8x512xf32> -> vector<8x512xf32>
    %201 = arith.extf %7 : vector<8x512xbf16> to vector<8x512xf32>
    %202 = arith.addf %200, %201 : vector<8x512xf32>
    %c0_86 = arith.constant 0 : index
    %c0_87 = arith.constant 0 : index
    %203 = vector.load %arg7[%c0_86, %c0_87] : memref<1x512xf32, #tpu.memory_space<vmem>>, vector<1x512xf32>
    %c0_88 = arith.constant 0 : index
    %c0_89 = arith.constant 0 : index
    %204 = vector.load %arg8[%c0_88, %c0_89] : memref<1x512xf32, #tpu.memory_space<vmem>>, vector<1x512xf32>
    %cst_90 = arith.constant dense<0.000000e+00> : vector<8xf32>
    %205 = vector.multi_reduction <add>, %202, %cst_90 [1] : vector<8x512xf32> to vector<8xf32>
    %206 = vector.shape_cast %205 : vector<8xf32> to vector<8x1xf32>
    %cst_91 = arith.constant 5.120000e+02 : f32
    %207 = vector.broadcast %cst_91 : f32 to vector<8x1xf32>
    %208 = arith.divf %206, %207 : vector<8x1xf32>
    %209 = vector.broadcast %208 : vector<8x1xf32> to vector<8x512xf32>
    %210 = arith.subf %202, %209 : vector<8x512xf32>
    %211 = arith.mulf %210, %210 : vector<8x512xf32>
    %cst_92 = arith.constant dense<0.000000e+00> : vector<8xf32>
    %212 = vector.multi_reduction <add>, %211, %cst_92 [1] : vector<8x512xf32> to vector<8xf32>
    %213 = vector.shape_cast %212 : vector<8xf32> to vector<8x1xf32>
    %cst_93 = arith.constant 5.120000e+02 : f32
    %214 = vector.broadcast %cst_93 : f32 to vector<8x1xf32>
    %215 = arith.divf %213, %214 : vector<8x1xf32>
    %cst_94 = arith.constant 9.99999974E-6 : f32
    %216 = vector.broadcast %cst_94 : f32 to vector<8x1xf32>
    %217 = arith.addf %215, %216 : vector<8x1xf32>
    %218 = math.rsqrt %217 : vector<8x1xf32>
    %219 = vector.broadcast %218 : vector<8x1xf32> to vector<8x512xf32>
    %220 = arith.mulf %210, %219 : vector<8x512xf32>
    %221 = vector.broadcast %203 : vector<1x512xf32> to vector<8x512xf32>
    %222 = arith.mulf %220, %221 : vector<8x512xf32>
    %223 = vector.broadcast %204 : vector<1x512xf32> to vector<8x512xf32>
    %224 = arith.addf %222, %223 : vector<8x512xf32>
    %225 = arith.truncf %224 : vector<8x512xf32> to vector<8x512xbf16>
    %c0_95 = arith.constant 0 : index
    %c0_96 = arith.constant 0 : index
    %226 = vector.load %arg9[%c0_95, %c0_96] : memref<512x2048xbf16, #tpu.memory_space<vmem>>, vector<512x2048xbf16>
    %cst_97 = arith.constant dense<0.000000e+00> : vector<8x2048xf32>
    %227 = tpu.matmul %225, %226, %cst_97 {dimension_numbers = #tpu.dot_dimension_numbers<[1], [0], [0], [1], [0, 0, 1, 1], [], []>} : vector<8x512xbf16>, vector<512x2048xbf16>, vector<8x2048xf32> -> vector<8x2048xf32>
    %cst_98 = arith.constant 0.000000e+00 : f32
    %228 = vector.broadcast %cst_98 : f32 to vector<8x2048xf32>
    %229 = arith.maximumf %227, %228 : vector<8x2048xf32>
    %230 = arith.truncf %229 : vector<8x2048xf32> to vector<8x2048xbf16>
    %c0_99 = arith.constant 0 : index
    %c0_100 = arith.constant 0 : index
    %231 = vector.load %arg10[%c0_99, %c0_100] : memref<2048x512xbf16, #tpu.memory_space<vmem>>, vector<2048x512xbf16>
    %cst_101 = arith.constant dense<0.000000e+00> : vector<8x512xf32>
    %232 = tpu.matmul %230, %231, %cst_101 {dimension_numbers = #tpu.dot_dimension_numbers<[1], [0], [0], [1], [0, 0, 1, 1], [], []>} : vector<8x2048xbf16>, vector<2048x512xbf16>, vector<8x512xf32> -> vector<8x512xf32>
    %233 = arith.addf %232, %224 : vector<8x512xf32>
    %c0_102 = arith.constant 0 : index
    %c0_103 = arith.constant 0 : index
    %234 = vector.load %arg11[%c0_102, %c0_103] : memref<1x512xf32, #tpu.memory_space<vmem>>, vector<1x512xf32>
    %c0_104 = arith.constant 0 : index
    %c0_105 = arith.constant 0 : index
    %235 = vector.load %arg12[%c0_104, %c0_105] : memref<1x512xf32, #tpu.memory_space<vmem>>, vector<1x512xf32>
    %cst_106 = arith.constant dense<0.000000e+00> : vector<8xf32>
    %236 = vector.multi_reduction <add>, %233, %cst_106 [1] : vector<8x512xf32> to vector<8xf32>
    %237 = vector.shape_cast %236 : vector<8xf32> to vector<8x1xf32>
    %cst_107 = arith.constant 5.120000e+02 : f32
    %238 = vector.broadcast %cst_107 : f32 to vector<8x1xf32>
    %239 = arith.divf %237, %238 : vector<8x1xf32>
    %240 = vector.broadcast %239 : vector<8x1xf32> to vector<8x512xf32>
    %241 = arith.subf %233, %240 : vector<8x512xf32>
    %242 = arith.mulf %241, %241 : vector<8x512xf32>
    %cst_108 = arith.constant dense<0.000000e+00> : vector<8xf32>
    %243 = vector.multi_reduction <add>, %242, %cst_108 [1] : vector<8x512xf32> to vector<8xf32>
    %244 = vector.shape_cast %243 : vector<8xf32> to vector<8x1xf32>
    %cst_109 = arith.constant 5.120000e+02 : f32
    %245 = vector.broadcast %cst_109 : f32 to vector<8x1xf32>
    %246 = arith.divf %244, %245 : vector<8x1xf32>
    %cst_110 = arith.constant 9.99999974E-6 : f32
    %247 = vector.broadcast %cst_110 : f32 to vector<8x1xf32>
    %248 = arith.addf %246, %247 : vector<8x1xf32>
    %249 = math.rsqrt %248 : vector<8x1xf32>
    %250 = vector.broadcast %249 : vector<8x1xf32> to vector<8x512xf32>
    %251 = arith.mulf %241, %250 : vector<8x512xf32>
    %252 = vector.broadcast %234 : vector<1x512xf32> to vector<8x512xf32>
    %253 = arith.mulf %251, %252 : vector<8x512xf32>
    %254 = vector.broadcast %235 : vector<1x512xf32> to vector<8x512xf32>
    %255 = arith.addf %253, %254 : vector<8x512xf32>
    %c0_111 = arith.constant 0 : index
    %c0_112 = arith.constant 0 : index
    %c0_113 = arith.constant 0 : index
    %256 = vector.load %arg13[%c0_111, %c0_112, %c0_113] : memref<1x8x512xf32, #tpu.memory_space<vmem>>, vector<1x8x512xf32>
    %257 = vector.shape_cast %256 : vector<1x8x512xf32> to vector<8x512xf32>
    %258 = vector.shape_cast %255 : vector<8x512xf32> to vector<1x8x512xf32>
    tpu.vector_store %arg13[%c0_111, %c0_112, %c0_113], %258 {strides = array<i32>} : memref<1x8x512xf32, #tpu.memory_space<vmem>>, vector<1x8x512xf32>,
    return
  }
  func.func @transform_0(%arg0: i32, %arg1: i32) -> (i32, i32, i32) {
    %c0_i32 = arith.constant 0 : i32
    %c0_i32_0 = arith.constant 0 : i32
    %c0_i32_1 = arith.constant 0 : i32
    return %arg0, %c0_i32, %c0_i32_0 : i32, i32, i32
  }
  func.func @transform_1(%arg0: i32, %arg1: i32) -> (i32, i32, i32) {
    %c0_i32 = arith.constant 0 : i32
    %c0_i32_0 = arith.constant 0 : i32
    return %arg0, %arg1, %c0_i32 : i32, i32, i32
  }
  func.func @transform_2(%arg0: i32, %arg1: i32) -> (i32, i32) {
    %c0_i32 = arith.constant 0 : i32
    %c0_i32_0 = arith.constant 0 : i32
    %c0_i32_1 = arith.constant 0 : i32
    return %c0_i32, %c0_i32_0 : i32, i32
  }
  func.func @transform_3(%arg0: i32, %arg1: i32) -> (i32, i32) {
    %c0_i32 = arith.constant 0 : i32
    %c0_i32_0 = arith.constant 0 : i32
    %c0_i32_1 = arith.constant 0 : i32
    return %c0_i32, %c0_i32_0 : i32, i32
  }
  func.func @transform_4(%arg0: i32, %arg1: i32) -> (i32, i32) {
    %c0_i32 = arith.constant 0 : i32
    %c0_i32_0 = arith.constant 0 : i32
    %c0_i32_1 = arith.constant 0 : i32
    return %c0_i32, %c0_i32_0 : i32, i32
  }
  func.func @transform_5(%arg0: i32, %arg1: i32) -> (i32, i32) {
    %c0_i32 = arith.constant 0 : i32
    %c0_i32_0 = arith.constant 0 : i32
    %c0_i32_1 = arith.constant 0 : i32
    return %c0_i32, %c0_i32_0 : i32, i32
  }
  func.func @transform_6(%arg0: i32, %arg1: i32) -> (i32, i32) {
    %c0_i32 = arith.constant 0 : i32
    %c0_i32_0 = arith.constant 0 : i32
    %c0_i32_1 = arith.constant 0 : i32
    return %c0_i32, %c0_i32_0 : i32, i32
  }
  func.func @transform_7(%arg0: i32, %arg1: i32) -> (i32, i32) {
    %c0_i32 = arith.constant 0 : i32
    %c0_i32_0 = arith.constant 0 : i32
    %c0_i32_1 = arith.constant 0 : i32
    return %c0_i32, %c0_i32_0 : i32, i32
  }
  func.func @transform_8(%arg0: i32, %arg1: i32) -> (i32, i32) {
    %c0_i32 = arith.constant 0 : i32
    %c0_i32_0 = arith.constant 0 : i32
    %c0_i32_1 = arith.constant 0 : i32
    return %c0_i32, %c0_i32_0 : i32, i32
  }
  func.func @transform_9(%arg0: i32, %arg1: i32) -> (i32, i32) {
    %c0_i32 = arith.constant 0 : i32
    %c0_i32_0 = arith.constant 0 : i32
    %c0_i32_1 = arith.constant 0 : i32
    return %c0_i32, %c0_i32_0 : i32, i32
  }
  func.func @transform_10(%arg0: i32, %arg1: i32) -> (i32, i32) {
    %c0_i32 = arith.constant 0 : i32
    %c0_i32_0 = arith.constant 0 : i32
    %c0_i32_1 = arith.constant 0 : i32
    return %c0_i32, %c0_i32_0 : i32, i32
  }
  func.func @transform_11(%arg0: i32, %arg1: i32) -> (i32, i32, i32) {
    %c0_i32 = arith.constant 0 : i32
    %c0_i32_0 = arith.constant 0 : i32
    return %arg0, %arg1, %c0_i32 : i32, i32, i32
  }
  func.func @transform_12(%arg0: i32, %arg1: i32) -> (i32, i32, i32, i32) {
    %c0_i32 = arith.constant 0 : i32
    %c0_i32_0 = arith.constant 0 : i32
    %c0_i32_1 = arith.constant 0 : i32
    return %arg0, %c0_i32, %arg1, %c0_i32_0 : i32, i32, i32, i32
  }
}

</mosaic_0001>

<bundles_post_ra>
// kernel: tpu_custom_call.1
= control target key start
LH: loop header
LB: loop body
LE: loop exit
PB: predicated region body
PF: predicated region fallthrough
CT: control target
= control target key end

     0   :  { %s18029_s0 = inlined_call_operand.hbm [shape: bf16[2,8,512], index: 0, kind: input, shape index: {}]   ;;  %s18030_s1 = inlined_call_operand.hbm [shape: s8[2,8,8], index: 1, kind: input, shape index: {}]   ;;  %s18031_s2 = inlined_call_operand.hbm [shape: bf16[512,512], index: 2, kind: input, shape index: {}]   ;;  %s18032_s3 = inlined_call_operand.hbm [shape: bf16[512,1024], index: 3, kind: input, shape index: {}]   ;;  %s18033_s4 = inlined_call_operand.hbm [shape: bf16[512,512], index: 4, kind: input, shape index: {}]   ;;  %s18034_s5 = inlined_call_operand.hbm [shape: f32[1,512], index: 5, kind: input, shape index: {}]   ;;  %s18035_s6 = inlined_call_operand.hbm [shape: f32[1,512], index: 6, kind: input, shape index: {}]   ;;  %s18036_s7 = inlined_call_operand.hbm [shape: bf16[512,2048], index: 7, kind: input, shape index: {}]   ;;  %s18037_s8 = inlined_call_operand.hbm [shape: bf16[2048,512], index: 8, kind: input, shape index: {}]   ;;  %s18038_s9 = inlined_call_operand.hbm [shape: f32[1,512], index: 9, kind: input, shape index: {}]   ;;  %s18039_s10 = inlined_call_operand.hbm [shape: f32[1,512], index: 10, kind: input, shape index: {}]   ;;  %s18040_s11 = inlined_call_operand.hbm [shape: f32[2,8,512], index: 11, kind: output, shape index: {0}]   ;;  %s18041_s12 = inlined_call_operand.hbm [shape: bf16[2,8,8,8], index: 12, kind: output, shape index: {1}]  }
   0x1   :  { %18055 = sst [smem:[#allocation35_spill]] %s18029_s0 }
   0x2   :  { %18056 = sst [smem:[#allocation36_spill]] %s18030_s1 }
   0x3   :  { %18057 = sst [smem:[#allocation37_spill]] %s18031_s2 }
   0x4   :  { %18058 = sst [smem:[#allocation38_spill]] %s18032_s3 }
   0x5   :  { %18059 = sst [smem:[#allocation39_spill]] %s18033_s4 }
   0x6   :  { %18060 = sst [smem:[#allocation40_spill]] %s18034_s5 }
   0x7   :  { %18061 = sst [smem:[#allocation41_spill]] %s18035_s6 }
   0x8   :  { %18062 = sst [smem:[#allocation42_spill]] %s18036_s7 }
   0x9   :  { %18063 = sst [smem:[#allocation43_spill]] %s18040_s11 }
   0xa   :  { %18064 = sst [smem:[#allocation44_spill]] %s18041_s12 }
   0xb   :  { %18 = vsyncpa [#allocation4], 0 }
   0xc   :  { %20 = vsyncpa [#allocation4 + $0x1], 0 }
   0xd   :  { %21 = vsyncpa [#allocation7], 0 }
   0xe   :  { %23 = vsyncpa [#allocation7 + $0x1], 0 }
   0xf   :  { %24 = vsyncpa [#allocation10], 0 }
  0x10   :  { %25 = vsyncpa [#allocation13], 0 }
  0x11   :  { %26 = vsyncpa [#allocation16], 0 }
  0x12   :  { %27 = vsyncpa [#allocation19], 0 }
  0x13   :  { %28 = vsyncpa [#allocation5], 0 }
  0x14   :  { %30 = vsyncpa [#allocation5 + $0x1], 0 }
  0x15   :  { %31 = vsyncpa [#allocation23], 0 }
  0x16   :  { %33 = vsyncpa [#allocation23 + $0x1], 0  ;;  %s17116_s21 = smov 0   ;;  %s17118_s22 = smov 0  }
  0x17   :  { %s17120_s23 = smov 0   ;;  %s17122_s24 = smov 0  }
  0x18   :  { %s17124_s25 = smov 0   ;;  %s17126_s26 = smov 0  }
  0x19 LB: > { %18065 = sst [smem:[#allocation33_spill]] %s17018_s24  ;;  %s17147_s27 = sadd.s32 4294967295, %s17026_s26   ;;  %s17026_s26 = sphi %s17126_s26, %s39_s26   ;;  %s17022_s25 = sphi %s17124_s25, %s18112_s25   ;;  %s17018_s24 = sphi %s17122_s24, %s18111_s24   ;;  %s17014_s23 = sphi %s17120_s23, %s18110_s23   ;;  %s17010_s22 = sphi %s17118_s22, %s18109_s22   ;;  %s17006_s21 = sphi %s17116_s21, %s18108_s21  }
  0x1a   : > { %p13317_p0 = scmp.ge.s32.totalorder %s17026_s26, 1  ;;  %p18051_p1 = scmp.eq.s32.totalorder %s17147_s27, 0 }
  0x1b   : > { %p355_p2 = scmp.lt.s32.totalorder %s17026_s26, 3  ;;  %s17028_s29 = smov [#allocation8]  }
  0x1c   : > { %s367_s30 = sshll.u32 %s17028_s29, 4  ;;  %s17029_s14 = smov [#allocation9]   ;;  %s17156_s30 = int_to_ptr.vmem [resolvable:$true] %s367_s30 }
  0x1d   : > { %p17152_p3 = pnand %p13317_p0, %p355_p2  ;;  %s380_s15 = sshll.u32 %s17029_s14, 4  ;;  %s17167_s15 = int_to_ptr.vmem [resolvable:$true] %s380_s15 }
  0x1e   : > { %s18069_s2 = sld [smem:[#allocation37_spill]] }
  0x1f   : > { %s18066_s28 = scalar_select %p17152_p3, 1, 0 }
  0x20   : > { %p15241_p4 = pneg %p17152_p3 }
  0x21   : > { %18067 = sst [smem:[#allocation34_spill]] %s18066_s28 }
  0x22   : > { %p17163_p6 = pnand %p15241_p4, %p18051_p1 }
  0x24   : > { %s16576_s18 = scalar_lea.hbm %s18069_s2, 16384  ;;  %p17177_p8 = pneg %p17163_p6 }
  0x25   : > { %p16577_p7 = scmp.ne.s32.totalorder %s18069_s2, %s16576_s18  ;;  %p16583_p11 = scmp.lt.u32.totalorder %s16576_s18, %s18069_s2 }
  0x27   : > { %p16579_p9 = pnand %p17177_p8, %p16577_p7 }
  0x29   : > { %p16580_p10 = pneg %p16579_p9 }
  0x2b   : > { %p16585_p12 = pnand %p16583_p11, %p16580_p10 }
  0x2d   : > { %16588 = shalt.err (!%p16585_p12)
}
  0x2e   : > { %s16589_s16 = scalar_lea.vmem %s17156_s30, 16384  ;;  %p16597_p4 = scmp.lt.s32.totalorder %s17156_s30, %s17156_s30 }
  0x2f   : > { %p16590_p13 = scmp.ne.s32.totalorder %s17156_s30, %s16589_s16  ;;  %p16598_p5 = scmp.lt.s32.totalorder %s16589_s16, %s16589_s16 }
  0x31   : > { %p16592_p0 = pnand %p16590_p13, %p17177_p8  ;;  %p16599_p7 = por %p16598_p5, %p16597_p4 }
  0x33   : > { %p16593_p2 = pneg %p16592_p0 }
  0x35   : > { %p16600_p9 = pnand %p16599_p7, %p16593_p2 }
  0x37   : > { %16603 = shalt.err (!%p16600_p9)
}
  0x38   : > { %s18047_s17 = smov 256   ;;  %s18049_s11 = smov 16  }
  0x39   : > { %15244 = dma.hbm_to_vmem [thread:$0]  (!%p17163_p6), %s18069_s2, 16384, %s17156_s30, [#allocation7], %s18047_s17, %s18047_s17, %s18049_s11  }
  0x3a   : > { %s18071_s3 = sld [smem:[#allocation38_spill]] }
  0x40   : > { %s16604_s16 = scalar_lea.hbm %s18071_s3, 32768 }
  0x41   : > { %p16605_p5 = scmp.ne.s32.totalorder %s18071_s3, %s16604_s16  ;;  %p16611_p12 = scmp.lt.u32.totalorder %s16604_s16, %s18071_s3 }
  0x43   : > { %p16607_p10 = pnand %p16605_p5, %p17177_p8 }
  0x45   : > { %p16608_p11 = pneg %p16607_p10 }
  0x47   : > { %p16613_p13 = pnand %p16611_p12, %p16608_p11 }
  0x49   : > { %16616 = shalt.err (!%p16613_p13)
}
  0x4a   : > { %s16617_s30 = scalar_lea.vmem %s17167_s15, 32768  ;;  %p16625_p7 = scmp.lt.s32.totalorder %s17167_s15, %s17167_s15 }
  0x4b   : > { %p16618_p0 = scmp.ne.s32.totalorder %s17167_s15, %s16617_s30  ;;  %p16626_p9 = scmp.lt.s32.totalorder %s16617_s30, %s16617_s30 }
  0x4d   : > { %p16620_p2 = pnand %p16618_p0, %p17177_p8  ;;  %p16627_p5 = por %p16626_p9, %p16625_p7 }
  0x4f   : > { %p16621_p4 = pneg %p16620_p2 }
  0x51   : > { %p16628_p10 = pnand %p16627_p5, %p16621_p4 }
  0x53   : > { %16631 = shalt.err (!%p16628_p10)
}
  0x54   : > { %s17032_s12 = smov 512   ;;  %s17033_s1 = smov 32  }
  0x55   : > { %15247 = dma.hbm_to_vmem [thread:$0]  (!%p17163_p6), %s18071_s3, 32768, %s17167_s15, [#allocation10], %s17032_s12, %s17032_s12, %s17033_s1  }
  0x56   : > { %s17034_s18 = smov [#allocation12]   ;;  %s17035_s20 = smov [#allocation15]  }
  0x57   : > { %s407_s19 = sshll.u32 %s17034_s18, 4  ;;  %s428_s14 = sshll.u32 %s17035_s20, 4  ;;  %s408_s19 = int_to_ptr.vmem [resolvable:$true] %s407_s19  ;;  %s17224_s14 = int_to_ptr.vmem [resolvable:$true] %s428_s14 }
  0x58   : > { %s18072_s5 = sld [smem:[#allocation40_spill]] }
  0x5e   : > { %s16632_s17 = scalar_lea.hbm %s18072_s5, 64 }
  0x5f   : > { %p16633_p11 = scmp.ne.s32.totalorder %s18072_s5, %s16632_s17  ;;  %p16639_p0 = scmp.lt.u32.totalorder %s16632_s17, %s18072_s5 }
  0x61   : > { %p16635_p12 = pnand %p16633_p11, %p17177_p8 }
  0x63   : > { %p16636_p13 = pneg %p16635_p12 }
  0x65   : > { %p16641_p2 = pnand %p16639_p0, %p16636_p13 }
  0x67   : > { %16644 = shalt.err (!%p16641_p2)
}
  0x68   : > { %s16645_s12 = scalar_lea.vmem %s408_s19, 64  ;;  %p16653_p5 = scmp.lt.s32.totalorder %s408_s19, %s408_s19 }
  0x69   : > { %p16646_p4 = scmp.ne.s32.totalorder %s408_s19, %s16645_s12  ;;  %p16654_p10 = scmp.lt.s32.totalorder %s16645_s12, %s16645_s12 }
  0x6b   : > { %p16648_p7 = pnand %p16646_p4, %p17177_p8  ;;  %p16655_p1 = por %p16654_p10, %p16653_p5 }
  0x6d   : > { %p16649_p9 = pneg %p16648_p7 }
  0x6f   : > { %p16656_p3 = pnand %p16655_p1, %p16649_p9 }
  0x71   : > { %16659 = shalt.err (!%p16656_p3)
}
  0x72   : > { %15253 = dma.hbm_to_vmem [thread:$0]  (!%p17163_p6), %s18072_s5, 64, %s408_s19, [#allocation13]  }
  0x73   : > { %s18073_s7 = sld [smem:[#allocation42_spill]] }
  0x79   : > { %s16660_s28 = scalar_lea.hbm %s18073_s7, 65536 }
  0x7a   : > { %p16661_p11 = scmp.ne.s32.totalorder %s18073_s7, %s16660_s28  ;;  %p16667_p1 = scmp.lt.u32.totalorder %s16660_s28, %s18073_s7 }
  0x7c   : > { %p16663_p12 = pnand %p16661_p11, %p17177_p8 }
  0x7e   : > { %p16664_p13 = pneg %p16663_p12 }
  0x80   : > { %p16669_p3 = pnand %p16667_p1, %p16664_p13 }
  0x82   : > { %16672 = shalt.err (!%p16669_p3)
}
  0x83   : > { %s16673_s19 = scalar_lea.vmem %s17224_s14, 65536  ;;  %p16681_p7 = scmp.lt.s32.totalorder %s17224_s14, %s17224_s14 }
  0x84   : > { %p16674_p0 = scmp.ne.s32.totalorder %s17224_s14, %s16673_s19  ;;  %p16682_p9 = scmp.lt.s32.totalorder %s16673_s19, %s16673_s19 }
  0x86   : > { %p16676_p2 = pnand %p16674_p0, %p17177_p8  ;;  %p16683_p5 = por %p16682_p9, %p16681_p7 }
  0x88   : > { %p16677_p4 = pneg %p16676_p2 }
  0x8a   : > { %p16684_p10 = pnand %p16683_p5, %p16677_p4 }
  0x8c   : > { %16687 = shalt.err (!%p16684_p10)
}
  0x8d   : > { %s17036_s24 = smov 1024   ;;  %s17037_s15 = smov 64  }
  0x8e   : > { %15259 = dma.hbm_to_vmem [thread:$0]  (!%p17163_p6), %s18073_s7, 65536, %s17224_s14, [#allocation16], %s17036_s24, %s17036_s24, %s17037_s15  }
  0x8f   : > { %s17038_s11 = smov [#allocation18]   ;;  %s17039_s1 = smov [#allocation11]  }
  0x90   : > { %s455_s17 = sshll.u32 %s17038_s11, 4  ;;  %s393_s28 = sshll.u32 %s17039_s1, 4  ;;  %s456_s17 = int_to_ptr.vmem [resolvable:$true] %s455_s17  ;;  %s17267_s28 = int_to_ptr.vmem [resolvable:$true] %s393_s28 }
  0x91   : > { %s16688_s16 = scalar_lea.hbm %s18038_s9, 64 }
  0x92   : > { %p16689_p11 = scmp.ne.s32.totalorder %s18038_s9, %s16688_s16  ;;  %p16695_p1 = scmp.lt.u32.totalorder %s16688_s16, %s18038_s9 }
  0x94   : > { %p16691_p12 = pnand %p16689_p11, %p17177_p8 }
  0x96   : > { %p16692_p13 = pneg %p16691_p12 }
  0x98   : > { %p16697_p3 = pnand %p16695_p1, %p16692_p13 }
  0x9a   : > { %16700 = shalt.err (!%p16697_p3)
}
  0x9b   : > { %s16701_s24 = scalar_lea.vmem %s456_s17, 64  ;;  %p16709_p7 = scmp.lt.s32.totalorder %s456_s17, %s456_s17 }
  0x9c   : > { %p16702_p0 = scmp.ne.s32.totalorder %s456_s17, %s16701_s24  ;;  %p16710_p9 = scmp.lt.s32.totalorder %s16701_s24, %s16701_s24 }
  0x9e   : > { %p16704_p2 = pnand %p16702_p0, %p17177_p8  ;;  %p16711_p5 = por %p16710_p9, %p16709_p7 }
  0xa0   : > { %p16705_p4 = pneg %p16704_p2 }
  0xa2   : > { %p16712_p10 = pnand %p16711_p5, %p16705_p4 }
  0xa4   : > { %16715 = shalt.err (!%p16712_p10)
}
  0xa5   : > { %15265 = dma.hbm_to_vmem [thread:$0]  (!%p17163_p6), %s18038_s9, 64, %s456_s17, [#allocation19]  }
  0xa6   : > { %s18074_s4 = sld [smem:[#allocation39_spill]] }
  0xac   : > { %s16716_s18 = scalar_lea.hbm %s18074_s4, 16384 }
  0xad   : > { %p16717_p11 = scmp.ne.s32.totalorder %s18074_s4, %s16716_s18  ;;  %p16723_p1 = scmp.lt.u32.totalorder %s16716_s18, %s18074_s4 }
  0xaf   : > { %p16719_p12 = pnand %p16717_p11, %p17177_p8 }
  0xb1   : > { %p16720_p13 = pneg %p16719_p12 }
  0xb3   : > { %p16725_p3 = pnand %p16723_p1, %p16720_p13 }
  0xb5   : > { %16728 = shalt.err (!%p16725_p3)
}
  0xb6   : > { %s16729_s17 = scalar_lea.vmem %s17267_s28, 16384  ;;  %p16737_p7 = scmp.lt.s32.totalorder %s17267_s28, %s17267_s28 }
  0xb7   : > { %p16730_p0 = scmp.ne.s32.totalorder %s17267_s28, %s16729_s17  ;;  %p16738_p9 = scmp.lt.s32.totalorder %s16729_s17, %s16729_s17 }
  0xb9   : > { %p16732_p2 = pnand %p16730_p0, %p17177_p8  ;;  %p16739_p5 = por %p16738_p9, %p16737_p7 }
  0xbb   : > { %p16733_p4 = pneg %p16732_p2 }
  0xbd   : > { %p16740_p10 = pnand %p16739_p5, %p16733_p4 }
  0xbf   : > { %16743 = shalt.err (!%p16740_p10)
}
  0xc0   : > { %s18075_s12 = smov 16   ;;  %s18076_s14 = smov 256  }
  0xc1   : > { %15250 = dma.hbm_to_vmem [thread:$0]  (!%p17163_p6), %s18074_s4, 16384, %s17267_s28, [#allocation10], %s18076_s14, %s18076_s14, %s18075_s12  }
  0xc2   : > { %s17040_s2 = smov [#allocation14]   ;;  %s17041_s1 = smov [#allocation17]  }
  0xc3   : > { %s418_s11 = sshll.u32 %s17040_s2, 4  ;;  %s441_s18 = sshll.u32 %s17041_s1, 4  ;;  %s419_s11 = int_to_ptr.vmem [resolvable:$true] %s418_s11  ;;  %s17313_s18 = int_to_ptr.vmem [resolvable:$true] %s441_s18 }
  0xc4   : > { %s18077_s6 = sld [smem:[#allocation41_spill]] }
  0xca   : > { %s16744_s30 = scalar_lea.hbm %s18077_s6, 64 }
  0xcb   : > { %p16745_p11 = scmp.ne.s32.totalorder %s18077_s6, %s16744_s30  ;;  %p16751_p1 = scmp.lt.u32.totalorder %s16744_s30, %s18077_s6 }
  0xcd   : > { %p16747_p12 = pnand %p16745_p11, %p17177_p8 }
  0xcf   : > { %p16748_p13 = pneg %p16747_p12 }
  0xd1   : > { %p16753_p3 = pnand %p16751_p1, %p16748_p13 }
  0xd3   : > { %16756 = shalt.err (!%p16753_p3)
}
  0xd4   : > { %s16757_s15 = scalar_lea.vmem %s419_s11, 64  ;;  %p16765_p7 = scmp.lt.s32.totalorder %s419_s11, %s419_s11 }
  0xd5   : > { %p16758_p0 = scmp.ne.s32.totalorder %s419_s11, %s16757_s15  ;;  %p16766_p9 = scmp.lt.s32.totalorder %s16757_s15, %s16757_s15 }
  0xd7   : > { %p16760_p2 = pnand %p16758_p0, %p17177_p8  ;;  %p16767_p5 = por %p16766_p9, %p16765_p7 }
  0xd9   : > { %p16761_p4 = pneg %p16760_p2 }
  0xdb   : > { %p16768_p10 = pnand %p16767_p5, %p16761_p4 }
  0xdd   : > { %16771 = shalt.err (!%p16768_p10)
}
  0xde   : > { %15256 = dma.hbm_to_vmem [thread:$0]  (!%p17163_p6), %s18077_s6, 64, %s419_s11, [#allocation13]  }
  0xdf   : > { %s16772_s30 = scalar_lea.hbm %s18037_s8, 65536 }
  0xe0   : > { %p16773_p11 = scmp.ne.s32.totalorder %s18037_s8, %s16772_s30  ;;  %p16779_p1 = scmp.lt.u32.totalorder %s16772_s30, %s18037_s8 }
  0xe2   : > { %p16775_p12 = pnand %p16773_p11, %p17177_p8 }
  0xe4   : > { %p16776_p13 = pneg %p16775_p12 }
  0xe6   : > { %p16781_p3 = pnand %p16779_p1, %p16776_p13 }
  0xe8   : > { %16784 = shalt.err (!%p16781_p3)
}
  0xe9   : > { %s16785_s11 = scalar_lea.vmem %s17313_s18, 65536  ;;  %p16793_p7 = scmp.lt.s32.totalorder %s17313_s18, %s17313_s18 }
  0xea   : > { %p16786_p0 = scmp.ne.s32.totalorder %s17313_s18, %s16785_s11  ;;  %p16794_p9 = scmp.lt.s32.totalorder %s16785_s11, %s16785_s11 }
  0xec   : > { %p16788_p2 = pnand %p16786_p0, %p17177_p8  ;;  %p16795_p5 = por %p16794_p9, %p16793_p7 }
  0xee   : > { %p16789_p4 = pneg %p16788_p2 }
  0xf0   : > { %p16796_p10 = pnand %p16795_p5, %p16789_p4 }
  0xf2   : > { %16799 = shalt.err (!%p16796_p10)
}
  0xf3   : > { %15262 = dma.hbm_to_vmem [thread:$0]  (!%p17163_p6), %s18037_s8, 65536, %s17313_s18, [#allocation16], %s18076_s14, %s18076_s14, %s18075_s12  }
  0xf4   : > { %s17042_s1 = smov [#allocation20]   ;;  %s16800_s19 = scalar_lea.hbm %s18039_s10, 64 }
  0xf5   : > { %s466_s20 = sshll.u32 %s17042_s1, 4  ;;  %p16801_p11 = scmp.ne.s32.totalorder %s18039_s10, %s16800_s19  ;;  %s467_s20 = int_to_ptr.vmem [resolvable:$true] %s466_s20 }
  0xf6   : > { %p16807_p1 = scmp.lt.u32.totalorder %s16800_s19, %s18039_s10 }
  0xf7   : > { %p16803_p12 = pnand %p16801_p11, %p17177_p8 }
  0xf9   : > { %p16804_p13 = pneg %p16803_p12 }
  0xfb   : > { %p16809_p3 = pnand %p16807_p1, %p16804_p13 }
  0xfd   : > { %16812 = shalt.err (!%p16809_p3)
}
  0xfe   : > { %s16813_s12 = scalar_lea.vmem %s467_s20, 64  ;;  %p16821_p7 = scmp.lt.s32.totalorder %s467_s20, %s467_s20 }
  0xff   : > { %p16814_p0 = scmp.ne.s32.totalorder %s467_s20, %s16813_s12  ;;  %p16822_p9 = scmp.lt.s32.totalorder %s16813_s12, %s16813_s12 }
 0x101   : > { %p16816_p2 = pnand %p16814_p0, %p17177_p8  ;;  %p16823_p5 = por %p16822_p9, %p16821_p7 }
 0x103   : > { %p16817_p4 = pneg %p16816_p2 }
 0x105   : > { %p16824_p10 = pnand %p16823_p5, %p16817_p4 }
 0x107   : > { %16827 = shalt.err (!%p16824_p10)
}
 0x108   : > { %15268 = dma.hbm_to_vmem [thread:$0]  (!%p17163_p6), %s18039_s10, 64, %s467_s20, [#allocation19]  }
 0x109   : > { %s13316_s29 = sadd.s32 4294967294, %s17026_s26   ;;  %s51_s15 = sadd.s32 1, %s17022_s25 }
 0x10a   : > { %s58_s13 = sadd.s32 1, %s17014_s23  ;;  %p53_p8 = scmp.ge.s32.totalorder %s51_s15, 2 }
 0x10b   : > { %p65_p11 = scmp.ne.s32.totalorder %s17014_s23, %s17010_s22  ;;  %p66_p12 = scmp.eq.s32.totalorder %s17026_s26, 0 }
 0x10c   : > { %p71_p13 = scmp.ne.s32.totalorder %s17010_s22, %s17006_s21  ;;  %s18114_s15 = smov (%p53_p8, %s51_s15), 0 }
 0x10d   : > { %p17387_p1 = por %p66_p12, %p65_p11  ;;  %p18079_p3 = scmp.eq.s32.totalorder %s17147_s27, 0 }
 0x10e   : > { %s55_s20 = ssub.s32 %s17022_s25, %s18114_s15  ;;  %p314_p0 = scmp.eq.s32.totalorder %s17147_s27, 1 }
 0x10f   : > { %p17393_p6 = por %p18079_p3, %p71_p13  ;;  %p56_p2 = scmp.eq.s32.totalorder %s55_s20, 0 }
 0x110   : > { %p320_p4 = scmp.eq.s32.totalorder %s13316_s29, 1  ;;  %p17400_p7 = por %p314_p0, %p65_p11 }
 0x111   : > { %s18080_s1 = scalar_select %p17393_p6, 1, 0 }
 0x112   : > { %s18081_s16 = scalar_select %p17400_p7, 1, 0 }
 0x113   : > { %p15292_p9 = scmp.lt.s32.totalorder %s17026_s26, 2  ;;  %p17408_p5 = por %p320_p4, %p71_p13 }
 0x114   : > { %s17406_s30 = scalar_select %p56_p2, %s17014_s23, %s58_s13  }
 0x115   : > { %s18082_s19 = scalar_select %p17408_p5, 1, 0 }
 0x116   : > { %s17413_s17 = sand.u32 1, %s17014_s23   ;;  %s14934_s28 = sshll.u32 %s17022_s25, 8 }
 0x117   : > { %s13328_s24 = sshll.u32 %s17413_s17, 4  ;;  %s18083_s0 = sld [smem:[#allocation35_spill]] }
 0x118   : > { %s481_s18 = scalar_lea.vmem [#allocation3], %s13328_s24  ;;  %p17426_p10 = pnand %p15292_p9, %p17387_p1 }
 0x119   : > { %s489_s29 = sshll.u32 %s481_s18, 4  ;;  %s478_s11 = scalar_lea.sflag [#allocation4], %s17413_s17  ;;  %s17422_s29 = int_to_ptr.vmem [resolvable:$true] %s489_s29 }
 0x11a   : > { %p16830_p11 = pneg %p17426_p10 }
 0x11d   : > { %s17420_s14 = scalar_lea.hbm %s18083_s0, %s14934_s28  ;;  %s16833_s2 = scalar_lea.hbm %s18083_s0, 512 }
 0x11e   : > { %s16828_s28 = scalar_lea.hbm %s17420_s14, 256  ;;  %p16834_p1 = scmp.lt.u32.totalorder %s17420_s14, %s18083_s0 }
 0x11f   : > { %p16829_p8 = scmp.ne.s32.totalorder %s17420_s14, %s16828_s28  ;;  %p16835_p3 = scmp.lt.u32.totalorder %s16833_s2, %s16828_s28 }
 0x120   : > { %p16837_p2 = scmp.lt.u32.totalorder %s16828_s28, %s17420_s14 }
 0x121   : > { %p16831_p12 = pnand %p16830_p11, %p16829_p8  ;;  %p16836_p0 = por %p16835_p3, %p16834_p1 }
 0x123   : > { %p16832_p13 = pneg %p16831_p12  ;;  %p16838_p4 = por %p16837_p2, %p16836_p0 }
 0x125   : > { %p16839_p9 = pnand %p16838_p4, %p16832_p13 }
 0x127   : > { %16842 = shalt.err (!%p16839_p9)
}
 0x128   : > { %s16843_s20 = scalar_lea.vmem %s17422_s29, 256  ;;  %s17043_s24 = smov [#allocation3]  }
 0x129   : > { %p16844_p8 = scmp.ne.s32.totalorder %s17422_s29, %s16843_s20  ;;  %s16848_s12 = sshll.u32 %s17043_s24, 4  ;;  %s16849_s12 = int_to_ptr.vmem [resolvable:$false] %s16848_s12 }
 0x12a   : > { %s16850_s4 = scalar_lea.vmem %s16849_s12, 512  ;;  %p16851_p7 = scmp.lt.s32.totalorder %s17422_s29, %s16849_s12 }
 0x12b   : > { %p16846_p12 = pnand %p16844_p8, %p16830_p11  ;;  %p16852_p1 = scmp.lt.s32.totalorder %s16850_s4, %s16843_s20 }
 0x12d   : > { %p16847_p5 = pneg %p16846_p12  ;;  %p16853_p3 = por %p16852_p1, %p16851_p7 }
 0x12f   : > { %p16854_p0 = pnand %p16853_p3, %p16847_p5 }
 0x131   : > { %16857 = shalt.err (!%p16854_p0)
}
 0x132   : > { %15272 = dma.hbm_to_vmem [thread:$0]  (!%p17426_p10), %s17420_s14, 256, %s17422_s29, %s478_s11  }
 0x133   : > { %s13332_s28 = sshll.u32 %s17022_s25, 5  ;;  %s18085_s24 = sld [smem:[#allocation36_spill]] }
 0x134   : > { %s18087_s12 = sshll.u32 %s17413_s17, 1  ;;  %s18088_s5 = sand.u32 1, %s17026_s26  }
 0x135   : > { %s500_s20 = scalar_lea.vmem [#allocation6], %s18087_s12  ;;  %s497_s6 = scalar_lea.sflag [#allocation7], %s18088_s5 }
 0x136   : > { %s508_s4 = sshll.u32 %s500_s20, 4  ;;  %s509_s4 = int_to_ptr.vmem [resolvable:$true] %s508_s4 }
 0x139   : > { %s18086_s3 = smov %s18085_s24  ;;  %s17462_s0 = scalar_lea.hbm %s18085_s24, %s13332_s28 }
 0x13a   : > { %s16858_s7 = scalar_lea.hbm %s17462_s0, 32  ;;  %s16863_s11 = scalar_lea.hbm %s18086_s3, 64 }
 0x13b   : > { %p16859_p7 = scmp.ne.s32.totalorder %s17462_s0, %s16858_s7  ;;  %p16864_p2 = scmp.lt.u32.totalorder %s17462_s0, %s18086_s3 }
 0x13c   : > { %p16865_p4 = scmp.lt.u32.totalorder %s16863_s11, %s16858_s7  ;;  %p16867_p8 = scmp.lt.u32.totalorder %s16858_s7, %s17462_s0 }
 0x13d   : > { %p16861_p5 = pnand %p16859_p7, %p16830_p11 }
 0x13e   : > { %p16866_p9 = por %p16865_p4, %p16864_p2 }
 0x13f   : > { %p16862_p13 = pneg %p16861_p5 }
 0x140   : > { %p16868_p12 = por %p16867_p8, %p16866_p9 }
 0x142   : > { %p16869_p1 = pnand %p16868_p12, %p16862_p13 }
 0x144   : > { %16872 = shalt.err (!%p16869_p1)
}
 0x145   : > { %s16873_s5 = scalar_lea.vmem %s509_s4, 32  ;;  %s17044_s2 = smov [#allocation6]  }
 0x146   : > { %p16874_p3 = scmp.ne.s32.totalorder %s509_s4, %s16873_s5  ;;  %s16878_s18 = sshll.u32 %s17044_s2, 4  ;;  %s16879_s18 = int_to_ptr.vmem [resolvable:$false] %s16878_s18 }
 0x147   : > { %s16880_s24 = scalar_lea.vmem %s16879_s18, 64  ;;  %p16881_p5 = scmp.lt.s32.totalorder %s509_s4, %s16879_s18 }
 0x148   : > { %p16876_p0 = pnand %p16874_p3, %p16830_p11  ;;  %p16882_p6 = scmp.lt.s32.totalorder %s16880_s24, %s16873_s5 }
 0x14a   : > { %p16877_p7 = pneg %p16876_p0  ;;  %p16883_p2 = por %p16882_p6, %p16881_p5 }
 0x14c   : > { %p16884_p4 = pnand %p16883_p2, %p16877_p7 }
 0x14e   : > { %16887 = shalt.err (!%p16884_p4)
}
 0x14f   : > { %15275 = dma.hbm_to_vmem [thread:$0]  (!%p17426_p10), %s17462_s0, 32, %s509_s4, %s497_s6  }
 0x150   : > { %s18089_s7 = sld [smem:[#allocation34_spill]] }
 0x156   : > { %p18090_p13 = scmp.ne.s32.totalorder %s18089_s7, 0 }
 0x157   : > { %s17490_s12 = sand.u32 (!%p18090_p13), 1, %s17010_s22   ;;  %p18091_p6 = scmp.ne.s32.totalorder (!%p18090_p13), %s18080_s1, 0 }
 0x158   : > { %517 = sbr.rel (%p18090_p13) target bundleno = 4090 (0xffa), region = 64  ;;  %s13334_s20 = sshll.u32 (!%p18090_p13), %s17490_s12, 4 }
 0x159   : > { %s520_s14 = scalar_lea.sflag (!%p18090_p13), [#allocation4], %s17490_s12  ;;  %s17494_s29 = scalar_lea.vmem (!%p18090_p13), [#allocation3], %s13334_s20 }
 0x15f   : > { %16969 = dma.done.wait (%p18091_p6), %s520_s14, 256  }
 0x160   : > { %16971 = vsyncadd (%p18091_p6), %s520_s14, 4294967040  ;;  %s528_s0 = sand.u32 1, %s17147_s27   ;;  %s13335_s6 = sshll.u32 %s17490_s12, 1 }
 0x161   : > { %s529_s13 = scalar_lea.sflag [#allocation7], %s528_s0  ;;  %s17502_s4 = scalar_lea.vmem [#allocation6], %s13335_s6 }
 0x162   : > { %16973 = dma.done.wait (%p18091_p6), %s529_s13, 32  }
 0x163   : > { %16975 = vsyncadd (%p18091_p6), %s529_s13, 4294967264  ;;  %p18092_p10 = scmp.eq.s32.totalorder %s17147_s27, 0 }
 0x165   : > { %16977 = dma.done.wait (%p18092_p10), [#allocation7], 16384   ;;  %p18093_p11 = pmov %p18092_p10 }
 0x166   : > { %p18094_p9 = pmov %p18092_p10 }
 0x167   : > { %16979 = vsyncadd (%p18093_p11), [#allocation7], 4294950912 }
 0x168   : > { %16981 = dma.done.wait (%p18094_p9), [#allocation10], 49152   ;;  %p18095_p8 = pmov %p18094_p9 }
 0x16a   : > { %16983 = vsyncadd (%p18095_p8), [#allocation10], 4294918144  ;;  %p18096_p12 = pmov %p18095_p8 }
 0x16b   : > { %p18097_p1 = pmov %p18095_p8 }
 0x16c   : > { %16985 = dma.done.wait (%p18096_p12), [#allocation13], 128  }
 0x16d   : > { %16987 = vsyncadd (%p18097_p1), [#allocation13], 4294967168  ;;  %p18098_p3 = pmov %p18097_p1 }
 0x16e   : > { %p18099_p0 = pmov %p18097_p1 }
 0x16f   : > { %16989 = dma.done.wait (%p18098_p3), [#allocation16], 131072  }
 0x170   : > { %16991 = vsyncadd (%p18099_p0), [#allocation16], 4294836224  ;;  %p18100_p7 = pmov %p18099_p0 }
 0x171   : > { %p18101_p5 = pmov %p18099_p0 }
 0x172   : > { %16993 = dma.done.wait (%p18100_p7), [#allocation19], 128  }
 0x173   : > { %16995 = vsyncadd (%p18101_p5), [#allocation19], 4294967168  ;;  %v627_v0 = vld [vmem:[#allocation9] sm:$0xff]  ;;  %v628_v2 = vld [vmem:[#allocation9 + $0x8] sm:$0xff]  ;;  %s17045_s27 = smov 64   ;;  %vm3508_vm0 = vcmask 523264  }
 0x174   : > { %v631_v1 = vld [vmem:[#allocation9 + $0x20] sm:$0xff]  ;;  %v632_v4 = vld [vmem:[#allocation9 + $0x28] sm:$0xff]  ;;  %vm17047_vm1 = vmmov 0   ;;  %vm3573_vm2 = vcmask 1043456   ;;  %vm3555_vm3 = vcmask 64512   ;;  %s13345_s1 = sshll.u32 %s17490_s12, 5 }
 0x175   : > { %v13352_v3 = vcombine.high %v627_v0, %v631_v1  ;;  %v13351_v5 = vcombine.low %v627_v0, %v631_v1  ;;  %v635_v6 = vld [vmem:[#allocation9 + $0x40] sm:$0xff]  ;;  %v13354_v8 = vcombine.high %v628_v2, %v632_v4  ;;  %v13353_v9 = vcombine.low %v628_v2, %v632_v4  ;;  %v636_v11 = vld [vmem:[#allocation9 + $0x48] sm:$0xff]  ;;  %s17667_s11 = scalar_lea.vmem [#allocation22], %s13345_s1  ;;  %s18102_s17 = sld [smem:[#allocation33_spill]] }
 0x176   : > { %v639_v7 = vld [vmem:[#allocation9 + $0x60] sm:$0xff]  ;;  %v640_v12 = vld [vmem:[#allocation9 + $0x68] sm:$0xff]  ;;  %vm3568_vm4 = vcmask 60416   ;;  %s18103_s18 = sld [smem:[#allocation44_spill]]  ;;  %s13086_s7 = sshll.u32 %s17667_s11, 4  ;;  %s17937_s7 = int_to_ptr.vmem [resolvable:$true] %s13086_s7 }
 0x177   : > { %v13360_v10 = vcombine.high %v635_v6, %v639_v7  ;;  %v643_v13 = vld [vmem:[#allocation9 + $0x80] sm:$0xff]  ;;  %2177 = vmatprep.subr.bf16.mxu0 %v13352_v3  ;;  %v13362_v14 = vcombine.high %v636_v11, %v640_v12  ;;  %v644_v16 = vld [vmem:[#allocation9 + $0x88] sm:$0xff]  ;;  %2259 = vmatprep.subr.bf16.mxu1 %v13354_v8  ;;  %v13359_v18 = vcombine.low %v635_v6, %v639_v7  ;;  %s13056_s20 = scalar_lea.sflag [#allocation23], %s17490_s12  ;;  %s16888_s14 = scalar_lea.vmem %s17937_s7, 512 }
 0x178   : > { %v647_v15 = vld [vmem:[#allocation9 + $0xa0] sm:$0xff]  ;;  %v648_v17 = vld [vmem:[#allocation9 + $0xa8] sm:$0xff]  ;;  %2178 = vmatpush1.bf16.msra.mxu0 %v13351_v5  ;;  %2260 = vmatpush1.bf16.msra.mxu1 %v13353_v9  ;;  %v13361_v19 = vcombine.low %v636_v11, %v640_v12  ;;  %p16889_p2 = scmp.ne.s32.totalorder %s17937_s7, %s16888_s14  ;;  %p18104_p4 = scmp.ne.s32.totalorder %s18081_s16, 0 }
 0x179   : > { %2179 = vmatprep.subr.bf16.mxu0 %v13360_v10  ;;  %v13368_v20 = vcombine.high %v643_v13, %v647_v15  ;;  %2261 = vmatprep.subr.bf16.mxu1 %v13362_v14  ;;  %v13370_v21 = vcombine.high %v644_v16, %v648_v17  ;;  %v651_v22 = vld [vmem:[#allocation9 + $0xc0] sm:$0xff]  ;;  %v652_v24 = vld [vmem:[#allocation9 + $0xc8] sm:$0xff]  ;;  %v13367_v26 = vcombine.low %v643_v13, %v647_v15 }
 0x17a   : > { %v655_v23 = vld [vmem:[#allocation9 + $0xe0] sm:$0xff]  ;;  %v656_v25 = vld [vmem:[#allocation9 + $0xe8] sm:$0xff]  ;;  %v13369_v27 = vcombine.low %v644_v16, %v648_v17  ;;  %p16890_p13 = pnand %p16889_p2, %p18104_p4 }
 0x17b   : > { %v13376_v28 = vcombine.high %v651_v22, %v655_v23  ;;  %v13378_v29 = vcombine.high %v652_v24, %v656_v25  ;;  %v659_v30 = vld [vmem:[#allocation9 + $0x100] sm:$0xff]  ;;  %v660_v32 = vld [vmem:[#allocation9 + $0x108] sm:$0xff]  ;;  %v13375_v34 = vcombine.low %v651_v22, %v655_v23  ;;  %v13377_v35 = vcombine.low %v652_v24, %v656_v25  ;;  %s14939_s28 = sshll.u32 %s18102_s17, 9 }
 0x17c   : > { %2180 = vmatpush1.bf16.msra.mxu0 %v13359_v18  ;;  %2262 = vmatpush1.bf16.msra.mxu1 %v13361_v19  ;;  %v663_v31 = vld [vmem:[#allocation9 + $0x120] sm:$0xff]  ;;  %v664_v33 = vld [vmem:[#allocation9 + $0x128] sm:$0xff]  ;;  %s17934_s24 = scalar_lea.hbm %s18103_s18, %s14939_s28  ;;  %p16891_p6 = pneg %p16890_p13 }
 0x17d   : > { %2181 = vmatprep.subr.bf16.mxu0 %v13368_v20  ;;  %2263 = vmatprep.subr.bf16.mxu1 %v13370_v21  ;;  %v13384_v36 = vcombine.high %v659_v30, %v663_v31  ;;  %v13386_v37 = vcombine.high %v660_v32, %v664_v33  ;;  %v667_v38 = vld [vmem:[#allocation9 + $0x140] sm:$0xff]  ;;  %v668_v40 = vld [vmem:[#allocation9 + $0x148] sm:$0xff]  ;;  %v13383_v42 = vcombine.low %v659_v30, %v663_v31 }
 0x17e   : > { %v671_v39 = vld [vmem:[#allocation9 + $0x160] sm:$0xff]  ;;  %v672_v41 = vld [vmem:[#allocation9 + $0x168] sm:$0xff]  ;;  %v13385_v43 = vcombine.low %v660_v32, %v664_v33 }
 0x17f   : > { %v13392_v44 = vcombine.high %v667_v38, %v671_v39  ;;  %v13394_v45 = vcombine.high %v668_v40, %v672_v41  ;;  %v675_v46 = vld [vmem:[#allocation9 + $0x180] sm:$0xff]  ;;  %v676_v48 = vld [vmem:[#allocation9 + $0x188] sm:$0xff]  ;;  %v13391_v50 = vcombine.low %v667_v38, %v671_v39  ;;  %v13393_v51 = vcombine.low %v668_v40, %v672_v41 }
 0x180   : > { %2182 = vmatpush1.bf16.msra.mxu0 %v13367_v26  ;;  %2264 = vmatpush1.bf16.msra.mxu1 %v13369_v27  ;;  %v679_v47 = vld [vmem:[#allocation9 + $0x1a0] sm:$0xff]  ;;  %v680_v49 = vld [vmem:[#allocation9 + $0x1a8] sm:$0xff] }
 0x181   : > { %2183 = vmatprep.subr.bf16.mxu0 %v13376_v28  ;;  %2265 = vmatprep.subr.bf16.mxu1 %v13378_v29  ;;  %v13400_v52 = vcombine.high %v675_v46, %v679_v47  ;;  %v17529_v53 = vld [vmem:[%s17494_s29] sm:$0xff]  ;;  %v13402_v54 = vcombine.high %v676_v48, %v680_v49  ;;  %v13399_v60 = vcombine.low %v675_v46, %v679_v47 }
 0x182   : > { %v683_v55 = vld [vmem:[#allocation9 + $0x1c0] sm:$0xff]  ;;  %v17533_v57 = vcombine.high %v17529_v53, %v17529_v53  ;;  %v684_v58 = vld [vmem:[#allocation9 + $0x1c8] sm:$0xff]  ;;  %v13401_v61 = vcombine.low %v676_v48, %v680_v49 }
 0x183   : > { %v687_v56 = vld [vmem:[#allocation9 + $0x1e0] sm:$0xff]  ;;  %v688_v59 = vld [vmem:[#allocation9 + $0x1e8] sm:$0xff] }
 0x184   : > { %2184 = vmatpush1.bf16.msra.mxu0 %v13375_v34  ;;  %2266 = vmatpush1.bf16.msra.mxu1 %v13377_v35  ;;  %v13408_v62 = vcombine.high %v683_v55, %v687_v56  ;;  %v13410_v63 = vcombine.high %v684_v58, %v688_v59  ;;  %v691_v0 = vld [vmem:[#allocation9 + $0x200] sm:$0xff]  ;;  %v692_v2 = vld [vmem:[#allocation9 + $0x208] sm:$0xff]  ;;  %v13407_v4 = vcombine.low %v683_v55, %v687_v56 }
 0x185   : > { %2185 = vmatprep.subr.bf16.mxu0 %v13384_v36  ;;  %2267 = vmatprep.subr.bf16.mxu1 %v13386_v37  ;;  %v695_v1 = vld [vmem:[#allocation9 + $0x220] sm:$0xff]  ;;  %v696_v3 = vld [vmem:[#allocation9 + $0x228] sm:$0xff]  ;;  %v13409_v5 = vcombine.low %v684_v58, %v688_v59 }
 0x186   : > { %2209 = vmatprep.mubr.bf16.mxu0 %v17533_v57  ;;  %2291 = vmatprep.mubr.bf16.mxu1 %v17533_v57  ;;  %v13416_v6 = vcombine.high %v691_v0, %v695_v1  ;;  %v13418_v7 = vcombine.high %v692_v2, %v696_v3  ;;  %v699_v8 = vld [vmem:[#allocation9 + $0x240] sm:$0xff]  ;;  %v700_v10 = vld [vmem:[#allocation9 + $0x248] sm:$0xff]  ;;  %v13415_v12 = vcombine.low %v691_v0, %v695_v1 }
 0x187   : > { %v703_v9 = vld [vmem:[#allocation9 + $0x260] sm:$0xff]  ;;  %v704_v11 = vld [vmem:[#allocation9 + $0x268] sm:$0xff]  ;;  %v13417_v13 = vcombine.low %v692_v2, %v696_v3 }
 0x188   : > { %2186 = vmatpush1.bf16.msra.mxu0 %v13383_v42  ;;  %2268 = vmatpush1.bf16.msra.mxu1 %v13385_v43  ;;  %v13424_v14 = vcombine.high %v699_v8, %v703_v9  ;;  %v13426_v15 = vcombine.high %v700_v10, %v704_v11  ;;  %v707_v16 = vld [vmem:[#allocation9 + $0x280] sm:$0xff]  ;;  %v708_v18 = vld [vmem:[#allocation9 + $0x288] sm:$0xff]  ;;  %v13423_v20 = vcombine.low %v699_v8, %v703_v9 }
 0x189   : > { %2187 = vmatprep.subr.bf16.mxu0 %v13392_v44  ;;  %2269 = vmatprep.subr.bf16.mxu1 %v13394_v45  ;;  %v711_v17 = vld [vmem:[#allocation9 + $0x2a0] sm:$0xff]  ;;  %v712_v19 = vld [vmem:[#allocation9 + $0x2a8] sm:$0xff]  ;;  %v13425_v21 = vcombine.low %v700_v10, %v704_v11 }
 0x18a   : > { %v13432_v22 = vcombine.high %v707_v16, %v711_v17  ;;  %v13434_v23 = vcombine.high %v708_v18, %v712_v19  ;;  %v715_v24 = vld [vmem:[#allocation9 + $0x2c0] sm:$0xff]  ;;  %v716_v26 = vld [vmem:[#allocation9 + $0x2c8] sm:$0xff]  ;;  %v13431_v28 = vcombine.low %v707_v16, %v711_v17  ;;  %v13433_v29 = vcombine.low %v708_v18, %v712_v19 }
 0x18b   : > { %v719_v25 = vld [vmem:[#allocation9 + $0x2e0] sm:$0xff]  ;;  %v720_v27 = vld [vmem:[#allocation9 + $0x2e8] sm:$0xff] }
 0x18c   : > { %2188 = vmatpush1.bf16.msra.mxu0 %v13391_v50  ;;  %2270 = vmatpush1.bf16.msra.mxu1 %v13393_v51  ;;  %v13440_v30 = vcombine.high %v715_v24, %v719_v25  ;;  %v13442_v31 = vcombine.high %v716_v26, %v720_v27  ;;  %v723_v32 = vld [vmem:[#allocation9 + $0x300] sm:$0xff]  ;;  %v724_v34 = vld [vmem:[#allocation9 + $0x308] sm:$0xff]  ;;  %v13439_v36 = vcombine.low %v715_v24, %v719_v25 }
 0x18d   : > { %2189 = vmatprep.subr.bf16.mxu0 %v13400_v52  ;;  %2271 = vmatprep.subr.bf16.mxu1 %v13402_v54  ;;  %v727_v33 = vld [vmem:[#allocation9 + $0x320] sm:$0xff]  ;;  %v728_v35 = vld [vmem:[#allocation9 + $0x328] sm:$0xff]  ;;  %v13441_v37 = vcombine.low %v716_v26, %v720_v27 }
 0x18e   : > { %v13448_v38 = vcombine.high %v723_v32, %v727_v33  ;;  %v13450_v39 = vcombine.high %v724_v34, %v728_v35  ;;  %v731_v40 = vld [vmem:[#allocation9 + $0x340] sm:$0xff]  ;;  %v732_v42 = vld [vmem:[#allocation9 + $0x348] sm:$0xff]  ;;  %v13447_v44 = vcombine.low %v723_v32, %v727_v33  ;;  %v13449_v45 = vcombine.low %v724_v34, %v728_v35 }
 0x18f   : > { %v735_v41 = vld [vmem:[#allocation9 + $0x360] sm:$0xff]  ;;  %v736_v43 = vld [vmem:[#allocation9 + $0x368] sm:$0xff] }
 0x190   : > { %2190 = vmatpush1.bf16.msra.mxu0 %v13399_v60  ;;  %2272 = vmatpush1.bf16.msra.mxu1 %v13401_v61  ;;  %v13456_v46 = vcombine.high %v731_v40, %v735_v41  ;;  %v13458_v47 = vcombine.high %v732_v42, %v736_v43  ;;  %v739_v48 = vld [vmem:[#allocation9 + $0x380] sm:$0xff]  ;;  %v740_v50 = vld [vmem:[#allocation9 + $0x388] sm:$0xff]  ;;  %v13455_v52 = vcombine.low %v731_v40, %v735_v41 }
 0x191   : > { %2191 = vmatprep.subr.bf16.mxu0 %v13408_v62  ;;  %2273 = vmatprep.subr.bf16.mxu1 %v13410_v63  ;;  %v743_v49 = vld [vmem:[#allocation9 + $0x3a0] sm:$0xff]  ;;  %v744_v51 = vld [vmem:[#allocation9 + $0x3a8] sm:$0xff]  ;;  %v13457_v54 = vcombine.low %v732_v42, %v736_v43 }
 0x192   : > { %v13464_v55 = vcombine.high %v739_v48, %v743_v49  ;;  %v13466_v56 = vcombine.high %v740_v50, %v744_v51  ;;  %v747_v58 = vld [vmem:[#allocation9 + $0x3c0] sm:$0xff]  ;;  %v748_v60 = vld [vmem:[#allocation9 + $0x3c8] sm:$0xff]  ;;  %v13463_v62 = vcombine.low %v739_v48, %v743_v49  ;;  %v13465_v63 = vcombine.low %v740_v50, %v744_v51 }
 0x193   : > { %v751_v59 = vld [vmem:[#allocation9 + $0x3e0] sm:$0xff]  ;;  %v752_v61 = vld [vmem:[#allocation9 + $0x3e8] sm:$0xff] }
 0x194   : > { %2192 = vmatpush1.bf16.msra.mxu0 %v13407_v4  ;;  %2274 = vmatpush1.bf16.msra.mxu1 %v13409_v5  ;;  %v13472_v0 = vcombine.high %v747_v58, %v751_v59  ;;  %v13474_v1 = vcombine.high %v748_v60, %v752_v61  ;;  %v755_v2 = vld [vmem:[#allocation9 + $0x400] sm:$0xff]  ;;  %v756_v4 = vld [vmem:[#allocation9 + $0x408] sm:$0xff] }
 0x195   : > { %2193 = vmatprep.subr.bf16.mxu0 %v13416_v6  ;;  %2275 = vmatprep.subr.bf16.mxu1 %v13418_v7  ;;  %v759_v3 = vld [vmem:[#allocation9 + $0x420] sm:$0xff]  ;;  %v760_v5 = vld [vmem:[#allocation9 + $0x428] sm:$0xff]  ;;  %v13471_v6 = vcombine.low %v747_v58, %v751_v59  ;;  %v13473_v7 = vcombine.low %v748_v60, %v752_v61 }
 0x196   : > { %v13480_v8 = vcombine.high %v755_v2, %v759_v3  ;;  %v13482_v9 = vcombine.high %v756_v4, %v760_v5  ;;  %v763_v10 = vld [vmem:[#allocation9 + $0x440] sm:$0xff]  ;;  %v13479_v16 = vcombine.low %v755_v2, %v759_v3  ;;  %v13481_v18 = vcombine.low %v756_v4, %v760_v5 }
 0x197   : > { %v767_v11 = vld [vmem:[#allocation9 + $0x460] sm:$0xff] }
 0x198   : > { %2194 = vmatpush1.bf16.msra.mxu0 %v13415_v12  ;;  %2276 = vmatpush1.bf16.msra.mxu1 %v13417_v13  ;;  %v17539_v12 = vcombine.low %v17529_v53, %v17529_v53  ;;  %v764_v13 = vld [vmem:[#allocation9 + $0x448] sm:$0xff]  ;;  %v771_v17 = vld [vmem:[#allocation9 + $0x480] sm:$0xff]  ;;  %v13488_v19 = vcombine.high %v763_v10, %v767_v11  ;;  %v13487_v24 = vcombine.low %v763_v10, %v767_v11 }
 0x199   : > { %2195 = vmatprep.subr.bf16.mxu0 %v13424_v14  ;;  %2277 = vmatprep.subr.bf16.mxu1 %v13426_v15  ;;  %v768_v14 = vld [vmem:[#allocation9 + $0x468] sm:$0xff]  ;;  %v779_v25 = vld [vmem:[#allocation9 + $0x4c0] sm:$0xff] }
 0x19a   : > { %v17542_v15 = vld [vmem:[%s17494_s29 + $0x8] sm:$0xff]  ;;  %v13489_v27 = vcombine.low %v764_v13, %v768_v14 }
 0x19b   : > { %v17546_v53 = vcombine.high %v17542_v15, %v17542_v15  ;;  %v783_v26 = vld [vmem:[#allocation9 + $0x4e0] sm:$0xff] }
 0x19c   : > { %2196 = vmatpush1.bf16.msra.mxu0 %v13423_v20  ;;  %2278 = vmatpush1.bf16.msra.mxu1 %v13425_v21  ;;  %v775_v20 = vld [vmem:[#allocation9 + $0x4a0] sm:$0xff]  ;;  %v772_v21 = vld [vmem:[#allocation9 + $0x488] sm:$0xff]  ;;  %v13503_v40 = vcombine.low %v779_v25, %v783_v26 }
 0x19d   : > { %2197 = vmatprep.subr.bf16.mxu0 %v13432_v22  ;;  %2279 = vmatprep.subr.bf16.mxu1 %v13434_v23  ;;  %v776_v22 = vld [vmem:[#allocation9 + $0x4a8] sm:$0xff]  ;;  %v13490_v23 = vcombine.high %v764_v13, %v768_v14  ;;  %v13495_v32 = vcombine.low %v771_v17, %v775_v20  ;;  %v787_v33 = vld [vmem:[#allocation9 + $0x500] sm:$0xff] }
 0x19e   : > { %v791_v34 = vld [vmem:[#allocation9 + $0x520] sm:$0xff]  ;;  %v13497_v35 = vcombine.low %v772_v21, %v776_v22 }
 0x19f   : > { %v795_v41 = vld [vmem:[#allocation9 + $0x540] sm:$0xff]  ;;  %v13511_v48 = vcombine.low %v787_v33, %v791_v34 }
 0x1a0   : > { %2198 = vmatpush1.bf16.msra.mxu0 %v13431_v28  ;;  %2280 = vmatpush1.bf16.msra.mxu1 %v13433_v29  ;;  %v13496_v28 = vcombine.high %v771_v17, %v775_v20  ;;  %v780_v29 = vld [vmem:[#allocation9 + $0x4c8] sm:$0xff]  ;;  %v799_v42 = vld [vmem:[#allocation9 + $0x560] sm:$0xff] }
 0x1a1   : > { %2199 = vmatprep.subr.bf16.mxu0 %v13440_v30  ;;  %2281 = vmatprep.subr.bf16.mxu1 %v13442_v31  ;;  %v784_v30 = vld [vmem:[#allocation9 + $0x4e8] sm:$0xff]  ;;  %v13498_v31 = vcombine.high %v772_v21, %v776_v22  ;;  %v803_v49 = vld [vmem:[#allocation9 + $0x580] sm:$0xff]  ;;  %v13519_v58 = vcombine.low %v795_v41, %v799_v42 }
 0x1a2   : > { %v13505_v43 = vcombine.low %v780_v29, %v784_v30  ;;  %v807_v50 = vld [vmem:[#allocation9 + $0x5a0] sm:$0xff]  ;;  %v828_v17 = vld [vmem:[#allocation9 + $0x648] sm:$0xff] }
 0x1a3   : > { %v811_v59 = vld [vmem:[#allocation9 + $0x5c0] sm:$0xff]  ;;  %v13527_v2 = vcombine.low %v803_v49, %v807_v50 }
 0x1a4   : > { %2200 = vmatpush1.bf16.msra.mxu0 %v13439_v36  ;;  %2282 = vmatpush1.bf16.msra.mxu1 %v13441_v37  ;;  %v13504_v36 = vcombine.high %v779_v25, %v783_v26  ;;  %v788_v37 = vld [vmem:[#allocation9 + $0x508] sm:$0xff]  ;;  %v815_v60 = vld [vmem:[#allocation9 + $0x5e0] sm:$0xff] }
 0x1a5   : > { %2201 = vmatprep.subr.bf16.mxu0 %v13448_v38  ;;  %2283 = vmatprep.subr.bf16.mxu1 %v13450_v39  ;;  %v792_v38 = vld [vmem:[#allocation9 + $0x528] sm:$0xff]  ;;  %v13506_v39 = vcombine.high %v780_v29, %v784_v30  ;;  %v819_v3 = vld [vmem:[#allocation9 + $0x600] sm:$0xff]  ;;  %v13535_v10 = vcombine.low %v811_v59, %v815_v60 }
 0x1a6   : > { %v13513_v51 = vcombine.low %v788_v37, %v792_v38  ;;  %v823_v4 = vld [vmem:[#allocation9 + $0x620] sm:$0xff]  ;;  %v836_v25 = vld [vmem:[#allocation9 + $0x688] sm:$0xff] }
 0x1a7   : > { %v827_v11 = vld [vmem:[#allocation9 + $0x640] sm:$0xff]  ;;  %v13543_v20 = vcombine.low %v819_v3, %v823_v4  ;;  %v840_v26 = vld [vmem:[#allocation9 + $0x6a8] sm:$0xff] }
 0x1a8   : > { %2202 = vmatpush1.bf16.msra.mxu0 %v13447_v44  ;;  %2284 = vmatpush1.bf16.msra.mxu1 %v13449_v45  ;;  %v13512_v44 = vcombine.high %v787_v33, %v791_v34  ;;  %v796_v45 = vld [vmem:[#allocation9 + $0x548] sm:$0xff]  ;;  %v831_v13 = vld [vmem:[#allocation9 + $0x660] sm:$0xff] }
 0x1a9   : > { %2203 = vmatprep.subr.bf16.mxu0 %v13456_v46  ;;  %2285 = vmatprep.subr.bf16.mxu1 %v13458_v47  ;;  %v800_v46 = vld [vmem:[#allocation9 + $0x568] sm:$0xff]  ;;  %v13514_v47 = vcombine.high %v788_v37, %v792_v38  ;;  %v835_v21 = vld [vmem:[#allocation9 + $0x680] sm:$0xff] }
 0x1aa   : > { %v13521_v61 = vcombine.low %v796_v45, %v800_v46  ;;  %v839_v22 = vld [vmem:[#allocation9 + $0x6a0] sm:$0xff]  ;;  %v844_v33 = vld [vmem:[#allocation9 + $0x6c8] sm:$0xff] }
 0x1ab   : > { %v843_v29 = vld [vmem:[#allocation9 + $0x6c0] sm:$0xff]  ;;  %v848_v34 = vld [vmem:[#allocation9 + $0x6e8] sm:$0xff] }
 0x1ac   : > { %2204 = vmatpush1.bf16.msra.mxu0 %v13455_v52  ;;  %2286 = vmatpush1.bf16.msra.mxu1 %v13457_v54  ;;  %v13520_v52 = vcombine.high %v795_v41, %v799_v42  ;;  %v804_v54 = vld [vmem:[#allocation9 + $0x588] sm:$0xff]  ;;  %v847_v30 = vld [vmem:[#allocation9 + $0x6e0] sm:$0xff] }
 0x1ad   : > { %2205 = vmatprep.subr.bf16.mxu0 %v13464_v55  ;;  %2287 = vmatprep.subr.bf16.mxu1 %v13466_v56  ;;  %v808_v55 = vld [vmem:[#allocation9 + $0x5a8] sm:$0xff]  ;;  %v13522_v56 = vcombine.high %v796_v45, %v800_v46  ;;  %v851_v37 = vld [vmem:[#allocation9 + $0x700] sm:$0xff] }
 0x1ae   : > { %v13529_v5 = vcombine.low %v804_v54, %v808_v55  ;;  %v855_v38 = vld [vmem:[#allocation9 + $0x720] sm:$0xff]  ;;  %v852_v41 = vld [vmem:[#allocation9 + $0x708] sm:$0xff] }
 0x1af   : > { %v856_v42 = vld [vmem:[#allocation9 + $0x728] sm:$0xff]  ;;  %v859_v45 = vld [vmem:[#allocation9 + $0x740] sm:$0xff] }
 0x1b0   : > { %2206 = vmatpush1.bf16.msra.mxu0 %v13463_v62  ;;  %2288 = vmatpush1.bf16.msra.mxu1 %v13465_v63  ;;  %v13528_v62 = vcombine.high %v803_v49, %v807_v50  ;;  %v812_v63 = vld [vmem:[#allocation9 + $0x5c8] sm:$0xff]  ;;  %v863_v46 = vld [vmem:[#allocation9 + $0x760] sm:$0xff] }
 0x1b1   : > { %2207 = vmatprep.subr.bf16.mxu0 %v13472_v0  ;;  %2289 = vmatprep.subr.bf16.mxu1 %v13474_v1  ;;  %v816_v0 = vld [vmem:[#allocation9 + $0x5e8] sm:$0xff]  ;;  %v13530_v1 = vcombine.high %v804_v54, %v808_v55  ;;  %v867_v54 = vld [vmem:[#allocation9 + $0x780] sm:$0xff] }
 0x1b2   : > { %v13537_v14 = vcombine.low %v812_v63, %v816_v0  ;;  %v860_v49 = vld [vmem:[#allocation9 + $0x748] sm:$0xff]  ;;  %v871_v55 = vld [vmem:[#allocation9 + $0x7a0] sm:$0xff] }
 0x1b3   : > { %v864_v50 = vld [vmem:[#allocation9 + $0x768] sm:$0xff] }
 0x1b4   : > { %2208 = vmatpush1.bf16.msra.mxu0 %v13471_v6  ;;  %2290 = vmatpush1.bf16.msra.mxu1 %v13473_v7  ;;  %v13536_v6 = vcombine.high %v811_v59, %v815_v60  ;;  %v820_v7 = vld [vmem:[#allocation9 + $0x608] sm:$0xff] }
 0x1b5   : > { %2218 = vmatprep.subr.bf16.mxu0 %v13480_v8  ;;  %2300 = vmatprep.subr.bf16.mxu1 %v13482_v9  ;;  %v824_v8 = vld [vmem:[#allocation9 + $0x628] sm:$0xff]  ;;  %v13538_v9 = vcombine.high %v812_v63, %v816_v0  ;;  %v875_v63 = vld [vmem:[#allocation9 + $0x7c0] sm:$0xff] }
 0x1b6   : > { %v868_v59 = vld [vmem:[#allocation9 + $0x788] sm:$0xff]  ;;  %v879_v0 = vld [vmem:[#allocation9 + $0x7e0] sm:$0xff] }
 0x1b7   : > { %2210 = vmatmul.mubr.bf16.vlgmr.msra.gmra.mrb[0].mxu0 %v17539_v12  ;;  %2292 = vmatmul.mubr.bf16.vlgmr.msra.gmra.mrb[0].mxu1 %v17539_v12  ;;  %v872_v60 = vld [vmem:[#allocation9 + $0x7a8] sm:$0xff] }
 0x1b8   : > { %2219 = vmatpush1.bf16.msra.mxu0 %v13479_v16  ;;  %2301 = vmatpush1.bf16.msra.mxu1 %v13481_v18  ;;  %v13544_v16 = vcombine.high %v819_v3, %v823_v4  ;;  %v832_v18 = vld [vmem:[#allocation9 + $0x668] sm:$0xff] }
 0x1b9   : > { %2220 = vmatprep.subr.bf16.mxu0 %v13488_v19  ;;  %2302 = vmatprep.subr.bf16.mxu1 %v13490_v23  ;;  %v13546_v19 = vcombine.high %v820_v7, %v824_v8  ;;  %v13545_v23 = vcombine.low %v820_v7, %v824_v8  ;;  %v876_v3 = vld [vmem:[#allocation9 + $0x7c8] sm:$0xff]  ;;  %v629_v7 = vld [vmem:[#allocation9 + $0x10] sm:$0xff] }
 0x1ba   : > { %2250 = vmatprep.mubr.bf16.mxu0 %v17546_v53  ;;  %2332 = vmatprep.mubr.bf16.mxu1 %v17546_v53  ;;  %v880_v4 = vld [vmem:[#allocation9 + $0x7e8] sm:$0xff]  ;;  %v633_v8 = vld [vmem:[#allocation9 + $0x30] sm:$0xff] }
 0x1bc   : > { %2221 = vmatpush1.bf16.msra.mxu0 %v13487_v24  ;;  %2303 = vmatpush1.bf16.msra.mxu1 %v13489_v27  ;;  %v13552_v24 = vcombine.high %v827_v11, %v831_v13  ;;  %v13554_v27 = vcombine.high %v828_v17, %v832_v18 }
 0x1bd   : > { %2222 = vmatprep.subr.bf16.mxu0 %v13496_v28  ;;  %2304 = vmatprep.subr.bf16.mxu1 %v13498_v31  ;;  %v13551_v28 = vcombine.low %v827_v11, %v831_v13  ;;  %v13553_v31 = vcombine.low %v828_v17, %v832_v18  ;;  %v630_v11 = vld [vmem:[#allocation9 + $0x18] sm:$0xff]  ;;  %v637_v17 = vld [vmem:[#allocation9 + $0x50] sm:$0xff] }
 0x1be   : > { %v634_v13 = vld [vmem:[#allocation9 + $0x38] sm:$0xff]  ;;  %v641_v18 = vld [vmem:[#allocation9 + $0x70] sm:$0xff] }
 0x1c0   : > { %2223 = vmatpush1.bf16.msra.mxu0 %v13495_v32  ;;  %2305 = vmatpush1.bf16.msra.mxu1 %v13497_v35  ;;  %v13560_v32 = vcombine.high %v835_v21, %v839_v22  ;;  %v13562_v35 = vcombine.high %v836_v25, %v840_v26 }
 0x1c1   : > { %2224 = vmatprep.subr.bf16.mxu0 %v13504_v36  ;;  %2306 = vmatprep.subr.bf16.mxu1 %v13506_v39  ;;  %v13559_v36 = vcombine.low %v835_v21, %v839_v22  ;;  %v13561_v39 = vcombine.low %v836_v25, %v840_v26  ;;  %v638_v21 = vld [vmem:[#allocation9 + $0x58] sm:$0xff]  ;;  %v13355_v25 = vcombine.low %v629_v7, %v633_v8  ;;  %v645_v26 = vld [vmem:[#allocation9 + $0x90] sm:$0xff] }
 0x1c2   : > { %v642_v22 = vld [vmem:[#allocation9 + $0x78] sm:$0xff] }
 0x1c4   : > { %2225 = vmatpush1.bf16.msra.mxu0 %v13503_v40  ;;  %2307 = vmatpush1.bf16.msra.mxu1 %v13505_v43  ;;  %v13568_v40 = vcombine.high %v843_v29, %v847_v30  ;;  %v13570_v43 = vcombine.high %v844_v33, %v848_v34 }
 0x1c5   : > { %2226 = vmatprep.subr.bf16.mxu0 %v13512_v44  ;;  %2308 = vmatprep.subr.bf16.mxu1 %v13514_v47  ;;  %v13567_v44 = vcombine.low %v843_v29, %v847_v30  ;;  %v13569_v47 = vcombine.low %v844_v33, %v848_v34  ;;  %v649_v29 = vld [vmem:[#allocation9 + $0xb0] sm:$0xff]  ;;  %v13366_v30 = vcombine.high %v638_v21, %v642_v22 }
 0x1c6   : > { %v13363_v33 = vcombine.low %v637_v17, %v641_v18  ;;  %v13372_v34 = vcombine.high %v645_v26, %v649_v29 }
 0x1c8   : > { %2227 = vmatpush1.bf16.msra.mxu0 %v13511_v48  ;;  %2309 = vmatpush1.bf16.msra.mxu1 %v13513_v51  ;;  %v13576_v48 = vcombine.high %v851_v37, %v855_v38  ;;  %v13578_v51 = vcombine.high %v852_v41, %v856_v42 }
 0x1c9   : > { %2228 = vmatprep.subr.bf16.mxu0 %v13520_v52  ;;  %2310 = vmatprep.subr.bf16.mxu1 %v13522_v56  ;;  %v13575_v52 = vcombine.low %v851_v37, %v855_v38  ;;  %v13577_v56 = vcombine.low %v852_v41, %v856_v42  ;;  %v654_v37 = vld [vmem:[#allocation9 + $0xd8] sm:$0xff] }
 0x1cc   : > { %2229 = vmatpush1.bf16.msra.mxu0 %v13519_v58  ;;  %2311 = vmatpush1.bf16.msra.mxu1 %v13521_v61  ;;  %v13584_v58 = vcombine.high %v859_v45, %v863_v46  ;;  %v13586_v61 = vcombine.high %v860_v49, %v864_v50 }
 0x1cd   : > { %2230 = vmatprep.subr.bf16.mxu0 %v13528_v62  ;;  %2312 = vmatprep.subr.bf16.mxu1 %v13530_v1  ;;  %v13583_v62 = vcombine.low %v859_v45, %v863_v46  ;;  %v13585_v1 = vcombine.low %v860_v49, %v864_v50  ;;  %v662_v45 = vld [vmem:[#allocation9 + $0x118] sm:$0xff] }
 0x1d0   : > { %2231 = vmatpush1.bf16.msra.mxu0 %v13527_v2  ;;  %2313 = vmatpush1.bf16.msra.mxu1 %v13529_v5  ;;  %v13592_v2 = vcombine.high %v867_v54, %v871_v55  ;;  %v13594_v5 = vcombine.high %v868_v59, %v872_v60 }
 0x1d1   : > { %2232 = vmatprep.subr.bf16.mxu0 %v13536_v6  ;;  %2314 = vmatprep.subr.bf16.mxu1 %v13538_v9  ;;  %v13591_v6 = vcombine.low %v867_v54, %v871_v55  ;;  %v13593_v9 = vcombine.low %v868_v59, %v872_v60  ;;  %v674_v55 = vld [vmem:[#allocation9 + $0x178] sm:$0xff]  ;;  %v677_v60 = vld [vmem:[#allocation9 + $0x190] sm:$0xff] }
 0x1d4   : > { %2233 = vmatpush1.bf16.msra.mxu0 %v13535_v10  ;;  %2315 = vmatpush1.bf16.msra.mxu1 %v13537_v14  ;;  %v13600_v10 = vcombine.high %v875_v63, %v879_v0  ;;  %v13602_v14 = vcombine.high %v876_v3, %v880_v4 }
 0x1d5   : > { %2234 = vmatprep.subr.bf16.mxu0 %v13544_v16  ;;  %2316 = vmatprep.subr.bf16.mxu1 %v13546_v19  ;;  %v13599_v16 = vcombine.low %v875_v63, %v879_v0  ;;  %v13601_v19 = vcombine.low %v876_v3, %v880_v4  ;;  %v682_v0 = vld [vmem:[#allocation9 + $0x1b8] sm:$0xff]  ;;  %v685_v4 = vld [vmem:[#allocation9 + $0x1d0] sm:$0xff] }
 0x1d8   : > { %2235 = vmatpush1.bf16.msra.mxu0 %v13543_v20  ;;  %2317 = vmatpush1.bf16.msra.mxu1 %v13545_v23  ;;  %v13356_v20 = vcombine.high %v629_v7, %v633_v8  ;;  %v13358_v23 = vcombine.high %v630_v11, %v634_v13  ;;  %v690_v8 = vld [vmem:[#allocation9 + $0x1f8] sm:$0xff] }
 0x1d9   : > { %2236 = vmatprep.subr.bf16.mxu0 %v13552_v24  ;;  %2318 = vmatprep.subr.bf16.mxu1 %v13554_v27  ;;  %v17554_v24 = vcombine.low %v17542_v15, %v17542_v15  ;;  %v13357_v27 = vcombine.low %v630_v11, %v634_v13  ;;  %v13365_v15 = vcombine.low %v638_v21, %v642_v22  ;;  %v693_v13 = vld [vmem:[#allocation9 + $0x210] sm:$0xff] }
 0x1da   : > { %v701_v22 = vld [vmem:[#allocation9 + $0x250] sm:$0xff] }
 0x1dc   : > { %2237 = vmatpush1.bf16.msra.mxu0 %v13551_v28  ;;  %2319 = vmatpush1.bf16.msra.mxu1 %v13553_v31  ;;  %v13364_v28 = vcombine.high %v637_v17, %v641_v18  ;;  %v646_v31 = vld [vmem:[#allocation9 + $0x98] sm:$0xff] }
 0x1dd   : > { %2238 = vmatprep.subr.bf16.mxu0 %v13560_v32  ;;  %2320 = vmatprep.subr.bf16.mxu1 %v13562_v35  ;;  %v650_v32 = vld [vmem:[#allocation9 + $0xb8] sm:$0xff]  ;;  %v653_v35 = vld [vmem:[#allocation9 + $0xd0] sm:$0xff] }
 0x1de   : > { %v13374_v38 = vcombine.high %v646_v31, %v650_v32  ;;  %v13373_v41 = vcombine.low %v646_v31, %v650_v32  ;;  %v698_v18 = vld [vmem:[#allocation9 + $0x238] sm:$0xff]  ;;  %v709_v31 = vld [vmem:[#allocation9 + $0x290] sm:$0xff] }
 0x1df   : > { %v713_v32 = vld [vmem:[#allocation9 + $0x2b0] sm:$0xff] }
 0x1e0   : > { %2239 = vmatpush1.bf16.msra.mxu0 %v13559_v36  ;;  %2321 = vmatpush1.bf16.msra.mxu1 %v13561_v39  ;;  %v657_v36 = vld [vmem:[#allocation9 + $0xf0] sm:$0xff]  ;;  %v658_v39 = vld [vmem:[#allocation9 + $0xf8] sm:$0xff] }
 0x1e1   : > { %2240 = vmatprep.subr.bf16.mxu0 %v13568_v40  ;;  %2322 = vmatprep.subr.bf16.mxu1 %v13570_v43  ;;  %v13371_v40 = vcombine.low %v645_v26, %v649_v29  ;;  %v13380_v42 = vcombine.high %v653_v35, %v657_v36  ;;  %v661_v43 = vld [vmem:[#allocation9 + $0x110] sm:$0xff]  ;;  %v13382_v46 = vcombine.high %v654_v37, %v658_v39 }
 0x1e2   : > { %v13381_v49 = vcombine.low %v654_v37, %v658_v39  ;;  %v13436_v37 = vcombine.high %v709_v31, %v713_v32  ;;  %v721_v39 = vld [vmem:[#allocation9 + $0x2f0] sm:$0xff] }
 0x1e4   : > { %2241 = vmatpush1.bf16.msra.mxu0 %v13567_v44  ;;  %2323 = vmatpush1.bf16.msra.mxu1 %v13569_v47  ;;  %v665_v44 = vld [vmem:[#allocation9 + $0x130] sm:$0xff]  ;;  %v666_v47 = vld [vmem:[#allocation9 + $0x138] sm:$0xff] }
 0x1e5   : > { %2242 = vmatprep.subr.bf16.mxu0 %v13576_v48  ;;  %2324 = vmatprep.subr.bf16.mxu1 %v13578_v51  ;;  %v13379_v48 = vcombine.low %v653_v35, %v657_v36  ;;  %v13388_v50 = vcombine.high %v661_v43, %v665_v44  ;;  %v669_v51 = vld [vmem:[#allocation9 + $0x150] sm:$0xff]  ;;  %v13390_v54 = vcombine.high %v662_v45, %v666_v47 }
 0x1e8   : > { %2243 = vmatpush1.bf16.msra.mxu0 %v13575_v52  ;;  %2325 = vmatpush1.bf16.msra.mxu1 %v13577_v56  ;;  %v670_v52 = vld [vmem:[#allocation9 + $0x158] sm:$0xff]  ;;  %v13387_v56 = vcombine.low %v661_v43, %v665_v44  ;;  %v13435_v43 = vcombine.low %v709_v31, %v713_v32 }
 0x1e9   : > { %2244 = vmatprep.subr.bf16.mxu0 %v13584_v58  ;;  %2326 = vmatprep.subr.bf16.mxu1 %v13586_v61  ;;  %v13389_v58 = vcombine.low %v662_v45, %v666_v47  ;;  %v681_v61 = vld [vmem:[#allocation9 + $0x1b0] sm:$0xff]  ;;  %v13398_v63 = vcombine.high %v670_v52, %v674_v55 }
 0x1ea   : > { %v13404_v3 = vcombine.high %v677_v60, %v681_v61  ;;  %v729_v47 = vld [vmem:[#allocation9 + $0x330] sm:$0xff] }
 0x1ec   : > { %2245 = vmatpush1.bf16.msra.mxu0 %v13583_v62  ;;  %2327 = vmatpush1.bf16.msra.mxu1 %v13585_v1  ;;  %v678_v62 = vld [vmem:[#allocation9 + $0x198] sm:$0xff] }
 0x1ed   : > { %2246 = vmatprep.subr.bf16.mxu0 %v13592_v2  ;;  %2328 = vmatprep.subr.bf16.mxu1 %v13594_v5  ;;  %v13397_v2 = vcombine.low %v670_v52, %v674_v55  ;;  %v689_v5 = vld [vmem:[#allocation9 + $0x1f0] sm:$0xff]  ;;  %v13406_v7 = vcombine.high %v678_v62, %v682_v0 }
 0x1ee   : > { %v13412_v11 = vcombine.high %v685_v4, %v689_v5  ;;  %v737_v55 = vld [vmem:[#allocation9 + $0x370] sm:$0xff] }
 0x1f0   : > { %2247 = vmatpush1.bf16.msra.mxu0 %v13591_v6  ;;  %2329 = vmatpush1.bf16.msra.mxu1 %v13593_v9  ;;  %v686_v6 = vld [vmem:[#allocation9 + $0x1d8] sm:$0xff]  ;;  %v13403_v9 = vcombine.low %v677_v60, %v681_v61 }
 0x1f1   : > { %2248 = vmatprep.subr.bf16.mxu0 %v13600_v10  ;;  %2330 = vmatprep.subr.bf16.mxu1 %v13602_v14  ;;  %v13405_v10 = vcombine.low %v678_v62, %v682_v0  ;;  %v697_v14 = vld [vmem:[#allocation9 + $0x230] sm:$0xff]  ;;  %v13414_v17 = vcombine.high %v686_v6, %v690_v8 }
 0x1f2   : > { %v13420_v21 = vcombine.high %v693_v13, %v697_v14  ;;  %v745_v0 = vld [vmem:[#allocation9 + $0x3b0] sm:$0xff] }
 0x1f4   : > { %2249 = vmatpush1.bf16.msra.mxu0 %v13599_v16  ;;  %2331 = vmatpush1.bf16.msra.mxu1 %v13601_v19  ;;  %v694_v16 = vld [vmem:[#allocation9 + $0x218] sm:$0xff]  ;;  %v13411_v19 = vcombine.low %v685_v4, %v689_v5 }
 0x1f5   : > { %2341 = vmatprep.subr.bf16.mxu0 %v13356_v20  ;;  %2423 = vmatprep.subr.bf16.mxu1 %v13358_v23  ;;  %v13413_v20 = vcombine.low %v686_v6, %v690_v8  ;;  %v705_v23 = vld [vmem:[#allocation9 + $0x270] sm:$0xff]  ;;  %v13422_v26 = vcombine.high %v694_v16, %v698_v18  ;;  %v13421_v29 = vcombine.low %v694_v16, %v698_v18 }
 0x1f6   : > { %v13427_v35 = vcombine.low %v701_v22, %v705_v23  ;;  %v753_v8 = vld [vmem:[#allocation9 + $0x3f0] sm:$0xff] }
 0x1f7   : > { %2251 = vmatmul.mubr.bf16.vlgmr.msra.gmra.mrb[0].mxu0 %v17554_v24  ;;  %2333 = vmatmul.mubr.bf16.vlgmr.msra.gmra.mrb[0].mxu1 %v17554_v24  ;;  %v761_v18 = vld [vmem:[#allocation9 + $0x430] sm:$0xff] }
 0x1f8   : > { %2342 = vmatpush1.bf16.msra.mxu0 %v13355_v25  ;;  %2424 = vmatpush1.bf16.msra.mxu1 %v13357_v27  ;;  %v702_v25 = vld [vmem:[#allocation9 + $0x258] sm:$0xff] }
 0x1f9   : > { %2343 = vmatprep.subr.bf16.mxu0 %v13364_v28  ;;  %2425 = vmatprep.subr.bf16.mxu1 %v13366_v30  ;;  %v706_v27 = vld [vmem:[#allocation9 + $0x278] sm:$0xff]  ;;  %v13419_v28 = vcombine.low %v693_v13, %v697_v14  ;;  %v13428_v30 = vcombine.high %v701_v22, %v705_v23 }
 0x1fa   : > { %2373 = vmatprep.mubr.bf16.mxu0 %v17533_v57  ;;  %2455 = vmatprep.mubr.bf16.mxu1 %v17533_v57  ;;  %v673_v57 = vld [vmem:[#allocation9 + $0x170] sm:$0xff]  ;;  %v13429_v36 = vcombine.low %v702_v25, %v706_v27 }
 0x1fb   : > { %v13396_v59 = vcombine.high %v669_v51, %v673_v57  ;;  %v13395_v1 = vcombine.low %v669_v51, %v673_v57 }
 0x1fc   : > { %2344 = vmatpush1.bf16.msra.mxu0 %v13363_v33  ;;  %2426 = vmatpush1.bf16.msra.mxu1 %v13365_v15  ;;  %v710_v33 = vld [vmem:[#allocation9 + $0x298] sm:$0xff]  ;;  %v13430_v15 = vcombine.high %v702_v25, %v706_v27  ;;  %v769_v27 = vld [vmem:[#allocation9 + $0x470] sm:$0xff] }
 0x1fd   : > { %2345 = vmatprep.subr.bf16.mxu0 %v13372_v34  ;;  %2427 = vmatprep.subr.bf16.mxu1 %v13374_v38  ;;  %v714_v34 = vld [vmem:[#allocation9 + $0x2b8] sm:$0xff]  ;;  %v717_v38 = vld [vmem:[#allocation9 + $0x2d0] sm:$0xff] }
 0x1fe   : > { %v13437_v44 = vcombine.low %v710_v33, %v714_v34  ;;  %v13444_v45 = vcombine.high %v717_v38, %v721_v39  ;;  %v13443_v51 = vcombine.low %v717_v38, %v721_v39 }
 0x200   : > { %2346 = vmatpush1.bf16.msra.mxu0 %v13371_v40  ;;  %2428 = vmatpush1.bf16.msra.mxu1 %v13373_v41  ;;  %v718_v40 = vld [vmem:[#allocation9 + $0x2d8] sm:$0xff]  ;;  %v13438_v41 = vcombine.high %v710_v33, %v714_v34  ;;  %v777_v34 = vld [vmem:[#allocation9 + $0x4b0] sm:$0xff] }
 0x201   : > { %2347 = vmatprep.subr.bf16.mxu0 %v13380_v42  ;;  %2429 = vmatprep.subr.bf16.mxu1 %v13382_v46  ;;  %v722_v42 = vld [vmem:[#allocation9 + $0x2f8] sm:$0xff]  ;;  %v725_v46 = vld [vmem:[#allocation9 + $0x310] sm:$0xff] }
 0x202   : > { %v13445_v57 = vcombine.low %v718_v40, %v722_v42  ;;  %v13452_v52 = vcombine.high %v725_v46, %v729_v47  ;;  %v13451_v60 = vcombine.low %v725_v46, %v729_v47 }
 0x204   : > { %2348 = vmatpush1.bf16.msra.mxu0 %v13379_v48  ;;  %2430 = vmatpush1.bf16.msra.mxu1 %v13381_v49  ;;  %v726_v48 = vld [vmem:[#allocation9 + $0x318] sm:$0xff]  ;;  %v13446_v49 = vcombine.high %v718_v40, %v722_v42  ;;  %v785_v42 = vld [vmem:[#allocation9 + $0x4f0] sm:$0xff] }
 0x205   : > { %2349 = vmatprep.subr.bf16.mxu0 %v13388_v50  ;;  %2431 = vmatprep.subr.bf16.mxu1 %v13390_v54  ;;  %v730_v50 = vld [vmem:[#allocation9 + $0x338] sm:$0xff]  ;;  %v733_v54 = vld [vmem:[#allocation9 + $0x350] sm:$0xff] }
 0x206   : > { %v13453_v61 = vcombine.low %v726_v48, %v730_v50  ;;  %v13460_v62 = vcombine.high %v733_v54, %v737_v55  ;;  %v13459_v4 = vcombine.low %v733_v54, %v737_v55 }
 0x208   : > { %2350 = vmatpush1.bf16.msra.mxu0 %v13387_v56  ;;  %2432 = vmatpush1.bf16.msra.mxu1 %v13389_v58  ;;  %v734_v56 = vld [vmem:[#allocation9 + $0x358] sm:$0xff]  ;;  %v13454_v58 = vcombine.high %v726_v48, %v730_v50  ;;  %v789_v48 = vld [vmem:[#allocation9 + $0x510] sm:$0xff] }
 0x209   : > { %2351 = vmatprep.subr.bf16.mxu0 %v13396_v59  ;;  %2433 = vmatprep.subr.bf16.mxu1 %v13398_v63  ;;  %v738_v59 = vld [vmem:[#allocation9 + $0x378] sm:$0xff]  ;;  %v741_v63 = vld [vmem:[#allocation9 + $0x390] sm:$0xff] }
 0x20a   : > { %v13461_v5 = vcombine.low %v734_v56, %v738_v59  ;;  %v13468_v6 = vcombine.high %v741_v63, %v745_v0  ;;  %v13467_v13 = vcombine.low %v741_v63, %v745_v0  ;;  %v790_v50 = vld [vmem:[#allocation9 + $0x518] sm:$0xff]  ;;  %v805_v0 = vld [vmem:[#allocation9 + $0x590] sm:$0xff] }
 0x20c   : > { %2352 = vmatpush1.bf16.msra.mxu0 %v13395_v1  ;;  %2434 = vmatpush1.bf16.msra.mxu1 %v13397_v2  ;;  %v742_v1 = vld [vmem:[#allocation9 + $0x398] sm:$0xff]  ;;  %v13462_v2 = vcombine.high %v734_v56, %v738_v59  ;;  %v797_v56 = vld [vmem:[#allocation9 + $0x550] sm:$0xff] }
 0x20d   : > { %2353 = vmatprep.subr.bf16.mxu0 %v13404_v3  ;;  %2435 = vmatprep.subr.bf16.mxu1 %v13406_v7  ;;  %v746_v3 = vld [vmem:[#allocation9 + $0x3b8] sm:$0xff]  ;;  %v749_v7 = vld [vmem:[#allocation9 + $0x3d0] sm:$0xff] }
 0x20e   : > { %v13469_v14 = vcombine.low %v742_v1, %v746_v3  ;;  %v13476_v16 = vcombine.high %v749_v7, %v753_v8  ;;  %v13475_v22 = vcombine.low %v749_v7, %v753_v8 }
 0x210   : > { %2354 = vmatpush1.bf16.msra.mxu0 %v13403_v9  ;;  %2436 = vmatpush1.bf16.msra.mxu1 %v13405_v10  ;;  %v750_v9 = vld [vmem:[#allocation9 + $0x3d8] sm:$0xff]  ;;  %v13470_v10 = vcombine.high %v742_v1, %v746_v3  ;;  %v809_v1 = vld [vmem:[#allocation9 + $0x5b0] sm:$0xff] }
 0x211   : > { %2355 = vmatprep.subr.bf16.mxu0 %v13412_v11  ;;  %2437 = vmatprep.subr.bf16.mxu1 %v13414_v17  ;;  %v754_v11 = vld [vmem:[#allocation9 + $0x3f8] sm:$0xff]  ;;  %v757_v17 = vld [vmem:[#allocation9 + $0x410] sm:$0xff]  ;;  %v13532_v8 = vcombine.high %v805_v0, %v809_v1 }
 0x212   : > { %v13477_v23 = vcombine.low %v750_v9, %v754_v11  ;;  %v13484_v25 = vcombine.high %v757_v17, %v761_v18  ;;  %v13483_v31 = vcombine.low %v757_v17, %v761_v18  ;;  %v821_v18 = vld [vmem:[#allocation9 + $0x610] sm:$0xff] }
 0x214   : > { %2356 = vmatpush1.bf16.msra.mxu0 %v13411_v19  ;;  %2438 = vmatpush1.bf16.msra.mxu1 %v13413_v20  ;;  %v758_v19 = vld [vmem:[#allocation9 + $0x418] sm:$0xff]  ;;  %v13478_v20 = vcombine.high %v750_v9, %v754_v11  ;;  %v817_v9 = vld [vmem:[#allocation9 + $0x5f0] sm:$0xff] }
 0x215   : > { %2357 = vmatprep.subr.bf16.mxu0 %v13420_v21  ;;  %2439 = vmatprep.subr.bf16.mxu1 %v13422_v26  ;;  %v762_v21 = vld [vmem:[#allocation9 + $0x438] sm:$0xff]  ;;  %v765_v26 = vld [vmem:[#allocation9 + $0x450] sm:$0xff] }
 0x216   : > { %v13485_v32 = vcombine.low %v758_v19, %v762_v21  ;;  %v13492_v33 = vcombine.high %v765_v26, %v769_v27  ;;  %v13491_v38 = vcombine.low %v765_v26, %v769_v27  ;;  %v814_v11 = vld [vmem:[#allocation9 + $0x5d8] sm:$0xff]  ;;  %v829_v27 = vld [vmem:[#allocation9 + $0x650] sm:$0xff] }
 0x218   : > { %2358 = vmatpush1.bf16.msra.mxu0 %v13419_v28  ;;  %2440 = vmatpush1.bf16.msra.mxu1 %v13421_v29  ;;  %v766_v28 = vld [vmem:[#allocation9 + $0x458] sm:$0xff]  ;;  %v13486_v29 = vcombine.high %v758_v19, %v762_v21 }
 0x219   : > { %2359 = vmatprep.subr.bf16.mxu0 %v13428_v30  ;;  %2441 = vmatprep.subr.bf16.mxu1 %v13430_v15  ;;  %v770_v30 = vld [vmem:[#allocation9 + $0x478] sm:$0xff]  ;;  %v773_v15 = vld [vmem:[#allocation9 + $0x490] sm:$0xff] }
 0x21a   : > { %v13493_v39 = vcombine.low %v766_v28, %v770_v30  ;;  %v13500_v40 = vcombine.high %v773_v15, %v777_v34  ;;  %v13499_v46 = vcombine.low %v773_v15, %v777_v34  ;;  %v822_v21 = vld [vmem:[#allocation9 + $0x618] sm:$0xff]  ;;  %v837_v34 = vld [vmem:[#allocation9 + $0x690] sm:$0xff] }
 0x21c   : > { %2360 = vmatpush1.bf16.msra.mxu0 %v13427_v35  ;;  %2442 = vmatpush1.bf16.msra.mxu1 %v13429_v36  ;;  %v774_v35 = vld [vmem:[#allocation9 + $0x498] sm:$0xff]  ;;  %v13494_v36 = vcombine.high %v766_v28, %v770_v30  ;;  %v833_v28 = vld [vmem:[#allocation9 + $0x670] sm:$0xff] }
 0x21d   : > { %2361 = vmatprep.subr.bf16.mxu0 %v13436_v37  ;;  %2443 = vmatprep.subr.bf16.mxu1 %v13438_v41  ;;  %v778_v37 = vld [vmem:[#allocation9 + $0x4b8] sm:$0xff]  ;;  %v781_v41 = vld [vmem:[#allocation9 + $0x4d0] sm:$0xff]  ;;  %v13556_v15 = vcombine.high %v829_v27, %v833_v28 }
 0x21e   : > { %v13508_v47 = vcombine.high %v781_v41, %v785_v42 }
 0x220   : > { %2362 = vmatpush1.bf16.msra.mxu0 %v13435_v43  ;;  %2444 = vmatpush1.bf16.msra.mxu1 %v13437_v44  ;;  %v782_v43 = vld [vmem:[#allocation9 + $0x4d8] sm:$0xff]  ;;  %v13502_v44 = vcombine.high %v774_v35, %v778_v37 }
 0x221   : > { %2363 = vmatprep.subr.bf16.mxu0 %v13444_v45  ;;  %2445 = vmatprep.subr.bf16.mxu1 %v13446_v49  ;;  %v786_v45 = vld [vmem:[#allocation9 + $0x4f8] sm:$0xff]  ;;  %v793_v49 = vld [vmem:[#allocation9 + $0x530] sm:$0xff] }
 0x222   : > { %v13509_v54 = vcombine.low %v782_v43, %v786_v45  ;;  %v13516_v55 = vcombine.high %v789_v48, %v793_v49 }
 0x224   : > { %2364 = vmatpush1.bf16.msra.mxu0 %v13443_v51  ;;  %2446 = vmatpush1.bf16.msra.mxu1 %v13445_v57  ;;  %v13510_v51 = vcombine.high %v782_v43, %v786_v45  ;;  %v794_v57 = vld [vmem:[#allocation9 + $0x538] sm:$0xff]  ;;  %v849_v43 = vld [vmem:[#allocation9 + $0x6f0] sm:$0xff] }
 0x225   : > { %2365 = vmatprep.subr.bf16.mxu0 %v13452_v52  ;;  %2447 = vmatprep.subr.bf16.mxu1 %v13454_v58  ;;  %v13507_v52 = vcombine.low %v781_v41, %v785_v42  ;;  %v798_v58 = vld [vmem:[#allocation9 + $0x558] sm:$0xff]  ;;  %v13518_v59 = vcombine.high %v790_v50, %v794_v57  ;;  %v845_v42 = vld [vmem:[#allocation9 + $0x6d0] sm:$0xff] }
 0x228   : > { %2366 = vmatpush1.bf16.msra.mxu0 %v13451_v60  ;;  %2448 = vmatpush1.bf16.msra.mxu1 %v13453_v61  ;;  %v802_v60 = vld [vmem:[#allocation9 + $0x578] sm:$0xff]  ;;  %v13515_v61 = vcombine.low %v789_v48, %v793_v49  ;;  %v13572_v48 = vcombine.high %v845_v42, %v849_v43  ;;  %v853_v49 = vld [vmem:[#allocation9 + $0x710] sm:$0xff] }
 0x229   : > { %2367 = vmatprep.subr.bf16.mxu0 %v13460_v62  ;;  %2449 = vmatprep.subr.bf16.mxu1 %v13462_v2  ;;  %v13517_v62 = vcombine.low %v790_v50, %v794_v57  ;;  %v806_v2 = vld [vmem:[#allocation9 + $0x598] sm:$0xff]  ;;  %v13526_v3 = vcombine.high %v798_v58, %v802_v60  ;;  %v13525_v7 = vcombine.low %v798_v58, %v802_v60  ;;  %v857_v50 = vld [vmem:[#allocation9 + $0x730] sm:$0xff] }
 0x22a   : > { %v865_v58 = vld [vmem:[#allocation9 + $0x770] sm:$0xff] }
 0x22c   : > { %2368 = vmatpush1.bf16.msra.mxu0 %v13459_v4  ;;  %2450 = vmatpush1.bf16.msra.mxu1 %v13461_v5  ;;  %v810_v4 = vld [vmem:[#allocation9 + $0x5b8] sm:$0xff] }
 0x22d   : > { %2369 = vmatprep.subr.bf16.mxu0 %v13468_v6  ;;  %2451 = vmatprep.subr.bf16.mxu1 %v13470_v10  ;;  %v813_v6 = vld [vmem:[#allocation9 + $0x5d0] sm:$0xff]  ;;  %v13534_v10 = vcombine.high %v806_v2, %v810_v4 }
 0x22e   : > { %v13540_v17 = vcombine.high %v813_v6, %v817_v9 }
 0x230   : > { %2370 = vmatpush1.bf16.msra.mxu0 %v13467_v13  ;;  %2452 = vmatpush1.bf16.msra.mxu1 %v13469_v14  ;;  %v818_v13 = vld [vmem:[#allocation9 + $0x5f8] sm:$0xff]  ;;  %v13531_v14 = vcombine.low %v805_v0, %v809_v1  ;;  %v869_v1 = vld [vmem:[#allocation9 + $0x790] sm:$0xff] }
 0x231   : > { %2371 = vmatprep.subr.bf16.mxu0 %v13476_v16  ;;  %2453 = vmatprep.subr.bf16.mxu1 %v13478_v20  ;;  %v13533_v16 = vcombine.low %v806_v2, %v810_v4  ;;  %v13542_v19 = vcombine.high %v814_v11, %v818_v13  ;;  %v825_v20 = vld [vmem:[#allocation9 + $0x630] sm:$0xff] }
 0x232   : > { %v13548_v26 = vcombine.high %v821_v18, %v825_v20  ;;  %v873_v2 = vld [vmem:[#allocation9 + $0x7b0] sm:$0xff] }
 0x234   : > { %2372 = vmatpush1.bf16.msra.mxu0 %v13475_v22  ;;  %2454 = vmatpush1.bf16.msra.mxu1 %v13477_v23  ;;  %v826_v22 = vld [vmem:[#allocation9 + $0x638] sm:$0xff]  ;;  %v13539_v23 = vcombine.low %v813_v6, %v817_v9  ;;  %v877_v9 = vld [vmem:[#allocation9 + $0x7d0] sm:$0xff] }
 0x235   : > { %2382 = vmatprep.subr.bf16.mxu0 %v13484_v25  ;;  %2464 = vmatprep.subr.bf16.mxu1 %v13486_v29  ;;  %v13541_v25 = vcombine.low %v814_v11, %v818_v13  ;;  %v830_v29 = vld [vmem:[#allocation9 + $0x658] sm:$0xff]  ;;  %v13550_v30 = vcombine.high %v822_v21, %v826_v22 }
 0x236   : > { %v878_v11 = vld [vmem:[#allocation9 + $0x7d8] sm:$0xff] }
 0x237   : > { %2374 = vmatmul.mubr.bf16.vlgmr.msra.gmra.mrb[4].mxu0 %v17539_v12  ;;  %2456 = vmatmul.mubr.bf16.vlgmr.msra.gmra.mrb[4].mxu1 %v17539_v12  ;;  %v13501_v12 = vcombine.low %v774_v35, %v778_v37  ;;  %v841_v35 = vld [vmem:[#allocation9 + $0x6b0] sm:$0xff] }
 0x238   : > { %2383 = vmatpush1.bf16.msra.mxu0 %v13483_v31  ;;  %2465 = vmatpush1.bf16.msra.mxu1 %v13485_v32  ;;  %v834_v31 = vld [vmem:[#allocation9 + $0x678] sm:$0xff]  ;;  %v13547_v32 = vcombine.low %v821_v18, %v825_v20  ;;  %v13564_v41 = vcombine.high %v837_v34, %v841_v35 }
 0x239   : > { %2384 = vmatprep.subr.bf16.mxu0 %v13492_v33  ;;  %2466 = vmatprep.subr.bf16.mxu1 %v13494_v36  ;;  %v13549_v33 = vcombine.low %v822_v21, %v826_v22  ;;  %v838_v36 = vld [vmem:[#allocation9 + $0x698] sm:$0xff]  ;;  %v13558_v37 = vcombine.high %v830_v29, %v834_v31  ;;  %v15376_v22 = vld [vmem:[#allocation8 + $0x4] ss:$16 sps:$4 sm:$0xff]  }
 0x23a   : > { %2414 = vmatprep.mubr.bf16.mxu0 %v17546_v53  ;;  %2496 = vmatprep.mubr.bf16.mxu1 %v17546_v53  ;;  %v801_v53 = vld [vmem:[#allocation9 + $0x570] sm:$0xff] }
 0x23b   : > { %v13524_v63 = vcombine.high %v797_v56, %v801_v53  ;;  %v13523_v5 = vcombine.low %v797_v56, %v801_v53  ;;  %v13580_v56 = vcombine.high %v853_v49, %v857_v50  ;;  %v861_v53 = vld [vmem:[#allocation9 + $0x750] sm:$0xff] }
 0x23c   : > { %2385 = vmatpush1.bf16.msra.mxu0 %v13491_v38  ;;  %2467 = vmatpush1.bf16.msra.mxu1 %v13493_v39  ;;  %v842_v38 = vld [vmem:[#allocation9 + $0x6b8] sm:$0xff]  ;;  %v13555_v39 = vcombine.low %v829_v27, %v833_v28  ;;  %v13588_v0 = vcombine.high %v861_v53, %v865_v58  ;;  %v13587_v6 = vcombine.low %v861_v53, %v865_v58  ;;  %v15382_v28 = vld [vmem:[#allocation8 + $0x24] ss:$16 sps:$4 sm:$0xff]  }
 0x23d   : > { %2386 = vmatprep.subr.bf16.mxu0 %v13500_v40  ;;  %2468 = vmatprep.subr.bf16.mxu1 %v13502_v44  ;;  %v13557_v40 = vcombine.low %v830_v29, %v834_v31  ;;  %v846_v44 = vld [vmem:[#allocation9 + $0x6d8] sm:$0xff]  ;;  %v13566_v45 = vcombine.high %v838_v36, %v842_v38  ;;  %v15430_v58 = vld [vmem:[#allocation8 + $0x124] ss:$16 sps:$4 sm:$0xff]  }
 0x23e   : > { %v15377_v27 = vld [vmem:[#allocation8 + $0x8] ss:$16 sps:$4 sm:$0xff]   ;;  %v15385_v29 = vld [vmem:[#allocation8 + $0x2c] ss:$16 sps:$4 sm:$0xff]  }
 0x23f   : > { %v15425_v53 = vld [vmem:[#allocation8 + $0x108] ss:$16 sps:$4 sm:$0xff]  }
 0x240   : > { %2387 = vmatpush1.bf16.msra.mxu0 %v13499_v46  ;;  %2469 = vmatpush1.bf16.msra.mxu1 %v13501_v12  ;;  %v850_v46 = vld [vmem:[#allocation9 + $0x6f8] sm:$0xff]  ;;  %v13563_v12 = vcombine.low %v837_v34, %v841_v35  ;;  %v15386_v34 = vld [vmem:[#allocation8 + $0x40] ss:$16 sps:$4 sm:$0xff]  }
 0x241   : > { %2388 = vmatprep.subr.bf16.mxu0 %v13508_v47  ;;  %2470 = vmatprep.subr.bf16.mxu1 %v13510_v51  ;;  %v13565_v47 = vcombine.low %v838_v36, %v842_v38  ;;  %v854_v51 = vld [vmem:[#allocation9 + $0x718] sm:$0xff]  ;;  %v13574_v57 = vcombine.high %v846_v44, %v850_v46  ;;  %v15394_v36 = vld [vmem:[#allocation8 + $0x64] ss:$16 sps:$4 sm:$0xff]   ;;  %v15392_v38 = vld [vmem:[#allocation8 + $0x60] ss:$16 sps:$4 sm:$0xff]  }
 0x242   : > { %v15389_v35 = vld [vmem:[#allocation8 + $0x48] ss:$16 sps:$4 sm:$0xff]  }
 0x244   : > { %2389 = vmatpush1.bf16.msra.mxu0 %v13507_v52  ;;  %2471 = vmatpush1.bf16.msra.mxu1 %v13509_v54  ;;  %v858_v52 = vld [vmem:[#allocation9 + $0x738] sm:$0xff]  ;;  %v13571_v54 = vcombine.low %v845_v42, %v849_v43  ;;  %v15406_v43 = vld [vmem:[#allocation8 + $0xa4] ss:$16 sps:$4 sm:$0xff]  }
 0x245   : > { %2390 = vmatprep.subr.bf16.mxu0 %v13516_v55  ;;  %2472 = vmatprep.subr.bf16.mxu1 %v13518_v59  ;;  %v13573_v55 = vcombine.low %v846_v44, %v850_v46  ;;  %v862_v59 = vld [vmem:[#allocation9 + $0x758] sm:$0xff]  ;;  %v13582_v60 = vcombine.high %v854_v51, %v858_v52 }
 0x246   : > { %v15401_v42 = vld [vmem:[#allocation8 + $0x88] ss:$16 sps:$4 sm:$0xff]   ;;  %v15409_v44 = vld [vmem:[#allocation8 + $0xac] ss:$16 sps:$4 sm:$0xff]  }
 0x247   : > { %v15407_v46 = vld [vmem:[#allocation8 + $0xa8] ss:$16 sps:$4 sm:$0xff]  }
 0x248   : > { %2391 = vmatpush1.bf16.msra.mxu0 %v13515_v61  ;;  %2473 = vmatpush1.bf16.msra.mxu1 %v13517_v62  ;;  %v866_v61 = vld [vmem:[#allocation9 + $0x778] sm:$0xff]  ;;  %v13579_v62 = vcombine.low %v853_v49, %v857_v50  ;;  %v15418_v50 = vld [vmem:[#allocation8 + $0xe4] ss:$16 sps:$4 sm:$0xff]  }
 0x249   : > { %2392 = vmatprep.subr.bf16.mxu0 %v13524_v63  ;;  %2474 = vmatprep.subr.bf16.mxu1 %v13526_v3  ;;  %v13581_v63 = vcombine.low %v854_v51, %v858_v52  ;;  %v870_v3 = vld [vmem:[#allocation9 + $0x798] sm:$0xff]  ;;  %v13590_v4 = vcombine.high %v862_v59, %v866_v61 }
 0x24a   : > { %v15413_v49 = vld [vmem:[#allocation8 + $0xc8] ss:$16 sps:$4 sm:$0xff]   ;;  %v15421_v51 = vld [vmem:[#allocation8 + $0xec] ss:$16 sps:$4 sm:$0xff]  }
 0x24b   : > { %v15419_v52 = vld [vmem:[#allocation8 + $0xe8] ss:$16 sps:$4 sm:$0xff]  }
 0x24c   : > { %2393 = vmatpush1.bf16.msra.mxu0 %v13523_v5  ;;  %2475 = vmatpush1.bf16.msra.mxu1 %v13525_v7  ;;  %v874_v5 = vld [vmem:[#allocation9 + $0x7b8] sm:$0xff]  ;;  %v13589_v7 = vcombine.low %v862_v59, %v866_v61 }
 0x24d   : > { %2394 = vmatprep.subr.bf16.mxu0 %v13532_v8  ;;  %2476 = vmatprep.subr.bf16.mxu1 %v13534_v10  ;;  %v13596_v8 = vcombine.high %v869_v1, %v873_v2  ;;  %v881_v10 = vld [vmem:[#allocation9 + $0x7f0] sm:$0xff]  ;;  %v13598_v13 = vcombine.high %v870_v3, %v874_v5  ;;  %v15433_v59 = vld [vmem:[#allocation8 + $0x12c] ss:$16 sps:$4 sm:$0xff]   ;;  %v15431_v61 = vld [vmem:[#allocation8 + $0x128] ss:$16 sps:$4 sm:$0xff]  }
 0x24e   : > { %v13604_v18 = vcombine.high %v877_v9, %v881_v10  ;;  %v13603_v20 = vcombine.low %v877_v9, %v881_v10  ;;  %v15449_v9 = vld [vmem:[#allocation8 + $0x188] ss:$16 sps:$4 sm:$0xff]   ;;  %v15454_v10 = vld [vmem:[#allocation8 + $0x1a4] ss:$16 sps:$4 sm:$0xff]  }
 0x250   : > { %2395 = vmatpush1.bf16.msra.mxu0 %v13531_v14  ;;  %2477 = vmatpush1.bf16.msra.mxu1 %v13533_v16  ;;  %v882_v14 = vld [vmem:[#allocation9 + $0x7f8] sm:$0xff]  ;;  %v13595_v16 = vcombine.low %v869_v1, %v873_v2  ;;  %v15442_v2 = vld [vmem:[#allocation8 + $0x164] ss:$16 sps:$4 sm:$0xff]  }
 0x251   : > { %2396 = vmatprep.subr.bf16.mxu0 %v13540_v17  ;;  %2478 = vmatprep.subr.bf16.mxu1 %v13542_v19  ;;  %v13597_v17 = vcombine.low %v870_v3, %v874_v5  ;;  %v13606_v19 = vcombine.high %v878_v11, %v882_v14  ;;  %v13605_v21 = vcombine.low %v878_v11, %v882_v14  ;;  %v15437_v1 = vld [vmem:[#allocation8 + $0x148] ss:$16 sps:$4 sm:$0xff]   ;;  %v15445_v3 = vld [vmem:[#allocation8 + $0x16c] ss:$16 sps:$4 sm:$0xff]  }
 0x252   : > { %v15443_v5 = vld [vmem:[#allocation8 + $0x168] ss:$16 sps:$4 sm:$0xff]   ;;  %v15457_v11 = vld [vmem:[#allocation8 + $0x1ac] ss:$16 sps:$4 sm:$0xff]  }
 0x253   : > { %v15455_v14 = vld [vmem:[#allocation8 + $0x1a8] ss:$16 sps:$4 sm:$0xff]  }
 0x254   : > { %2397 = vmatpush1.bf16.msra.mxu0 %v13539_v23  ;;  %2479 = vmatpush1.bf16.msra.mxu1 %v13541_v25  ;;  %v15379_v23 = vld [vmem:[#allocation8 + $0xc] ss:$16 sps:$4 sm:$0xff]   ;;  %v15374_v25 = vld [vmem:[#allocation8] ss:$16 sps:$4 sm:$0xff]  }
 0x255   : > { %2398 = vmatprep.subr.bf16.mxu0 %v13548_v26  ;;  %2480 = vmatprep.subr.bf16.mxu1 %v13550_v30  ;;  %v17565_v26 = vld [vmem:[%s17494_s29] sm:$0xff] }
 0x256   : > { %v15380_v30 = vld [vmem:[#allocation8 + $0x20] ss:$16 sps:$4 sm:$0xff]   ;;  %v13612_v31 = vcombine.high %v17565_v26, %v17565_v26 }
 0x258   : > { %2399 = vmatpush1.bf16.msra.mxu0 %v13547_v32  ;;  %2481 = vmatpush1.bf16.msra.mxu1 %v13549_v33  ;;  %v15383_v32 = vld [vmem:[#allocation8 + $0x28] ss:$16 sps:$4 sm:$0xff]   ;;  %v15388_v33 = vld [vmem:[#allocation8 + $0x44] ss:$16 sps:$4 sm:$0xff]  }
 0x259   : > { %2400 = vmatprep.subr.bf16.mxu0 %v13556_v15  ;;  %2482 = vmatprep.subr.bf16.mxu1 %v13558_v37  ;;  %v15391_v15 = vld [vmem:[#allocation8 + $0x4c] ss:$16 sps:$4 sm:$0xff]  }
 0x25a   : > { %v15397_v37 = vld [vmem:[#allocation8 + $0x6c] ss:$16 sps:$4 sm:$0xff]  }
 0x25c   : > { %2401 = vmatpush1.bf16.msra.mxu0 %v13555_v39  ;;  %2483 = vmatpush1.bf16.msra.mxu1 %v13557_v40  ;;  %v15395_v39 = vld [vmem:[#allocation8 + $0x68] ss:$16 sps:$4 sm:$0xff]   ;;  %v15400_v40 = vld [vmem:[#allocation8 + $0x84] ss:$16 sps:$4 sm:$0xff]  }
 0x25d   : > { %2402 = vmatprep.subr.bf16.mxu0 %v13564_v41  ;;  %2484 = vmatprep.subr.bf16.mxu1 %v13566_v45  ;;  %v15398_v41 = vld [vmem:[#allocation8 + $0x80] ss:$16 sps:$4 sm:$0xff]  }
 0x25e   : > { %v15404_v45 = vld [vmem:[#allocation8 + $0xa0] ss:$16 sps:$4 sm:$0xff]  }
 0x260   : > { %2403 = vmatpush1.bf16.msra.mxu0 %v13563_v12  ;;  %2485 = vmatpush1.bf16.msra.mxu1 %v13565_v47  ;;  %v15412_v12 = vld [vmem:[#allocation8 + $0xc4] ss:$16 sps:$4 sm:$0xff]   ;;  %v15415_v47 = vld [vmem:[#allocation8 + $0xcc] ss:$16 sps:$4 sm:$0xff]  }
 0x261   : > { %2404 = vmatprep.subr.bf16.mxu0 %v13572_v48  ;;  %2486 = vmatprep.subr.bf16.mxu1 %v13574_v57  ;;  %v15410_v48 = vld [vmem:[#allocation8 + $0xc0] ss:$16 sps:$4 sm:$0xff]  }
 0x262   : > { %v15416_v57 = vld [vmem:[#allocation8 + $0xe0] ss:$16 sps:$4 sm:$0xff]  }
 0x264   : > { %2405 = vmatpush1.bf16.msra.mxu0 %v13571_v54  ;;  %2487 = vmatpush1.bf16.msra.mxu1 %v13573_v55  ;;  %v15424_v54 = vld [vmem:[#allocation8 + $0x104] ss:$16 sps:$4 sm:$0xff]   ;;  %v15427_v55 = vld [vmem:[#allocation8 + $0x10c] ss:$16 sps:$4 sm:$0xff]  }
 0x265   : > { %2406 = vmatprep.subr.bf16.mxu0 %v13580_v56  ;;  %2488 = vmatprep.subr.bf16.mxu1 %v13582_v60  ;;  %v15422_v56 = vld [vmem:[#allocation8 + $0x100] ss:$16 sps:$4 sm:$0xff]  }
 0x266   : > { %v15428_v60 = vld [vmem:[#allocation8 + $0x120] ss:$16 sps:$4 sm:$0xff]  }
 0x268   : > { %2407 = vmatpush1.bf16.msra.mxu0 %v13579_v62  ;;  %2489 = vmatpush1.bf16.msra.mxu1 %v13581_v63  ;;  %v15436_v62 = vld [vmem:[#allocation8 + $0x144] ss:$16 sps:$4 sm:$0xff]   ;;  %v15439_v63 = vld [vmem:[#allocation8 + $0x14c] ss:$16 sps:$4 sm:$0xff]  }
 0x269   : > { %2408 = vmatprep.subr.bf16.mxu0 %v13588_v0  ;;  %2490 = vmatprep.subr.bf16.mxu1 %v13590_v4  ;;  %v15434_v0 = vld [vmem:[#allocation8 + $0x140] ss:$16 sps:$4 sm:$0xff]  }
 0x26a   : > { %v15440_v4 = vld [vmem:[#allocation8 + $0x160] ss:$16 sps:$4 sm:$0xff]  }
 0x26c   : > { %2409 = vmatpush1.bf16.msra.mxu0 %v13587_v6  ;;  %2491 = vmatpush1.bf16.msra.mxu1 %v13589_v7  ;;  %v15448_v6 = vld [vmem:[#allocation8 + $0x184] ss:$16 sps:$4 sm:$0xff]   ;;  %v15451_v7 = vld [vmem:[#allocation8 + $0x18c] ss:$16 sps:$4 sm:$0xff]  }
 0x26d   : > { %2410 = vmatprep.subr.bf16.mxu0 %v13596_v8  ;;  %2492 = vmatprep.subr.bf16.mxu1 %v13598_v13  ;;  %v15446_v8 = vld [vmem:[#allocation8 + $0x180] ss:$16 sps:$4 sm:$0xff]  }
 0x26e   : > { %v15452_v13 = vld [vmem:[#allocation8 + $0x1a0] ss:$16 sps:$4 sm:$0xff]  }
 0x270   : > { %2411 = vmatpush1.bf16.msra.mxu0 %v13595_v16  ;;  %2493 = vmatpush1.bf16.msra.mxu1 %v13597_v17  ;;  %v15460_v16 = vld [vmem:[#allocation8 + $0x1c4] ss:$16 sps:$4 sm:$0xff]   ;;  %v15463_v17 = vld [vmem:[#allocation8 + $0x1cc] ss:$16 sps:$4 sm:$0xff]  }
 0x271   : > { %2412 = vmatprep.subr.bf16.mxu0 %v13604_v18  ;;  %2494 = vmatprep.subr.bf16.mxu1 %v13606_v19  ;;  %v15458_v18 = vld [vmem:[#allocation8 + $0x1c0] ss:$16 sps:$4 sm:$0xff]   ;;  %v15461_v19 = vld [vmem:[#allocation8 + $0x1c8] ss:$16 sps:$4 sm:$0xff]  }
 0x274   : > { %2413 = vmatpush1.bf16.msra.mxu0 %v13603_v20  ;;  %2495 = vmatpush1.bf16.msra.mxu1 %v13605_v21  ;;  %v15466_v20 = vld [vmem:[#allocation8 + $0x1e4] ss:$16 sps:$4 sm:$0xff]   ;;  %v15469_v21 = vld [vmem:[#allocation8 + $0x1ec] ss:$16 sps:$4 sm:$0xff]  }
 0x275   : > { %3330 = vmatprep.subr.bf16.mxu0 %v15376_v22  ;;  %3412 = vmatprep.subr.bf16.mxu1 %v15379_v23  ;;  %v15464_v22 = vld [vmem:[#allocation8 + $0x1e0] ss:$16 sps:$4 sm:$0xff]   ;;  %v15467_v23 = vld [vmem:[#allocation8 + $0x1e8] ss:$16 sps:$4 sm:$0xff]  }
 0x277   : > { %2415 = vmatmul.mubr.bf16.vlgmr.msra.gmra.mrb[4].mxu0 %v17554_v24  ;;  %2497 = vmatmul.mubr.bf16.vlgmr.msra.gmra.mrb[4].mxu1 %v17554_v24  ;;  %v15403_v24 = vld [vmem:[#allocation8 + $0x8c] ss:$16 sps:$4 sm:$0xff]  }
 0x278   : > { %3331 = vmatpush1.bf16.msra.mxu0 %v15374_v25  ;;  %3413 = vmatpush1.bf16.msra.mxu1 %v15377_v27  ;;  %v15473_v25 = vld [vmem:[#allocation8 + $0x204] ss:$16 sps:$4 sm:$0xff]   ;;  %v15476_v27 = vld [vmem:[#allocation8 + $0x20c] ss:$16 sps:$4 sm:$0xff]  }
 0x279   : > { %3332 = vmatprep.subr.bf16.mxu0 %v15382_v28  ;;  %3414 = vmatprep.subr.bf16.mxu1 %v15385_v29  ;;  %v17572_v28 = vld [vmem:[%s17494_s29 + $0x8] sm:$0xff]  ;;  %v15471_v29 = vld [vmem:[#allocation8 + $0x200] ss:$16 sps:$4 sm:$0xff]  }
 0x27a   : > { %3362 = vmatprep.mubr.bf16.mxu0 %v13612_v31  ;;  %3444 = vmatprep.mubr.bf16.mxu1 %v13612_v31  ;;  %v13611_v31 = vcombine.low %v17565_v26, %v17565_v26  ;;  %v15484_v26 = vld [vmem:[#allocation8 + $0x240] ss:$16 sps:$4 sm:$0xff]  }
 0x27c   : > { %3333 = vmatpush1.bf16.msra.mxu0 %v15380_v30  ;;  %3415 = vmatpush1.bf16.msra.mxu1 %v15383_v32  ;;  %v15474_v30 = vld [vmem:[#allocation8 + $0x208] ss:$16 sps:$4 sm:$0xff]   ;;  %v15480_v32 = vld [vmem:[#allocation8 + $0x224] ss:$16 sps:$4 sm:$0xff]  }
 0x27d   : > { %3334 = vmatprep.subr.bf16.mxu0 %v15388_v33  ;;  %3416 = vmatprep.subr.bf16.mxu1 %v15391_v15  ;;  %v15483_v33 = vld [vmem:[#allocation8 + $0x22c] ss:$16 sps:$4 sm:$0xff]   ;;  %v15478_v15 = vld [vmem:[#allocation8 + $0x220] ss:$16 sps:$4 sm:$0xff]  }
 0x280   : > { %3335 = vmatpush1.bf16.msra.mxu0 %v15386_v34  ;;  %3417 = vmatpush1.bf16.msra.mxu1 %v15389_v35  ;;  %v13614_v34 = vcombine.high %v17572_v28, %v17572_v28  ;;  %v15481_v35 = vld [vmem:[#allocation8 + $0x228] ss:$16 sps:$4 sm:$0xff]  }
 0x281   : > { %3336 = vmatprep.subr.bf16.mxu0 %v15394_v36  ;;  %3418 = vmatprep.subr.bf16.mxu1 %v15397_v37  ;;  %v15486_v36 = vld [vmem:[#allocation8 + $0x244] ss:$16 sps:$4 sm:$0xff]   ;;  %v15489_v37 = vld [vmem:[#allocation8 + $0x24c] ss:$16 sps:$4 sm:$0xff]  }
 0x284   : > { %3337 = vmatpush1.bf16.msra.mxu0 %v15392_v38  ;;  %3419 = vmatpush1.bf16.msra.mxu1 %v15395_v39  ;;  %v15487_v38 = vld [vmem:[#allocation8 + $0x248] ss:$16 sps:$4 sm:$0xff]   ;;  %v15492_v39 = vld [vmem:[#allocation8 + $0x264] ss:$16 sps:$4 sm:$0xff]  }
 0x285   : > { %3338 = vmatprep.subr.bf16.mxu0 %v15400_v40  ;;  %3420 = vmatprep.subr.bf16.mxu1 %v15403_v24  ;;  %v15495_v40 = vld [vmem:[#allocation8 + $0x26c] ss:$16 sps:$4 sm:$0xff]   ;;  %v15490_v24 = vld [vmem:[#allocation8 + $0x260] ss:$16 sps:$4 sm:$0xff]  }
 0x288   : > { %3339 = vmatpush1.bf16.msra.mxu0 %v15398_v41  ;;  %3421 = vmatpush1.bf16.msra.mxu1 %v15401_v42  ;;  %v15493_v41 = vld [vmem:[#allocation8 + $0x268] ss:$16 sps:$4 sm:$0xff]   ;;  %v15498_v42 = vld [vmem:[#allocation8 + $0x284] ss:$16 sps:$4 sm:$0xff]  }
 0x289   : > { %3340 = vmatprep.subr.bf16.mxu0 %v15406_v43  ;;  %3422 = vmatprep.subr.bf16.mxu1 %v15409_v44  ;;  %v15501_v43 = vld [vmem:[#allocation8 + $0x28c] ss:$16 sps:$4 sm:$0xff]   ;;  %v15496_v44 = vld [vmem:[#allocation8 + $0x280] ss:$16 sps:$4 sm:$0xff]  }
 0x28c   : > { %3341 = vmatpush1.bf16.msra.mxu0 %v15404_v45  ;;  %3423 = vmatpush1.bf16.msra.mxu1 %v15407_v46  ;;  %v15499_v45 = vld [vmem:[#allocation8 + $0x288] ss:$16 sps:$4 sm:$0xff]   ;;  %v15504_v46 = vld [vmem:[#allocation8 + $0x2a4] ss:$16 sps:$4 sm:$0xff]  }
 0x28d   : > { %3342 = vmatprep.subr.bf16.mxu0 %v15412_v12  ;;  %3424 = vmatprep.subr.bf16.mxu1 %v15415_v47  ;;  %v15507_v12 = vld [vmem:[#allocation8 + $0x2ac] ss:$16 sps:$4 sm:$0xff]   ;;  %v15502_v47 = vld [vmem:[#allocation8 + $0x2a0] ss:$16 sps:$4 sm:$0xff]  }
 0x290   : > { %3343 = vmatpush1.bf16.msra.mxu0 %v15410_v48  ;;  %3425 = vmatpush1.bf16.msra.mxu1 %v15413_v49  ;;  %v15505_v48 = vld [vmem:[#allocation8 + $0x2a8] ss:$16 sps:$4 sm:$0xff]   ;;  %v15510_v49 = vld [vmem:[#allocation8 + $0x2c4] ss:$16 sps:$4 sm:$0xff]  }
 0x291   : > { %3344 = vmatprep.subr.bf16.mxu0 %v15418_v50  ;;  %3426 = vmatprep.subr.bf16.mxu1 %v15421_v51  ;;  %v15513_v50 = vld [vmem:[#allocation8 + $0x2cc] ss:$16 sps:$4 sm:$0xff]  }
 0x294   : > { %3345 = vmatpush1.bf16.msra.mxu0 %v15416_v57  ;;  %3427 = vmatpush1.bf16.msra.mxu1 %v15419_v52  ;;  %v15508_v57 = vld [vmem:[#allocation8 + $0x2c0] ss:$16 sps:$4 sm:$0xff]  }
 0x295   : > { %3346 = vmatprep.subr.bf16.mxu0 %v15424_v54  ;;  %3428 = vmatprep.subr.bf16.mxu1 %v15427_v55  ;;  %v15511_v55 = vld [vmem:[#allocation8 + $0x2c8] ss:$16 sps:$4 sm:$0xff]  }
 0x298   : > { %3347 = vmatpush1.bf16.msra.mxu0 %v15422_v56  ;;  %3429 = vmatpush1.bf16.msra.mxu1 %v15425_v53  ;;  %v15516_v56 = vld [vmem:[#allocation8 + $0x2e4] ss:$16 sps:$4 sm:$0xff]  }
 0x299   : > { %3348 = vmatprep.subr.bf16.mxu0 %v15430_v58  ;;  %3430 = vmatprep.subr.bf16.mxu1 %v15433_v59 }
 0x29c   : > { %3349 = vmatpush1.bf16.msra.mxu0 %v15428_v60  ;;  %3431 = vmatpush1.bf16.msra.mxu1 %v15431_v61  ;;  %v15519_v60 = vld [vmem:[#allocation8 + $0x2ec] ss:$16 sps:$4 sm:$0xff]  }
 0x29d   : > { %3350 = vmatprep.subr.bf16.mxu0 %v15436_v62  ;;  %3432 = vmatprep.subr.bf16.mxu1 %v15439_v63 }
 0x2a0   : > { %3351 = vmatpush1.bf16.msra.mxu0 %v15434_v0  ;;  %3433 = vmatpush1.bf16.msra.mxu1 %v15437_v1  ;;  %v15514_v1 = vld [vmem:[#allocation8 + $0x2e0] ss:$16 sps:$4 sm:$0xff]  }
 0x2a1   : > { %3352 = vmatprep.subr.bf16.mxu0 %v15442_v2  ;;  %3434 = vmatprep.subr.bf16.mxu1 %v15445_v3  ;;  %v15517_v2 = vld [vmem:[#allocation8 + $0x2e8] ss:$16 sps:$4 sm:$0xff]   ;;  %v15522_v3 = vld [vmem:[#allocation8 + $0x304] ss:$16 sps:$4 sm:$0xff]  }
 0x2a4   : > { %3353 = vmatpush1.bf16.msra.mxu0 %v15440_v4  ;;  %3435 = vmatpush1.bf16.msra.mxu1 %v15443_v5  ;;  %v15525_v4 = vld [vmem:[#allocation8 + $0x30c] ss:$16 sps:$4 sm:$0xff]   ;;  %v15520_v5 = vld [vmem:[#allocation8 + $0x300] ss:$16 sps:$4 sm:$0xff]  }
 0x2a5   : > { %3354 = vmatprep.subr.bf16.mxu0 %v15448_v6  ;;  %3436 = vmatprep.subr.bf16.mxu1 %v15451_v7  ;;  %v15523_v6 = vld [vmem:[#allocation8 + $0x308] ss:$16 sps:$4 sm:$0xff]   ;;  %v15530_v7 = vld [vmem:[#allocation8 + $0x324] ss:$16 sps:$4 sm:$0xff]  }
 0x2a8   : > { %3355 = vmatpush1.bf16.msra.mxu0 %v15446_v8  ;;  %3437 = vmatpush1.bf16.msra.mxu1 %v15449_v9 }
 0x2a9   : > { %3356 = vmatprep.subr.bf16.mxu0 %v15454_v10  ;;  %3438 = vmatprep.subr.bf16.mxu1 %v15457_v11  ;;  %v15533_v10 = vld [vmem:[#allocation8 + $0x32c] ss:$16 sps:$4 sm:$0xff]   ;;  %v15528_v11 = vld [vmem:[#allocation8 + $0x320] ss:$16 sps:$4 sm:$0xff]  }
 0x2ac   : > { %3357 = vmatpush1.bf16.msra.mxu0 %v15452_v13  ;;  %3439 = vmatpush1.bf16.msra.mxu1 %v15455_v14  ;;  %v15531_v13 = vld [vmem:[#allocation8 + $0x328] ss:$16 sps:$4 sm:$0xff]   ;;  %v15536_v14 = vld [vmem:[#allocation8 + $0x344] ss:$16 sps:$4 sm:$0xff]  }
 0x2ad   : > { %3358 = vmatprep.subr.bf16.mxu0 %v15460_v16  ;;  %3440 = vmatprep.subr.bf16.mxu1 %v15463_v17  ;;  %v15539_v16 = vld [vmem:[#allocation8 + $0x34c] ss:$16 sps:$4 sm:$0xff]   ;;  %v15534_v17 = vld [vmem:[#allocation8 + $0x340] ss:$16 sps:$4 sm:$0xff]  }
 0x2b0   : > { %3359 = vmatpush1.bf16.msra.mxu0 %v15458_v18  ;;  %3441 = vmatpush1.bf16.msra.mxu1 %v15461_v19  ;;  %v15537_v18 = vld [vmem:[#allocation8 + $0x348] ss:$16 sps:$4 sm:$0xff]   ;;  %v15542_v19 = vld [vmem:[#allocation8 + $0x364] ss:$16 sps:$4 sm:$0xff]  }
 0x2b1   : > { %3360 = vmatprep.subr.bf16.mxu0 %v15466_v20  ;;  %3442 = vmatprep.subr.bf16.mxu1 %v15469_v21  ;;  %v15545_v20 = vld [vmem:[#allocation8 + $0x36c] ss:$16 sps:$4 sm:$0xff]   ;;  %v15540_v21 = vld [vmem:[#allocation8 + $0x360] ss:$16 sps:$4 sm:$0xff]  }
 0x2b4   : > { %3361 = vmatpush1.bf16.msra.mxu0 %v15464_v22  ;;  %3443 = vmatpush1.bf16.msra.mxu1 %v15467_v23  ;;  %v15543_v22 = vld [vmem:[#allocation8 + $0x368] ss:$16 sps:$4 sm:$0xff]   ;;  %v15548_v23 = vld [vmem:[#allocation8 + $0x384] ss:$16 sps:$4 sm:$0xff]  }
 0x2b5   : > { %3371 = vmatprep.subr.bf16.mxu0 %v15473_v25  ;;  %3453 = vmatprep.subr.bf16.mxu1 %v15476_v27  ;;  %v15551_v25 = vld [vmem:[#allocation8 + $0x38c] ss:$16 sps:$4 sm:$0xff]   ;;  %v15546_v27 = vld [vmem:[#allocation8 + $0x380] ss:$16 sps:$4 sm:$0xff]  }
 0x2b7   : > { %3363 = vmatmul.mubr.bf16.vlgmr.msra.gmra.mrb[8].mxu0 %v13611_v31  ;;  %3445 = vmatmul.mubr.bf16.vlgmr.msra.gmra.mrb[8].mxu1 %v13611_v31  ;;  %v15557_v31 = vld [vmem:[#allocation8 + $0x3ac] ss:$16 sps:$4 sm:$0xff]  }
 0x2b8   : > { %3372 = vmatpush1.bf16.msra.mxu0 %v15471_v29  ;;  %3454 = vmatpush1.bf16.msra.mxu1 %v15474_v30  ;;  %v15549_v29 = vld [vmem:[#allocation8 + $0x388] ss:$16 sps:$4 sm:$0xff]   ;;  %v15554_v30 = vld [vmem:[#allocation8 + $0x3a4] ss:$16 sps:$4 sm:$0xff]  }
 0x2b9   : > { %3373 = vmatprep.subr.bf16.mxu0 %v15480_v32  ;;  %3455 = vmatprep.subr.bf16.mxu1 %v15483_v33  ;;  %v15552_v32 = vld [vmem:[#allocation8 + $0x3a0] ss:$16 sps:$4 sm:$0xff]   ;;  %v15555_v33 = vld [vmem:[#allocation8 + $0x3a8] ss:$16 sps:$4 sm:$0xff]  }
 0x2ba   : > { %3403 = vmatprep.mubr.bf16.mxu0 %v13614_v34  ;;  %3485 = vmatprep.mubr.bf16.mxu1 %v13614_v34  ;;  %v15563_v34 = vld [vmem:[#allocation8 + $0x3cc] ss:$16 sps:$4 sm:$0xff]  }
 0x2bc   : > { %3374 = vmatpush1.bf16.msra.mxu0 %v15478_v15  ;;  %3456 = vmatpush1.bf16.msra.mxu1 %v15481_v35  ;;  %v15560_v15 = vld [vmem:[#allocation8 + $0x3c4] ss:$16 sps:$4 sm:$0xff]   ;;  %v15558_v35 = vld [vmem:[#allocation8 + $0x3c0] ss:$16 sps:$4 sm:$0xff]  }
 0x2bd   : > { %3375 = vmatprep.subr.bf16.mxu0 %v15486_v36  ;;  %3457 = vmatprep.subr.bf16.mxu1 %v15489_v37  ;;  %v15561_v36 = vld [vmem:[#allocation8 + $0x3c8] ss:$16 sps:$4 sm:$0xff]   ;;  %v15566_v37 = vld [vmem:[#allocation8 + $0x3e4] ss:$16 sps:$4 sm:$0xff]  }
 0x2c0   : > { %3376 = vmatpush1.bf16.msra.mxu0 %v15484_v26  ;;  %3458 = vmatpush1.bf16.msra.mxu1 %v15487_v38  ;;  %v15569_v26 = vld [vmem:[#allocation8 + $0x3ec] ss:$16 sps:$4 sm:$0xff]   ;;  %v15564_v38 = vld [vmem:[#allocation8 + $0x3e0] ss:$16 sps:$4 sm:$0xff]  }
 0x2c1   : > { %3377 = vmatprep.subr.bf16.mxu0 %v15492_v39  ;;  %3459 = vmatprep.subr.bf16.mxu1 %v15495_v40  ;;  %v15567_v39 = vld [vmem:[#allocation8 + $0x3e8] ss:$16 sps:$4 sm:$0xff]   ;;  %v13613_v40 = vcombine.low %v17572_v28, %v17572_v28 }
 0x2c4   : > { %3378 = vmatpush1.bf16.msra.mxu0 %v15490_v24  ;;  %3460 = vmatpush1.bf16.msra.mxu1 %v15493_v41  ;;  %v17046_v24 = vmov 0.0  }
 0x2c5   : > { %3379 = vmatprep.subr.bf16.mxu0 %v15498_v42  ;;  %3461 = vmatprep.subr.bf16.mxu1 %v15501_v43 }
 0x2c8   : > { %3380 = vmatpush1.bf16.msra.mxu0 %v15496_v44  ;;  %3462 = vmatpush1.bf16.msra.mxu1 %v15499_v45 }
 0x2c9   : > { %3381 = vmatprep.subr.bf16.mxu0 %v15504_v46  ;;  %3463 = vmatprep.subr.bf16.mxu1 %v15507_v12 }
 0x2ca   : > { %v2252_v51 = vpop.f32.mrb[0].mxu0  ;;  %v2334_v52 = vpop.f32.mrb[0].mxu1 }
 0x2cb   : > { %v2254_v54 = vpop.f32.mrb[1].mxu0  ;;  %v2336_v58 = vpop.f32.mrb[1].mxu1 }
 0x2cc   : > { %v14935_v53 = vpack.c.bf16 %v2254_v54, %v2252_v51  ;;  %v2256_v59 = vpop.f32.mrb[2].mxu0  ;;  %3382 = vmatpush1.bf16.msra.mxu0 %v15502_v47  ;;  %v14936_v61 = vpack.c.bf16 %v2336_v58, %v2334_v52  ;;  %v2338_v62 = vpop.f32.mrb[2].mxu1  ;;  %3464 = vmatpush1.bf16.msra.mxu1 %v15505_v48 }
 0x2cd   : > { %v2257_v63 = vpop.f32.mrb[3].mxu0  ;;  %3383 = vmatprep.subr.bf16.mxu0 %v15510_v49  ;;  %v2339_v0 = vpop.f32.mrb[3].mxu1  ;;  %3465 = vmatprep.subr.bf16.mxu1 %v15513_v50 }
 0x2ce   : > { %2537 = vst [vmem:[#allocation2] sm:$0xff] %v14935_v53  ;;  %2538 = vst [vmem:[#allocation2 + $0x8] sm:$0xff] %v14936_v61 }
 0x2d0   : > { %3384 = vmatpush1.bf16.msra.mxu0 %v15508_v57  ;;  %3466 = vmatpush1.bf16.msra.mxu1 %v15511_v55 }
 0x2d1   : > { %3385 = vmatprep.subr.bf16.mxu0 %v15516_v56  ;;  %3467 = vmatprep.subr.bf16.mxu1 %v15519_v60 }
 0x2d4   : > { %3386 = vmatpush1.bf16.msra.mxu0 %v15514_v1  ;;  %3468 = vmatpush1.bf16.msra.mxu1 %v15517_v2 }
 0x2d5   : > { %3387 = vmatprep.subr.bf16.mxu0 %v15522_v3  ;;  %v15526_v8 = vld [vmem:[#allocation2 + $0x4] ss:$0 sps:$4 sm:$0xff]   ;;  %3469 = vmatprep.subr.bf16.mxu1 %v15525_v4  ;;  %v15527_v9 = vld [vmem:[#allocation2] ss:$0 sps:$4 sm:$0xff]  }
 0x2d6   : > { %3857 = vrot.lane.b32.xlu1 %v15526_v8, %s17045_s27  ;;  %3626 = vrot.lane.b32.xlu0 %v15527_v9, %s17045_s27  ;;  %v3506_v41 = vld [vmem:[#allocation2] sm:$0xf]  ;;  %v3740_v9 = vld [vmem:[#allocation2 + $0x4] sm:$0xf] }
 0x2d7   : > { %v3513_v42 = vsel %vm3508_vm0, %v3506_v41, 0 }
 0x2d8   : > { %3388 = vmatpush1.bf16.msra.mxu0 %v15520_v5  ;;  %3470 = vmatpush1.bf16.msra.mxu1 %v15523_v6  ;;  %v15572_v5 = vld [vmem:[#allocation2 + $0x8] ss:$0 sps:$4 sm:$0xff]  }
 0x2d9   : > { %3389 = vmatprep.subr.bf16.mxu0 %v15530_v7  ;;  %3471 = vmatprep.subr.bf16.mxu1 %v15533_v10  ;;  %v15573_v7 = vld [vmem:[#allocation2 + $0xc] ss:$0 sps:$4 sm:$0xff]  }
 0x2dc   : > { %3390 = vmatpush1.bf16.msra.mxu0 %v15528_v11  ;;  %3472 = vmatpush1.bf16.msra.mxu1 %v15531_v13  ;;  %v3746_v11 = vsel %vm3508_vm0, %v3740_v9, 0 }
 0x2dd   : > { %3391 = vmatprep.subr.bf16.mxu0 %v15536_v14  ;;  %3473 = vmatprep.subr.bf16.mxu1 %v15539_v16  ;;  %v3971_v16 = vld [vmem:[#allocation2 + $0x8] sm:$0xf] }
 0x2e0   : > { %3392 = vmatpush1.bf16.msra.mxu0 %v15534_v17  ;;  %3474 = vmatpush1.bf16.msra.mxu1 %v15537_v18  ;;  %v3977_v18 = vsel %vm3508_vm0, %v3971_v16, 0 }
 0x2e1   : > { %3393 = vmatprep.subr.bf16.mxu0 %v15542_v19  ;;  %3475 = vmatprep.subr.bf16.mxu1 %v15545_v20 }
 0x2e4   : > { %3394 = vmatpush1.bf16.msra.mxu0 %v15540_v21  ;;  %3476 = vmatpush1.bf16.msra.mxu1 %v15543_v22  ;;  %v4202_v21 = vld [vmem:[#allocation2 + $0xc] sm:$0xf] }
 0x2e5   : > { %3395 = vmatprep.subr.bf16.mxu0 %v15548_v23  ;;  %3477 = vmatprep.subr.bf16.mxu1 %v15551_v25  ;;  %v4208_v23 = vsel %vm3508_vm0, %v4202_v21, 0 }
 0x2e8   : > { %3396 = vmatpush1.bf16.msra.mxu0 %v15546_v27  ;;  %3478 = vmatpush1.bf16.msra.mxu1 %v15549_v29 }
 0x2e9   : > { %3397 = vmatprep.subr.bf16.mxu0 %v15554_v30  ;;  %3479 = vmatprep.subr.bf16.mxu1 %v15557_v31  ;;  %v3502_v30 = vld [vmem:[%s17502_s4] sm:$0x3] }
 0x2ea   : > { %v3503_v31 = vunpack.c.0.s8 %v3502_v30 }
 0x2ec   : > { %3398 = vmatpush1.bf16.msra.mxu0 %v15552_v32  ;;  %3480 = vmatpush1.bf16.msra.mxu1 %v15555_v33  ;;  %v3504_v32 = vcvt.s32.f32 %v3503_v31 }
 0x2ed   : > { %3399 = vmatprep.subr.bf16.mxu0 %v15560_v15  ;;  %3481 = vmatprep.subr.bf16.mxu1 %v15563_v34 }
 0x2ee   : > { %v3505_v33 = vmul.f32 -1e+09, %v3504_v32 }
 0x2f0   : > { %3400 = vmatpush1.bf16.msra.mxu0 %v15558_v35  ;;  %3482 = vmatpush1.bf16.msra.mxu1 %v15561_v36 }
 0x2f1   : > { %3401 = vmatprep.subr.bf16.mxu0 %v15566_v37  ;;  %3483 = vmatprep.subr.bf16.mxu1 %v15569_v26 }
 0x2f4   : > { %3402 = vmatpush1.bf16.msra.mxu0 %v15564_v38  ;;  %3484 = vmatpush1.bf16.msra.mxu1 %v15567_v39 }
 0x2f5   : > { %14973 = vmatprep.subr.bf16.mxu0 %v17046_v24  ;;  %14979 = vmatprep.subr.bf16.mxu1 %v17046_v24 }
 0x2f7   : > { %3404 = vmatmul.mubr.bf16.vlgmr.msra.gmra.mrb[8].mxu0 %v13613_v40  ;;  %3486 = vmatmul.mubr.bf16.vlgmr.msra.gmra.mrb[8].mxu1 %v13613_v40 }
 0x2f8   : > { %14975 = vmatprep.mubr.msk.bf16.mxu0 %vm17047_vm1, %v17046_v24  ;;  %14981 = vmatprep.mubr.msk.bf16.mxu1 %vm17047_vm1, %v17046_v24 }
 0x2fd   : > { %14974 = vmatpush3.bf16.xpose.msra.mxu0 %v3513_v42 }
 0x2fe   : > { %14985 = vmatprep.subr.bf16.mxu0 %v17046_v24 }
 0x348   : > { %v3627_v52 = vpop.permute.xlu0 %3626  ;;  %v3858_v13 = vpop.permute.xlu1 %3857 }
 0x349   : > { %v3632_v3 = vsel %vm3508_vm0, %v3627_v52, 0  ;;  %v3863_v14 = vsel %vm3508_vm0, %v3858_v13, 0 }
 0x34a   : > { %v2416_v43 = vpop.f32.mrb[4].mxu0  ;;  %v2498_v44 = vpop.f32.mrb[4].mxu1 }
 0x34b   : > { %v2418_v45 = vpop.f32.mrb[5].mxu0  ;;  %v2500_v46 = vpop.f32.mrb[5].mxu1 }
 0x34c   : > { %v14937_v28 = vpack.c.bf16 %v2418_v45, %v2416_v43  ;;  %v2420_v12 = vpop.f32.mrb[6].mxu0  ;;  %v14938_v47 = vpack.c.bf16 %v2500_v46, %v2498_v44  ;;  %v2502_v48 = vpop.f32.mrb[6].mxu1 }
 0x34d   : > { %v2421_v49 = vpop.f32.mrb[7].mxu0  ;;  %v2503_v50 = vpop.f32.mrb[7].mxu1 }
 0x34e   : > { %2539 = vst [vmem:[#allocation2 + $0x10] sm:$0xff] %v14937_v28  ;;  %2540 = vst [vmem:[#allocation2 + $0x18] sm:$0xff] %v14938_v47 }
 0x355   : > { %v3507_v51 = vld [vmem:[#allocation2 + $0x10] sm:$0xf] }
 0x356   : > { %v3575_v57 = vsel %vm3573_vm2, %v3507_v51, 0 }
 0x357   : > { %14980 = vmatpush3.bf16.msra.mxu1 %v3575_v57 }
 0x358   : > { %14991 = vmatprep.subr.bf16.mxu1 %v17046_v24 }
 0x3ca   : > { %v3405_v54 = vpop.f32.mrb[8].mxu0  ;;  %v3487_v56 = vpop.f32.mrb[8].mxu1 }
 0x3cb   : > { %v3494_v55 = vmul.f32 0.125, %v3405_v54  ;;  %v3407_v53 = vpop.f32.mrb[9].mxu0  ;;  %v3496_v58 = vmul.f32 0.125, %v3487_v56  ;;  %v3489_v60 = vpop.f32.mrb[9].mxu1 }
 0x3cc   : > { %v3495_v59 = vmul.f32 0.125, %v3407_v53  ;;  %v3409_v61 = vpop.f32.mrb[10].mxu0  ;;  %v3491_v63 = vpop.f32.mrb[10].mxu1  ;;  %v3497_v6 = vmul.f32 0.125, %v3489_v60 }
 0x3cd   : > { %v3498_v62 = vpack.c.bf16 %v3494_v55, %v3494_v55  ;;  %v3410_v0 = vpop.f32.mrb[11].mxu0  ;;  %v3492_v2 = vpop.f32.mrb[11].mxu1  ;;  %v3500_v4 = vpack.c.bf16 %v3496_v58, %v3496_v58 }
 0x3ce   : > { %v3499_v1 = vpack.c.bf16 %v3495_v59, %v3495_v59  ;;  %v3501_v8 = vpack.c.bf16 %v3497_v6, %v3497_v6 }
 0x3cf   : > { %3621 = vrot.lane.b32.xlu0 %v3498_v62, %s17045_s27  ;;  %14976 = vmatmul.mubr.msk.bf16.vlgmr.msra.gmra.mrb[12].mxu0 %vm3508_vm0, %v3498_v62 }
 0x3d0   : > { %14986 = vmatpush3.bf16.xpose.msra.mxu0 %v3632_v3  ;;  %3852 = vrot.lane.b32.xlu1 %v3499_v1, %s17045_s27 }
 0x3d1   : > { %14987 = vmatprep.mubr.msk.bf16.mxu0 %vm17047_vm1, %v17046_v24  ;;  %14997 = vmatprep.subr.bf16.mxu0 %v17046_v24 }
 0x3d3   : > { %4088 = vrot.lane.b32.xlu0 %v15572_v5, %s17045_s27 }
 0x3d4   : > { %4083 = vrot.lane.b32.xlu1 %v3500_v4, %s17045_s27 }
 0x3d7   : > { %4319 = vrot.lane.b32.xlu0 %v15573_v7, %s17045_s27 }
 0x3d8   : > { %4314 = vrot.lane.b32.xlu1 %v3501_v8, %s17045_s27 }
 0x441   : > { %v3622_v10 = vpop.permute.xlu0 %3621 }
 0x442   : > { %14988 = vmatmul.mubr.msk.bf16.vlgmr.msra.gmra.mrb[16].mxu0 %vm3508_vm0, %v3622_v10  ;;  %v3853_v17 = vpop.permute.xlu1 %3852 }
 0x443   : > { %14998 = vmatpush3.bf16.xpose.msra.mxu0 %v3746_v11  ;;  %14999 = vmatprep.mubr.msk.bf16.mxu0 %vm17047_vm1, %v17046_v24 }
 0x444   : > { %15009 = vmatprep.subr.bf16.mxu0 %v17046_v24 }
 0x445   : > { %v4089_v19 = vpop.permute.xlu0 %4088 }
 0x446   : > { %v4094_v20 = vsel %vm3508_vm0, %v4089_v19, 0  ;;  %v4084_v22 = vpop.permute.xlu1 %4083 }
 0x449   : > { %v4320_v25 = vpop.permute.xlu0 %4319 }
 0x44a   : > { %15000 = vmatmul.mubr.msk.bf16.vlgmr.msra.gmra.mrb[20].mxu0 %vm3508_vm0, %v3499_v1  ;;  %v4325_v27 = vsel %vm3508_vm0, %v4320_v25, 0  ;;  %v4315_v29 = vpop.permute.xlu1 %4314 }
 0x44b   : > { %15010 = vmatpush3.bf16.xpose.msra.mxu0 %v3863_v14  ;;  %15011 = vmatprep.mubr.msk.bf16.mxu0 %vm17047_vm1, %v17046_v24 }
 0x44c   : > { %15021 = vmatprep.subr.bf16.mxu0 %v17046_v24 }
 0x452   : > { %15012 = vmatmul.mubr.msk.bf16.vlgmr.msra.gmra.mrb[24].mxu0 %vm3508_vm0, %v3853_v17 }
 0x453   : > { %15022 = vmatpush3.bf16.xpose.msra.mxu0 %v3977_v18  ;;  %15023 = vmatprep.mubr.msk.bf16.mxu0 %vm17047_vm1, %v17046_v24 }
 0x454   : > { %15033 = vmatprep.subr.bf16.mxu0 %v17046_v24 }
 0x45a   : > { %15024 = vmatmul.mubr.msk.bf16.vlgmr.msra.gmra.mrb[28].mxu0 %vm3508_vm0, %v3500_v4 }
 0x45b   : > { %15034 = vmatpush3.bf16.xpose.msra.mxu0 %v4094_v20  ;;  %15035 = vmatprep.mubr.msk.bf16.mxu0 %vm17047_vm1, %v17046_v24 }
 0x45c   : > { %15045 = vmatprep.subr.bf16.mxu0 %v17046_v24 }
 0x462   : > { %15036 = vmatmul.mubr.msk.bf16.vlgmr.msra.gmra.mrb[32].mxu0 %vm3508_vm0, %v4084_v22 }
 0x463   : > { %15046 = vmatpush3.bf16.xpose.msra.mxu0 %v4208_v23  ;;  %15047 = vmatprep.mubr.msk.bf16.mxu0 %vm17047_vm1, %v17046_v24 }
 0x464   : > { %15057 = vmatprep.subr.bf16.mxu0 %v17046_v24 }
 0x46a   : > { %15048 = vmatmul.mubr.msk.bf16.vlgmr.msra.gmra.mrb[36].mxu0 %vm3508_vm0, %v3501_v8 }
 0x46b   : > { %15058 = vmatpush3.bf16.xpose.msra.mxu0 %v4325_v27  ;;  %15059 = vmatprep.mubr.msk.bf16.mxu0 %vm17047_vm1, %v17046_v24 }
 0x472   : > { %15060 = vmatmul.mubr.msk.bf16.vlgmr.msra.gmra.mrb[40].mxu0 %vm3508_vm0, %v4315_v29 }
 0x4a2   : > { %v3549_v15 = vpop.f32.mrb[12].mxu0 }
 0x4a3   : > { %v3550_v34 = vadd.f32 %v3549_v15, %v3505_v33  ;;  %v14977_v35 = vpop.f32.mrb[13].mxu0 }
 0x4a4   : > { %v3552_v36 = vpop.f32.mrb[14].mxu0 }
 0x4a5   : > { %v14978_v37 = vpop.f32.mrb[15].mxu0  ;;  %v3556_v26 = vsel %vm3555_vm3, %v3550_v34, -inf }
 0x4a6   : > { %3557 = vmax.xlane.f32.xlu0 %v3556_v26 }
 0x515   : > { %v3668_v38 = vpop.f32.mrb[16].mxu0 }
 0x516   : > { %v3669_v39 = vadd.f32 %v3668_v38, %v3505_v33  ;;  %v14989_v40 = vpop.f32.mrb[17].mxu0 }
 0x517   : > { %v3671_v41 = vpop.f32.mrb[18].mxu0 }
 0x518   : > { %v14990_v42 = vpop.f32.mrb[19].mxu0  ;;  %v3674_v43 = vsel %vm3555_vm3, %v3669_v39, -inf  ;;  %v15575_v41 = vld [vmem:[#allocation2 + $0x14] ss:$0 sps:$4 sm:$0xff]  }
 0x519   : > { %3675 = vmax.xlane.f32.xlu1 %v3674_v43 }
 0x51d   : > { %v3782_v44 = vpop.f32.mrb[20].mxu0 }
 0x51e   : > { %v3783_v45 = vadd.f32 %v3782_v44, %v3505_v33  ;;  %v15001_v28 = vpop.f32.mrb[21].mxu0 }
 0x51f   : > { %v3785_v46 = vpop.f32.mrb[22].mxu0 }
 0x520   : > { %v15002_v12 = vpop.f32.mrb[23].mxu0  ;;  %v3788_v47 = vsel %vm3555_vm3, %v3783_v45, -inf }
 0x521   : > { %3789 = vmax.xlane.f32.xlu0 %v3788_v47 }
 0x525   : > { %v3899_v48 = vpop.f32.mrb[24].mxu0 }
 0x526   : > { %v3900_v49 = vadd.f32 %v3899_v48, %v3505_v33  ;;  %v15013_v50 = vpop.f32.mrb[25].mxu0 }
 0x527   : > { %v3902_v51 = vpop.f32.mrb[26].mxu0 }
 0x528   : > { %v15014_v57 = vpop.f32.mrb[27].mxu0  ;;  %v3905_v52 = vsel %vm3555_vm3, %v3900_v49, -inf }
 0x529   : > { %3906 = vmax.xlane.f32.xlu0 %v3905_v52 }
 0x52d   : > { %v4013_v54 = vpop.f32.mrb[28].mxu0 }
 0x52e   : > { %v17638_v55 = vadd.f32 %v4013_v54, %v3505_v33  ;;  %v15025_v56 = vpop.f32.mrb[29].mxu0 }
 0x52f   : > { %v4016_v53 = vpop.f32.mrb[30].mxu0 }
 0x530   : > { %v15026_v58 = vpop.f32.mrb[31].mxu0  ;;  %v4019_v59 = vsel %vm3555_vm3, %v17638_v55, -inf }
 0x531   : > { %4020 = vmax.xlane.f32.xlu1 %v4019_v59 }
 0x533   : > { %v3558_v60 = vpop.xlane.xlu0 %3557 }
 0x534   : > { %v3559_v61 = vsub.f32 %v3550_v34, %v3558_v60 }
 0x535   : > { %v4130_v62 = vpop.f32.mrb[32].mxu0 }
 0x536   : > { %v3560_v63 = vmul.f32 1.442695, %v3559_v61  ;;  %v17642_v0 = vadd.f32 %v4130_v62, %v3505_v33  ;;  %v15037_v1 = vpop.f32.mrb[33].mxu0  ;;  %v15576_v61 = vld [vmem:[#allocation2 + $0x18] ss:$0 sps:$4 sm:$0xff]  }
 0x537   : > { %v4133_v2 = vpop.f32.mrb[34].mxu0  ;;  %v15577_v62 = vld [vmem:[#allocation2 + $0x1c] ss:$0 sps:$4 sm:$0xff]  }
 0x538   : > { %16538 = vpow2.f32 %v3560_v63  ;;  %v15038_v3 = vpop.f32.mrb[35].mxu0  ;;  %v4136_v4 = vsel %vm3555_vm3, %v17642_v0, -inf }
 0x539   : > { %4137 = vmax.xlane.f32.xlu0 %v4136_v4 }
 0x53d   : > { %v4244_v5 = vpop.f32.mrb[36].mxu0 }
 0x53e   : > { %v4245_v6 = vadd.f32 %v4244_v5, %v3505_v33  ;;  %v15049_v7 = vpop.f32.mrb[37].mxu0 }
 0x53f   : > { %v4247_v8 = vpop.f32.mrb[38].mxu0 }
 0x540   : > { %v15050_v9 = vpop.f32.mrb[39].mxu0  ;;  %v4250_v10 = vsel %vm3555_vm3, %v4245_v6, -inf }
 0x541   : > { %4251 = vmax.xlane.f32.xlu1 %v4250_v10 }
 0x542   : > { %v16539_v11 = vpop.eup %16538 }
 0x543   : > { %v3562_v13 = vsel %vm3555_vm3, %v16539_v11, 0.0 }
 0x545   : > { %3563 = vadd.xlane.f32.xlu1 %v3562_v13  ;;  %v4361_v14 = vpop.f32.mrb[40].mxu0 }
 0x546   : > { %v4362_v16 = vadd.f32 %v4361_v14, %v3505_v33  ;;  %v15061_v17 = vpop.f32.mrb[41].mxu0 }
 0x547   : > { %v4364_v18 = vpop.f32.mrb[42].mxu0 }
 0x548   : > { %v15062_v19 = vpop.f32.mrb[43].mxu0  ;;  %v4367_v20 = vsel %vm3555_vm3, %v4362_v16, -inf }
 0x549   : > { %4368 = vmax.xlane.f32.xlu0 %v4367_v20  ;;  %v3972_v19 = vld [vmem:[#allocation2 + $0x18] sm:$0xf] }
 0x54a   : > { %v4037_v20 = vsel %vm3573_vm2, %v3972_v19, 0  ;;  %v15634_v19 = vld [vmem:[#allocation11 + $0x124] ss:$16 sps:$4 sm:$0xff]  }
 0x5a6   : > { %v3676_v21 = vpop.xlane.xlu1 %3675 }
 0x5a7   : > { %v3677_v22 = vsub.f32 %v3669_v39, %v3676_v21  ;;  %v15574_v39 = vld [vmem:[#allocation2 + $0x10] ss:$0 sps:$4 sm:$0xff]  }
 0x5a9   : > { %v3678_v23 = vmul.f32 1.442695, %v3677_v22 }
 0x5ab   : > { %16540 = vpow2.f32 %v3678_v23 }
 0x5ae   : > { %v3790_v25 = vpop.xlane.xlu0 %3789 }
 0x5af   : > { %v3791_v27 = vsub.f32 %v3783_v45, %v3790_v25 }
 0x5b1   : > { %v3792_v29 = vmul.f32 1.442695, %v3791_v27 }
 0x5b3   : > { %16542 = vpow2.f32 %v3792_v29 }
 0x5b5   : > { %v17649_v30 = vpop.eup %16540 }
 0x5b6   : > { %v3907_v31 = vpop.xlane.xlu0 %3906  ;;  %v3680_v32 = vsel %vm3555_vm3, %v17649_v30, 0.0 }
 0x5b7   : > { %v3908_v33 = vsub.f32 %v3900_v49, %v3907_v31  ;;  %3681 = vadd.xlane.f32.xlu0 %v3680_v32 }
 0x5b9   : > { %v3909_v15 = vmul.f32 1.442695, %v3908_v33 }
 0x5bb   : > { %16544 = vpow2.f32 %v3909_v15 }
 0x5bd   : > { %v17653_v34 = vpop.eup %16542 }
 0x5be   : > { %v3794_v35 = vsel %vm3555_vm3, %v17653_v34, 0.0  ;;  %v4021_v26 = vpop.xlane.xlu1 %4020 }
 0x5bf   : > { %3795 = vadd.xlane.f32.xlu1 %v3794_v35  ;;  %v4022_v43 = vsub.f32 %v17638_v55, %v4021_v26 }
 0x5c1   : > { %v4023_v28 = vmul.f32 1.442695, %v4022_v43 }
 0x5c5   : > { %v17657_v36 = vpop.eup %16544 }
 0x5c6   : > { %v3911_v37 = vsel %vm3555_vm3, %v17657_v36, 0.0  ;;  %v4138_v12 = vpop.xlane.xlu0 %4137 }
 0x5c7   : > { %3912 = vadd.xlane.f32.xlu0 %v3911_v37  ;;  %v4139_v47 = vsub.f32 %v17642_v0, %v4138_v12  ;;  %v4203_v37 = vld [vmem:[#allocation2 + $0x1c] sm:$0xf]  ;;  %v15578_v12 = vld [vmem:[#allocation11] ss:$16 sps:$4 sm:$0xff]  }
 0x5c9   : > { %v4140_v50 = vmul.f32 1.442695, %v4139_v47  ;;  %v15580_v47 = vld [vmem:[#allocation11 + $0x4] ss:$16 sps:$4 sm:$0xff]  }
 0x5ca   : > { %5233 = vmatprep.subr.bf16.mxu0 %v15580_v47  ;;  %v15670_v47 = vld [vmem:[#allocation11 + $0x1e4] ss:$16 sps:$4 sm:$0xff]  }
 0x5cb   : > { %5234 = vmatpush1.bf16.msra.mxu0 %v15578_v12  ;;  %v15665_v12 = vld [vmem:[#allocation11 + $0x1c8] ss:$16 sps:$4 sm:$0xff]  }
 0x5ce   : > { %v4252_v38 = vpop.xlane.xlu1 %4251 }
 0x5cf   : > { %v4253_v46 = vsub.f32 %v4245_v6, %v4252_v38  ;;  %v3741_v6 = vld [vmem:[#allocation2 + $0x14] sm:$0xf] }
 0x5d0   : > { %3691 = vrot.lane.b32.xlu1 %v15574_v39, %s17045_s27  ;;  %v3806_v8 = vsel %vm3573_vm2, %v3741_v6, 0  ;;  %v15619_v6 = vld [vmem:[#allocation11 + $0xcc] ss:$16 sps:$4 sm:$0xff]  }
 0x5d1   : > { %v4254_v48 = vmul.f32 1.442695, %v4253_v46 }
 0x5d2   : > { %v3564_v40 = vpop.xlane.xlu1 %3563 }
 0x5d3   : > { %16546 = vrcp.f32 %v3564_v40  ;;  %v4268_v40 = vsel %vm3573_vm2, %v4203_v37, 0  ;;  %v15658_v37 = vld [vmem:[#allocation11 + $0x1a4] ss:$16 sps:$4 sm:$0xff]  }
 0x5d4   : > { %16548 = vpow2.f32 %v4023_v28 }
 0x5d5   : > { %16550 = vpow2.f32 %v4254_v48  ;;  %v15581_v48 = vld [vmem:[#allocation11 + $0x8] ss:$16 sps:$4 sm:$0xff]  }
 0x5d6   : > { %v4369_v49 = vpop.xlane.xlu0 %4368  ;;  %16552 = vpow2.f32 %v4140_v50  ;;  %v15584_v50 = vld [vmem:[#allocation11 + $0x20] ss:$16 sps:$4 sm:$0xff]  }
 0x5d7   : > { %v4370_v51 = vsub.f32 %v4362_v16, %v4369_v49  ;;  %v15583_v49 = vld [vmem:[#allocation11 + $0xc] ss:$16 sps:$4 sm:$0xff]  }
 0x5d9   : > { %v4371_v57 = vmul.f32 1.442695, %v4370_v51  ;;  %v15586_v51 = vld [vmem:[#allocation11 + $0x24] ss:$16 sps:$4 sm:$0xff]  }
 0x5da   : > { %5235 = vmatprep.subr.bf16.mxu0 %v15586_v51 }
 0x5db   : > { %16554 = vpow2.f32 %v4371_v57  ;;  %v15587_v57 = vld [vmem:[#allocation11 + $0x28] ss:$16 sps:$4 sm:$0xff]   ;;  %5236 = vmatpush1.bf16.msra.mxu0 %v15584_v50  ;;  %v15673_v50 = vld [vmem:[#allocation11 + $0x1ec] ss:$16 sps:$4 sm:$0xff]  }
 0x5dd   : > { %3922 = vrot.lane.b32.xlu0 %v15575_v41, %s17045_s27  ;;  %v16547_v42 = vpop.eup %16546 }
 0x5de   : > { %v3566_v44 = vmul.f32 %v16547_v42, %v16539_v11  ;;  %v17675_v52 = vpop.eup %16548 }
 0x5df   : > { %v4025_v54 = vsel %vm3555_vm3, %v17675_v52, 0.0  ;;  %v17679_v55 = vpop.eup %16550 }
 0x5e0   : > { %v3567_v45 = vpack.c.bf16 %v3566_v44, %v3566_v44  ;;  %v4256_v56 = vsel %vm3555_vm3, %v17679_v55, 0.0  ;;  %v17683_v53 = vpop.eup %16552 }
 0x5e1   : > { %v4142_v58 = vsel %vm3555_vm3, %v17683_v53, 0.0 }
 0x5e2   : > { %3569 = vst.msk [vmem:[%s17667_s11] sm:$0xf] %vm3568_vm4, %v3567_v45  ;;  %14982 = vmatmul.mubr.msk.bf16.vlgmr.msra.gmra.mrb[12].mxu1 %vm3555_vm3, %v3567_v45 }
 0x5e3   : > { %14993 = vmatprep.mubr.msk.bf16.mxu1 %vm17047_vm1, %v17046_v24 }
 0x5e5   : > { %v17687_v59 = vpop.eup %16554 }
 0x5e6   : > { %v4373_v60 = vsel %vm3555_vm3, %v17687_v59, 0.0 }
 0x5f4   : > { %4026 = vadd.xlane.f32.xlu1 %v4025_v54  ;;  %v15595_v54 = vld [vmem:[#allocation11 + $0x4c] ss:$16 sps:$4 sm:$0xff]  }
 0x5f8   : > { %4257 = vadd.xlane.f32.xlu1 %v4256_v56  ;;  %v15593_v56 = vld [vmem:[#allocation11 + $0x48] ss:$16 sps:$4 sm:$0xff]  }
 0x5fc   : > { %4143 = vadd.xlane.f32.xlu0 %v4142_v58  ;;  %v15598_v58 = vld [vmem:[#allocation11 + $0x64] ss:$16 sps:$4 sm:$0xff]  }
 0x600   : > { %4374 = vadd.xlane.f32.xlu0 %v4373_v60  ;;  %v15601_v60 = vld [vmem:[#allocation11 + $0x6c] ss:$16 sps:$4 sm:$0xff]  }
 0x609   : > { %4153 = vrot.lane.b32.xlu1 %v15576_v61, %s17045_s27  ;;  %v15604_v61 = vld [vmem:[#allocation11 + $0x84] ss:$16 sps:$4 sm:$0xff]  }
 0x616   : > { %4384 = vrot.lane.b32.xlu0 %v15577_v62, %s17045_s27  ;;  %v15607_v62 = vld [vmem:[#allocation11 + $0x8c] ss:$16 sps:$4 sm:$0xff]  }
 0x644   : > { %v3682_v63 = vpop.xlane.xlu0 %3681 }
 0x645   : > { %16556 = vrcp.f32 %v3682_v63  ;;  %v15602_v63 = vld [vmem:[#allocation11 + $0x80] ss:$16 sps:$4 sm:$0xff]  }
 0x64c   : > { %v3796_v0 = vpop.xlane.xlu1 %3795 }
 0x64d   : > { %16558 = vrcp.f32 %v3796_v0  ;;  %v15605_v0 = vld [vmem:[#allocation11 + $0x88] ss:$16 sps:$4 sm:$0xff]  }
 0x64f   : > { %v16557_v1 = vpop.eup %16556 }
 0x650   : > { %v3684_v2 = vmul.f32 %v16557_v1, %v17649_v30  ;;  %v3692_v3 = vpop.permute.xlu1 %3691  ;;  %v15610_v1 = vld [vmem:[#allocation11 + $0xa4] ss:$16 sps:$4 sm:$0xff]  }
 0x651   : > { %v3697_v4 = vsel %vm3573_vm2, %v3692_v3, 0  ;;  %v15608_v3 = vld [vmem:[#allocation11 + $0xa0] ss:$16 sps:$4 sm:$0xff]  }
 0x652   : > { %14992 = vmatpush3.bf16.msra.mxu1 %v3697_v4  ;;  %v3685_v5 = vpack.c.bf16 %v3684_v2, %v3684_v2  ;;  %v15613_v2 = vld [vmem:[#allocation11 + $0xac] ss:$16 sps:$4 sm:$0xff]   ;;  %v15611_v4 = vld [vmem:[#allocation11 + $0xa8] ss:$16 sps:$4 sm:$0xff]  }
 0x653   : > { %15003 = vmatprep.subr.bf16.mxu1 %v17046_v24 }
 0x654   : > { %v3913_v7 = vpop.xlane.xlu0 %3912  ;;  %13747 = vst.msk [vmem:[%s17667_s11 + $0x4] sm:$0xf] %vm3568_vm4, %v3685_v5 }
 0x655   : > { %16560 = vrcp.f32 %v3913_v7  ;;  %14994 = vmatmul.mubr.msk.bf16.vlgmr.msra.gmra.mrb[16].mxu1 %vm3555_vm3, %v3685_v5  ;;  %v15616_v5 = vld [vmem:[#allocation11 + $0xc4] ss:$16 sps:$4 sm:$0xff]   ;;  %v15614_v7 = vld [vmem:[#allocation11 + $0xc0] ss:$16 sps:$4 sm:$0xff]  }
 0x656   : > { %15004 = vmatpush3.bf16.msra.mxu1 %v3806_v8  ;;  %15005 = vmatprep.mubr.msk.bf16.mxu1 %vm17047_vm1, %v17046_v24  ;;  %v15617_v8 = vld [vmem:[#allocation11 + $0xc8] ss:$16 sps:$4 sm:$0xff]  }
 0x657   : > { %v16559_v9 = vpop.eup %16558  ;;  %15015 = vmatprep.subr.bf16.mxu1 %v17046_v24 }
 0x658   : > { %v3798_v10 = vmul.f32 %v16559_v9, %v17653_v34  ;;  %v3923_v11 = vpop.permute.xlu0 %3922  ;;  %v15622_v9 = vld [vmem:[#allocation11 + $0xe4] ss:$16 sps:$4 sm:$0xff]  }
 0x659   : > { %v3928_v14 = vsel %vm3573_vm2, %v3923_v11, 0  ;;  %v15620_v11 = vld [vmem:[#allocation11 + $0xe0] ss:$16 sps:$4 sm:$0xff]  }
 0x65a   : > { %v3799_v13 = vpack.c.bf16 %v3798_v10, %v3798_v10  ;;  %v15625_v10 = vld [vmem:[#allocation11 + $0xec] ss:$16 sps:$4 sm:$0xff]  }
 0x65c   : > { %13751 = vst.msk [vmem:[%s17667_s11 + $0x8] sm:$0xf] %vm3568_vm4, %v3799_v13 }
 0x65d   : > { %15006 = vmatmul.mubr.msk.bf16.vlgmr.msra.gmra.mrb[20].mxu1 %vm3555_vm3, %v3799_v13  ;;  %v15623_v13 = vld [vmem:[#allocation11 + $0xe8] ss:$16 sps:$4 sm:$0xff]  }
 0x65e   : > { %15016 = vmatpush3.bf16.msra.mxu1 %v3928_v14  ;;  %15017 = vmatprep.mubr.msk.bf16.mxu1 %vm17047_vm1, %v17046_v24  ;;  %v15628_v14 = vld [vmem:[#allocation11 + $0x104] ss:$16 sps:$4 sm:$0xff]  }
 0x65f   : > { %v16561_v16 = vpop.eup %16560  ;;  %15027 = vmatprep.subr.bf16.mxu1 %v17046_v24 }
 0x660   : > { %v3915_v17 = vmul.f32 %v16561_v16, %v17657_v36  ;;  %v15631_v16 = vld [vmem:[#allocation11 + $0x10c] ss:$16 sps:$4 sm:$0xff]  }
 0x662   : > { %v3916_v18 = vpack.c.bf16 %v3915_v17, %v3915_v17  ;;  %v15626_v17 = vld [vmem:[#allocation11 + $0x100] ss:$16 sps:$4 sm:$0xff]  }
 0x664   : > { %13755 = vst.msk [vmem:[%s17667_s11 + $0xc] sm:$0xf] %vm3568_vm4, %v3916_v18 }
 0x665   : > { %15018 = vmatmul.mubr.msk.bf16.vlgmr.msra.gmra.mrb[24].mxu1 %vm3555_vm3, %v3916_v18  ;;  %v15629_v18 = vld [vmem:[#allocation11 + $0x108] ss:$16 sps:$4 sm:$0xff]  }
 0x666   : > { %15028 = vmatpush3.bf16.msra.mxu1 %v4037_v20  ;;  %15029 = vmatprep.mubr.msk.bf16.mxu1 %vm17047_vm1, %v17046_v24  ;;  %v15637_v20 = vld [vmem:[#allocation11 + $0x12c] ss:$16 sps:$4 sm:$0xff]  }
 0x667   : > { %15039 = vmatprep.subr.bf16.mxu1 %v17046_v24 }
 0x681   : > { %v4027_v21 = vpop.xlane.xlu1 %4026 }
 0x682   : > { %16562 = vrcp.f32 %v4027_v21  ;;  %v15632_v21 = vld [vmem:[#allocation11 + $0x120] ss:$16 sps:$4 sm:$0xff]  }
 0x685   : > { %v4258_v22 = vpop.xlane.xlu1 %4257 }
 0x686   : > { %16564 = vrcp.f32 %v4258_v22  ;;  %v15635_v22 = vld [vmem:[#allocation11 + $0x128] ss:$16 sps:$4 sm:$0xff]  }
 0x689   : > { %v4144_v23 = vpop.xlane.xlu0 %4143  ;;  %v4154_v30 = vpop.permute.xlu1 %4153 }
 0x68a   : > { %16566 = vrcp.f32 %v4144_v23  ;;  %v4159_v15 = vsel %vm3573_vm2, %v4154_v30, 0  ;;  %v15640_v23 = vld [vmem:[#allocation11 + $0x144] ss:$16 sps:$4 sm:$0xff]  }
 0x68b   : > { %v15646_v30 = vld [vmem:[#allocation11 + $0x164] ss:$16 sps:$4 sm:$0xff]  }
 0x68c   : > { %v16563_v25 = vpop.eup %16562 }
 0x68d   : > { %v4029_v27 = vmul.f32 %v16563_v25, %v17675_v52  ;;  %v4375_v29 = vpop.xlane.xlu0 %4374  ;;  %v15589_v52 = vld [vmem:[#allocation11 + $0x2c] ss:$16 sps:$4 sm:$0xff]  }
 0x68e   : > { %16568 = vrcp.f32 %v4375_v29  ;;  %v15643_v25 = vld [vmem:[#allocation11 + $0x14c] ss:$16 sps:$4 sm:$0xff]   ;;  %v15641_v29 = vld [vmem:[#allocation11 + $0x148] ss:$16 sps:$4 sm:$0xff]  }
 0x68f   : > { %v4030_v31 = vpack.c.bf16 %v4029_v27, %v4029_v27  ;;  %v15638_v27 = vld [vmem:[#allocation11 + $0x140] ss:$16 sps:$4 sm:$0xff]  }
 0x690   : > { %v16565_v32 = vpop.eup %16564 }
 0x691   : > { %v4260_v33 = vmul.f32 %v16565_v32, %v17679_v55  ;;  %13759 = vst.msk [vmem:[%s17667_s11 + $0x10] sm:$0xf] %vm3568_vm4, %v4030_v31  ;;  %15030 = vmatmul.mubr.msk.bf16.vlgmr.msra.gmra.mrb[28].mxu1 %vm3555_vm3, %v4030_v31  ;;  %v4385_v42 = vpop.permute.xlu0 %4384  ;;  %v15590_v55 = vld [vmem:[#allocation11 + $0x40] ss:$16 sps:$4 sm:$0xff]   ;;  %v15649_v31 = vld [vmem:[#allocation11 + $0x16c] ss:$16 sps:$4 sm:$0xff]  }
 0x692   : > { %15040 = vmatpush3.bf16.msra.mxu1 %v4159_v15  ;;  %15041 = vmatprep.mubr.msk.bf16.mxu1 %vm17047_vm1, %v17046_v24  ;;  %v4390_v43 = vsel %vm3573_vm2, %v4385_v42, 0  ;;  %v15644_v32 = vld [vmem:[#allocation11 + $0x160] ss:$16 sps:$4 sm:$0xff]   ;;  %v15652_v15 = vld [vmem:[#allocation11 + $0x184] ss:$16 sps:$4 sm:$0xff]  }
 0x693   : > { %15051 = vmatprep.subr.bf16.mxu1 %v17046_v24  ;;  %v4261_v34 = vpack.c.bf16 %v4260_v33, %v4260_v33  ;;  %v15647_v33 = vld [vmem:[#allocation11 + $0x168] ss:$16 sps:$4 sm:$0xff]   ;;  %v15667_v42 = vld [vmem:[#allocation11 + $0x1cc] ss:$16 sps:$4 sm:$0xff]  }
 0x694   : > { %v16567_v35 = vpop.eup %16566 }
 0x695   : > { %v4146_v36 = vmul.f32 %v16567_v35, %v17683_v53  ;;  %13767 = vst.msk [vmem:[%s17667_s11 + $0x18] sm:$0xf] %vm3568_vm4, %v4261_v34  ;;  %v15596_v53 = vld [vmem:[#allocation11 + $0x60] ss:$16 sps:$4 sm:$0xff]  }
 0x696   : > { %v15650_v35 = vld [vmem:[#allocation11 + $0x180] ss:$16 sps:$4 sm:$0xff]  }
 0x697   : > { %v4147_v26 = vpack.c.bf16 %v4146_v36, %v4146_v36  ;;  %v15653_v36 = vld [vmem:[#allocation11 + $0x188] ss:$16 sps:$4 sm:$0xff]  }
 0x698   : > { %v16569_v38 = vpop.eup %16568 }
 0x699   : > { %v4377_v39 = vmul.f32 %v16569_v38, %v17687_v59  ;;  %13763 = vst.msk [vmem:[%s17667_s11 + $0x14] sm:$0xf] %vm3568_vm4, %v4147_v26  ;;  %15042 = vmatmul.mubr.msk.bf16.vlgmr.msra.gmra.mrb[32].mxu1 %vm3555_vm3, %v4147_v26  ;;  %v15599_v59 = vld [vmem:[#allocation11 + $0x68] ss:$16 sps:$4 sm:$0xff]   ;;  %v15661_v26 = vld [vmem:[#allocation11 + $0x1ac] ss:$16 sps:$4 sm:$0xff]  }
 0x69a   : > { %15052 = vmatpush3.bf16.msra.mxu1 %v4268_v40  ;;  %15053 = vmatprep.mubr.msk.bf16.mxu1 %vm17047_vm1, %v17046_v24  ;;  %v15656_v38 = vld [vmem:[#allocation11 + $0x1a0] ss:$16 sps:$4 sm:$0xff]   ;;  %v15664_v40 = vld [vmem:[#allocation11 + $0x1c4] ss:$16 sps:$4 sm:$0xff]  }
 0x69b   : > { %15063 = vmatprep.subr.bf16.mxu1 %v17046_v24  ;;  %v4378_v41 = vpack.c.bf16 %v4377_v39, %v4377_v39  ;;  %v15659_v39 = vld [vmem:[#allocation11 + $0x1a8] ss:$16 sps:$4 sm:$0xff]  }
 0x69d   : > { %13771 = vst.msk [vmem:[%s17667_s11 + $0x1c] sm:$0xf] %vm3568_vm4, %v4378_v41 }
 0x6a1   : > { %15054 = vmatmul.mubr.msk.bf16.vlgmr.msra.gmra.mrb[36].mxu1 %vm3555_vm3, %v4261_v34  ;;  %v15655_v34 = vld [vmem:[#allocation11 + $0x18c] ss:$16 sps:$4 sm:$0xff]  }
 0x6a2   : > { %15064 = vmatpush3.bf16.msra.mxu1 %v4390_v43  ;;  %15065 = vmatprep.mubr.msk.bf16.mxu1 %vm17047_vm1, %v17046_v24  ;;  %v15592_v24 = vld [vmem:[#allocation11 + $0x44] ss:$16 sps:$4 sm:$0xff]  }
 0x6a3   : > { %5315 = vmatprep.subr.bf16.mxu1 %v15583_v49  ;;  %5237 = vmatprep.subr.bf16.mxu0 %v15592_v24  ;;  %v15671_v49 = vld [vmem:[#allocation11 + $0x1e8] ss:$16 sps:$4 sm:$0xff]  }
 0x6a4   : > { %5238 = vmatpush1.bf16.msra.mxu0 %v15590_v55  ;;  %v15679_v55 = vld [vmem:[#allocation11 + $0x20c] ss:$16 sps:$4 sm:$0xff]  }
 0x6a5   : > { %5239 = vmatprep.subr.bf16.mxu0 %v15598_v58 }
 0x6a8   : > { %5240 = vmatpush1.bf16.msra.mxu0 %v15596_v53 }
 0x6a9   : > { %15066 = vmatmul.mubr.msk.bf16.vlgmr.msra.gmra.mrb[40].mxu1 %vm3555_vm3, %v4378_v41  ;;  %5241 = vmatprep.subr.bf16.mxu0 %v15604_v61 }
 0x6aa   : > { %5316 = vmatpush1.bf16.msra.mxu1 %v15581_v48  ;;  %v15668_v48 = vld [vmem:[#allocation11 + $0x1e0] ss:$16 sps:$4 sm:$0xff]  }
 0x6ab   : > { %5317 = vmatprep.subr.bf16.mxu1 %v15589_v52 }
 0x6ac   : > { %5242 = vmatpush1.bf16.msra.mxu0 %v15602_v63 }
 0x6ad   : > { %5243 = vmatprep.subr.bf16.mxu0 %v15610_v1 }
 0x6ae   : > { %5318 = vmatpush1.bf16.msra.mxu1 %v15587_v57 }
 0x6af   : > { %5319 = vmatprep.subr.bf16.mxu1 %v15595_v54  ;;  %v15676_v54 = vld [vmem:[#allocation11 + $0x204] ss:$16 sps:$4 sm:$0xff]  }
 0x6b0   : > { %5244 = vmatpush1.bf16.msra.mxu0 %v15608_v3 }
 0x6b1   : > { %5245 = vmatprep.subr.bf16.mxu0 %v15616_v5 }
 0x6b2   : > { %5320 = vmatpush1.bf16.msra.mxu1 %v15593_v56 }
 0x6b3   : > { %5321 = vmatprep.subr.bf16.mxu1 %v15601_v60 }
 0x6b4   : > { %5246 = vmatpush1.bf16.msra.mxu0 %v15614_v7 }
 0x6b5   : > { %v17746_v44 = vpop.f32.mrb[12].mxu1  ;;  %5247 = vmatprep.subr.bf16.mxu0 %v15622_v9 }
 0x6b6   : > { %v14983_v45 = vpop.f32.mrb[13].mxu1  ;;  %5322 = vmatpush1.bf16.msra.mxu1 %v15599_v59 }
 0x6b7   : > { %v3614_v28 = vpop.f32.mrb[14].mxu1  ;;  %5323 = vmatprep.subr.bf16.mxu1 %v15607_v62 }
 0x6b8   : > { %v14984_v46 = vpop.f32.mrb[15].mxu1  ;;  %5248 = vmatpush1.bf16.msra.mxu0 %v15620_v11  ;;  %v15662_v28 = vld [vmem:[#allocation11 + $0x1c0] ss:$16 sps:$4 sm:$0xff]  }
 0x6b9   : > { %5249 = vmatprep.subr.bf16.mxu0 %v15628_v14 }
 0x6ba   : > { %5324 = vmatpush1.bf16.msra.mxu1 %v15605_v0 }
 0x6bb   : > { %5325 = vmatprep.subr.bf16.mxu1 %v15613_v2 }
 0x6bc   : > { %5250 = vmatpush1.bf16.msra.mxu0 %v15626_v17 }
 0x6bd   : > { %5251 = vmatprep.subr.bf16.mxu0 %v15634_v19 }
 0x6be   : > { %5326 = vmatpush1.bf16.msra.mxu1 %v15611_v4 }
 0x6bf   : > { %5327 = vmatprep.subr.bf16.mxu1 %v15619_v6 }
 0x6c0   : > { %5252 = vmatpush1.bf16.msra.mxu0 %v15632_v21  ;;  %v3617_v21 = vpack.c.bf16 %v17746_v44, %v17746_v44  ;;  %v15686_v44 = vld [vmem:[#allocation11 + $0x240] ss:$16 sps:$4 sm:$0xff]  }
 0x6c1   : > { %5253 = vmatprep.subr.bf16.mxu0 %v15640_v23  ;;  %v15677_v23 = vld [vmem:[#allocation11 + $0x208] ss:$16 sps:$4 sm:$0xff]  }
 0x6c2   : > { %5328 = vmatpush1.bf16.msra.mxu1 %v15617_v8 }
 0x6c3   : > { %5329 = vmatprep.subr.bf16.mxu1 %v15625_v10 }
 0x6c4   : > { %5254 = vmatpush1.bf16.msra.mxu0 %v15638_v27  ;;  %v15682_v27 = vld [vmem:[#allocation11 + $0x224] ss:$16 sps:$4 sm:$0xff]  }
 0x6c5   : > { %5255 = vmatprep.subr.bf16.mxu0 %v15646_v30 }
 0x6c6   : > { %5330 = vmatpush1.bf16.msra.mxu1 %v15623_v13 }
 0x6c7   : > { %5331 = vmatprep.subr.bf16.mxu1 %v15631_v16 }
 0x6c8   : > { %5256 = vmatpush1.bf16.msra.mxu0 %v15644_v32  ;;  %v15683_v32 = vld [vmem:[#allocation11 + $0x228] ss:$16 sps:$4 sm:$0xff]  }
 0x6c9   : > { %5257 = vmatprep.subr.bf16.mxu0 %v15652_v15  ;;  %v15691_v15 = vld [vmem:[#allocation11 + $0x24c] ss:$16 sps:$4 sm:$0xff]  }
 0x6ca   : > { %5332 = vmatpush1.bf16.msra.mxu1 %v15629_v18 }
 0x6cb   : > { %5333 = vmatprep.subr.bf16.mxu1 %v15637_v20 }
 0x6cc   : > { %5258 = vmatpush1.bf16.msra.mxu0 %v15650_v35  ;;  %v15694_v35 = vld [vmem:[#allocation11 + $0x264] ss:$16 sps:$4 sm:$0xff]  }
 0x6cd   : > { %5259 = vmatprep.subr.bf16.mxu0 %v15658_v37  ;;  %v15692_v37 = vld [vmem:[#allocation11 + $0x260] ss:$16 sps:$4 sm:$0xff]  }
 0x6ce   : > { %5334 = vmatpush1.bf16.msra.mxu1 %v15635_v22  ;;  %v15674_v22 = vld [vmem:[#allocation11 + $0x200] ss:$16 sps:$4 sm:$0xff]  }
 0x6cf   : > { %5335 = vmatprep.subr.bf16.mxu1 %v15643_v25 }
 0x6d0   : > { %5260 = vmatpush1.bf16.msra.mxu0 %v15656_v38  ;;  %v15700_v38 = vld [vmem:[#allocation11 + $0x284] ss:$16 sps:$4 sm:$0xff]  }
 0x6d1   : > { %5261 = vmatprep.subr.bf16.mxu0 %v15664_v40  ;;  %v15698_v40 = vld [vmem:[#allocation11 + $0x280] ss:$16 sps:$4 sm:$0xff]  }
 0x6d2   : > { %5336 = vmatpush1.bf16.msra.mxu1 %v15641_v29  ;;  %v15685_v29 = vld [vmem:[#allocation11 + $0x22c] ss:$16 sps:$4 sm:$0xff]  }
 0x6d3   : > { %5337 = vmatprep.subr.bf16.mxu1 %v15649_v31  ;;  %v15680_v31 = vld [vmem:[#allocation11 + $0x220] ss:$16 sps:$4 sm:$0xff]  }
 0x6d4   : > { %5262 = vmatpush1.bf16.msra.mxu0 %v15662_v28  ;;  %v15707_v28 = vld [vmem:[#allocation11 + $0x2a8] ss:$16 sps:$4 sm:$0xff]  }
 0x6d5   : > { %5263 = vmatprep.subr.bf16.mxu0 %v15670_v47  ;;  %v15710_v47 = vld [vmem:[#allocation11 + $0x2c0] ss:$16 sps:$4 sm:$0xff]  }
 0x6d6   : > { %5338 = vmatpush1.bf16.msra.mxu1 %v15647_v33  ;;  %v15688_v33 = vld [vmem:[#allocation11 + $0x244] ss:$16 sps:$4 sm:$0xff]  }
 0x6d7   : > { %5339 = vmatprep.subr.bf16.mxu1 %v15655_v34  ;;  %v15689_v34 = vld [vmem:[#allocation11 + $0x248] ss:$16 sps:$4 sm:$0xff]  }
 0x6d8   : > { %5264 = vmatpush1.bf16.msra.mxu0 %v15668_v48  ;;  %v15713_v48 = vld [vmem:[#allocation11 + $0x2c8] ss:$16 sps:$4 sm:$0xff]  }
 0x6d9   : > { %5274 = vmatprep.subr.bf16.mxu0 %v15676_v54  ;;  %v15722_v54 = vld [vmem:[#allocation11 + $0x300] ss:$16 sps:$4 sm:$0xff]  }
 0x6da   : > { %5340 = vmatpush1.bf16.msra.mxu1 %v15653_v36  ;;  %v15697_v36 = vld [vmem:[#allocation11 + $0x26c] ss:$16 sps:$4 sm:$0xff]  }
 0x6db   : > { %5341 = vmatprep.subr.bf16.mxu1 %v15661_v26  ;;  %v15695_v26 = vld [vmem:[#allocation11 + $0x268] ss:$16 sps:$4 sm:$0xff]  }
 0x6de   : > { %5342 = vmatpush1.bf16.msra.mxu1 %v15659_v39  ;;  %v15703_v39 = vld [vmem:[#allocation11 + $0x28c] ss:$16 sps:$4 sm:$0xff]  }
 0x6df   : > { %5343 = vmatprep.subr.bf16.mxu1 %v15667_v42  ;;  %v15706_v42 = vld [vmem:[#allocation11 + $0x2a4] ss:$16 sps:$4 sm:$0xff]  }
 0x6e2   : > { %5344 = vmatpush1.bf16.msra.mxu1 %v15665_v12  ;;  %v15715_v12 = vld [vmem:[#allocation11 + $0x2cc] ss:$16 sps:$4 sm:$0xff]  }
 0x6e3   : > { %5345 = vmatprep.subr.bf16.mxu1 %v15673_v50  ;;  %v15721_v50 = vld [vmem:[#allocation11 + $0x2ec] ss:$16 sps:$4 sm:$0xff]  }
 0x6e6   : > { %5346 = vmatpush1.bf16.msra.mxu1 %v15671_v49  ;;  %v15718_v49 = vld [vmem:[#allocation11 + $0x2e4] ss:$16 sps:$4 sm:$0xff]  }
 0x6e7   : > { %5356 = vmatprep.subr.bf16.mxu1 %v15679_v55  ;;  %v15725_v55 = vld [vmem:[#allocation11 + $0x308] ss:$16 sps:$4 sm:$0xff]  }
 0x728   : > { %v3733_v41 = vpop.f32.mrb[16].mxu1 }
 0x729   : > { %v14995_v43 = vpop.f32.mrb[17].mxu1  ;;  %v3739_v61 = vpack.c.bf16 %v3733_v41, %v3733_v41  ;;  %v15701_v41 = vld [vmem:[#allocation11 + $0x288] ss:$16 sps:$4 sm:$0xff]  }
 0x72a   : > { %v3736_v45 = vpop.f32.mrb[18].mxu1  ;;  %v15709_v43 = vld [vmem:[#allocation11 + $0x2ac] ss:$16 sps:$4 sm:$0xff]  }
 0x72b   : > { %v14996_v46 = vpop.f32.mrb[19].mxu1  ;;  %v15704_v45 = vld [vmem:[#allocation11 + $0x2a0] ss:$16 sps:$4 sm:$0xff]  }
 0x72c   : > { %v15712_v46 = vld [vmem:[#allocation11 + $0x2c4] ss:$16 sps:$4 sm:$0xff]  }
 0x730   : > { %v3842_v51 = vpop.f32.mrb[20].mxu1 }
 0x731   : > { %v15007_v57 = vpop.f32.mrb[21].mxu1  ;;  %v3848_v18 = vpack.c.bf16 %v3842_v51, %v3842_v51  ;;  %v15716_v51 = vld [vmem:[#allocation11 + $0x2e0] ss:$16 sps:$4 sm:$0xff]  }
 0x732   : > { %v3845_v52 = vpop.f32.mrb[22].mxu1  ;;  %v15719_v57 = vld [vmem:[#allocation11 + $0x2e8] ss:$16 sps:$4 sm:$0xff]  }
 0x733   : > { %v15008_v24 = vpop.f32.mrb[23].mxu1  ;;  %v15724_v52 = vld [vmem:[#allocation11 + $0x304] ss:$16 sps:$4 sm:$0xff]  }
 0x734   : > { %v15727_v24 = vld [vmem:[#allocation11 + $0x30c] ss:$16 sps:$4 sm:$0xff]  }
 0x738   : > { %v3964_v56 = vpop.f32.mrb[24].mxu1 }
 0x739   : > { %v3970_v53 = vpack.c.bf16 %v3964_v56, %v3964_v56  ;;  %v15019_v58 = vpop.f32.mrb[25].mxu1  ;;  %v15730_v56 = vld [vmem:[#allocation11 + $0x324] ss:$16 sps:$4 sm:$0xff]  }
 0x73a   : > { %v3967_v59 = vpop.f32.mrb[26].mxu1  ;;  %v15728_v58 = vld [vmem:[#allocation11 + $0x320] ss:$16 sps:$4 sm:$0xff]  }
 0x73b   : > { %4441 = vrot.lane.b32.xlu1 %v3970_v53, %s17045_s27  ;;  %v15020_v60 = vpop.f32.mrb[27].mxu1  ;;  %v15733_v53 = vld [vmem:[#allocation11 + $0x32c] ss:$16 sps:$4 sm:$0xff]   ;;  %v15731_v59 = vld [vmem:[#allocation11 + $0x328] ss:$16 sps:$4 sm:$0xff]  }
 0x73c   : > { %v15736_v60 = vld [vmem:[#allocation11 + $0x344] ss:$16 sps:$4 sm:$0xff]  }
 0x73f   : > { %4434 = vrot.lane.b32.xlu1 %v3739_v61, %s17045_s27  ;;  %v15739_v61 = vld [vmem:[#allocation11 + $0x34c] ss:$16 sps:$4 sm:$0xff]  }
 0x764   : > { %v17750_v62 = vpop.f32.mrb[28].mxu1 }
 0x765   : > { %v15031_v63 = vpop.f32.mrb[29].mxu1 }
 0x766   : > { %v4076_v0 = vpop.f32.mrb[30].mxu1  ;;  %v15734_v63 = vld [vmem:[#allocation11 + $0x340] ss:$16 sps:$4 sm:$0xff]  }
 0x767   : > { %v15032_v1 = vpop.f32.mrb[31].mxu1  ;;  %v15737_v0 = vld [vmem:[#allocation11 + $0x348] ss:$16 sps:$4 sm:$0xff]  }
 0x768   : > { %v15742_v1 = vld [vmem:[#allocation11 + $0x364] ss:$16 sps:$4 sm:$0xff]  }
 0x76c   : > { %v4195_v2 = vpop.f32.mrb[32].mxu1 }
 0x76d   : > { %v4201_v3 = vpack.c.bf16 %v4195_v2, %v4195_v2  ;;  %v15043_v4 = vpop.f32.mrb[33].mxu1  ;;  %v15745_v2 = vld [vmem:[#allocation11 + $0x36c] ss:$16 sps:$4 sm:$0xff]  }
 0x76e   : > { %v4198_v5 = vpop.f32.mrb[34].mxu1  ;;  %v15743_v4 = vld [vmem:[#allocation11 + $0x368] ss:$16 sps:$4 sm:$0xff]  }
 0x76f   : > { %4448 = vrot.lane.b32.xlu1 %v4201_v3, %s17045_s27  ;;  %v15044_v6 = vpop.f32.mrb[35].mxu1  ;;  %v15740_v3 = vld [vmem:[#allocation11 + $0x360] ss:$16 sps:$4 sm:$0xff]   ;;  %v15748_v5 = vld [vmem:[#allocation11 + $0x384] ss:$16 sps:$4 sm:$0xff]  }
 0x770   : > { %v15751_v6 = vld [vmem:[#allocation11 + $0x38c] ss:$16 sps:$4 sm:$0xff]  }
 0x774   : > { %v17753_v7 = vpop.f32.mrb[36].mxu1 }
 0x775   : > { %v15055_v8 = vpop.f32.mrb[37].mxu1 }
 0x776   : > { %v4307_v9 = vpop.f32.mrb[38].mxu1  ;;  %v15746_v8 = vld [vmem:[#allocation11 + $0x380] ss:$16 sps:$4 sm:$0xff]  }
 0x777   : > { %v15056_v10 = vpop.f32.mrb[39].mxu1  ;;  %v15749_v9 = vld [vmem:[#allocation11 + $0x388] ss:$16 sps:$4 sm:$0xff]  }
 0x778   : > { %v15754_v10 = vld [vmem:[#allocation11 + $0x3a4] ss:$16 sps:$4 sm:$0xff]  }
 0x77c   : > { %v4426_v11 = vpop.f32.mrb[40].mxu1 }
 0x77d   : > { %v4432_v13 = vpack.c.bf16 %v4426_v11, %v4426_v11  ;;  %v15067_v14 = vpop.f32.mrb[41].mxu1  ;;  %v15757_v11 = vld [vmem:[#allocation11 + $0x3ac] ss:$16 sps:$4 sm:$0xff]  }
 0x77e   : > { %v4429_v16 = vpop.f32.mrb[42].mxu1  ;;  %v15755_v14 = vld [vmem:[#allocation11 + $0x3a8] ss:$16 sps:$4 sm:$0xff]  }
 0x77f   : > { %4455 = vrot.lane.b32.xlu0 %v4432_v13, %s17045_s27  ;;  %v15068_v17 = vpop.f32.mrb[43].mxu1  ;;  %v15752_v13 = vld [vmem:[#allocation11 + $0x3a0] ss:$16 sps:$4 sm:$0xff]   ;;  %v15760_v16 = vld [vmem:[#allocation11 + $0x3c4] ss:$16 sps:$4 sm:$0xff]  }
 0x780   : > { %v15763_v17 = vld [vmem:[#allocation11 + $0x3cc] ss:$16 sps:$4 sm:$0xff]  }
 0x7ad   : > { %v4442_v19 = vpop.permute.xlu1 %4441 }
 0x7ae   : > { %v4445_v20 = vsel %vm3508_vm0, %v3848_v18, %v4442_v19  ;;  %v15758_v18 = vld [vmem:[#allocation11 + $0x3c0] ss:$16 sps:$4 sm:$0xff]   ;;  %v15761_v19 = vld [vmem:[#allocation11 + $0x3c8] ss:$16 sps:$4 sm:$0xff]  }
 0x7af   : > { %5265 = vmatprep.mubr.bf16.mxu0 %v4445_v20  ;;  %5347 = vmatprep.mubr.bf16.mxu1 %v4445_v20  ;;  %v15766_v20 = vld [vmem:[#allocation11 + $0x3e4] ss:$16 sps:$4 sm:$0xff]  }
 0x7b1   : > { %v4435_v25 = vpop.permute.xlu1 %4434 }
 0x7b2   : > { %v4438_v30 = vsel %vm3508_vm0, %v3617_v21, %v4435_v25  ;;  %v15769_v21 = vld [vmem:[#allocation11 + $0x3ec] ss:$16 sps:$4 sm:$0xff]   ;;  %v4310_v25 = vpack.c.bf16 %v17753_v7, %v17753_v7 }
 0x7b3   : > { %5266 = vmatmul.mubr.bf16.vlgmr.msra.gmra.mrb[44].mxu0 %v4438_v30  ;;  %5348 = vmatmul.mubr.bf16.vlgmr.msra.gmra.mrb[44].mxu1 %v4438_v30 }
 0x7b4   : > { %5275 = vmatpush1.bf16.msra.mxu0 %v15674_v22  ;;  %5357 = vmatpush1.bf16.msra.mxu1 %v15677_v23  ;;  %v15764_v22 = vld [vmem:[#allocation11 + $0x3e0] ss:$16 sps:$4 sm:$0xff]   ;;  %v15767_v23 = vld [vmem:[#allocation11 + $0x3e8] ss:$16 sps:$4 sm:$0xff]  }
 0x7b5   : > { %5276 = vmatprep.subr.bf16.mxu0 %v15682_v27  ;;  %5358 = vmatprep.subr.bf16.mxu1 %v15685_v29  ;;  %v4079_v29 = vpack.c.bf16 %v17750_v62, %v17750_v62 }
 0x7b8   : > { %5277 = vmatpush1.bf16.msra.mxu0 %v15680_v31  ;;  %5359 = vmatpush1.bf16.msra.mxu1 %v15683_v32 }
 0x7b9   : > { %5278 = vmatprep.subr.bf16.mxu0 %v15688_v33  ;;  %5360 = vmatprep.subr.bf16.mxu1 %v15691_v15  ;;  %v16574_v33 = vld [vmem:[%s17494_s29] sm:$0xff] }
 0x7ba   : > { %v4589_v15 = vunpack.c.l.bf16 %v16574_v33 }
 0x7bc   : > { %5279 = vmatpush1.bf16.msra.mxu0 %v15686_v44  ;;  %5361 = vmatpush1.bf16.msra.mxu1 %v15689_v34  ;;  %v4590_v44 = vunpack.c.h.bf16 %v16574_v33  ;;  %v16575_v34 = vld [vmem:[%s17494_s29 + $0x8] sm:$0xff]  ;;  %s17048_s29 = smov [#allocation22]  }
 0x7bd   : > { %5280 = vmatprep.subr.bf16.mxu0 %v15694_v35  ;;  %5362 = vmatprep.subr.bf16.mxu1 %v15697_v36  ;;  %v4591_v35 = vunpack.c.l.bf16 %v16575_v34  ;;  %s16892_s0 = sshll.u32 %s17048_s29, 4  ;;  %s16893_s0 = int_to_ptr.vmem [resolvable:$false] %s16892_s0 }
 0x7be   : > { %s16894_s6 = scalar_lea.vmem %s16893_s0, 1024  ;;  %p16895_p10 = scmp.lt.s32.totalorder %s17937_s7, %s16893_s0 }
 0x7bf   : > { %p16896_p11 = scmp.lt.s32.totalorder %s16894_s6, %s16888_s14 }
 0x7c0   : > { %5281 = vmatpush1.bf16.msra.mxu0 %v15692_v37  ;;  %5363 = vmatpush1.bf16.msra.mxu1 %v15695_v26 }
 0x7c1   : > { %5282 = vmatprep.subr.bf16.mxu0 %v15700_v38  ;;  %5364 = vmatprep.subr.bf16.mxu1 %v15703_v39  ;;  %v4592_v39 = vunpack.c.h.bf16 %v16575_v34  ;;  %v5584_v34 = vld [vmem:[#allocation15 + $0x340] sm:$0xff]  ;;  %p16897_p9 = por %p16896_p11, %p16895_p10 }
 0x7c3   : > { %p16898_p8 = pnand %p16897_p9, %p16891_p6 }
 0x7c4   : > { %5283 = vmatpush1.bf16.msra.mxu0 %v15698_v40  ;;  %5365 = vmatpush1.bf16.msra.mxu1 %v15701_v41 }
 0x7c5   : > { %5284 = vmatprep.subr.bf16.mxu0 %v15706_v42  ;;  %5366 = vmatprep.subr.bf16.mxu1 %v15709_v43 }
 0x7c8   : > { %5285 = vmatpush1.bf16.msra.mxu0 %v15704_v45  ;;  %5367 = vmatpush1.bf16.msra.mxu1 %v15707_v28 }
 0x7c9   : > { %5286 = vmatprep.subr.bf16.mxu0 %v15712_v46  ;;  %5368 = vmatprep.subr.bf16.mxu1 %v15715_v12 }
 0x7cc   : > { %5287 = vmatpush1.bf16.msra.mxu0 %v15710_v47  ;;  %5369 = vmatpush1.bf16.msra.mxu1 %v15713_v48  ;;  %v5480_v48 = vld [vmem:[#allocation15] sm:$0xff] }
 0x7cd   : > { %5288 = vmatprep.subr.bf16.mxu0 %v15718_v49  ;;  %5370 = vmatprep.subr.bf16.mxu1 %v15721_v50  ;;  %v5488_v49 = vld [vmem:[#allocation15 + $0x40] sm:$0xff]  ;;  %v5481_v50 = vld [vmem:[#allocation15 + $0x8] sm:$0xff] }
 0x7d0   : > { %5289 = vmatpush1.bf16.msra.mxu0 %v15716_v51  ;;  %5371 = vmatpush1.bf16.msra.mxu1 %v15719_v57  ;;  %v13902_v51 = vcombine.low %v5480_v48, %v5488_v49  ;;  %v13903_v57 = vcombine.high %v5480_v48, %v5488_v49 }
 0x7d1   : > { %5290 = vmatprep.subr.bf16.mxu0 %v15724_v52  ;;  %5372 = vmatprep.subr.bf16.mxu1 %v15727_v24  ;;  %v5489_v52 = vld [vmem:[#allocation15 + $0x48] sm:$0xff]  ;;  %v5496_v24 = vld [vmem:[#allocation15 + $0x80] sm:$0xff] }
 0x7d4   : > { %5291 = vmatpush1.bf16.msra.mxu0 %v15722_v54  ;;  %5373 = vmatpush1.bf16.msra.mxu1 %v15725_v55  ;;  %v5504_v54 = vld [vmem:[#allocation15 + $0xc0] sm:$0xff]  ;;  %v13904_v55 = vcombine.low %v5481_v50, %v5489_v52 }
 0x7d5   : > { %5292 = vmatprep.subr.bf16.mxu0 %v15730_v56  ;;  %5374 = vmatprep.subr.bf16.mxu1 %v15733_v53  ;;  %v13905_v56 = vcombine.high %v5481_v50, %v5489_v52  ;;  %v13919_v53 = vcombine.high %v5496_v24, %v5504_v54  ;;  %v5608_v50 = vld [vmem:[#allocation15 + $0x400] sm:$0xff]  ;;  %v5617_v52 = vld [vmem:[#allocation15 + $0x448] sm:$0xff] }
 0x7d8   : > { %5293 = vmatpush1.bf16.msra.mxu0 %v15728_v58  ;;  %5375 = vmatpush1.bf16.msra.mxu1 %v15731_v59  ;;  %v5497_v58 = vld [vmem:[#allocation15 + $0x88] sm:$0xff] }
 0x7d9   : > { %5294 = vmatprep.subr.bf16.mxu0 %v15736_v60  ;;  %5376 = vmatprep.subr.bf16.mxu1 %v15739_v61  ;;  %v5505_v59 = vld [vmem:[#allocation15 + $0xc8] sm:$0xff]  ;;  %v5512_v60 = vld [vmem:[#allocation15 + $0x100] sm:$0xff] }
 0x7da   : > { %v13921_v61 = vcombine.high %v5497_v58, %v5505_v59 }
 0x7dc   : > { %5295 = vmatpush1.bf16.msra.mxu0 %v15734_v63  ;;  %5377 = vmatpush1.bf16.msra.mxu1 %v15737_v0  ;;  %v5520_v63 = vld [vmem:[#allocation15 + $0x140] sm:$0xff]  ;;  %v5513_v0 = vld [vmem:[#allocation15 + $0x108] sm:$0xff] }
 0x7dd   : > { %5296 = vmatprep.subr.bf16.mxu0 %v15742_v1  ;;  %5378 = vmatprep.subr.bf16.mxu1 %v15745_v2  ;;  %v5521_v1 = vld [vmem:[#allocation15 + $0x148] sm:$0xff]  ;;  %v13918_v2 = vcombine.low %v5496_v24, %v5504_v54 }
 0x7e0   : > { %5297 = vmatpush1.bf16.msra.mxu0 %v15740_v3  ;;  %5379 = vmatpush1.bf16.msra.mxu1 %v15743_v4  ;;  %v13920_v3 = vcombine.low %v5497_v58, %v5505_v59  ;;  %v13935_v4 = vcombine.high %v5512_v60, %v5520_v63  ;;  %v5632_v58 = vld [vmem:[#allocation15 + $0x4c0] sm:$0xff]  ;;  %v5625_v59 = vld [vmem:[#allocation15 + $0x488] sm:$0xff] }
 0x7e1   : > { %5298 = vmatprep.subr.bf16.mxu0 %v15748_v5  ;;  %5380 = vmatprep.subr.bf16.mxu1 %v15751_v6  ;;  %v4449_v27 = vpop.permute.xlu1 %4448  ;;  %v13937_v5 = vcombine.high %v5513_v0, %v5521_v1  ;;  %v5528_v6 = vld [vmem:[#allocation15 + $0x180] sm:$0xff] }
 0x7e2   : > { %v4452_v32 = vsel %vm3508_vm0, %v4079_v29, %v4449_v27  ;;  %v5560_v27 = vld [vmem:[#allocation15 + $0x280] sm:$0xff] }
 0x7e3   : > { %v5568_v29 = vld [vmem:[#allocation15 + $0x2c0] sm:$0xff] }
 0x7e4   : > { %5299 = vmatpush1.bf16.msra.mxu0 %v15746_v8  ;;  %5381 = vmatpush1.bf16.msra.mxu1 %v15749_v9  ;;  %v5536_v8 = vld [vmem:[#allocation15 + $0x1c0] sm:$0xff]  ;;  %v5529_v9 = vld [vmem:[#allocation15 + $0x188] sm:$0xff] }
 0x7e5   : > { %5300 = vmatprep.subr.bf16.mxu0 %v15754_v10  ;;  %5382 = vmatprep.subr.bf16.mxu1 %v15757_v11  ;;  %v5537_v10 = vld [vmem:[#allocation15 + $0x1c8] sm:$0xff]  ;;  %v13934_v11 = vcombine.low %v5512_v60, %v5520_v63 }
 0x7e6   : > { %v5633_v60 = vld [vmem:[#allocation15 + $0x4c8] sm:$0xff] }
 0x7e8   : > { %5301 = vmatpush1.bf16.msra.mxu0 %v15752_v13  ;;  %5383 = vmatpush1.bf16.msra.mxu1 %v15755_v14  ;;  %v13936_v13 = vcombine.low %v5513_v0, %v5521_v1  ;;  %v13951_v14 = vcombine.high %v5528_v6, %v5536_v8  ;;  %v14049_v1 = vcombine.high %v5625_v59, %v5633_v60 }
 0x7e9   : > { %5302 = vmatprep.subr.bf16.mxu0 %v15760_v16  ;;  %5384 = vmatprep.subr.bf16.mxu1 %v15763_v17  ;;  %v13953_v16 = vcombine.high %v5529_v9, %v5537_v10  ;;  %v5544_v17 = vld [vmem:[#allocation15 + $0x200] sm:$0xff] }
 0x7ec   : > { %5303 = vmatpush1.bf16.msra.mxu0 %v15758_v18  ;;  %5385 = vmatpush1.bf16.msra.mxu1 %v15761_v19  ;;  %v5552_v18 = vld [vmem:[#allocation15 + $0x240] sm:$0xff]  ;;  %v5545_v19 = vld [vmem:[#allocation15 + $0x208] sm:$0xff] }
 0x7ed   : > { %5304 = vmatprep.subr.bf16.mxu0 %v15766_v20  ;;  %5386 = vmatprep.subr.bf16.mxu1 %v15769_v21  ;;  %v5553_v20 = vld [vmem:[#allocation15 + $0x248] sm:$0xff]  ;;  %v13950_v21 = vcombine.low %v5528_v6, %v5536_v8  ;;  %v14048_v8 = vcombine.low %v5625_v59, %v5633_v60 }
 0x7ee   : > { %v13968_v33 = vcombine.low %v5545_v19, %v5553_v20 }
 0x7f0   : > { %5305 = vmatpush1.bf16.msra.mxu0 %v15764_v22  ;;  %5387 = vmatpush1.bf16.msra.mxu1 %v15767_v23  ;;  %v13952_v22 = vcombine.low %v5529_v9, %v5537_v10  ;;  %v13967_v23 = vcombine.high %v5544_v17, %v5552_v18 }
 0x7f1   : > { %v4456_v30 = vpop.permute.xlu0 %4455  ;;  %8552 = vmatprep.subr.bf16.mxu0 %v13903_v57  ;;  %8634 = vmatprep.subr.bf16.mxu1 %v13905_v56  ;;  %v5609_v57 = vld [vmem:[#allocation15 + $0x408] sm:$0xff] }
 0x7f2   : > { %v4459_v31 = vsel %vm3508_vm0, %v4310_v25, %v4456_v30  ;;  %v13969_v25 = vcombine.high %v5545_v19, %v5553_v20  ;;  %v5561_v30 = vld [vmem:[#allocation15 + $0x288] sm:$0xff]  ;;  %v14033_v56 = vcombine.high %v5609_v57, %v5617_v52  ;;  %v14032_v63 = vcombine.low %v5609_v57, %v5617_v52 }
 0x7f3   : > { %5306 = vmatprep.mubr.bf16.mxu0 %v4459_v31  ;;  %5388 = vmatprep.mubr.bf16.mxu1 %v4459_v31  ;;  %v5569_v31 = vld [vmem:[#allocation15 + $0x2c8] sm:$0xff] }
 0x7f4   : > { %5307 = vmatmul.mubr.bf16.vlgmr.msra.gmra.mrb[44].mxu0 %v4452_v32  ;;  %5389 = vmatmul.mubr.bf16.vlgmr.msra.gmra.mrb[44].mxu1 %v4452_v32  ;;  %v13966_v32 = vcombine.low %v5544_v17, %v5552_v18 }
 0x7f5   : > { %8553 = vmatpush1.bf16.msra.mxu0 %v13902_v51  ;;  %8635 = vmatpush1.bf16.msra.mxu1 %v13904_v55  ;;  %v5616_v51 = vld [vmem:[#allocation15 + $0x440] sm:$0xff] }
 0x7f6   : > { %8554 = vmatprep.subr.bf16.mxu0 %v13919_v53  ;;  %8636 = vmatprep.subr.bf16.mxu1 %v13921_v61  ;;  %v14031_v55 = vcombine.high %v5608_v50, %v5616_v51  ;;  %v5624_v53 = vld [vmem:[#allocation15 + $0x480] sm:$0xff]  ;;  %v14030_v61 = vcombine.low %v5608_v50, %v5616_v51  ;;  %v5713_v50 = vld [vmem:[#allocation15 + $0x748] sm:$0xff] }
 0x7f7   : > { %v14047_v0 = vcombine.high %v5624_v53, %v5632_v58  ;;  %v14046_v6 = vcombine.low %v5624_v53, %v5632_v58  ;;  %v5729_v53 = vld [vmem:[#allocation15 + $0x7c8] sm:$0xff] }
 0x7f9   : > { %8555 = vmatpush1.bf16.msra.mxu0 %v13918_v2  ;;  %8637 = vmatpush1.bf16.msra.mxu1 %v13920_v3  ;;  %v5640_v2 = vld [vmem:[#allocation15 + $0x500] sm:$0xff] }
 0x7fa   : > { %8556 = vmatprep.subr.bf16.mxu0 %v13935_v4  ;;  %8638 = vmatprep.subr.bf16.mxu1 %v13937_v5  ;;  %v5648_v3 = vld [vmem:[#allocation15 + $0x540] sm:$0xff]  ;;  %v5641_v4 = vld [vmem:[#allocation15 + $0x508] sm:$0xff] }
 0x7fb   : > { %v5649_v5 = vld [vmem:[#allocation15 + $0x548] sm:$0xff]  ;;  %v14063_v9 = vcombine.high %v5640_v2, %v5648_v3 }
 0x7fc   : > { %v14065_v10 = vcombine.high %v5641_v4, %v5649_v5 }
 0x7fd   : > { %8557 = vmatpush1.bf16.msra.mxu0 %v13934_v11  ;;  %8639 = vmatpush1.bf16.msra.mxu1 %v13936_v13  ;;  %v14062_v11 = vcombine.low %v5640_v2, %v5648_v3  ;;  %v14064_v13 = vcombine.low %v5641_v4, %v5649_v5  ;;  %v5744_v2 = vld [vmem:[#allocation15 + $0x840] sm:$0xff]  ;;  %v5737_v3 = vld [vmem:[#allocation15 + $0x808] sm:$0xff] }
 0x7fe   : > { %8558 = vmatprep.subr.bf16.mxu0 %v13951_v14  ;;  %8640 = vmatprep.subr.bf16.mxu1 %v13953_v16 }
 0x801   : > { %8559 = vmatpush1.bf16.msra.mxu0 %v13950_v21  ;;  %8641 = vmatpush1.bf16.msra.mxu1 %v13952_v22 }
 0x802   : > { %8560 = vmatprep.subr.bf16.mxu0 %v13967_v23  ;;  %8642 = vmatprep.subr.bf16.mxu1 %v13969_v25 }
 0x805   : > { %8561 = vmatpush1.bf16.msra.mxu0 %v13966_v32  ;;  %8643 = vmatpush1.bf16.msra.mxu1 %v13968_v33  ;;  %v5665_v32 = vld [vmem:[#allocation15 + $0x5c8] sm:$0xff]  ;;  %v5672_v33 = vld [vmem:[#allocation15 + $0x600] sm:$0xff] }
 0x8c7   : > { %v5308_v7 = vpop.f32.mrb[44].mxu0  ;;  %v5390_v36 = vpop.f32.mrb[44].mxu1 }
 0x8c8   : > { %v17768_v37 = vadd.f32 %v5308_v7, %v4589_v15  ;;  %v5310_v26 = vpop.f32.mrb[45].mxu0  ;;  %v5392_v62 = vpop.f32.mrb[45].mxu1  ;;  %v17772_v45 = vadd.f32 %v5390_v36, %v4591_v35  ;;  %v13983_v15 = vcombine.high %v5560_v27, %v5568_v29  ;;  %v5576_v7 = vld [vmem:[#allocation15 + $0x300] sm:$0xff]  ;;  %v5577_v35 = vld [vmem:[#allocation15 + $0x308] sm:$0xff] }
 0x8c9   : > { %v17770_v38 = vadd.f32 %v5310_v26, %v4590_v44  ;;  %v5312_v40 = vpop.f32.mrb[46].mxu0  ;;  %v5394_v41 = vpop.f32.mrb[46].mxu1  ;;  %v17776_v46 = vadd.f32 %v5392_v62, %v4592_v39  ;;  %v13985_v44 = vcombine.high %v5561_v30, %v5569_v31  ;;  %v5585_v36 = vld [vmem:[#allocation15 + $0x348] sm:$0xff]  ;;  %v13982_v26 = vcombine.low %v5560_v27, %v5568_v29  ;;  %v5664_v29 = vld [vmem:[#allocation15 + $0x5c0] sm:$0xff] }
 0x8ca   : > { %v5313_v42 = vpop.f32.mrb[47].mxu0  ;;  %v5395_v43 = vpop.f32.mrb[47].mxu1  ;;  %8562 = vmatprep.subr.bf16.mxu0 %v13983_v15  ;;  %v13984_v62 = vcombine.low %v5561_v30, %v5569_v31  ;;  %v13999_v39 = vcombine.high %v5576_v7, %v5584_v34  ;;  %v14001_v40 = vcombine.high %v5577_v35, %v5585_v36  ;;  %v5592_v41 = vld [vmem:[#allocation15 + $0x380] sm:$0xff] }
 0x8cb   : > { %v5399_v28 = vadd.f32 %v17770_v38, %v17768_v37  ;;  %8644 = vmatprep.subr.bf16.mxu1 %v13985_v44  ;;  %v5600_v42 = vld [vmem:[#allocation15 + $0x3c0] sm:$0xff]  ;;  %v5593_v43 = vld [vmem:[#allocation15 + $0x388] sm:$0xff]  ;;  %8563 = vmatpush1.bf16.msra.mxu0 %v13982_v26 }
 0x8cc   : > { %8645 = vmatpush1.bf16.msra.mxu1 %v13984_v62  ;;  %8564 = vmatprep.subr.bf16.mxu0 %v13999_v39  ;;  %v14015_v48 = vcombine.high %v5592_v41, %v5600_v42  ;;  %v14014_v24 = vcombine.low %v5592_v41, %v5600_v42  ;;  %v5680_v15 = vld [vmem:[#allocation15 + $0x640] sm:$0xff]  ;;  %v5697_v41 = vld [vmem:[#allocation15 + $0x6c8] sm:$0xff] }
 0x8cd   : > { %v5400_v12 = vadd.f32 %v17772_v45, %v5399_v28  ;;  %v5601_v28 = vld [vmem:[#allocation15 + $0x3c8] sm:$0xff]  ;;  %8646 = vmatprep.subr.bf16.mxu1 %v14001_v40  ;;  %v5688_v26 = vld [vmem:[#allocation15 + $0x680] sm:$0xff]  ;;  %v14094_v42 = vcombine.low %v5672_v33, %v5680_v15 }
 0x8ce   : > { %v14017_v49 = vcombine.high %v5593_v43, %v5601_v28  ;;  %v14016_v54 = vcombine.low %v5593_v43, %v5601_v28  ;;  %v5696_v39 = vld [vmem:[#allocation15 + $0x6c0] sm:$0xff]  ;;  %v5689_v40 = vld [vmem:[#allocation15 + $0x688] sm:$0xff] }
 0x8cf   : > { %v5401_v47 = vadd.f32 %v17776_v46, %v5400_v12  ;;  %v13998_v12 = vcombine.low %v5576_v7, %v5584_v34  ;;  %v14095_v34 = vcombine.high %v5672_v33, %v5680_v15  ;;  %v14111_v28 = vcombine.high %v5688_v26, %v5696_v39 }
 0x8d0   : > { %v14110_v51 = vcombine.low %v5688_v26, %v5696_v39  ;;  %v14112_v57 = vcombine.low %v5689_v40, %v5697_v41 }
 0x8d1   : > { %5402 = vadd.xlane.f32.xlu0 %v5401_v47  ;;  %v14000_v47 = vcombine.low %v5577_v35, %v5585_v36  ;;  %8565 = vmatpush1.bf16.msra.mxu0 %v13998_v12  ;;  %v5673_v35 = vld [vmem:[#allocation15 + $0x608] sm:$0xff]  ;;  %v14113_v12 = vcombine.high %v5689_v40, %v5697_v41 }
 0x8d2   : > { %8566 = vmatprep.subr.bf16.mxu0 %v14015_v48  ;;  %v5681_v36 = vld [vmem:[#allocation15 + $0x648] sm:$0xff]  ;;  %v5712_v48 = vld [vmem:[#allocation15 + $0x740] sm:$0xff] }
 0x8d3   : > { %8647 = vmatpush1.bf16.msra.mxu1 %v14000_v47  ;;  %v14097_v62 = vcombine.high %v5673_v35, %v5681_v36  ;;  %v14096_v43 = vcombine.low %v5673_v35, %v5681_v36  ;;  %v5704_v47 = vld [vmem:[#allocation15 + $0x700] sm:$0xff] }
 0x8d4   : > { %8648 = vmatprep.subr.bf16.mxu1 %v14017_v49  ;;  %v5705_v49 = vld [vmem:[#allocation15 + $0x708] sm:$0xff]  ;;  %v14127_v52 = vcombine.high %v5704_v47, %v5712_v48  ;;  %v14126_v58 = vcombine.low %v5704_v47, %v5712_v48  ;;  %v5768_v47 = vld [vmem:[#allocation15 + $0x900] sm:$0xff] }
 0x8d5   : > { %8567 = vmatpush1.bf16.msra.mxu0 %v14014_v24  ;;  %v14129_v24 = vcombine.high %v5705_v49, %v5713_v50  ;;  %v14128_v59 = vcombine.low %v5705_v49, %v5713_v50  ;;  %v5776_v50 = vld [vmem:[#allocation15 + $0x940] sm:$0xff] }
 0x8d6   : > { %8568 = vmatprep.subr.bf16.mxu0 %v14031_v55  ;;  %v5728_v55 = vld [vmem:[#allocation15 + $0x7c0] sm:$0xff] }
 0x8d7   : > { %8649 = vmatpush1.bf16.msra.mxu1 %v14016_v54  ;;  %v5720_v54 = vld [vmem:[#allocation15 + $0x780] sm:$0xff] }
 0x8d8   : > { %8650 = vmatprep.subr.bf16.mxu1 %v14033_v56  ;;  %v5721_v56 = vld [vmem:[#allocation15 + $0x788] sm:$0xff]  ;;  %v14143_v60 = vcombine.high %v5720_v54, %v5728_v55 }
 0x8d9   : > { %8569 = vmatpush1.bf16.msra.mxu0 %v14030_v61  ;;  %v14145_v61 = vcombine.high %v5721_v56, %v5729_v53 }
 0x8da   : > { %8570 = vmatprep.subr.bf16.mxu0 %v14047_v0  ;;  %v14144_v0 = vcombine.low %v5721_v56, %v5729_v53  ;;  %v5784_v53 = vld [vmem:[#allocation15 + $0x980] sm:$0xff] }
 0x8db   : > { %8651 = vmatpush1.bf16.msra.mxu1 %v14032_v63  ;;  %v14142_v63 = vcombine.low %v5720_v54, %v5728_v55  ;;  %v14191_v55 = vcombine.high %v5768_v47, %v5776_v50 }
 0x8dc   : > { %8652 = vmatprep.subr.bf16.mxu1 %v14049_v1  ;;  %v5736_v1 = vld [vmem:[#allocation15 + $0x800] sm:$0xff] }
 0x8dd   : > { %8571 = vmatpush1.bf16.msra.mxu0 %v14046_v6  ;;  %v14158_v4 = vcombine.low %v5736_v1, %v5744_v2  ;;  %v14159_v5 = vcombine.high %v5736_v1, %v5744_v2  ;;  %v5745_v6 = vld [vmem:[#allocation15 + $0x848] sm:$0xff]  ;;  %v5800_v2 = vld [vmem:[#allocation15 + $0xa00] sm:$0xff] }
 0x8de   : > { %8572 = vmatprep.subr.bf16.mxu0 %v14063_v9  ;;  %v14161_v9 = vcombine.high %v5737_v3, %v5745_v6 }
 0x8df   : > { %8653 = vmatpush1.bf16.msra.mxu1 %v14048_v8  ;;  %v14160_v8 = vcombine.low %v5737_v3, %v5745_v6  ;;  %v5808_v3 = vld [vmem:[#allocation15 + $0xa40] sm:$0xff] }
 0x8e0   : > { %8654 = vmatprep.subr.bf16.mxu1 %v14065_v10 }
 0x8e1   : > { %8573 = vmatpush1.bf16.msra.mxu0 %v14062_v11 }
 0x8e3   : > { %8655 = vmatpush1.bf16.msra.mxu1 %v14064_v13  ;;  %v5427_v13 = vlaneseq }
 0x95e   : > { %v5403_v14 = vpop.xlane.xlu0 %5402 }
 0x95f   : > { %v5405_v16 = vmul.f32 0.001953125, %v5403_v14 }
 0x961   : > { %v17781_v17 = vsub.f32 %v17768_v37, %v5405_v16  ;;  %v17784_v18 = vsub.f32 %v17770_v38, %v5405_v16  ;;  %v17787_v19 = vsub.f32 %v17772_v45, %v5405_v16  ;;  %v17790_v20 = vsub.f32 %v17776_v46, %v5405_v16  ;;  %v5656_v45 = vld [vmem:[#allocation15 + $0x580] sm:$0xff]  ;;  %v5657_v46 = vld [vmem:[#allocation15 + $0x588] sm:$0xff] }
 0x962   : > { %v14078_v30 = vcombine.low %v5656_v45, %v5664_v29  ;;  %v14079_v31 = vcombine.high %v5656_v45, %v5664_v29  ;;  %v14080_v44 = vcombine.low %v5657_v46, %v5665_v32  ;;  %v14081_v7 = vcombine.high %v5657_v46, %v5665_v32 }
 0x963   : > { %v5410_v21 = vmul.f32 %v17781_v17, %v17781_v17  ;;  %v5411_v22 = vmul.f32 %v17784_v18, %v17784_v18  ;;  %v5412_v23 = vmul.f32 %v17787_v19, %v17787_v19  ;;  %v5413_v38 = vmul.f32 %v17790_v20, %v17790_v20 }
 0x964   : > { %8574 = vmatprep.subr.bf16.mxu0 %v14079_v31  ;;  %8656 = vmatprep.subr.bf16.mxu1 %v14081_v7  ;;  %v5428_v16 = vshrl.u32 %v5427_v13, 7  ;;  %v5824_v13 = vld [vmem:[#allocation15 + $0xac0] sm:$0xff] }
 0x965   : > { %v5414_v37 = vadd.f32 %v5411_v22, %v5410_v21  ;;  %8575 = vmatpush1.bf16.msra.mxu0 %v14078_v30  ;;  %8657 = vmatpush1.bf16.msra.mxu1 %v14080_v44 }
 0x966   : > { %8576 = vmatprep.subr.bf16.mxu0 %v14095_v34  ;;  %8658 = vmatprep.subr.bf16.mxu1 %v14097_v62  ;;  %v17800_v21 = vsub.s32 1, %v5428_v16  ;;  %v17802_v22 = vsub.s32 0, %v5428_v16 }
 0x967   : > { %v5415_v25 = vadd.f32 %v5414_v37, %v5412_v23  ;;  %v17804_v23 = vsub.s32 3, %v5428_v16  ;;  %v17806_v37 = vsub.s32 2, %v5428_v16  ;;  %v5825_v16 = vld [vmem:[#allocation15 + $0xac8] sm:$0xff] }
 0x969   : > { %v5416_v27 = vadd.f32 %v5415_v25, %v5413_v38  ;;  %8577 = vmatpush1.bf16.msra.mxu0 %v14094_v42  ;;  %8659 = vmatpush1.bf16.msra.mxu1 %v14096_v43  ;;  %v5397_v38 = vld [vmem:[#allocation12] sm:$0xf]  ;;  %v5398_v25 = vld [vmem:[#allocation14] sm:$0xf]  ;;  %v5752_v42 = vld [vmem:[#allocation15 + $0x880] sm:$0xff] }
 0x96a   : > { %8578 = vmatprep.subr.bf16.mxu0 %v14111_v28  ;;  %8660 = vmatprep.subr.bf16.mxu1 %v14113_v12  ;;  %v5430_v45 = vrot.slane %v5397_v38, %v17802_v22  ;;  %v5442_v29 = vrot.slane %v5397_v38, %v17804_v23  ;;  %v5438_v46 = vrot.slane %v5397_v38, %v17806_v37  ;;  %v5753_v28 = vld [vmem:[#allocation15 + $0x888] sm:$0xff] }
 0x96b   : > { %5417 = vadd.xlane.f32.xlu1 %v5416_v27  ;;  %v5434_v27 = vrot.slane %v5397_v38, %v17800_v21  ;;  %v5459_v31 = vrot.slane %v5398_v25, %v17800_v21  ;;  %v5455_v32 = vrot.slane %v5398_v25, %v17802_v22  ;;  %v5463_v33 = vrot.slane %v5398_v25, %v17806_v37 }
 0x96c   : > { %v5467_v35 = vrot.slane %v5398_v25, %v17804_v23  ;;  %v14222_v38 = vcombine.low %v5800_v2, %v5808_v3 }
 0x96d   : > { %8579 = vmatpush1.bf16.msra.mxu0 %v14110_v51  ;;  %8661 = vmatpush1.bf16.msra.mxu1 %v14112_v57  ;;  %v5769_v51 = vld [vmem:[#allocation15 + $0x908] sm:$0xff] }
 0x96e   : > { %8580 = vmatprep.subr.bf16.mxu0 %v14127_v52  ;;  %8662 = vmatprep.subr.bf16.mxu1 %v14129_v24  ;;  %v5777_v57 = vld [vmem:[#allocation15 + $0x948] sm:$0xff] }
 0x96f   : > { %v14193_v56 = vcombine.high %v5769_v51, %v5777_v57 }
 0x971   : > { %8581 = vmatpush1.bf16.msra.mxu0 %v14126_v58  ;;  %8663 = vmatpush1.bf16.msra.mxu1 %v14128_v59  ;;  %v5792_v58 = vld [vmem:[#allocation15 + $0x9c0] sm:$0xff]  ;;  %v5785_v59 = vld [vmem:[#allocation15 + $0x988] sm:$0xff] }
 0x972   : > { %8582 = vmatprep.subr.bf16.mxu0 %v14143_v60  ;;  %8664 = vmatprep.subr.bf16.mxu1 %v14145_v61  ;;  %v5793_v60 = vld [vmem:[#allocation15 + $0x9c8] sm:$0xff]  ;;  %v14190_v61 = vcombine.low %v5768_v47, %v5776_v50  ;;  %v14206_v6 = vcombine.low %v5784_v53, %v5792_v58 }
 0x973   : > { %v14209_v1 = vcombine.high %v5785_v59, %v5793_v60  ;;  %v5873_v47 = vld [vmem:[#allocation15 + $0xc48] sm:$0xff] }
 0x975   : > { %8583 = vmatpush1.bf16.msra.mxu0 %v14142_v63  ;;  %8665 = vmatpush1.bf16.msra.mxu1 %v14144_v0  ;;  %v14192_v63 = vcombine.low %v5769_v51, %v5777_v57  ;;  %v14207_v0 = vcombine.high %v5784_v53, %v5792_v58  ;;  %v5880_v57 = vld [vmem:[#allocation15 + $0xc80] sm:$0xff] }
 0x976   : > { %8593 = vmatprep.subr.bf16.mxu0 %v14159_v5  ;;  %8675 = vmatprep.subr.bf16.mxu1 %v14161_v9  ;;  %v5809_v5 = vld [vmem:[#allocation15 + $0xa48] sm:$0xff]  ;;  %v14223_v9 = vcombine.high %v5800_v2, %v5808_v3 }
 0x9f8   : > { %v5418_v10 = vpop.xlane.xlu1 %5417 }
 0x9f9   : > { %v5419_v11 = vmul.f32 0.001953125, %v5418_v10 }
 0x9fb   : > { %v5420_v14 = vadd.f32 1e-05, %v5419_v11  ;;  %v5816_v11 = vld [vmem:[#allocation15 + $0xa80] sm:$0xff] }
 0x9fd   : > { %16570 = vrsqrt.f32 %v5420_v14  ;;  %v5817_v14 = vld [vmem:[#allocation15 + $0xa88] sm:$0xff] }
 0xa07   : > { %v16571_v30 = vpop.eup %16570 }
 0xa08   : > { %v5423_v15 = vmul.f32 %v16571_v30, %v17784_v18  ;;  %v5422_v44 = vmul.f32 %v16571_v30, %v17781_v17  ;;  %v5425_v7 = vmul.f32 %v16571_v30, %v17790_v20  ;;  %v5424_v34 = vmul.f32 %v16571_v30, %v17787_v19  ;;  %v5760_v17 = vld [vmem:[#allocation15 + $0x8c0] sm:$0xff]  ;;  %v5761_v20 = vld [vmem:[#allocation15 + $0x8c8] sm:$0xff] }
 0xa09   : > { %v14175_v48 = vcombine.high %v5752_v42, %v5760_v17  ;;  %v14177_v49 = vcombine.high %v5753_v28, %v5761_v20  ;;  %v14174_v24 = vcombine.low %v5752_v42, %v5760_v17  ;;  %v14176_v54 = vcombine.low %v5753_v28, %v5761_v20  ;;  %v5833_v30 = vld [vmem:[#allocation15 + $0xb08] sm:$0xff]  ;;  %v5864_v17 = vld [vmem:[#allocation15 + $0xc00] sm:$0xff] }
 0xa0a   : > { %v5448_v36 = vmul.f32 %v5434_v27, %v5423_v15  ;;  %v5447_v26 = vmul.f32 %v5430_v45, %v5422_v44  ;;  %v5450_v62 = vmul.f32 %v5442_v29, %v5425_v7  ;;  %v5449_v39 = vmul.f32 %v5438_v46, %v5424_v34  ;;  %v5832_v29 = vld [vmem:[#allocation15 + $0xb00] sm:$0xff]  ;;  %v5865_v20 = vld [vmem:[#allocation15 + $0xc08] sm:$0xff] }
 0xa0b   : > { %v14239_v27 = vcombine.high %v5816_v11, %v5824_v13  ;;  %v14241_v45 = vcombine.high %v5817_v14, %v5825_v16  ;;  %v5840_v46 = vld [vmem:[#allocation15 + $0xb40] sm:$0xff]  ;;  %v14289_v51 = vcombine.high %v5865_v20, %v5873_v47  ;;  %v14288_v53 = vcombine.low %v5865_v20, %v5873_v47 }
 0xa0c   : > { %v17820_v40 = vadd.f32 %v5459_v31, %v5448_v36  ;;  %v17822_v41 = vadd.f32 %v5455_v32, %v5447_v26  ;;  %v17824_v43 = vadd.f32 %v5463_v33, %v5449_v39  ;;  %v17826_v18 = vadd.f32 %v5467_v35, %v5450_v62  ;;  %v5841_v31 = vld [vmem:[#allocation15 + $0xb48] sm:$0xff]  ;;  %v5848_v7 = vld [vmem:[#allocation15 + $0xb80] sm:$0xff] }
 0xa0d   : > { %v14238_v32 = vcombine.low %v5816_v11, %v5824_v13  ;;  %v14240_v33 = vcombine.low %v5817_v14, %v5825_v16  ;;  %v14255_v15 = vcombine.high %v5832_v29, %v5840_v46  ;;  %v14257_v44 = vcombine.high %v5833_v30, %v5841_v31  ;;  %v5856_v34 = vld [vmem:[#allocation15 + $0xbc0] sm:$0xff]  ;;  %v5849_v35 = vld [vmem:[#allocation15 + $0xb88] sm:$0xff] }
 0xa0e   : > { %v17830_v19 = vpack.c.bf16 %v17820_v40, %v17820_v40  ;;  %v17834_v12 = vpack.c.bf16 %v17822_v41, %v17822_v41  ;;  %v17842_v52 = vpack.c.bf16 %v17826_v18, %v17826_v18  ;;  %v5857_v36 = vld [vmem:[#allocation15 + $0xbc8] sm:$0xff]  ;;  %v14254_v26 = vcombine.low %v5832_v29, %v5840_v46  ;;  %v5872_v28 = vld [vmem:[#allocation15 + $0xc40] sm:$0xff] }
 0xa0f   : > { %v14256_v62 = vcombine.low %v5833_v30, %v5841_v31  ;;  %v14271_v39 = vcombine.high %v5848_v7, %v5856_v34  ;;  %v14273_v42 = vcombine.high %v5849_v35, %v5857_v36  ;;  %v14287_v50 = vcombine.high %v5864_v17, %v5872_v28  ;;  %v5928_v16 = vld [vmem:[#allocation15 + $0xe00] sm:$0xff] }
 0xa10   : > { %8584 = vmatprep.mubr.bf16.mxu0 %v17830_v19  ;;  %8666 = vmatprep.mubr.bf16.mxu1 %v17830_v19  ;;  %v5944_v31 = vld [vmem:[#allocation15 + $0xe80] sm:$0xff] }
 0xa11   : > { %8585 = vmatmul.mubr.bf16.vlgmr.msra.gmra.mrb[48].mxu0 %v17834_v12  ;;  %8667 = vmatmul.mubr.bf16.vlgmr.msra.gmra.mrb[48].mxu1 %v17834_v12  ;;  %v5976_v47 = vld [vmem:[#allocation15 + $0xf80] sm:$0xff] }
 0xa12   : > { %8594 = vmatpush1.bf16.msra.mxu0 %v14158_v4  ;;  %8676 = vmatpush1.bf16.msra.mxu1 %v14160_v8  ;;  %v5801_v4 = vld [vmem:[#allocation15 + $0xa08] sm:$0xff]  ;;  %v14208_v8 = vcombine.low %v5785_v59, %v5793_v60  ;;  %v5896_v60 = vld [vmem:[#allocation15 + $0xd00] sm:$0xff] }
 0xa13   : > { %8625 = vmatprep.mubr.bf16.mxu0 %v17842_v52  ;;  %8707 = vmatprep.mubr.bf16.mxu1 %v17842_v52  ;;  %v14225_v10 = vcombine.high %v5801_v4, %v5809_v5  ;;  %v14224_v25 = vcombine.low %v5801_v4, %v5809_v5  ;;  %v5912_v5 = vld [vmem:[#allocation15 + $0xd80] sm:$0xff] }
 0xa14   : > { %8595 = vmatprep.subr.bf16.mxu0 %v14175_v48  ;;  %8677 = vmatprep.subr.bf16.mxu1 %v14177_v49  ;;  %v14270_v48 = vcombine.low %v5848_v7, %v5856_v34  ;;  %v14272_v49 = vcombine.low %v5849_v35, %v5857_v36  ;;  %v5960_v36 = vld [vmem:[#allocation15 + $0xf00] sm:$0xff] }
 0xa16   : > { %8596 = vmatpush1.bf16.msra.mxu0 %v14174_v24  ;;  %8678 = vmatpush1.bf16.msra.mxu1 %v14176_v54  ;;  %v5888_v24 = vld [vmem:[#allocation15 + $0xcc0] sm:$0xff]  ;;  %v5881_v54 = vld [vmem:[#allocation15 + $0xc88] sm:$0xff] }
 0xa17   : > { %8597 = vmatprep.subr.bf16.mxu0 %v14191_v55  ;;  %8679 = vmatprep.subr.bf16.mxu1 %v14193_v56  ;;  %v5889_v55 = vld [vmem:[#allocation15 + $0xcc8] sm:$0xff]  ;;  %v14286_v56 = vcombine.low %v5864_v17, %v5872_v28  ;;  %v14303_v58 = vcombine.high %v5880_v57, %v5888_v24 }
 0xa18   : > { %v14305_v59 = vcombine.high %v5881_v54, %v5889_v55  ;;  %v14304_v2 = vcombine.low %v5881_v54, %v5889_v55  ;;  %v5482_v55 = vld [vmem:[#allocation15 + $0x10] sm:$0xff] }
 0xa1a   : > { %8598 = vmatpush1.bf16.msra.mxu0 %v14190_v61  ;;  %8680 = vmatpush1.bf16.msra.mxu1 %v14192_v63  ;;  %v5904_v61 = vld [vmem:[#allocation15 + $0xd40] sm:$0xff]  ;;  %v5897_v63 = vld [vmem:[#allocation15 + $0xd08] sm:$0xff] }
 0xa1b   : > { %8599 = vmatprep.subr.bf16.mxu0 %v14207_v0  ;;  %8681 = vmatprep.subr.bf16.mxu1 %v14209_v1  ;;  %v5905_v0 = vld [vmem:[#allocation15 + $0xd48] sm:$0xff]  ;;  %v14302_v1 = vcombine.low %v5880_v57, %v5888_v24  ;;  %v14319_v3 = vcombine.high %v5896_v60, %v5904_v61 }
 0xa1c   : > { %v14321_v4 = vcombine.high %v5897_v63, %v5905_v0  ;;  %v14320_v11 = vcombine.low %v5897_v63, %v5905_v0  ;;  %v5498_v0 = vld [vmem:[#allocation15 + $0x90] sm:$0xff] }
 0xa1e   : > { %8600 = vmatpush1.bf16.msra.mxu0 %v14206_v6  ;;  %8682 = vmatpush1.bf16.msra.mxu1 %v14208_v8  ;;  %v5920_v6 = vld [vmem:[#allocation15 + $0xdc0] sm:$0xff]  ;;  %v5913_v8 = vld [vmem:[#allocation15 + $0xd88] sm:$0xff] }
 0xa1f   : > { %8601 = vmatprep.subr.bf16.mxu0 %v14223_v9  ;;  %8683 = vmatprep.subr.bf16.mxu1 %v14225_v10  ;;  %v5921_v9 = vld [vmem:[#allocation15 + $0xdc8] sm:$0xff]  ;;  %v14318_v10 = vcombine.low %v5896_v60, %v5904_v61  ;;  %v14335_v13 = vcombine.high %v5912_v5, %v5920_v6 }
 0xa20   : > { %v14337_v14 = vcombine.high %v5913_v8, %v5921_v9  ;;  %v14336_v29 = vcombine.low %v5913_v8, %v5921_v9 }
 0xa22   : > { %8602 = vmatpush1.bf16.msra.mxu0 %v14222_v38  ;;  %8684 = vmatpush1.bf16.msra.mxu1 %v14224_v25  ;;  %v5936_v38 = vld [vmem:[#allocation15 + $0xe40] sm:$0xff]  ;;  %v5929_v25 = vld [vmem:[#allocation15 + $0xe08] sm:$0xff] }
 0xa23   : > { %8603 = vmatprep.subr.bf16.mxu0 %v14239_v27  ;;  %8685 = vmatprep.subr.bf16.mxu1 %v14241_v45  ;;  %v5937_v27 = vld [vmem:[#allocation15 + $0xe48] sm:$0xff]  ;;  %v14334_v45 = vcombine.low %v5912_v5, %v5920_v6  ;;  %v14351_v46 = vcombine.high %v5928_v16, %v5936_v38  ;;  %v17848_v5 = vpack.c.bf16 %v17824_v43, %v17824_v43 }
 0xa24   : > { %v14353_v30 = vcombine.high %v5929_v25, %v5937_v27  ;;  %v14352_v7 = vcombine.low %v5929_v25, %v5937_v27 }
 0xa26   : > { %8604 = vmatpush1.bf16.msra.mxu0 %v14238_v32  ;;  %8686 = vmatpush1.bf16.msra.mxu1 %v14240_v33  ;;  %v5952_v32 = vld [vmem:[#allocation15 + $0xec0] sm:$0xff]  ;;  %v5945_v33 = vld [vmem:[#allocation15 + $0xe88] sm:$0xff] }
 0xa27   : > { %8605 = vmatprep.subr.bf16.mxu0 %v14255_v15  ;;  %8687 = vmatprep.subr.bf16.mxu1 %v14257_v44  ;;  %v5953_v15 = vld [vmem:[#allocation15 + $0xec8] sm:$0xff]  ;;  %v14350_v44 = vcombine.low %v5928_v16, %v5936_v38  ;;  %v14367_v34 = vcombine.high %v5944_v31, %v5952_v32 }
 0xa28   : > { %v14369_v35 = vcombine.high %v5945_v33, %v5953_v15  ;;  %v14368_v17 = vcombine.low %v5945_v33, %v5953_v15 }
 0xa2a   : > { %8606 = vmatpush1.bf16.msra.mxu0 %v14254_v26  ;;  %8688 = vmatpush1.bf16.msra.mxu1 %v14256_v62  ;;  %v5968_v26 = vld [vmem:[#allocation15 + $0xf40] sm:$0xff]  ;;  %v5961_v62 = vld [vmem:[#allocation15 + $0xf08] sm:$0xff] }
 0xa2b   : > { %8607 = vmatprep.subr.bf16.mxu0 %v14271_v39  ;;  %8689 = vmatprep.subr.bf16.mxu1 %v14273_v42  ;;  %v5969_v39 = vld [vmem:[#allocation15 + $0xf48] sm:$0xff]  ;;  %v14366_v42 = vcombine.low %v5944_v31, %v5952_v32  ;;  %v14383_v28 = vcombine.high %v5960_v36, %v5968_v26 }
 0xa2c   : > { %v14385_v20 = vcombine.high %v5961_v62, %v5969_v39  ;;  %v14384_v57 = vcombine.low %v5961_v62, %v5969_v39 }
 0xa2e   : > { %8608 = vmatpush1.bf16.msra.mxu0 %v14270_v48  ;;  %8690 = vmatpush1.bf16.msra.mxu1 %v14272_v49  ;;  %v5984_v48 = vld [vmem:[#allocation15 + $0xfc0] sm:$0xff]  ;;  %v5977_v49 = vld [vmem:[#allocation15 + $0xf88] sm:$0xff] }
 0xa2f   : > { %8609 = vmatprep.subr.bf16.mxu0 %v14287_v50  ;;  %8691 = vmatprep.subr.bf16.mxu1 %v14289_v51  ;;  %v5985_v50 = vld [vmem:[#allocation15 + $0xfc8] sm:$0xff]  ;;  %v14382_v51 = vcombine.low %v5960_v36, %v5968_v26  ;;  %v14399_v24 = vcombine.high %v5976_v47, %v5984_v48 }
 0xa30   : > { %v14401_v54 = vcombine.high %v5977_v49, %v5985_v50  ;;  %v14400_v60 = vcombine.low %v5977_v49, %v5985_v50 }
 0xa32   : > { %8610 = vmatpush1.bf16.msra.mxu0 %v14286_v56  ;;  %8692 = vmatpush1.bf16.msra.mxu1 %v14288_v53  ;;  %v5490_v56 = vld [vmem:[#allocation15 + $0x50] sm:$0xff]  ;;  %v5483_v53 = vld [vmem:[#allocation15 + $0x18] sm:$0xff] }
 0xa33   : > { %8611 = vmatprep.subr.bf16.mxu0 %v14303_v58  ;;  %8693 = vmatprep.subr.bf16.mxu1 %v14305_v59  ;;  %v5491_v58 = vld [vmem:[#allocation15 + $0x58] sm:$0xff]  ;;  %v14398_v59 = vcombine.low %v5976_v47, %v5984_v48  ;;  %v13907_v61 = vcombine.high %v5482_v55, %v5490_v56 }
 0xa34   : > { %v13909_v63 = vcombine.high %v5483_v53, %v5491_v58  ;;  %v13908_v6 = vcombine.low %v5483_v53, %v5491_v58 }
 0xa36   : > { %8612 = vmatpush1.bf16.msra.mxu0 %v14302_v1  ;;  %8694 = vmatpush1.bf16.msra.mxu1 %v14304_v2  ;;  %v5506_v1 = vld [vmem:[#allocation15 + $0xd0] sm:$0xff]  ;;  %v5499_v2 = vld [vmem:[#allocation15 + $0x98] sm:$0xff] }
 0xa37   : > { %8613 = vmatprep.subr.bf16.mxu0 %v14319_v3  ;;  %8695 = vmatprep.subr.bf16.mxu1 %v14321_v4  ;;  %v5507_v3 = vld [vmem:[#allocation15 + $0xd8] sm:$0xff]  ;;  %v13906_v4 = vcombine.low %v5482_v55, %v5490_v56  ;;  %v13923_v8 = vcombine.high %v5498_v0, %v5506_v1  ;;  %v13922_v16 = vcombine.low %v5498_v0, %v5506_v1 }
 0xa38   : > { %v13925_v9 = vcombine.high %v5499_v2, %v5507_v3  ;;  %v13924_v38 = vcombine.low %v5499_v2, %v5507_v3 }
 0xa3a   : > { %8614 = vmatpush1.bf16.msra.mxu0 %v14318_v10  ;;  %8696 = vmatpush1.bf16.msra.mxu1 %v14320_v11  ;;  %v5514_v10 = vld [vmem:[#allocation15 + $0x110] sm:$0xff] }
 0xa3b   : > { %8615 = vmatprep.subr.bf16.mxu0 %v14335_v13  ;;  %8697 = vmatprep.subr.bf16.mxu1 %v14337_v14  ;;  %v5522_v11 = vld [vmem:[#allocation15 + $0x150] sm:$0xff]  ;;  %v5515_v13 = vld [vmem:[#allocation15 + $0x118] sm:$0xff] }
 0xa3c   : > { %v5523_v14 = vld [vmem:[#allocation15 + $0x158] sm:$0xff]  ;;  %v13939_v25 = vcombine.high %v5514_v10, %v5522_v11  ;;  %v13938_v31 = vcombine.low %v5514_v10, %v5522_v11 }
 0xa3d   : > { %v13941_v27 = vcombine.high %v5515_v13, %v5523_v14  ;;  %v13940_v32 = vcombine.low %v5515_v13, %v5523_v14 }
 0xa3e   : > { %8616 = vmatpush1.bf16.msra.mxu0 %v14334_v45  ;;  %8698 = vmatpush1.bf16.msra.mxu1 %v14336_v29  ;;  %v5530_v45 = vld [vmem:[#allocation15 + $0x190] sm:$0xff] }
 0xa3f   : > { %8617 = vmatprep.subr.bf16.mxu0 %v14351_v46  ;;  %8699 = vmatprep.subr.bf16.mxu1 %v14353_v30  ;;  %v5538_v29 = vld [vmem:[#allocation15 + $0x1d0] sm:$0xff]  ;;  %v5531_v46 = vld [vmem:[#allocation15 + $0x198] sm:$0xff] }
 0xa40   : > { %v5539_v30 = vld [vmem:[#allocation15 + $0x1d8] sm:$0xff]  ;;  %v13955_v33 = vcombine.high %v5530_v45, %v5538_v29  ;;  %v13954_v36 = vcombine.low %v5530_v45, %v5538_v29 }
 0xa41   : > { %v13957_v15 = vcombine.high %v5531_v46, %v5539_v30  ;;  %v13956_v26 = vcombine.low %v5531_v46, %v5539_v30 }
 0xa42   : > { %8618 = vmatpush1.bf16.msra.mxu0 %v14350_v44  ;;  %8700 = vmatpush1.bf16.msra.mxu1 %v14352_v7  ;;  %v5546_v44 = vld [vmem:[#allocation15 + $0x210] sm:$0xff] }
 0xa43   : > { %8619 = vmatprep.subr.bf16.mxu0 %v14367_v34  ;;  %8701 = vmatprep.subr.bf16.mxu1 %v14369_v35  ;;  %v5554_v7 = vld [vmem:[#allocation15 + $0x250] sm:$0xff]  ;;  %v5547_v34 = vld [vmem:[#allocation15 + $0x218] sm:$0xff] }
 0xa44   : > { %v5555_v35 = vld [vmem:[#allocation15 + $0x258] sm:$0xff]  ;;  %v13971_v62 = vcombine.high %v5546_v44, %v5554_v7  ;;  %v13970_v47 = vcombine.low %v5546_v44, %v5554_v7 }
 0xa45   : > { %v13973_v39 = vcombine.high %v5547_v34, %v5555_v35  ;;  %v13972_v48 = vcombine.low %v5547_v34, %v5555_v35 }
 0xa46   : > { %8620 = vmatpush1.bf16.msra.mxu0 %v14366_v42  ;;  %8702 = vmatpush1.bf16.msra.mxu1 %v14368_v17  ;;  %v5562_v42 = vld [vmem:[#allocation15 + $0x290] sm:$0xff] }
 0xa47   : > { %8621 = vmatprep.subr.bf16.mxu0 %v14383_v28  ;;  %8703 = vmatprep.subr.bf16.mxu1 %v14385_v20  ;;  %v5570_v17 = vld [vmem:[#allocation15 + $0x2d0] sm:$0xff]  ;;  %v5563_v28 = vld [vmem:[#allocation15 + $0x298] sm:$0xff] }
 0xa48   : > { %v5571_v20 = vld [vmem:[#allocation15 + $0x2d8] sm:$0xff]  ;;  %v13987_v49 = vcombine.high %v5562_v42, %v5570_v17  ;;  %v13986_v55 = vcombine.low %v5562_v42, %v5570_v17 }
 0xa49   : > { %v13989_v50 = vcombine.high %v5563_v28, %v5571_v20  ;;  %v13988_v56 = vcombine.low %v5563_v28, %v5571_v20 }
 0xa4a   : > { %8622 = vmatpush1.bf16.msra.mxu0 %v14382_v51  ;;  %8704 = vmatpush1.bf16.msra.mxu1 %v14384_v57  ;;  %v5578_v51 = vld [vmem:[#allocation15 + $0x310] sm:$0xff] }
 0xa4b   : > { %8623 = vmatprep.subr.bf16.mxu0 %v14399_v24  ;;  %8705 = vmatprep.subr.bf16.mxu1 %v14401_v54  ;;  %v5586_v57 = vld [vmem:[#allocation15 + $0x350] sm:$0xff]  ;;  %v5579_v24 = vld [vmem:[#allocation15 + $0x318] sm:$0xff] }
 0xa4c   : > { %v5587_v54 = vld [vmem:[#allocation15 + $0x358] sm:$0xff]  ;;  %v14003_v53 = vcombine.high %v5578_v51, %v5586_v57  ;;  %v14002_v0 = vcombine.low %v5578_v51, %v5586_v57 }
 0xa4d   : > { %v14005_v58 = vcombine.high %v5579_v24, %v5587_v54  ;;  %v14004_v1 = vcombine.low %v5579_v24, %v5587_v54 }
 0xa4e   : > { %8624 = vmatpush1.bf16.msra.mxu0 %v14398_v59  ;;  %8706 = vmatpush1.bf16.msra.mxu1 %v14400_v60  ;;  %v5594_v59 = vld [vmem:[#allocation15 + $0x390] sm:$0xff] }
 0xa4f   : > { %8716 = vmatprep.subr.bf16.mxu0 %v13907_v61  ;;  %8798 = vmatprep.subr.bf16.mxu1 %v13909_v63  ;;  %v5602_v60 = vld [vmem:[#allocation15 + $0x3d0] sm:$0xff]  ;;  %v5595_v61 = vld [vmem:[#allocation15 + $0x398] sm:$0xff] }
 0xa50   : > { %v5603_v63 = vld [vmem:[#allocation15 + $0x3d8] sm:$0xff]  ;;  %v14019_v2 = vcombine.high %v5594_v59, %v5602_v60  ;;  %v14018_v10 = vcombine.low %v5594_v59, %v5602_v60 }
 0xa51   : > { %8626 = vmatmul.mubr.bf16.vlgmr.msra.gmra.mrb[48].mxu0 %v17848_v5  ;;  %8708 = vmatmul.mubr.bf16.vlgmr.msra.gmra.mrb[48].mxu1 %v17848_v5  ;;  %v14021_v3 = vcombine.high %v5595_v61, %v5603_v63  ;;  %v14020_v11 = vcombine.low %v5595_v61, %v5603_v63 }
 0xa52   : > { %8717 = vmatpush1.bf16.msra.mxu0 %v13906_v4  ;;  %8748 = vmatprep.mubr.bf16.mxu0 %v17830_v19  ;;  %v5610_v4 = vld [vmem:[#allocation15 + $0x410] sm:$0xff] }
 0xa53   : > { %8799 = vmatpush1.bf16.msra.mxu1 %v13908_v6  ;;  %8830 = vmatprep.mubr.bf16.mxu1 %v17830_v19  ;;  %v5618_v6 = vld [vmem:[#allocation15 + $0x450] sm:$0xff] }
 0xa54   : > { %8718 = vmatprep.subr.bf16.mxu0 %v13923_v8  ;;  %8800 = vmatprep.subr.bf16.mxu1 %v13925_v9  ;;  %v5611_v8 = vld [vmem:[#allocation15 + $0x418] sm:$0xff]  ;;  %v14035_v13 = vcombine.high %v5610_v4, %v5618_v6  ;;  %v14034_v45 = vcombine.low %v5610_v4, %v5618_v6 }
 0xa55   : > { %v5619_v9 = vld [vmem:[#allocation15 + $0x458] sm:$0xff] }
 0xa56   : > { %8719 = vmatpush1.bf16.msra.mxu0 %v13922_v16  ;;  %v14037_v14 = vcombine.high %v5611_v8, %v5619_v9  ;;  %v5626_v16 = vld [vmem:[#allocation15 + $0x490] sm:$0xff]  ;;  %v14036_v29 = vcombine.low %v5611_v8, %v5619_v9 }
 0xa57   : > { %8801 = vmatpush1.bf16.msra.mxu1 %v13924_v38  ;;  %8720 = vmatprep.subr.bf16.mxu0 %v13939_v25  ;;  %v5634_v38 = vld [vmem:[#allocation15 + $0x4d0] sm:$0xff]  ;;  %v5627_v25 = vld [vmem:[#allocation15 + $0x498] sm:$0xff] }
 0xa58   : > { %8802 = vmatprep.subr.bf16.mxu1 %v13941_v27  ;;  %v5635_v27 = vld [vmem:[#allocation15 + $0x4d8] sm:$0xff]  ;;  %v14051_v46 = vcombine.high %v5626_v16, %v5634_v38  ;;  %v14050_v44 = vcombine.low %v5626_v16, %v5634_v38 }
 0xa59   : > { %v14053_v30 = vcombine.high %v5627_v25, %v5635_v27  ;;  %v14052_v7 = vcombine.low %v5627_v25, %v5635_v27 }
 0xa5a   : > { %8721 = vmatpush1.bf16.msra.mxu0 %v13938_v31  ;;  %v5642_v31 = vld [vmem:[#allocation15 + $0x510] sm:$0xff] }
 0xa5b   : > { %8803 = vmatpush1.bf16.msra.mxu1 %v13940_v32  ;;  %8722 = vmatprep.subr.bf16.mxu0 %v13955_v33  ;;  %v5650_v32 = vld [vmem:[#allocation15 + $0x550] sm:$0xff]  ;;  %v5643_v33 = vld [vmem:[#allocation15 + $0x518] sm:$0xff] }
 0xa5c   : > { %8804 = vmatprep.subr.bf16.mxu1 %v13957_v15  ;;  %v5651_v15 = vld [vmem:[#allocation15 + $0x558] sm:$0xff]  ;;  %v14067_v34 = vcombine.high %v5642_v31, %v5650_v32  ;;  %v14066_v42 = vcombine.low %v5642_v31, %v5650_v32 }
 0xa5d   : > { %v14069_v35 = vcombine.high %v5643_v33, %v5651_v15  ;;  %v14068_v17 = vcombine.low %v5643_v33, %v5651_v15 }
 0xa5e   : > { %8723 = vmatpush1.bf16.msra.mxu0 %v13954_v36  ;;  %v5658_v36 = vld [vmem:[#allocation15 + $0x590] sm:$0xff] }
 0xa5f   : > { %8805 = vmatpush1.bf16.msra.mxu1 %v13956_v26  ;;  %8724 = vmatprep.subr.bf16.mxu0 %v13971_v62  ;;  %v5666_v26 = vld [vmem:[#allocation15 + $0x5d0] sm:$0xff]  ;;  %v5659_v62 = vld [vmem:[#allocation15 + $0x598] sm:$0xff] }
 0xa60   : > { %8806 = vmatprep.subr.bf16.mxu1 %v13973_v39  ;;  %v5667_v39 = vld [vmem:[#allocation15 + $0x5d8] sm:$0xff]  ;;  %v14083_v28 = vcombine.high %v5658_v36, %v5666_v26  ;;  %v14082_v51 = vcombine.low %v5658_v36, %v5666_v26 }
 0xa61   : > { %v14085_v20 = vcombine.high %v5659_v62, %v5667_v39  ;;  %v14084_v57 = vcombine.low %v5659_v62, %v5667_v39  ;;  %v5763_v36 = vld [vmem:[#allocation15 + $0x8d8] sm:$0xff]  ;;  %v5770_v39 = vld [vmem:[#allocation15 + $0x910] sm:$0xff] }
 0xa62   : > { %8725 = vmatpush1.bf16.msra.mxu0 %v13970_v47  ;;  %v5674_v47 = vld [vmem:[#allocation15 + $0x610] sm:$0xff] }
 0xa63   : > { %8807 = vmatpush1.bf16.msra.mxu1 %v13972_v48  ;;  %8726 = vmatprep.subr.bf16.mxu0 %v13987_v49  ;;  %v5682_v48 = vld [vmem:[#allocation15 + $0x650] sm:$0xff]  ;;  %v5675_v49 = vld [vmem:[#allocation15 + $0x618] sm:$0xff] }
 0xa64   : > { %8808 = vmatprep.subr.bf16.mxu1 %v13989_v50  ;;  %v5683_v50 = vld [vmem:[#allocation15 + $0x658] sm:$0xff]  ;;  %v14099_v24 = vcombine.high %v5674_v47, %v5682_v48  ;;  %v14098_v59 = vcombine.low %v5674_v47, %v5682_v48 }
 0xa65   : > { %v14101_v54 = vcombine.high %v5675_v49, %v5683_v50  ;;  %v14100_v60 = vcombine.low %v5675_v49, %v5683_v50 }
 0xa66   : > { %8727 = vmatpush1.bf16.msra.mxu0 %v13986_v55  ;;  %v5690_v55 = vld [vmem:[#allocation15 + $0x690] sm:$0xff] }
 0xa67   : > { %8809 = vmatpush1.bf16.msra.mxu1 %v13988_v56  ;;  %8728 = vmatprep.subr.bf16.mxu0 %v14003_v53  ;;  %v5698_v56 = vld [vmem:[#allocation15 + $0x6d0] sm:$0xff]  ;;  %v5691_v53 = vld [vmem:[#allocation15 + $0x698] sm:$0xff] }
 0xa68   : > { %8810 = vmatprep.subr.bf16.mxu1 %v14005_v58  ;;  %v5699_v58 = vld [vmem:[#allocation15 + $0x6d8] sm:$0xff]  ;;  %v14115_v61 = vcombine.high %v5690_v55, %v5698_v56  ;;  %v14114_v4 = vcombine.low %v5690_v55, %v5698_v56 }
 0xa69   : > { %v14117_v63 = vcombine.high %v5691_v53, %v5699_v58  ;;  %v14116_v6 = vcombine.low %v5691_v53, %v5699_v58 }
 0xa6a   : > { %8729 = vmatpush1.bf16.msra.mxu0 %v14002_v0  ;;  %v5706_v0 = vld [vmem:[#allocation15 + $0x710] sm:$0xff] }
 0xa6b   : > { %8811 = vmatpush1.bf16.msra.mxu1 %v14004_v1  ;;  %8730 = vmatprep.subr.bf16.mxu0 %v14019_v2  ;;  %v5714_v1 = vld [vmem:[#allocation15 + $0x750] sm:$0xff]  ;;  %v5707_v2 = vld [vmem:[#allocation15 + $0x718] sm:$0xff] }
 0xa6c   : > { %8812 = vmatprep.subr.bf16.mxu1 %v14021_v3  ;;  %v5715_v3 = vld [vmem:[#allocation15 + $0x758] sm:$0xff]  ;;  %v14131_v8 = vcombine.high %v5706_v0, %v5714_v1  ;;  %v14130_v16 = vcombine.low %v5706_v0, %v5714_v1 }
 0xa6d   : > { %v14133_v9 = vcombine.high %v5707_v2, %v5715_v3  ;;  %v14132_v38 = vcombine.low %v5707_v2, %v5715_v3 }
 0xa6e   : > { %8731 = vmatpush1.bf16.msra.mxu0 %v14018_v10  ;;  %v5722_v10 = vld [vmem:[#allocation15 + $0x790] sm:$0xff] }
 0xa6f   : > { %8813 = vmatpush1.bf16.msra.mxu1 %v14020_v11  ;;  %8732 = vmatprep.subr.bf16.mxu0 %v14035_v13  ;;  %v5730_v11 = vld [vmem:[#allocation15 + $0x7d0] sm:$0xff]  ;;  %v5723_v13 = vld [vmem:[#allocation15 + $0x798] sm:$0xff] }
 0xa70   : > { %8814 = vmatprep.subr.bf16.mxu1 %v14037_v14  ;;  %v5731_v14 = vld [vmem:[#allocation15 + $0x7d8] sm:$0xff]  ;;  %v14147_v25 = vcombine.high %v5722_v10, %v5730_v11  ;;  %v14146_v31 = vcombine.low %v5722_v10, %v5730_v11 }
 0xa71   : > { %v14149_v27 = vcombine.high %v5723_v13, %v5731_v14  ;;  %v14148_v32 = vcombine.low %v5723_v13, %v5731_v14 }
 0xa72   : > { %8733 = vmatpush1.bf16.msra.mxu0 %v14034_v45  ;;  %v5738_v45 = vld [vmem:[#allocation15 + $0x810] sm:$0xff] }
 0xa73   : > { %8815 = vmatpush1.bf16.msra.mxu1 %v14036_v29  ;;  %8734 = vmatprep.subr.bf16.mxu0 %v14051_v46  ;;  %v5746_v29 = vld [vmem:[#allocation15 + $0x850] sm:$0xff]  ;;  %v5739_v46 = vld [vmem:[#allocation15 + $0x818] sm:$0xff] }
 0xa74   : > { %8816 = vmatprep.subr.bf16.mxu1 %v14053_v30  ;;  %v5747_v30 = vld [vmem:[#allocation15 + $0x858] sm:$0xff]  ;;  %v14163_v33 = vcombine.high %v5738_v45, %v5746_v29 }
 0xa75   : > { %v14165_v15 = vcombine.high %v5739_v46, %v5747_v30  ;;  %v14164_v26 = vcombine.low %v5739_v46, %v5747_v30 }
 0xa76   : > { %8735 = vmatpush1.bf16.msra.mxu0 %v14050_v44  ;;  %v5754_v44 = vld [vmem:[#allocation15 + $0x890] sm:$0xff] }
 0xa77   : > { %8817 = vmatpush1.bf16.msra.mxu1 %v14052_v7  ;;  %8736 = vmatprep.subr.bf16.mxu0 %v14067_v34  ;;  %v5762_v7 = vld [vmem:[#allocation15 + $0x8d0] sm:$0xff]  ;;  %v14162_v34 = vcombine.low %v5738_v45, %v5746_v29 }
 0xa78   : > { %8818 = vmatprep.subr.bf16.mxu1 %v14069_v35  ;;  %v5755_v35 = vld [vmem:[#allocation15 + $0x898] sm:$0xff]  ;;  %v14179_v62 = vcombine.high %v5754_v44, %v5762_v7  ;;  %v14178_v47 = vcombine.low %v5754_v44, %v5762_v7 }
 0xa79   : > { %v14180_v48 = vcombine.low %v5755_v35, %v5763_v36 }
 0xa7a   : > { %8737 = vmatpush1.bf16.msra.mxu0 %v14066_v42  ;;  %v5778_v42 = vld [vmem:[#allocation15 + $0x950] sm:$0xff] }
 0xa7b   : > { %8819 = vmatpush1.bf16.msra.mxu1 %v14068_v17  ;;  %8738 = vmatprep.subr.bf16.mxu0 %v14083_v28  ;;  %v14181_v17 = vcombine.high %v5755_v35, %v5763_v36  ;;  %v5771_v28 = vld [vmem:[#allocation15 + $0x918] sm:$0xff]  ;;  %v14195_v49 = vcombine.high %v5770_v39, %v5778_v42  ;;  %v14194_v55 = vcombine.low %v5770_v39, %v5778_v42  ;;  %v5866_v36 = vld [vmem:[#allocation15 + $0xc10] sm:$0xff] }
 0xa7c   : > { %8820 = vmatprep.subr.bf16.mxu1 %v14085_v20  ;;  %v5779_v20 = vld [vmem:[#allocation15 + $0x958] sm:$0xff] }
 0xa7d   : > { %v14197_v50 = vcombine.high %v5771_v28, %v5779_v20  ;;  %v14196_v56 = vcombine.low %v5771_v28, %v5779_v20  ;;  %v5875_v39 = vld [vmem:[#allocation15 + $0xc58] sm:$0xff] }
 0xa7e   : > { %8739 = vmatpush1.bf16.msra.mxu0 %v14082_v51  ;;  %v5786_v51 = vld [vmem:[#allocation15 + $0x990] sm:$0xff] }
 0xa7f   : > { %8821 = vmatpush1.bf16.msra.mxu1 %v14084_v57  ;;  %8740 = vmatprep.subr.bf16.mxu0 %v14099_v24  ;;  %v5794_v57 = vld [vmem:[#allocation15 + $0x9d0] sm:$0xff]  ;;  %v5787_v24 = vld [vmem:[#allocation15 + $0x998] sm:$0xff] }
 0xa80   : > { %8822 = vmatprep.subr.bf16.mxu1 %v14101_v54  ;;  %v5795_v54 = vld [vmem:[#allocation15 + $0x9d8] sm:$0xff]  ;;  %v14211_v53 = vcombine.high %v5786_v51, %v5794_v57  ;;  %v14210_v0 = vcombine.low %v5786_v51, %v5794_v57 }
 0xa81   : > { %v14213_v58 = vcombine.high %v5787_v24, %v5795_v54  ;;  %v14212_v1 = vcombine.low %v5787_v24, %v5795_v54 }
 0xa82   : > { %8741 = vmatpush1.bf16.msra.mxu0 %v14098_v59  ;;  %v5802_v59 = vld [vmem:[#allocation15 + $0xa10] sm:$0xff] }
 0xa83   : > { %8823 = vmatpush1.bf16.msra.mxu1 %v14100_v60  ;;  %8742 = vmatprep.subr.bf16.mxu0 %v14115_v61  ;;  %v5810_v60 = vld [vmem:[#allocation15 + $0xa50] sm:$0xff]  ;;  %v5803_v61 = vld [vmem:[#allocation15 + $0xa18] sm:$0xff] }
 0xa84   : > { %8824 = vmatprep.subr.bf16.mxu1 %v14117_v63  ;;  %v5811_v63 = vld [vmem:[#allocation15 + $0xa58] sm:$0xff]  ;;  %v14227_v2 = vcombine.high %v5802_v59, %v5810_v60  ;;  %v14226_v10 = vcombine.low %v5802_v59, %v5810_v60 }
 0xa85   : > { %v14229_v3 = vcombine.high %v5803_v61, %v5811_v63  ;;  %v14228_v11 = vcombine.low %v5803_v61, %v5811_v63 }
 0xa86   : > { %8743 = vmatpush1.bf16.msra.mxu0 %v14114_v4  ;;  %v5818_v4 = vld [vmem:[#allocation15 + $0xa90] sm:$0xff] }
 0xa87   : > { %8825 = vmatpush1.bf16.msra.mxu1 %v14116_v6  ;;  %8744 = vmatprep.subr.bf16.mxu0 %v14131_v8  ;;  %v5826_v6 = vld [vmem:[#allocation15 + $0xad0] sm:$0xff]  ;;  %v5819_v8 = vld [vmem:[#allocation15 + $0xa98] sm:$0xff] }
 0xa88   : > { %8826 = vmatprep.subr.bf16.mxu1 %v14133_v9  ;;  %v5827_v9 = vld [vmem:[#allocation15 + $0xad8] sm:$0xff]  ;;  %v14243_v13 = vcombine.high %v5818_v4, %v5826_v6  ;;  %v14242_v45 = vcombine.low %v5818_v4, %v5826_v6 }
 0xa89   : > { %v14245_v14 = vcombine.high %v5819_v8, %v5827_v9  ;;  %v14244_v29 = vcombine.low %v5819_v8, %v5827_v9 }
 0xa8a   : > { %8745 = vmatpush1.bf16.msra.mxu0 %v14130_v16  ;;  %v5834_v16 = vld [vmem:[#allocation15 + $0xb10] sm:$0xff] }
 0xa8b   : > { %8827 = vmatpush1.bf16.msra.mxu1 %v14132_v38  ;;  %8746 = vmatprep.subr.bf16.mxu0 %v14147_v25  ;;  %v5842_v38 = vld [vmem:[#allocation15 + $0xb50] sm:$0xff]  ;;  %v5835_v25 = vld [vmem:[#allocation15 + $0xb18] sm:$0xff] }
 0xa8c   : > { %8828 = vmatprep.subr.bf16.mxu1 %v14149_v27  ;;  %v5843_v27 = vld [vmem:[#allocation15 + $0xb58] sm:$0xff]  ;;  %v14259_v46 = vcombine.high %v5834_v16, %v5842_v38  ;;  %v14258_v44 = vcombine.low %v5834_v16, %v5842_v38 }
 0xa8d   : > { %v14261_v30 = vcombine.high %v5835_v25, %v5843_v27  ;;  %v14260_v7 = vcombine.low %v5835_v25, %v5843_v27 }
 0xa8e   : > { %8747 = vmatpush1.bf16.msra.mxu0 %v14146_v31  ;;  %v5850_v31 = vld [vmem:[#allocation15 + $0xb90] sm:$0xff] }
 0xa8f   : > { %8829 = vmatpush1.bf16.msra.mxu1 %v14148_v32  ;;  %8757 = vmatprep.subr.bf16.mxu0 %v14163_v33  ;;  %v5858_v32 = vld [vmem:[#allocation15 + $0xbd0] sm:$0xff]  ;;  %v5851_v33 = vld [vmem:[#allocation15 + $0xb98] sm:$0xff] }
 0xa90   : > { %8839 = vmatprep.subr.bf16.mxu1 %v14165_v15  ;;  %v5859_v15 = vld [vmem:[#allocation15 + $0xbd8] sm:$0xff]  ;;  %v14274_v42 = vcombine.low %v5850_v31, %v5858_v32 }
 0xa91   : > { %8749 = vmatmul.mubr.bf16.vlgmr.msra.gmra.mrb[52].mxu0 %v17834_v12  ;;  %v14277_v35 = vcombine.high %v5851_v33, %v5859_v15 }
 0xa92   : > { %8831 = vmatmul.mubr.bf16.vlgmr.msra.gmra.mrb[52].mxu1 %v17834_v12  ;;  %8758 = vmatpush1.bf16.msra.mxu0 %v14162_v34  ;;  %v14275_v34 = vcombine.high %v5850_v31, %v5858_v32 }
 0xa93   : > { %8789 = vmatprep.mubr.bf16.mxu0 %v17842_v52  ;;  %8840 = vmatpush1.bf16.msra.mxu1 %v14164_v26  ;;  %v5874_v26 = vld [vmem:[#allocation15 + $0xc50] sm:$0xff] }
 0xa94   : > { %8871 = vmatprep.mubr.bf16.mxu1 %v17842_v52  ;;  %8759 = vmatprep.subr.bf16.mxu0 %v14179_v62  ;;  %v5867_v62 = vld [vmem:[#allocation15 + $0xc18] sm:$0xff]  ;;  %v14291_v28 = vcombine.high %v5866_v36, %v5874_v26  ;;  %v14290_v51 = vcombine.low %v5866_v36, %v5874_v26 }
 0xa95   : > { %8841 = vmatprep.subr.bf16.mxu1 %v14181_v17  ;;  %v14276_v17 = vcombine.low %v5851_v33, %v5859_v15  ;;  %v14293_v20 = vcombine.high %v5867_v62, %v5875_v39  ;;  %v14292_v57 = vcombine.low %v5867_v62, %v5875_v39 }
 0xa96   : > { %8760 = vmatpush1.bf16.msra.mxu0 %v14178_v47  ;;  %v5882_v47 = vld [vmem:[#allocation15 + $0xc90] sm:$0xff] }
 0xa97   : > { %8842 = vmatpush1.bf16.msra.mxu1 %v14180_v48  ;;  %8761 = vmatprep.subr.bf16.mxu0 %v14195_v49  ;;  %v5890_v48 = vld [vmem:[#allocation15 + $0xcd0] sm:$0xff]  ;;  %v5883_v49 = vld [vmem:[#allocation15 + $0xc98] sm:$0xff] }
 0xa98   : > { %8843 = vmatprep.subr.bf16.mxu1 %v14197_v50  ;;  %v5891_v50 = vld [vmem:[#allocation15 + $0xcd8] sm:$0xff]  ;;  %v14307_v24 = vcombine.high %v5882_v47, %v5890_v48  ;;  %v14306_v59 = vcombine.low %v5882_v47, %v5890_v48 }
 0xa99   : > { %v14309_v54 = vcombine.high %v5883_v49, %v5891_v50  ;;  %v14308_v60 = vcombine.low %v5883_v49, %v5891_v50 }
 0xa9a   : > { %8762 = vmatpush1.bf16.msra.mxu0 %v14194_v55  ;;  %v5898_v55 = vld [vmem:[#allocation15 + $0xd10] sm:$0xff] }
 0xa9b   : > { %8844 = vmatpush1.bf16.msra.mxu1 %v14196_v56  ;;  %8763 = vmatprep.subr.bf16.mxu0 %v14211_v53  ;;  %v5906_v56 = vld [vmem:[#allocation15 + $0xd50] sm:$0xff]  ;;  %v5899_v53 = vld [vmem:[#allocation15 + $0xd18] sm:$0xff] }
 0xa9c   : > { %8845 = vmatprep.subr.bf16.mxu1 %v14213_v58  ;;  %v5907_v58 = vld [vmem:[#allocation15 + $0xd58] sm:$0xff]  ;;  %v14323_v61 = vcombine.high %v5898_v55, %v5906_v56  ;;  %v14322_v4 = vcombine.low %v5898_v55, %v5906_v56 }
 0xa9d   : > { %v14325_v63 = vcombine.high %v5899_v53, %v5907_v58  ;;  %v14324_v6 = vcombine.low %v5899_v53, %v5907_v58 }
 0xa9e   : > { %8764 = vmatpush1.bf16.msra.mxu0 %v14210_v0  ;;  %v5914_v0 = vld [vmem:[#allocation15 + $0xd90] sm:$0xff] }
 0xa9f   : > { %8846 = vmatpush1.bf16.msra.mxu1 %v14212_v1  ;;  %8765 = vmatprep.subr.bf16.mxu0 %v14227_v2  ;;  %v5922_v1 = vld [vmem:[#allocation15 + $0xdd0] sm:$0xff]  ;;  %v5915_v2 = vld [vmem:[#allocation15 + $0xd98] sm:$0xff] }
 0xaa0   : > { %8847 = vmatprep.subr.bf16.mxu1 %v14229_v3  ;;  %v5923_v3 = vld [vmem:[#allocation15 + $0xdd8] sm:$0xff]  ;;  %v14339_v8 = vcombine.high %v5914_v0, %v5922_v1  ;;  %v14338_v16 = vcombine.low %v5914_v0, %v5922_v1  ;;  %v5509_v0 = vld [vmem:[#allocation15 + $0xe8] sm:$0xff] }
 0xaa1   : > { %v14341_v9 = vcombine.high %v5915_v2, %v5923_v3  ;;  %v14340_v38 = vcombine.low %v5915_v2, %v5923_v3  ;;  %v5516_v3 = vld [vmem:[#allocation15 + $0x120] sm:$0xff] }
 0xaa2   : > { %8766 = vmatpush1.bf16.msra.mxu0 %v14226_v10  ;;  %v5930_v10 = vld [vmem:[#allocation15 + $0xe10] sm:$0xff] }
 0xaa3   : > { %8848 = vmatpush1.bf16.msra.mxu1 %v14228_v11  ;;  %8767 = vmatprep.subr.bf16.mxu0 %v14243_v13  ;;  %v5938_v11 = vld [vmem:[#allocation15 + $0xe50] sm:$0xff]  ;;  %v5931_v13 = vld [vmem:[#allocation15 + $0xe18] sm:$0xff] }
 0xaa4   : > { %8849 = vmatprep.subr.bf16.mxu1 %v14245_v14  ;;  %v5939_v14 = vld [vmem:[#allocation15 + $0xe58] sm:$0xff]  ;;  %v14355_v25 = vcombine.high %v5930_v10, %v5938_v11  ;;  %v14354_v31 = vcombine.low %v5930_v10, %v5938_v11 }
 0xaa5   : > { %v14357_v27 = vcombine.high %v5931_v13, %v5939_v14  ;;  %v14356_v32 = vcombine.low %v5931_v13, %v5939_v14 }
 0xaa6   : > { %8768 = vmatpush1.bf16.msra.mxu0 %v14242_v45  ;;  %v5946_v45 = vld [vmem:[#allocation15 + $0xe90] sm:$0xff] }
 0xaa7   : > { %8850 = vmatpush1.bf16.msra.mxu1 %v14244_v29  ;;  %8769 = vmatprep.subr.bf16.mxu0 %v14259_v46  ;;  %v5954_v29 = vld [vmem:[#allocation15 + $0xed0] sm:$0xff]  ;;  %v5947_v46 = vld [vmem:[#allocation15 + $0xe98] sm:$0xff] }
 0xaa8   : > { %8851 = vmatprep.subr.bf16.mxu1 %v14261_v30  ;;  %v5955_v30 = vld [vmem:[#allocation15 + $0xed8] sm:$0xff]  ;;  %v14371_v33 = vcombine.high %v5946_v45, %v5954_v29  ;;  %v14370_v36 = vcombine.low %v5946_v45, %v5954_v29 }
 0xaa9   : > { %v14373_v15 = vcombine.high %v5947_v46, %v5955_v30  ;;  %v14372_v26 = vcombine.low %v5947_v46, %v5955_v30 }
 0xaaa   : > { %8770 = vmatpush1.bf16.msra.mxu0 %v14258_v44  ;;  %v5962_v44 = vld [vmem:[#allocation15 + $0xf10] sm:$0xff] }
 0xaab   : > { %8852 = vmatpush1.bf16.msra.mxu1 %v14260_v7  ;;  %8771 = vmatprep.subr.bf16.mxu0 %v14275_v34  ;;  %v5970_v7 = vld [vmem:[#allocation15 + $0xf50] sm:$0xff]  ;;  %v5963_v34 = vld [vmem:[#allocation15 + $0xf18] sm:$0xff] }
 0xaac   : > { %8853 = vmatprep.subr.bf16.mxu1 %v14277_v35  ;;  %v5971_v35 = vld [vmem:[#allocation15 + $0xf58] sm:$0xff]  ;;  %v14387_v62 = vcombine.high %v5962_v44, %v5970_v7  ;;  %v14386_v47 = vcombine.low %v5962_v44, %v5970_v7 }
 0xaad   : > { %v14389_v39 = vcombine.high %v5963_v34, %v5971_v35  ;;  %v14388_v48 = vcombine.low %v5963_v34, %v5971_v35 }
 0xaae   : > { %8772 = vmatpush1.bf16.msra.mxu0 %v14274_v42  ;;  %v5978_v42 = vld [vmem:[#allocation15 + $0xf90] sm:$0xff] }
 0xaaf   : > { %8854 = vmatpush1.bf16.msra.mxu1 %v14276_v17  ;;  %8773 = vmatprep.subr.bf16.mxu0 %v14291_v28  ;;  %v5986_v17 = vld [vmem:[#allocation15 + $0xfd0] sm:$0xff]  ;;  %v5979_v28 = vld [vmem:[#allocation15 + $0xf98] sm:$0xff] }
 0xab0   : > { %8855 = vmatprep.subr.bf16.mxu1 %v14293_v20  ;;  %v5987_v20 = vld [vmem:[#allocation15 + $0xfd8] sm:$0xff]  ;;  %v14403_v49 = vcombine.high %v5978_v42, %v5986_v17  ;;  %v14402_v55 = vcombine.low %v5978_v42, %v5986_v17 }
 0xab1   : > { %v14405_v50 = vcombine.high %v5979_v28, %v5987_v20  ;;  %v14404_v56 = vcombine.low %v5979_v28, %v5987_v20 }
 0xab2   : > { %8774 = vmatpush1.bf16.msra.mxu0 %v14290_v51  ;;  %v5484_v51 = vld [vmem:[#allocation15 + $0x20] sm:$0xff] }
 0xab3   : > { %8856 = vmatpush1.bf16.msra.mxu1 %v14292_v57  ;;  %8775 = vmatprep.subr.bf16.mxu0 %v14307_v24  ;;  %v5492_v57 = vld [vmem:[#allocation15 + $0x60] sm:$0xff]  ;;  %v5485_v24 = vld [vmem:[#allocation15 + $0x28] sm:$0xff] }
 0xab4   : > { %8857 = vmatprep.subr.bf16.mxu1 %v14309_v54  ;;  %v5493_v54 = vld [vmem:[#allocation15 + $0x68] sm:$0xff]  ;;  %v13911_v53 = vcombine.high %v5484_v51, %v5492_v57 }
 0xab5   : > { %v13913_v58 = vcombine.high %v5485_v24, %v5493_v54  ;;  %v13912_v1 = vcombine.low %v5485_v24, %v5493_v54 }
 0xab6   : > { %8776 = vmatpush1.bf16.msra.mxu0 %v14306_v59  ;;  %v5500_v59 = vld [vmem:[#allocation15 + $0xa0] sm:$0xff] }
 0xab7   : > { %8858 = vmatpush1.bf16.msra.mxu1 %v14308_v60  ;;  %8777 = vmatprep.subr.bf16.mxu0 %v14323_v61  ;;  %v5508_v60 = vld [vmem:[#allocation15 + $0xe0] sm:$0xff]  ;;  %v13910_v61 = vcombine.low %v5484_v51, %v5492_v57 }
 0xab8   : > { %8859 = vmatprep.subr.bf16.mxu1 %v14325_v63  ;;  %v5501_v63 = vld [vmem:[#allocation15 + $0xa8] sm:$0xff]  ;;  %v13927_v2 = vcombine.high %v5500_v59, %v5508_v60  ;;  %v13926_v10 = vcombine.low %v5500_v59, %v5508_v60 }
 0xab9   : > { %v13928_v11 = vcombine.low %v5501_v63, %v5509_v0 }
 0xaba   : > { %8778 = vmatpush1.bf16.msra.mxu0 %v14322_v4  ;;  %v5524_v4 = vld [vmem:[#allocation15 + $0x160] sm:$0xff] }
 0xabb   : > { %8860 = vmatpush1.bf16.msra.mxu1 %v14324_v6  ;;  %8779 = vmatprep.subr.bf16.mxu0 %v14339_v8  ;;  %v13929_v6 = vcombine.high %v5501_v63, %v5509_v0  ;;  %v5517_v8 = vld [vmem:[#allocation15 + $0x128] sm:$0xff]  ;;  %v13943_v13 = vcombine.high %v5516_v3, %v5524_v4  ;;  %v13942_v45 = vcombine.low %v5516_v3, %v5524_v4  ;;  %v5612_v0 = vld [vmem:[#allocation15 + $0x420] sm:$0xff] }
 0xabc   : > { %8861 = vmatprep.subr.bf16.mxu1 %v14341_v9  ;;  %v5525_v9 = vld [vmem:[#allocation15 + $0x168] sm:$0xff] }
 0xabd   : > { %v13945_v14 = vcombine.high %v5517_v8, %v5525_v9  ;;  %v13944_v29 = vcombine.low %v5517_v8, %v5525_v9  ;;  %v5621_v3 = vld [vmem:[#allocation15 + $0x468] sm:$0xff] }
 0xabe   : > { %8780 = vmatpush1.bf16.msra.mxu0 %v14338_v16  ;;  %v5532_v16 = vld [vmem:[#allocation15 + $0x1a0] sm:$0xff] }
 0xabf   : > { %8862 = vmatpush1.bf16.msra.mxu1 %v14340_v38  ;;  %8781 = vmatprep.subr.bf16.mxu0 %v14355_v25  ;;  %v5540_v38 = vld [vmem:[#allocation15 + $0x1e0] sm:$0xff]  ;;  %v5533_v25 = vld [vmem:[#allocation15 + $0x1a8] sm:$0xff] }
 0xac0   : > { %8863 = vmatprep.subr.bf16.mxu1 %v14357_v27  ;;  %v5541_v27 = vld [vmem:[#allocation15 + $0x1e8] sm:$0xff]  ;;  %v13959_v46 = vcombine.high %v5532_v16, %v5540_v38  ;;  %v13958_v44 = vcombine.low %v5532_v16, %v5540_v38 }
 0xac1   : > { %v13961_v30 = vcombine.high %v5533_v25, %v5541_v27  ;;  %v13960_v7 = vcombine.low %v5533_v25, %v5541_v27 }
 0xac2   : > { %8782 = vmatpush1.bf16.msra.mxu0 %v14354_v31  ;;  %v5548_v31 = vld [vmem:[#allocation15 + $0x220] sm:$0xff] }
 0xac3   : > { %8864 = vmatpush1.bf16.msra.mxu1 %v14356_v32  ;;  %8783 = vmatprep.subr.bf16.mxu0 %v14371_v33  ;;  %v5556_v32 = vld [vmem:[#allocation15 + $0x260] sm:$0xff]  ;;  %v5549_v33 = vld [vmem:[#allocation15 + $0x228] sm:$0xff] }
 0xac4   : > { %8865 = vmatprep.subr.bf16.mxu1 %v14373_v15  ;;  %v5557_v15 = vld [vmem:[#allocation15 + $0x268] sm:$0xff]  ;;  %v13975_v34 = vcombine.high %v5548_v31, %v5556_v32  ;;  %v13974_v42 = vcombine.low %v5548_v31, %v5556_v32 }
 0xac5   : > { %v13977_v35 = vcombine.high %v5549_v33, %v5557_v15  ;;  %v13976_v17 = vcombine.low %v5549_v33, %v5557_v15 }
 0xac6   : > { %8784 = vmatpush1.bf16.msra.mxu0 %v14370_v36  ;;  %v5564_v36 = vld [vmem:[#allocation15 + $0x2a0] sm:$0xff] }
 0xac7   : > { %8866 = vmatpush1.bf16.msra.mxu1 %v14372_v26  ;;  %8785 = vmatprep.subr.bf16.mxu0 %v14387_v62  ;;  %v5572_v26 = vld [vmem:[#allocation15 + $0x2e0] sm:$0xff]  ;;  %v5565_v62 = vld [vmem:[#allocation15 + $0x2a8] sm:$0xff] }
 0xac8   : > { %8867 = vmatprep.subr.bf16.mxu1 %v14389_v39  ;;  %v5573_v39 = vld [vmem:[#allocation15 + $0x2e8] sm:$0xff]  ;;  %v13991_v28 = vcombine.high %v5564_v36, %v5572_v26  ;;  %v13990_v51 = vcombine.low %v5564_v36, %v5572_v26 }
 0xac9   : > { %v13993_v20 = vcombine.high %v5565_v62, %v5573_v39  ;;  %v13992_v57 = vcombine.low %v5565_v62, %v5573_v39 }
 0xaca   : > { %8786 = vmatpush1.bf16.msra.mxu0 %v14386_v47  ;;  %v5580_v47 = vld [vmem:[#allocation15 + $0x320] sm:$0xff] }
 0xacb   : > { %8868 = vmatpush1.bf16.msra.mxu1 %v14388_v48  ;;  %8787 = vmatprep.subr.bf16.mxu0 %v14403_v49  ;;  %v5588_v48 = vld [vmem:[#allocation15 + $0x360] sm:$0xff]  ;;  %v5581_v49 = vld [vmem:[#allocation15 + $0x328] sm:$0xff] }
 0xacc   : > { %8869 = vmatprep.subr.bf16.mxu1 %v14405_v50  ;;  %v5589_v50 = vld [vmem:[#allocation15 + $0x368] sm:$0xff]  ;;  %v14007_v24 = vcombine.high %v5580_v47, %v5588_v48  ;;  %v14006_v59 = vcombine.low %v5580_v47, %v5588_v48 }
 0xacd   : > { %v14009_v54 = vcombine.high %v5581_v49, %v5589_v50  ;;  %v14008_v60 = vcombine.low %v5581_v49, %v5589_v50 }
 0xace   : > { %8788 = vmatpush1.bf16.msra.mxu0 %v14402_v55  ;;  %v5596_v55 = vld [vmem:[#allocation15 + $0x3a0] sm:$0xff] }
 0xacf   : > { %8870 = vmatpush1.bf16.msra.mxu1 %v14404_v56  ;;  %8880 = vmatprep.subr.bf16.mxu0 %v13911_v53  ;;  %v5604_v56 = vld [vmem:[#allocation15 + $0x3e0] sm:$0xff]  ;;  %v5597_v53 = vld [vmem:[#allocation15 + $0x3a8] sm:$0xff] }
 0xad0   : > { %8962 = vmatprep.subr.bf16.mxu1 %v13913_v58  ;;  %v5605_v58 = vld [vmem:[#allocation15 + $0x3e8] sm:$0xff]  ;;  %v14022_v4 = vcombine.low %v5596_v55, %v5604_v56 }
 0xad1   : > { %8790 = vmatmul.mubr.bf16.vlgmr.msra.gmra.mrb[52].mxu0 %v17848_v5  ;;  %v14025_v63 = vcombine.high %v5597_v53, %v5605_v58 }
 0xad2   : > { %8872 = vmatmul.mubr.bf16.vlgmr.msra.gmra.mrb[52].mxu1 %v17848_v5  ;;  %8881 = vmatpush1.bf16.msra.mxu0 %v13910_v61  ;;  %v14023_v61 = vcombine.high %v5596_v55, %v5604_v56 }
 0xad3   : > { %8912 = vmatprep.mubr.bf16.mxu0 %v17830_v19  ;;  %8963 = vmatpush1.bf16.msra.mxu1 %v13912_v1  ;;  %v5620_v1 = vld [vmem:[#allocation15 + $0x460] sm:$0xff] }
 0xad4   : > { %8994 = vmatprep.mubr.bf16.mxu1 %v17830_v19  ;;  %8882 = vmatprep.subr.bf16.mxu0 %v13927_v2  ;;  %v5613_v2 = vld [vmem:[#allocation15 + $0x428] sm:$0xff]  ;;  %v14039_v8 = vcombine.high %v5612_v0, %v5620_v1  ;;  %v14038_v16 = vcombine.low %v5612_v0, %v5620_v1 }
 0xad5   : > { %8964 = vmatprep.subr.bf16.mxu1 %v13929_v6  ;;  %v14024_v6 = vcombine.low %v5597_v53, %v5605_v58  ;;  %v14041_v9 = vcombine.high %v5613_v2, %v5621_v3  ;;  %v14040_v38 = vcombine.low %v5613_v2, %v5621_v3 }
 0xad6   : > { %8883 = vmatpush1.bf16.msra.mxu0 %v13926_v10  ;;  %v5628_v10 = vld [vmem:[#allocation15 + $0x4a0] sm:$0xff] }
 0xad7   : > { %8965 = vmatpush1.bf16.msra.mxu1 %v13928_v11  ;;  %8884 = vmatprep.subr.bf16.mxu0 %v13943_v13  ;;  %v5636_v11 = vld [vmem:[#allocation15 + $0x4e0] sm:$0xff]  ;;  %v5629_v13 = vld [vmem:[#allocation15 + $0x4a8] sm:$0xff] }
 0xad8   : > { %8966 = vmatprep.subr.bf16.mxu1 %v13945_v14  ;;  %v5637_v14 = vld [vmem:[#allocation15 + $0x4e8] sm:$0xff]  ;;  %v14055_v25 = vcombine.high %v5628_v10, %v5636_v11  ;;  %v14054_v31 = vcombine.low %v5628_v10, %v5636_v11 }
 0xad9   : > { %v14057_v27 = vcombine.high %v5629_v13, %v5637_v14  ;;  %v14056_v32 = vcombine.low %v5629_v13, %v5637_v14 }
 0xada   : > { %8885 = vmatpush1.bf16.msra.mxu0 %v13942_v45  ;;  %v5644_v45 = vld [vmem:[#allocation15 + $0x520] sm:$0xff] }
 0xadb   : > { %8967 = vmatpush1.bf16.msra.mxu1 %v13944_v29  ;;  %8886 = vmatprep.subr.bf16.mxu0 %v13959_v46  ;;  %v5652_v29 = vld [vmem:[#allocation15 + $0x560] sm:$0xff]  ;;  %v5645_v46 = vld [vmem:[#allocation15 + $0x528] sm:$0xff] }
 0xadc   : > { %8968 = vmatprep.subr.bf16.mxu1 %v13961_v30  ;;  %v5653_v30 = vld [vmem:[#allocation15 + $0x568] sm:$0xff]  ;;  %v14071_v33 = vcombine.high %v5644_v45, %v5652_v29  ;;  %v14070_v36 = vcombine.low %v5644_v45, %v5652_v29 }
 0xadd   : > { %v14073_v15 = vcombine.high %v5645_v46, %v5653_v30  ;;  %v14072_v26 = vcombine.low %v5645_v46, %v5653_v30 }
 0xade   : > { %8887 = vmatpush1.bf16.msra.mxu0 %v13958_v44  ;;  %v5660_v44 = vld [vmem:[#allocation15 + $0x5a0] sm:$0xff] }
 0xadf   : > { %8969 = vmatpush1.bf16.msra.mxu1 %v13960_v7  ;;  %8888 = vmatprep.subr.bf16.mxu0 %v13975_v34  ;;  %v5668_v7 = vld [vmem:[#allocation15 + $0x5e0] sm:$0xff]  ;;  %v5661_v34 = vld [vmem:[#allocation15 + $0x5a8] sm:$0xff] }
 0xae0   : > { %8970 = vmatprep.subr.bf16.mxu1 %v13977_v35  ;;  %v5669_v35 = vld [vmem:[#allocation15 + $0x5e8] sm:$0xff]  ;;  %v14087_v62 = vcombine.high %v5660_v44, %v5668_v7  ;;  %v14086_v47 = vcombine.low %v5660_v44, %v5668_v7 }
 0xae1   : > { %v14089_v39 = vcombine.high %v5661_v34, %v5669_v35  ;;  %v14088_v48 = vcombine.low %v5661_v34, %v5669_v35  ;;  %v5765_v44 = vld [vmem:[#allocation15 + $0x8e8] sm:$0xff]  ;;  %v5772_v35 = vld [vmem:[#allocation15 + $0x920] sm:$0xff] }
 0xae2   : > { %8889 = vmatpush1.bf16.msra.mxu0 %v13974_v42  ;;  %v5676_v42 = vld [vmem:[#allocation15 + $0x620] sm:$0xff] }
 0xae3   : > { %8971 = vmatpush1.bf16.msra.mxu1 %v13976_v17  ;;  %8890 = vmatprep.subr.bf16.mxu0 %v13991_v28  ;;  %v5684_v17 = vld [vmem:[#allocation15 + $0x660] sm:$0xff]  ;;  %v5677_v28 = vld [vmem:[#allocation15 + $0x628] sm:$0xff] }
 0xae4   : > { %8972 = vmatprep.subr.bf16.mxu1 %v13993_v20  ;;  %v5685_v20 = vld [vmem:[#allocation15 + $0x668] sm:$0xff]  ;;  %v14103_v49 = vcombine.high %v5676_v42, %v5684_v17  ;;  %v14102_v55 = vcombine.low %v5676_v42, %v5684_v17 }
 0xae5   : > { %v14105_v50 = vcombine.high %v5677_v28, %v5685_v20  ;;  %v14104_v56 = vcombine.low %v5677_v28, %v5685_v20 }
 0xae6   : > { %8891 = vmatpush1.bf16.msra.mxu0 %v13990_v51  ;;  %v5692_v51 = vld [vmem:[#allocation15 + $0x6a0] sm:$0xff] }
 0xae7   : > { %8973 = vmatpush1.bf16.msra.mxu1 %v13992_v57  ;;  %8892 = vmatprep.subr.bf16.mxu0 %v14007_v24  ;;  %v5700_v57 = vld [vmem:[#allocation15 + $0x6e0] sm:$0xff]  ;;  %v5693_v24 = vld [vmem:[#allocation15 + $0x6a8] sm:$0xff] }
 0xae8   : > { %8974 = vmatprep.subr.bf16.mxu1 %v14009_v54  ;;  %v5701_v54 = vld [vmem:[#allocation15 + $0x6e8] sm:$0xff]  ;;  %v14119_v53 = vcombine.high %v5692_v51, %v5700_v57  ;;  %v14118_v0 = vcombine.low %v5692_v51, %v5700_v57 }
 0xae9   : > { %v14121_v58 = vcombine.high %v5693_v24, %v5701_v54  ;;  %v14120_v1 = vcombine.low %v5693_v24, %v5701_v54 }
 0xaea   : > { %8893 = vmatpush1.bf16.msra.mxu0 %v14006_v59  ;;  %v5708_v59 = vld [vmem:[#allocation15 + $0x720] sm:$0xff] }
 0xaeb   : > { %8975 = vmatpush1.bf16.msra.mxu1 %v14008_v60  ;;  %8894 = vmatprep.subr.bf16.mxu0 %v14023_v61  ;;  %v5716_v60 = vld [vmem:[#allocation15 + $0x760] sm:$0xff]  ;;  %v5709_v61 = vld [vmem:[#allocation15 + $0x728] sm:$0xff] }
 0xaec   : > { %8976 = vmatprep.subr.bf16.mxu1 %v14025_v63  ;;  %v5717_v63 = vld [vmem:[#allocation15 + $0x768] sm:$0xff]  ;;  %v14135_v2 = vcombine.high %v5708_v59, %v5716_v60  ;;  %v14134_v10 = vcombine.low %v5708_v59, %v5716_v60 }
 0xaed   : > { %v14137_v3 = vcombine.high %v5709_v61, %v5717_v63  ;;  %v14136_v11 = vcombine.low %v5709_v61, %v5717_v63 }
 0xaee   : > { %8895 = vmatpush1.bf16.msra.mxu0 %v14022_v4  ;;  %v5724_v4 = vld [vmem:[#allocation15 + $0x7a0] sm:$0xff] }
 0xaef   : > { %8977 = vmatpush1.bf16.msra.mxu1 %v14024_v6  ;;  %8896 = vmatprep.subr.bf16.mxu0 %v14039_v8  ;;  %v5732_v6 = vld [vmem:[#allocation15 + $0x7e0] sm:$0xff]  ;;  %v5725_v8 = vld [vmem:[#allocation15 + $0x7a8] sm:$0xff] }
 0xaf0   : > { %8978 = vmatprep.subr.bf16.mxu1 %v14041_v9  ;;  %v5733_v9 = vld [vmem:[#allocation15 + $0x7e8] sm:$0xff]  ;;  %v14151_v13 = vcombine.high %v5724_v4, %v5732_v6  ;;  %v14150_v45 = vcombine.low %v5724_v4, %v5732_v6 }
 0xaf1   : > { %v14153_v14 = vcombine.high %v5725_v8, %v5733_v9  ;;  %v14152_v29 = vcombine.low %v5725_v8, %v5733_v9 }
 0xaf2   : > { %8897 = vmatpush1.bf16.msra.mxu0 %v14038_v16  ;;  %v5740_v16 = vld [vmem:[#allocation15 + $0x820] sm:$0xff] }
 0xaf3   : > { %8979 = vmatpush1.bf16.msra.mxu1 %v14040_v38  ;;  %8898 = vmatprep.subr.bf16.mxu0 %v14055_v25  ;;  %v5748_v38 = vld [vmem:[#allocation15 + $0x860] sm:$0xff]  ;;  %v5741_v25 = vld [vmem:[#allocation15 + $0x828] sm:$0xff] }
 0xaf4   : > { %8980 = vmatprep.subr.bf16.mxu1 %v14057_v27  ;;  %v5749_v27 = vld [vmem:[#allocation15 + $0x868] sm:$0xff]  ;;  %v14167_v46 = vcombine.high %v5740_v16, %v5748_v38 }
 0xaf5   : > { %v14169_v30 = vcombine.high %v5741_v25, %v5749_v27  ;;  %v14168_v7 = vcombine.low %v5741_v25, %v5749_v27 }
 0xaf6   : > { %8899 = vmatpush1.bf16.msra.mxu0 %v14054_v31  ;;  %v5756_v31 = vld [vmem:[#allocation15 + $0x8a0] sm:$0xff] }
 0xaf7   : > { %8981 = vmatpush1.bf16.msra.mxu1 %v14056_v32  ;;  %8900 = vmatprep.subr.bf16.mxu0 %v14071_v33  ;;  %v5764_v32 = vld [vmem:[#allocation15 + $0x8e0] sm:$0xff]  ;;  %v14166_v33 = vcombine.low %v5740_v16, %v5748_v38 }
 0xaf8   : > { %8982 = vmatprep.subr.bf16.mxu1 %v14073_v15  ;;  %v5757_v15 = vld [vmem:[#allocation15 + $0x8a8] sm:$0xff]  ;;  %v14183_v34 = vcombine.high %v5756_v31, %v5764_v32  ;;  %v14182_v42 = vcombine.low %v5756_v31, %v5764_v32 }
 0xaf9   : > { %v14184_v17 = vcombine.low %v5757_v15, %v5765_v44 }
 0xafa   : > { %8901 = vmatpush1.bf16.msra.mxu0 %v14070_v36  ;;  %v5780_v36 = vld [vmem:[#allocation15 + $0x960] sm:$0xff] }
 0xafb   : > { %8983 = vmatpush1.bf16.msra.mxu1 %v14072_v26  ;;  %8902 = vmatprep.subr.bf16.mxu0 %v14087_v62  ;;  %v14185_v26 = vcombine.high %v5757_v15, %v5765_v44  ;;  %v5773_v62 = vld [vmem:[#allocation15 + $0x928] sm:$0xff]  ;;  %v14199_v28 = vcombine.high %v5772_v35, %v5780_v36  ;;  %v14198_v51 = vcombine.low %v5772_v35, %v5780_v36 }
 0xafc   : > { %8984 = vmatprep.subr.bf16.mxu1 %v14089_v39  ;;  %v5781_v39 = vld [vmem:[#allocation15 + $0x968] sm:$0xff] }
 0xafd   : > { %v14201_v20 = vcombine.high %v5773_v62, %v5781_v39  ;;  %v14200_v57 = vcombine.low %v5773_v62, %v5781_v39  ;;  %v5861_v15 = vld [vmem:[#allocation15 + $0xbe8] sm:$0xff] }
 0xafe   : > { %8903 = vmatpush1.bf16.msra.mxu0 %v14086_v47  ;;  %v5788_v47 = vld [vmem:[#allocation15 + $0x9a0] sm:$0xff] }
 0xaff   : > { %8985 = vmatpush1.bf16.msra.mxu1 %v14088_v48  ;;  %8904 = vmatprep.subr.bf16.mxu0 %v14103_v49  ;;  %v5796_v48 = vld [vmem:[#allocation15 + $0x9e0] sm:$0xff]  ;;  %v5789_v49 = vld [vmem:[#allocation15 + $0x9a8] sm:$0xff] }
 0xb00   : > { %8986 = vmatprep.subr.bf16.mxu1 %v14105_v50  ;;  %v5797_v50 = vld [vmem:[#allocation15 + $0x9e8] sm:$0xff]  ;;  %v14215_v24 = vcombine.high %v5788_v47, %v5796_v48  ;;  %v14214_v59 = vcombine.low %v5788_v47, %v5796_v48 }
 0xb01   : > { %v14217_v54 = vcombine.high %v5789_v49, %v5797_v50  ;;  %v14216_v60 = vcombine.low %v5789_v49, %v5797_v50 }
 0xb02   : > { %8905 = vmatpush1.bf16.msra.mxu0 %v14102_v55  ;;  %v5804_v55 = vld [vmem:[#allocation15 + $0xa20] sm:$0xff] }
 0xb03   : > { %8987 = vmatpush1.bf16.msra.mxu1 %v14104_v56  ;;  %8906 = vmatprep.subr.bf16.mxu0 %v14119_v53  ;;  %v5812_v56 = vld [vmem:[#allocation15 + $0xa60] sm:$0xff]  ;;  %v5805_v53 = vld [vmem:[#allocation15 + $0xa28] sm:$0xff] }
 0xb04   : > { %8988 = vmatprep.subr.bf16.mxu1 %v14121_v58  ;;  %v5813_v58 = vld [vmem:[#allocation15 + $0xa68] sm:$0xff]  ;;  %v14231_v61 = vcombine.high %v5804_v55, %v5812_v56  ;;  %v14230_v4 = vcombine.low %v5804_v55, %v5812_v56 }
 0xb05   : > { %v14233_v63 = vcombine.high %v5805_v53, %v5813_v58  ;;  %v14232_v6 = vcombine.low %v5805_v53, %v5813_v58 }
 0xb06   : > { %8907 = vmatpush1.bf16.msra.mxu0 %v14118_v0  ;;  %v5820_v0 = vld [vmem:[#allocation15 + $0xaa0] sm:$0xff] }
 0xb07   : > { %8989 = vmatpush1.bf16.msra.mxu1 %v14120_v1  ;;  %8908 = vmatprep.subr.bf16.mxu0 %v14135_v2  ;;  %v5828_v1 = vld [vmem:[#allocation15 + $0xae0] sm:$0xff]  ;;  %v5821_v2 = vld [vmem:[#allocation15 + $0xaa8] sm:$0xff] }
 0xb08   : > { %8990 = vmatprep.subr.bf16.mxu1 %v14137_v3  ;;  %v5829_v3 = vld [vmem:[#allocation15 + $0xae8] sm:$0xff]  ;;  %v14247_v8 = vcombine.high %v5820_v0, %v5828_v1  ;;  %v14246_v16 = vcombine.low %v5820_v0, %v5828_v1 }
 0xb09   : > { %v14249_v9 = vcombine.high %v5821_v2, %v5829_v3  ;;  %v14248_v38 = vcombine.low %v5821_v2, %v5829_v3 }
 0xb0a   : > { %8909 = vmatpush1.bf16.msra.mxu0 %v14134_v10  ;;  %v5836_v10 = vld [vmem:[#allocation15 + $0xb20] sm:$0xff] }
 0xb0b   : > { %8991 = vmatpush1.bf16.msra.mxu1 %v14136_v11  ;;  %8910 = vmatprep.subr.bf16.mxu0 %v14151_v13  ;;  %v5844_v11 = vld [vmem:[#allocation15 + $0xb60] sm:$0xff]  ;;  %v5837_v13 = vld [vmem:[#allocation15 + $0xb28] sm:$0xff] }
 0xb0c   : > { %8992 = vmatprep.subr.bf16.mxu1 %v14153_v14  ;;  %v5845_v14 = vld [vmem:[#allocation15 + $0xb68] sm:$0xff]  ;;  %v14263_v25 = vcombine.high %v5836_v10, %v5844_v11 }
 0xb0e   : > { %8911 = vmatpush1.bf16.msra.mxu0 %v14150_v45 }
 0xb0f   : > { %8993 = vmatpush1.bf16.msra.mxu1 %v14152_v29  ;;  %8921 = vmatprep.subr.bf16.mxu0 %v14167_v46  ;;  %v14265_v29 = vcombine.high %v5837_v13, %v5845_v14  ;;  %v5852_v46 = vld [vmem:[#allocation15 + $0xba0] sm:$0xff] }
 0xb10   : > { %9003 = vmatprep.subr.bf16.mxu1 %v14169_v30  ;;  %v5860_v30 = vld [vmem:[#allocation15 + $0xbe0] sm:$0xff] }
 0xb11   : > { %8913 = vmatmul.mubr.bf16.vlgmr.msra.gmra.mrb[56].mxu0 %v17834_v12  ;;  %v14279_v62 = vcombine.high %v5852_v46, %v5860_v30  ;;  %v14278_v47 = vcombine.low %v5852_v46, %v5860_v30 }
 0xb12   : > { %8995 = vmatmul.mubr.bf16.vlgmr.msra.gmra.mrb[56].mxu1 %v17834_v12  ;;  %8922 = vmatpush1.bf16.msra.mxu0 %v14166_v33  ;;  %v5853_v33 = vld [vmem:[#allocation15 + $0xba8] sm:$0xff] }
 0xb13   : > { %8953 = vmatprep.mubr.bf16.mxu0 %v17842_v52  ;;  %9004 = vmatpush1.bf16.msra.mxu1 %v14168_v7  ;;  %v14281_v39 = vcombine.high %v5853_v33, %v5861_v15  ;;  %v14280_v48 = vcombine.low %v5853_v33, %v5861_v15 }
 0xb14   : > { %9035 = vmatprep.mubr.bf16.mxu1 %v17842_v52  ;;  %8923 = vmatprep.subr.bf16.mxu0 %v14183_v34  ;;  %v14262_v34 = vcombine.low %v5836_v10, %v5844_v11 }
 0xb15   : > { %9005 = vmatprep.subr.bf16.mxu1 %v14185_v26  ;;  %v14264_v26 = vcombine.low %v5837_v13, %v5845_v14 }
 0xb16   : > { %8924 = vmatpush1.bf16.msra.mxu0 %v14182_v42  ;;  %v5868_v42 = vld [vmem:[#allocation15 + $0xc20] sm:$0xff] }
 0xb17   : > { %9006 = vmatpush1.bf16.msra.mxu1 %v14184_v17  ;;  %8925 = vmatprep.subr.bf16.mxu0 %v14199_v28  ;;  %v5876_v17 = vld [vmem:[#allocation15 + $0xc60] sm:$0xff]  ;;  %v5869_v28 = vld [vmem:[#allocation15 + $0xc28] sm:$0xff] }
 0xb18   : > { %9007 = vmatprep.subr.bf16.mxu1 %v14201_v20  ;;  %v5877_v20 = vld [vmem:[#allocation15 + $0xc68] sm:$0xff]  ;;  %v14295_v49 = vcombine.high %v5868_v42, %v5876_v17  ;;  %v14294_v55 = vcombine.low %v5868_v42, %v5876_v17  ;;  %v5964_v42 = vld [vmem:[#allocation15 + $0xf20] sm:$0xff] }
 0xb19   : > { %v14297_v50 = vcombine.high %v5869_v28, %v5877_v20  ;;  %v14296_v56 = vcombine.low %v5869_v28, %v5877_v20  ;;  %v5972_v17 = vld [vmem:[#allocation15 + $0xf60] sm:$0xff]  ;;  %v5965_v28 = vld [vmem:[#allocation15 + $0xf28] sm:$0xff] }
 0xb1a   : > { %8926 = vmatpush1.bf16.msra.mxu0 %v14198_v51  ;;  %v5884_v51 = vld [vmem:[#allocation15 + $0xca0] sm:$0xff]  ;;  %v5973_v20 = vld [vmem:[#allocation15 + $0xf68] sm:$0xff] }
 0xb1b   : > { %9008 = vmatpush1.bf16.msra.mxu1 %v14200_v57  ;;  %8927 = vmatprep.subr.bf16.mxu0 %v14215_v24  ;;  %v5892_v57 = vld [vmem:[#allocation15 + $0xce0] sm:$0xff]  ;;  %v5885_v24 = vld [vmem:[#allocation15 + $0xca8] sm:$0xff] }
 0xb1c   : > { %9009 = vmatprep.subr.bf16.mxu1 %v14217_v54  ;;  %v5893_v54 = vld [vmem:[#allocation15 + $0xce8] sm:$0xff]  ;;  %v14311_v53 = vcombine.high %v5884_v51, %v5892_v57  ;;  %v14310_v0 = vcombine.low %v5884_v51, %v5892_v57  ;;  %v5980_v51 = vld [vmem:[#allocation15 + $0xfa0] sm:$0xff] }
 0xb1d   : > { %v14313_v58 = vcombine.high %v5885_v24, %v5893_v54  ;;  %v14312_v1 = vcombine.low %v5885_v24, %v5893_v54  ;;  %v5988_v57 = vld [vmem:[#allocation15 + $0xfe0] sm:$0xff]  ;;  %v5981_v24 = vld [vmem:[#allocation15 + $0xfa8] sm:$0xff] }
 0xb1e   : > { %8928 = vmatpush1.bf16.msra.mxu0 %v14214_v59  ;;  %v5900_v59 = vld [vmem:[#allocation15 + $0xd20] sm:$0xff]  ;;  %v5989_v54 = vld [vmem:[#allocation15 + $0xfe8] sm:$0xff] }
 0xb1f   : > { %9010 = vmatpush1.bf16.msra.mxu1 %v14216_v60  ;;  %8929 = vmatprep.subr.bf16.mxu0 %v14231_v61  ;;  %v5908_v60 = vld [vmem:[#allocation15 + $0xd60] sm:$0xff]  ;;  %v5901_v61 = vld [vmem:[#allocation15 + $0xd28] sm:$0xff] }
 0xb20   : > { %9011 = vmatprep.subr.bf16.mxu1 %v14233_v63  ;;  %v5909_v63 = vld [vmem:[#allocation15 + $0xd68] sm:$0xff]  ;;  %v14327_v2 = vcombine.high %v5900_v59, %v5908_v60  ;;  %v14326_v10 = vcombine.low %v5900_v59, %v5908_v60  ;;  %v5486_v59 = vld [vmem:[#allocation15 + $0x30] sm:$0xff] }
 0xb21   : > { %v14329_v3 = vcombine.high %v5901_v61, %v5909_v63  ;;  %v14328_v11 = vcombine.low %v5901_v61, %v5909_v63  ;;  %v5494_v60 = vld [vmem:[#allocation15 + $0x70] sm:$0xff]  ;;  %v5487_v61 = vld [vmem:[#allocation15 + $0x38] sm:$0xff] }
 0xb22   : > { %8930 = vmatpush1.bf16.msra.mxu0 %v14230_v4  ;;  %v5916_v4 = vld [vmem:[#allocation15 + $0xda0] sm:$0xff]  ;;  %v5495_v63 = vld [vmem:[#allocation15 + $0x78] sm:$0xff] }
 0xb23   : > { %9012 = vmatpush1.bf16.msra.mxu1 %v14232_v6  ;;  %8931 = vmatprep.subr.bf16.mxu0 %v14247_v8  ;;  %v5924_v6 = vld [vmem:[#allocation15 + $0xde0] sm:$0xff]  ;;  %v5917_v8 = vld [vmem:[#allocation15 + $0xda8] sm:$0xff] }
 0xb24   : > { %v17866_v27 = vpop.f32.mrb[48].mxu0  ;;  %v17868_v45 = vpop.f32.mrb[48].mxu1  ;;  %9013 = vmatprep.subr.bf16.mxu1 %v14249_v9  ;;  %v5925_v9 = vld [vmem:[#allocation15 + $0xde8] sm:$0xff]  ;;  %v14343_v13 = vcombine.high %v5916_v4, %v5924_v6  ;;  %v14342_v46 = vcombine.low %v5916_v4, %v5924_v6  ;;  %v5502_v4 = vld [vmem:[#allocation15 + $0xb0] sm:$0xff] }
 0xb25   : > { %v17870_v31 = vpop.f32.mrb[49].mxu0  ;;  %v17872_v32 = vpop.f32.mrb[49].mxu1  ;;  %v14345_v14 = vcombine.high %v5917_v8, %v5925_v9  ;;  %v14344_v30 = vcombine.low %v5917_v8, %v5925_v9  ;;  %v5510_v6 = vld [vmem:[#allocation15 + $0xf0] sm:$0xff]  ;;  %v13914_v8 = vcombine.low %v5486_v59, %v5494_v60  ;;  %v5503_v9 = vld [vmem:[#allocation15 + $0xb8] sm:$0xff] }
 0xb26   : > { %v8631_v44 = vpop.f32.mrb[50].mxu0  ;;  %v8713_v7 = vpop.f32.mrb[50].mxu1  ;;  %8932 = vmatpush1.bf16.msra.mxu0 %v14246_v16  ;;  %v5932_v16 = vld [vmem:[#allocation15 + $0xe20] sm:$0xff] }
 0xb27   : > { %9014 = vmatpush1.bf16.msra.mxu1 %v14248_v38  ;;  %v8632_v35 = vpop.f32.mrb[51].mxu0  ;;  %v8714_v36 = vpop.f32.mrb[51].mxu1  ;;  %8933 = vmatprep.subr.bf16.mxu0 %v14263_v25  ;;  %v5940_v38 = vld [vmem:[#allocation15 + $0xe60] sm:$0xff]  ;;  %v5933_v25 = vld [vmem:[#allocation15 + $0xe28] sm:$0xff] }
 0xb28   : > { %9015 = vmatprep.subr.bf16.mxu1 %v14265_v29  ;;  %v5941_v29 = vld [vmem:[#allocation15 + $0xe68] sm:$0xff]  ;;  %v14359_v33 = vcombine.high %v5932_v16, %v5940_v38  ;;  %v5948_v44 = vld [vmem:[#allocation15 + $0xea0] sm:$0xff]  ;;  %v14358_v36 = vcombine.low %v5932_v16, %v5940_v38  ;;  %v5526_v16 = vld [vmem:[#allocation15 + $0x170] sm:$0xff] }
 0xb29   : > { %v14361_v15 = vcombine.high %v5933_v25, %v5941_v29  ;;  %v5956_v7 = vld [vmem:[#allocation15 + $0xee0] sm:$0xff]  ;;  %v5957_v35 = vld [vmem:[#allocation15 + $0xee8] sm:$0xff] }
 0xb2a   : > { %8934 = vmatpush1.bf16.msra.mxu0 %v14262_v34  ;;  %v5949_v34 = vld [vmem:[#allocation15 + $0xea8] sm:$0xff] }
 0xb2b   : > { %9016 = vmatpush1.bf16.msra.mxu1 %v14264_v26  ;;  %8935 = vmatprep.subr.bf16.mxu0 %v14279_v62  ;;  %v14360_v26 = vcombine.low %v5933_v25, %v5941_v29  ;;  %v14375_v62 = vcombine.high %v5948_v44, %v5956_v7  ;;  %v5519_v25 = vld [vmem:[#allocation15 + $0x138] sm:$0xff] }
 0xb2c   : > { %9017 = vmatprep.subr.bf16.mxu1 %v14281_v39  ;;  %v14377_v39 = vcombine.high %v5949_v34, %v5957_v35  ;;  %v5527_v29 = vld [vmem:[#allocation15 + $0x178] sm:$0xff] }
 0xb2e   : > { %8936 = vmatpush1.bf16.msra.mxu0 %v14278_v47  ;;  %v14374_v47 = vcombine.low %v5948_v44, %v5956_v7  ;;  %v5534_v44 = vld [vmem:[#allocation15 + $0x1b0] sm:$0xff] }
 0xb2f   : > { %9018 = vmatpush1.bf16.msra.mxu1 %v14280_v48  ;;  %8937 = vmatprep.subr.bf16.mxu0 %v14295_v49  ;;  %v14376_v48 = vcombine.low %v5949_v34, %v5957_v35  ;;  %v14391_v49 = vcombine.high %v5964_v42, %v5972_v17  ;;  %v5542_v7 = vld [vmem:[#allocation15 + $0x1f0] sm:$0xff]  ;;  %v5535_v34 = vld [vmem:[#allocation15 + $0x1b8] sm:$0xff] }
 0xb30   : > { %9019 = vmatprep.subr.bf16.mxu1 %v14297_v50  ;;  %v14393_v50 = vcombine.high %v5965_v28, %v5973_v20  ;;  %v5543_v35 = vld [vmem:[#allocation15 + $0x1f8] sm:$0xff] }
 0xb32   : > { %8938 = vmatpush1.bf16.msra.mxu0 %v14294_v55  ;;  %v14390_v55 = vcombine.low %v5964_v42, %v5972_v17  ;;  %v5550_v42 = vld [vmem:[#allocation15 + $0x230] sm:$0xff] }
 0xb33   : > { %9020 = vmatpush1.bf16.msra.mxu1 %v14296_v56  ;;  %8939 = vmatprep.subr.bf16.mxu0 %v14311_v53  ;;  %v14392_v56 = vcombine.low %v5965_v28, %v5973_v20  ;;  %v14407_v53 = vcombine.high %v5980_v51, %v5988_v57  ;;  %v5558_v17 = vld [vmem:[#allocation15 + $0x270] sm:$0xff]  ;;  %v5551_v28 = vld [vmem:[#allocation15 + $0x238] sm:$0xff] }
 0xb34   : > { %9021 = vmatprep.subr.bf16.mxu1 %v14313_v58  ;;  %v14409_v58 = vcombine.high %v5981_v24, %v5989_v54  ;;  %v5559_v20 = vld [vmem:[#allocation15 + $0x278] sm:$0xff] }
 0xb36   : > { %8940 = vmatpush1.bf16.msra.mxu0 %v14310_v0  ;;  %v14406_v0 = vcombine.low %v5980_v51, %v5988_v57  ;;  %v5574_v51 = vld [vmem:[#allocation15 + $0x2f0] sm:$0xff]  ;;  %v5567_v57 = vld [vmem:[#allocation15 + $0x2b8] sm:$0xff] }
 0xb37   : > { %9022 = vmatpush1.bf16.msra.mxu1 %v14312_v1  ;;  %8941 = vmatprep.subr.bf16.mxu0 %v14327_v2  ;;  %v14408_v1 = vcombine.low %v5981_v24, %v5989_v54  ;;  %v13915_v2 = vcombine.high %v5486_v59, %v5494_v60  ;;  %v5575_v24 = vld [vmem:[#allocation15 + $0x2f8] sm:$0xff]  ;;  %v13978_v54 = vcombine.low %v5550_v42, %v5558_v17  ;;  %v5590_v59 = vld [vmem:[#allocation15 + $0x370] sm:$0xff] }
 0xb38   : > { %9023 = vmatprep.subr.bf16.mxu1 %v14329_v3  ;;  %v13917_v3 = vcombine.high %v5487_v61, %v5495_v63  ;;  %v5583_v60 = vld [vmem:[#allocation15 + $0x338] sm:$0xff] }
 0xb3a   : > { %8942 = vmatpush1.bf16.msra.mxu0 %v14326_v10  ;;  %v5511_v10 = vld [vmem:[#allocation15 + $0xf8] sm:$0xff] }
 0xb3b   : > { %9024 = vmatpush1.bf16.msra.mxu1 %v14328_v11  ;;  %8943 = vmatprep.subr.bf16.mxu0 %v14343_v13  ;;  %v13916_v11 = vcombine.low %v5487_v61, %v5495_v63  ;;  %v13931_v13 = vcombine.high %v5502_v4, %v5510_v6  ;;  %v13933_v38 = vcombine.high %v5503_v9, %v5511_v10  ;;  %v5591_v61 = vld [vmem:[#allocation15 + $0x378] sm:$0xff] }
 0xb3c   : > { %9025 = vmatprep.subr.bf16.mxu1 %v14345_v14  ;;  %v5518_v14 = vld [vmem:[#allocation15 + $0x130] sm:$0xff] }
 0xb3e   : > { %8944 = vmatpush1.bf16.msra.mxu0 %v14342_v46  ;;  %v13930_v46 = vcombine.low %v5502_v4, %v5510_v6  ;;  %v5606_v4 = vld [vmem:[#allocation15 + $0x3f0] sm:$0xff]  ;;  %v5599_v6 = vld [vmem:[#allocation15 + $0x3b8] sm:$0xff] }
 0xb3f   : > { %9026 = vmatpush1.bf16.msra.mxu1 %v14344_v30  ;;  %8945 = vmatprep.subr.bf16.mxu0 %v14359_v33  ;;  %v13932_v30 = vcombine.low %v5503_v9, %v5511_v10  ;;  %v13947_v33 = vcombine.high %v5518_v14, %v5526_v16  ;;  %v14012_v10 = vcombine.low %v5583_v60, %v5591_v61 }
 0xb40   : > { %9027 = vmatprep.subr.bf16.mxu1 %v14361_v15  ;;  %v13949_v15 = vcombine.high %v5519_v25, %v5527_v29 }
 0xb42   : > { %8946 = vmatpush1.bf16.msra.mxu0 %v14358_v36  ;;  %v13946_v36 = vcombine.low %v5518_v14, %v5526_v16  ;;  %v5614_v14 = vld [vmem:[#allocation15 + $0x430] sm:$0xff] }
 0xb43   : > { %9028 = vmatpush1.bf16.msra.mxu1 %v14360_v26  ;;  %8947 = vmatprep.subr.bf16.mxu0 %v14375_v62  ;;  %v13948_v26 = vcombine.low %v5519_v25, %v5527_v29  ;;  %v13963_v62 = vcombine.high %v5534_v44, %v5542_v7  ;;  %v5622_v16 = vld [vmem:[#allocation15 + $0x470] sm:$0xff]  ;;  %v5623_v25 = vld [vmem:[#allocation15 + $0x478] sm:$0xff] }
 0xb44   : > { %9029 = vmatprep.subr.bf16.mxu1 %v14377_v39  ;;  %v13965_v39 = vcombine.high %v5535_v34, %v5543_v35 }
 0xb46   : > { %8948 = vmatpush1.bf16.msra.mxu0 %v14374_v47  ;;  %v13964_v47 = vcombine.low %v5535_v34, %v5543_v35  ;;  %v5639_v34 = vld [vmem:[#allocation15 + $0x4f8] sm:$0xff]  ;;  %v14042_v35 = vcombine.low %v5614_v14, %v5622_v16 }
 0xb47   : > { %9030 = vmatpush1.bf16.msra.mxu1 %v14376_v48  ;;  %8949 = vmatprep.subr.bf16.mxu0 %v14391_v49  ;;  %v13979_v48 = vcombine.high %v5550_v42, %v5558_v17  ;;  %v13981_v49 = vcombine.high %v5551_v28, %v5559_v20  ;;  %v5654_v42 = vld [vmem:[#allocation15 + $0x570] sm:$0xff]  ;;  %v5647_v17 = vld [vmem:[#allocation15 + $0x538] sm:$0xff] }
 0xb48   : > { %9031 = vmatprep.subr.bf16.mxu1 %v14393_v50  ;;  %v5566_v50 = vld [vmem:[#allocation15 + $0x2b0] sm:$0xff] }
 0xb49   : > { %v13994_v63 = vcombine.low %v5566_v50, %v5574_v51 }
 0xb4a   : > { %8950 = vmatpush1.bf16.msra.mxu0 %v14390_v55  ;;  %v13980_v55 = vcombine.low %v5551_v28, %v5559_v20  ;;  %v5655_v28 = vld [vmem:[#allocation15 + $0x578] sm:$0xff] }
 0xb4b   : > { %9032 = vmatpush1.bf16.msra.mxu1 %v14392_v56  ;;  %8951 = vmatprep.subr.bf16.mxu0 %v14407_v53  ;;  %v13995_v56 = vcombine.high %v5566_v50, %v5574_v51  ;;  %v13997_v53 = vcombine.high %v5567_v57, %v5575_v24  ;;  %v5670_v50 = vld [vmem:[#allocation15 + $0x5f0] sm:$0xff]  ;;  %v5663_v51 = vld [vmem:[#allocation15 + $0x5b8] sm:$0xff] }
 0xb4c   : > { %9033 = vmatprep.subr.bf16.mxu1 %v14409_v58  ;;  %v5582_v58 = vld [vmem:[#allocation15 + $0x330] sm:$0xff] }
 0xb4d   : > { %v14010_v9 = vcombine.low %v5582_v58, %v5590_v59 }
 0xb4e   : > { %8952 = vmatpush1.bf16.msra.mxu0 %v14406_v0  ;;  %v13996_v0 = vcombine.low %v5567_v57, %v5575_v24  ;;  %v5671_v57 = vld [vmem:[#allocation15 + $0x5f8] sm:$0xff] }
 0xb4f   : > { %9034 = vmatpush1.bf16.msra.mxu1 %v14408_v1  ;;  %9044 = vmatprep.subr.bf16.mxu0 %v13915_v2  ;;  %v14011_v1 = vcombine.high %v5582_v58, %v5590_v59  ;;  %v14013_v2 = vcombine.high %v5583_v60, %v5591_v61  ;;  %v5686_v58 = vld [vmem:[#allocation15 + $0x670] sm:$0xff]  ;;  %v5679_v59 = vld [vmem:[#allocation15 + $0x638] sm:$0xff] }
 0xb50   : > { %9126 = vmatprep.subr.bf16.mxu1 %v13917_v3  ;;  %v5598_v3 = vld [vmem:[#allocation15 + $0x3b0] sm:$0xff]  ;;  %v5687_v60 = vld [vmem:[#allocation15 + $0x678] sm:$0xff] }
 0xb51   : > { %8954 = vmatmul.mubr.bf16.vlgmr.msra.gmra.mrb[56].mxu0 %v17848_v5  ;;  %v14026_v29 = vcombine.low %v5598_v3, %v5606_v4 }
 0xb52   : > { %9036 = vmatmul.mubr.bf16.vlgmr.msra.gmra.mrb[56].mxu1 %v17848_v5  ;;  %9045 = vmatpush1.bf16.msra.mxu0 %v13914_v8  ;;  %v5607_v8 = vld [vmem:[#allocation15 + $0x3f8] sm:$0xff] }
 0xb53   : > { %9076 = vmatprep.mubr.bf16.mxu0 %v17830_v19  ;;  %9127 = vmatpush1.bf16.msra.mxu1 %v13916_v11  ;;  %v14027_v11 = vcombine.high %v5598_v3, %v5606_v4  ;;  %v5702_v3 = vld [vmem:[#allocation15 + $0x6f0] sm:$0xff]  ;;  %v5695_v4 = vld [vmem:[#allocation15 + $0x6b8] sm:$0xff] }
 0xb54   : > { %9158 = vmatprep.mubr.bf16.mxu1 %v17830_v19  ;;  %9046 = vmatprep.subr.bf16.mxu0 %v13931_v13  ;;  %v13962_v19 = vcombine.low %v5534_v44, %v5542_v7  ;;  %v14029_v13 = vcombine.high %v5599_v6, %v5607_v8  ;;  %v5638_v44 = vld [vmem:[#allocation15 + $0x4f0] sm:$0xff]  ;;  %v5631_v7 = vld [vmem:[#allocation15 + $0x4b8] sm:$0xff] }
 0xb55   : > { %9128 = vmatprep.subr.bf16.mxu1 %v13933_v38  ;;  %v5615_v38 = vld [vmem:[#allocation15 + $0x438] sm:$0xff] }
 0xb56   : > { %9047 = vmatpush1.bf16.msra.mxu0 %v13930_v46  ;;  %v14028_v46 = vcombine.low %v5599_v6, %v5607_v8  ;;  %v5703_v6 = vld [vmem:[#allocation15 + $0x6f8] sm:$0xff] }
 0xb57   : > { %9129 = vmatpush1.bf16.msra.mxu1 %v13932_v30  ;;  %9048 = vmatprep.subr.bf16.mxu0 %v13947_v33  ;;  %v14043_v30 = vcombine.high %v5614_v14, %v5622_v16  ;;  %v14045_v33 = vcombine.high %v5615_v38, %v5623_v25  ;;  %v5718_v14 = vld [vmem:[#allocation15 + $0x770] sm:$0xff]  ;;  %v5711_v16 = vld [vmem:[#allocation15 + $0x738] sm:$0xff] }
 0xb58   : > { %9130 = vmatprep.subr.bf16.mxu1 %v13949_v15  ;;  %v5630_v15 = vld [vmem:[#allocation15 + $0x4b0] sm:$0xff] }
 0xb59   : > { %v14058_v20 = vcombine.low %v5630_v15, %v5638_v44 }
 0xb5a   : > { %9049 = vmatpush1.bf16.msra.mxu0 %v13946_v36  ;;  %v14044_v36 = vcombine.low %v5615_v38, %v5623_v25  ;;  %v5719_v38 = vld [vmem:[#allocation15 + $0x778] sm:$0xff] }
 0xb5b   : > { %9131 = vmatpush1.bf16.msra.mxu1 %v13948_v26  ;;  %9050 = vmatprep.subr.bf16.mxu0 %v13963_v62  ;;  %v14059_v26 = vcombine.high %v5630_v15, %v5638_v44  ;;  %v14061_v62 = vcombine.high %v5631_v7, %v5639_v34  ;;  %v5734_v15 = vld [vmem:[#allocation15 + $0x7f0] sm:$0xff]  ;;  %v5727_v44 = vld [vmem:[#allocation15 + $0x7b8] sm:$0xff] }
 0xb5c   : > { %9132 = vmatprep.subr.bf16.mxu1 %v13965_v39  ;;  %v5646_v39 = vld [vmem:[#allocation15 + $0x530] sm:$0xff] }
 0xb5d   : > { %v14074_v24 = vcombine.low %v5646_v39, %v5654_v42 }
 0xb5e   : > { %9051 = vmatpush1.bf16.msra.mxu0 %v13962_v19  ;;  %v14060_v19 = vcombine.low %v5631_v7, %v5639_v34  ;;  %v5735_v7 = vld [vmem:[#allocation15 + $0x7f8] sm:$0xff] }
 0xb5f   : > { %9133 = vmatpush1.bf16.msra.mxu1 %v13964_v47  ;;  %9052 = vmatprep.subr.bf16.mxu0 %v13979_v48  ;;  %v14075_v47 = vcombine.high %v5646_v39, %v5654_v42  ;;  %v14077_v48 = vcombine.high %v5647_v17, %v5655_v28  ;;  %v5750_v39 = vld [vmem:[#allocation15 + $0x870] sm:$0xff]  ;;  %v5743_v42 = vld [vmem:[#allocation15 + $0x838] sm:$0xff] }
 0xb60   : > { %9134 = vmatprep.subr.bf16.mxu1 %v13981_v49  ;;  %v5662_v49 = vld [vmem:[#allocation15 + $0x5b0] sm:$0xff] }
 0xb61   : > { %v14090_v61 = vcombine.low %v5662_v49, %v5670_v50 }
 0xb62   : > { %9053 = vmatpush1.bf16.msra.mxu0 %v13978_v54  ;;  %v14076_v54 = vcombine.low %v5647_v17, %v5655_v28  ;;  %v5751_v17 = vld [vmem:[#allocation15 + $0x878] sm:$0xff] }
 0xb63   : > { %9135 = vmatpush1.bf16.msra.mxu1 %v13980_v55  ;;  %9054 = vmatprep.subr.bf16.mxu0 %v13995_v56  ;;  %v14091_v55 = vcombine.high %v5662_v49, %v5670_v50  ;;  %v14093_v56 = vcombine.high %v5663_v51, %v5671_v57  ;;  %v5766_v49 = vld [vmem:[#allocation15 + $0x8f0] sm:$0xff] }
 0xb64   : > { %9136 = vmatprep.subr.bf16.mxu1 %v13997_v53  ;;  %v5678_v53 = vld [vmem:[#allocation15 + $0x630] sm:$0xff] }
 0xb65   : > { %v14106_v8 = vcombine.low %v5678_v53, %v5686_v58 }
 0xb66   : > { %9055 = vmatpush1.bf16.msra.mxu0 %v13994_v63  ;;  %v14092_v63 = vcombine.low %v5663_v51, %v5671_v57  ;;  %v5759_v51 = vld [vmem:[#allocation15 + $0x8b8] sm:$0xff] }
 0xb67   : > { %9137 = vmatpush1.bf16.msra.mxu1 %v13996_v0  ;;  %9056 = vmatprep.subr.bf16.mxu0 %v14011_v1  ;;  %v14107_v0 = vcombine.high %v5678_v53, %v5686_v58  ;;  %v14109_v1 = vcombine.high %v5679_v59, %v5687_v60  ;;  %v5767_v57 = vld [vmem:[#allocation15 + $0x8f8] sm:$0xff] }
 0xb68   : > { %9138 = vmatprep.subr.bf16.mxu1 %v14013_v2  ;;  %v5694_v2 = vld [vmem:[#allocation15 + $0x6b0] sm:$0xff]  ;;  %v14189_v53 = vcombine.high %v5759_v51, %v5767_v57  ;;  %v5775_v58 = vld [vmem:[#allocation15 + $0x938] sm:$0xff] }
 0xb69   : > { %v14122_v25 = vcombine.low %v5694_v2, %v5702_v3 }
 0xb6a   : > { %9057 = vmatpush1.bf16.msra.mxu0 %v14010_v9  ;;  %v14108_v9 = vcombine.low %v5679_v59, %v5687_v60  ;;  %v5783_v59 = vld [vmem:[#allocation15 + $0x978] sm:$0xff] }
 0xb6b   : > { %9139 = vmatpush1.bf16.msra.mxu1 %v14012_v10  ;;  %9058 = vmatprep.subr.bf16.mxu0 %v14027_v11  ;;  %v14123_v10 = vcombine.high %v5694_v2, %v5702_v3  ;;  %v14125_v11 = vcombine.high %v5695_v4, %v5703_v6  ;;  %v5798_v2 = vld [vmem:[#allocation15 + $0x9f0] sm:$0xff]  ;;  %v5791_v3 = vld [vmem:[#allocation15 + $0x9b8] sm:$0xff] }
 0xb6c   : > { %9140 = vmatprep.subr.bf16.mxu1 %v14029_v13  ;;  %v5710_v13 = vld [vmem:[#allocation15 + $0x730] sm:$0xff] }
 0xb6d   : > { %v14138_v34 = vcombine.low %v5710_v13, %v5718_v14 }
 0xb6e   : > { %9059 = vmatpush1.bf16.msra.mxu0 %v14026_v29  ;;  %v14124_v29 = vcombine.low %v5695_v4, %v5703_v6  ;;  %v5799_v4 = vld [vmem:[#allocation15 + $0x9f8] sm:$0xff] }
 0xb6f   : > { %9141 = vmatpush1.bf16.msra.mxu1 %v14028_v46  ;;  %9060 = vmatprep.subr.bf16.mxu0 %v14043_v30  ;;  %v14139_v46 = vcombine.high %v5710_v13, %v5718_v14  ;;  %v14141_v30 = vcombine.high %v5711_v16, %v5719_v38  ;;  %v5807_v13 = vld [vmem:[#allocation15 + $0xa38] sm:$0xff] }
 0xb70   : > { %9142 = vmatprep.subr.bf16.mxu1 %v14045_v33  ;;  %v5726_v33 = vld [vmem:[#allocation15 + $0x7b0] sm:$0xff]  ;;  %v5815_v14 = vld [vmem:[#allocation15 + $0xa78] sm:$0xff] }
 0xb71   : > { %v14154_v28 = vcombine.low %v5726_v33, %v5734_v15 }
 0xb72   : > { %9061 = vmatpush1.bf16.msra.mxu0 %v14042_v35  ;;  %v14140_v35 = vcombine.low %v5711_v16, %v5719_v38  ;;  %v14220_v16 = vcombine.low %v5791_v3, %v5799_v4 }
 0xb73   : > { %9143 = vmatpush1.bf16.msra.mxu1 %v14044_v36  ;;  %9062 = vmatprep.subr.bf16.mxu0 %v14059_v26  ;;  %v14155_v36 = vcombine.high %v5726_v33, %v5734_v15  ;;  %v14157_v26 = vcombine.high %v5727_v44, %v5735_v7  ;;  %v5831_v33 = vld [vmem:[#allocation15 + $0xaf8] sm:$0xff] }
 0xb74   : > { %9144 = vmatprep.subr.bf16.mxu1 %v14061_v62  ;;  %v5742_v62 = vld [vmem:[#allocation15 + $0x830] sm:$0xff] }
 0xb75   : > { %v14170_v50 = vcombine.low %v5742_v62, %v5750_v39 }
 0xb76   : > { %9063 = vmatpush1.bf16.msra.mxu0 %v14058_v20  ;;  %v14156_v20 = vcombine.low %v5727_v44, %v5735_v7  ;;  %v14236_v44 = vcombine.low %v5807_v13, %v5815_v14 }
 0xb77   : > { %9145 = vmatpush1.bf16.msra.mxu1 %v14060_v19  ;;  %9064 = vmatprep.subr.bf16.mxu0 %v14075_v47  ;;  %v14171_v19 = vcombine.high %v5742_v62, %v5750_v39  ;;  %v14173_v47 = vcombine.high %v5743_v42, %v5751_v17  ;;  %v5847_v62 = vld [vmem:[#allocation15 + $0xb78] sm:$0xff] }
 0xb78   : > { %9146 = vmatprep.subr.bf16.mxu1 %v14077_v48  ;;  %v5758_v48 = vld [vmem:[#allocation15 + $0x8b0] sm:$0xff] }
 0xb79   : > { %v14186_v60 = vcombine.low %v5758_v48, %v5766_v49 }
 0xb7a   : > { %9065 = vmatpush1.bf16.msra.mxu0 %v14074_v24  ;;  %v14172_v24 = vcombine.low %v5743_v42, %v5751_v17 }
 0xb7b   : > { %9147 = vmatpush1.bf16.msra.mxu1 %v14076_v54  ;;  %9066 = vmatprep.subr.bf16.mxu0 %v14091_v55  ;;  %v14187_v54 = vcombine.high %v5758_v48, %v5766_v49  ;;  %v5774_v55 = vld [vmem:[#allocation15 + $0x930] sm:$0xff] }
 0xb7c   : > { %9148 = vmatprep.subr.bf16.mxu1 %v14093_v56  ;;  %v5782_v56 = vld [vmem:[#allocation15 + $0x970] sm:$0xff] }
 0xb7d   : > { %v14202_v6 = vcombine.low %v5774_v55, %v5782_v56 }
 0xb7e   : > { %9067 = vmatpush1.bf16.msra.mxu0 %v14090_v61  ;;  %v14188_v61 = vcombine.low %v5759_v51, %v5767_v57  ;;  %v5863_v51 = vld [vmem:[#allocation15 + $0xbf8] sm:$0xff] }
 0xb7f   : > { %9149 = vmatpush1.bf16.msra.mxu1 %v14092_v63  ;;  %9068 = vmatprep.subr.bf16.mxu0 %v14107_v0  ;;  %v14203_v63 = vcombine.high %v5774_v55, %v5782_v56  ;;  %v14205_v0 = vcombine.high %v5775_v58, %v5783_v59 }
 0xb80   : > { %9150 = vmatprep.subr.bf16.mxu1 %v14109_v1  ;;  %v5790_v1 = vld [vmem:[#allocation15 + $0x9b0] sm:$0xff] }
 0xb82   : > { %9069 = vmatpush1.bf16.msra.mxu0 %v14106_v8  ;;  %v14219_v8 = vcombine.high %v5790_v1, %v5798_v2 }
 0xb83   : > { %9151 = vmatpush1.bf16.msra.mxu1 %v14108_v9  ;;  %9070 = vmatprep.subr.bf16.mxu0 %v14123_v10  ;;  %v14221_v9 = vcombine.high %v5791_v3, %v5799_v4  ;;  %v5806_v10 = vld [vmem:[#allocation15 + $0xa30] sm:$0xff] }
 0xb84   : > { %9152 = vmatprep.subr.bf16.mxu1 %v14125_v11  ;;  %v5814_v11 = vld [vmem:[#allocation15 + $0xa70] sm:$0xff] }
 0xb85   : > { %v14235_v38 = vcombine.high %v5806_v10, %v5814_v11  ;;  %v14234_v15 = vcombine.low %v5806_v10, %v5814_v11  ;;  %v5895_v10 = vld [vmem:[#allocation15 + $0xcf8] sm:$0xff] }
 0xb86   : > { %9071 = vmatpush1.bf16.msra.mxu0 %v14122_v25  ;;  %v14237_v25 = vcombine.high %v5807_v13, %v5815_v14 }
 0xb87   : > { %9153 = vmatpush1.bf16.msra.mxu1 %v14124_v29  ;;  %9072 = vmatprep.subr.bf16.mxu0 %v14139_v46  ;;  %v5822_v29 = vld [vmem:[#allocation15 + $0xab0] sm:$0xff] }
 0xb88   : > { %9154 = vmatprep.subr.bf16.mxu1 %v14141_v30  ;;  %v5830_v46 = vld [vmem:[#allocation15 + $0xaf0] sm:$0xff]  ;;  %v5823_v30 = vld [vmem:[#allocation15 + $0xab8] sm:$0xff] }
 0xb89   : > { %v14251_v7 = vcombine.high %v5822_v29, %v5830_v46  ;;  %v14250_v39 = vcombine.low %v5822_v29, %v5830_v46  ;;  %v14252_v42 = vcombine.low %v5823_v30, %v5831_v33  ;;  %v5911_v29 = vld [vmem:[#allocation15 + $0xd78] sm:$0xff] }
 0xb8a   : > { %9073 = vmatpush1.bf16.msra.mxu0 %v14138_v34  ;;  %v14253_v34 = vcombine.high %v5823_v30, %v5831_v33 }
 0xb8b   : > { %9155 = vmatpush1.bf16.msra.mxu1 %v14140_v35  ;;  %9074 = vmatprep.subr.bf16.mxu0 %v14155_v36  ;;  %v5838_v35 = vld [vmem:[#allocation15 + $0xb30] sm:$0xff] }
 0xb8c   : > { %9156 = vmatprep.subr.bf16.mxu1 %v14157_v26  ;;  %v5846_v36 = vld [vmem:[#allocation15 + $0xb70] sm:$0xff]  ;;  %v5839_v26 = vld [vmem:[#allocation15 + $0xb38] sm:$0xff] }
 0xb8d   : > { %v14267_v17 = vcombine.high %v5838_v35, %v5846_v36 }
 0xb8e   : > { %9075 = vmatpush1.bf16.msra.mxu0 %v14154_v28 }
 0xb8f   : > { %9157 = vmatpush1.bf16.msra.mxu1 %v14156_v20  ;;  %9085 = vmatprep.subr.bf16.mxu0 %v14171_v19  ;;  %v14269_v20 = vcombine.high %v5839_v26, %v5847_v62  ;;  %v5854_v19 = vld [vmem:[#allocation15 + $0xbb0] sm:$0xff] }
 0xb90   : > { %9167 = vmatprep.subr.bf16.mxu1 %v14173_v47  ;;  %v5862_v47 = vld [vmem:[#allocation15 + $0xbf0] sm:$0xff] }
 0xb91   : > { %9077 = vmatmul.mubr.bf16.vlgmr.msra.gmra.mrb[60].mxu0 %v17834_v12 }
 0xb92   : > { %9159 = vmatmul.mubr.bf16.vlgmr.msra.gmra.mrb[60].mxu1 %v17834_v12  ;;  %9086 = vmatpush1.bf16.msra.mxu0 %v14170_v50  ;;  %v14204_v12 = vcombine.low %v5775_v58, %v5783_v59  ;;  %v5855_v50 = vld [vmem:[#allocation15 + $0xbb8] sm:$0xff]  ;;  %v14283_v58 = vcombine.high %v5854_v19, %v5862_v47 }
 0xb93   : > { %9117 = vmatprep.mubr.bf16.mxu0 %v17842_v52  ;;  %9168 = vmatpush1.bf16.msra.mxu1 %v14172_v24  ;;  %v14284_v3 = vcombine.low %v5855_v50, %v5863_v51 }
 0xb94   : > { %9199 = vmatprep.mubr.bf16.mxu1 %v17842_v52  ;;  %9087 = vmatprep.subr.bf16.mxu0 %v14187_v54  ;;  %v14218_v52 = vcombine.low %v5790_v1, %v5798_v2  ;;  %v14266_v54 = vcombine.low %v5838_v35, %v5846_v36  ;;  %v5879_v1 = vld [vmem:[#allocation15 + $0xc78] sm:$0xff]  ;;  %v14282_v2 = vcombine.low %v5854_v19, %v5862_v47 }
 0xb95   : > { %9169 = vmatprep.subr.bf16.mxu1 %v14189_v53  ;;  %v14268_v53 = vcombine.low %v5839_v26, %v5847_v62  ;;  %v5927_v35 = vld [vmem:[#allocation15 + $0xdf8] sm:$0xff] }
 0xb96   : > { %9088 = vmatpush1.bf16.msra.mxu0 %v14186_v60  ;;  %v14285_v60 = vcombine.high %v5855_v50, %v5863_v51  ;;  %v5943_v19 = vld [vmem:[#allocation15 + $0xe78] sm:$0xff] }
 0xb97   : > { %9170 = vmatpush1.bf16.msra.mxu1 %v14188_v61  ;;  %9089 = vmatprep.subr.bf16.mxu0 %v14203_v63  ;;  %v5870_v61 = vld [vmem:[#allocation15 + $0xc30] sm:$0xff] }
 0xb98   : > { %9171 = vmatprep.subr.bf16.mxu1 %v14205_v0  ;;  %v5878_v63 = vld [vmem:[#allocation15 + $0xc70] sm:$0xff]  ;;  %v5871_v0 = vld [vmem:[#allocation15 + $0xc38] sm:$0xff] }
 0xb99   : > { %v14299_v4 = vcombine.high %v5870_v61, %v5878_v63  ;;  %v14298_v11 = vcombine.low %v5870_v61, %v5878_v63  ;;  %v14300_v13 = vcombine.low %v5871_v0, %v5879_v1  ;;  %v5966_v63 = vld [vmem:[#allocation15 + $0xf30] sm:$0xff] }
 0xb9a   : > { %9090 = vmatpush1.bf16.msra.mxu0 %v14202_v6  ;;  %v14301_v6 = vcombine.high %v5871_v0, %v5879_v1  ;;  %v5974_v0 = vld [vmem:[#allocation15 + $0xf70] sm:$0xff]  ;;  %v5967_v1 = vld [vmem:[#allocation15 + $0xf38] sm:$0xff] }
 0xb9b   : > { %9172 = vmatpush1.bf16.msra.mxu1 %v14204_v12  ;;  %9091 = vmatprep.subr.bf16.mxu0 %v14219_v8  ;;  %v5886_v12 = vld [vmem:[#allocation15 + $0xcb0] sm:$0xff] }
 0xb9c   : > { %9173 = vmatprep.subr.bf16.mxu1 %v14221_v9  ;;  %v5894_v8 = vld [vmem:[#allocation15 + $0xcf0] sm:$0xff]  ;;  %v5887_v9 = vld [vmem:[#allocation15 + $0xcb8] sm:$0xff] }
 0xb9d   : > { %v14315_v14 = vcombine.high %v5886_v12, %v5894_v8  ;;  %v14314_v46 = vcombine.low %v5886_v12, %v5894_v8  ;;  %v14316_v30 = vcombine.low %v5887_v9, %v5895_v10  ;;  %v5982_v8 = vld [vmem:[#allocation15 + $0xfb0] sm:$0xff] }
 0xb9e   : > { %9092 = vmatpush1.bf16.msra.mxu0 %v14218_v52  ;;  %v14317_v52 = vcombine.high %v5887_v9, %v5895_v10  ;;  %v5990_v9 = vld [vmem:[#allocation15 + $0xff0] sm:$0xff]  ;;  %v5983_v10 = vld [vmem:[#allocation15 + $0xfb8] sm:$0xff] }
 0xb9f   : > { %9174 = vmatpush1.bf16.msra.mxu1 %v14220_v16  ;;  %9093 = vmatprep.subr.bf16.mxu0 %v14235_v38  ;;  %v5902_v16 = vld [vmem:[#allocation15 + $0xd30] sm:$0xff] }
 0xba0   : > { %9175 = vmatprep.subr.bf16.mxu1 %v14237_v25  ;;  %v5910_v38 = vld [vmem:[#allocation15 + $0xd70] sm:$0xff]  ;;  %v5903_v25 = vld [vmem:[#allocation15 + $0xd38] sm:$0xff] }
 0xba1   : > { %v14331_v33 = vcombine.high %v5902_v16, %v5910_v38  ;;  %v14330_v36 = vcombine.low %v5902_v16, %v5910_v38  ;;  %v14332_v26 = vcombine.low %v5903_v25, %v5911_v29  ;;  %v14410_v38 = vcombine.low %v5982_v8, %v5990_v9 }
 0xba2   : > { %9094 = vmatpush1.bf16.msra.mxu0 %v14234_v15  ;;  %v14333_v15 = vcombine.high %v5903_v25, %v5911_v29  ;;  %v15772_v29 = vld [vmem:[#allocation17 + $0x4] ss:$16 sps:$4 sm:$0xff]  }
 0xba3   : > { %9176 = vmatpush1.bf16.msra.mxu1 %v14236_v44  ;;  %9095 = vmatprep.subr.bf16.mxu0 %v14251_v7  ;;  %v5918_v44 = vld [vmem:[#allocation15 + $0xdb0] sm:$0xff] }
 0xba4   : > { %v17882_v28 = vpop.f32.mrb[52].mxu0  ;;  %9177 = vmatprep.subr.bf16.mxu1 %v14253_v34  ;;  %v5926_v7 = vld [vmem:[#allocation15 + $0xdf0] sm:$0xff]  ;;  %v5919_v34 = vld [vmem:[#allocation15 + $0xdb8] sm:$0xff] }
 0xba5   : > { %v17884_v48 = vpop.f32.mrb[52].mxu1  ;;  %v17886_v49 = vpop.f32.mrb[53].mxu0  ;;  %v14347_v62 = vcombine.high %v5918_v44, %v5926_v7  ;;  %v14346_v47 = vcombine.low %v5918_v44, %v5926_v7  ;;  %v14348_v50 = vcombine.low %v5919_v34, %v5927_v35  ;;  %v15778_v44 = vld [vmem:[#allocation17 + $0x24] ss:$16 sps:$4 sm:$0xff]  }
 0xba6   : > { %v17888_v57 = vpop.f32.mrb[53].mxu1  ;;  %v8795_v24 = vpop.f32.mrb[54].mxu0  ;;  %9096 = vmatpush1.bf16.msra.mxu0 %v14250_v39  ;;  %v14349_v39 = vcombine.high %v5919_v34, %v5927_v35  ;;  %v15781_v34 = vld [vmem:[#allocation17 + $0x2c] ss:$16 sps:$4 sm:$0xff]   ;;  %v15776_v35 = vld [vmem:[#allocation17 + $0x20] ss:$16 sps:$4 sm:$0xff]  }
 0xba7   : > { %v8877_v55 = vpop.f32.mrb[54].mxu1  ;;  %9178 = vmatpush1.bf16.msra.mxu1 %v14252_v42  ;;  %v8796_v56 = vpop.f32.mrb[55].mxu0  ;;  %9097 = vmatprep.subr.bf16.mxu0 %v14267_v17  ;;  %v5934_v42 = vld [vmem:[#allocation15 + $0xe30] sm:$0xff] }
 0xba8   : > { %v8878_v59 = vpop.f32.mrb[55].mxu1  ;;  %9179 = vmatprep.subr.bf16.mxu1 %v14269_v20  ;;  %v5942_v17 = vld [vmem:[#allocation15 + $0xe70] sm:$0xff]  ;;  %v5935_v20 = vld [vmem:[#allocation15 + $0xe38] sm:$0xff] }
 0xba9   : > { %v14363_v51 = vcombine.high %v5934_v42, %v5942_v17  ;;  %v14365_v24 = vcombine.high %v5935_v20, %v5943_v19  ;;  %v5958_v55 = vld [vmem:[#allocation15 + $0xef0] sm:$0xff]  ;;  %v5951_v56 = vld [vmem:[#allocation15 + $0xeb8] sm:$0xff]  ;;  %v14364_v59 = vcombine.low %v5935_v20, %v5943_v19 }
 0xbaa   : > { %9098 = vmatpush1.bf16.msra.mxu0 %v14266_v54  ;;  %v5950_v54 = vld [vmem:[#allocation15 + $0xeb0] sm:$0xff]  ;;  %v15791_v20 = vld [vmem:[#allocation17 + $0x68] ss:$16 sps:$4 sm:$0xff]  }
 0xbab   : > { %9180 = vmatpush1.bf16.msra.mxu1 %v14268_v53  ;;  %9099 = vmatprep.subr.bf16.mxu0 %v14283_v58  ;;  %v5959_v53 = vld [vmem:[#allocation15 + $0xef8] sm:$0xff]  ;;  %v14362_v58 = vcombine.low %v5934_v42, %v5942_v17  ;;  %v15790_v42 = vld [vmem:[#allocation17 + $0x64] ss:$16 sps:$4 sm:$0xff]  }
 0xbac   : > { %9181 = vmatprep.subr.bf16.mxu1 %v14285_v60  ;;  %v14379_v60 = vcombine.high %v5950_v54, %v5958_v55  ;;  %v14381_v61 = vcombine.high %v5951_v56, %v5959_v53  ;;  %v15793_v17 = vld [vmem:[#allocation17 + $0x6c] ss:$16 sps:$4 sm:$0xff]   ;;  %v15796_v19 = vld [vmem:[#allocation17 + $0x84] ss:$16 sps:$4 sm:$0xff]  }
 0xbae   : > { %9100 = vmatpush1.bf16.msra.mxu0 %v14282_v2  ;;  %v5975_v2 = vld [vmem:[#allocation15 + $0xf78] sm:$0xff] }
 0xbaf   : > { %9182 = vmatpush1.bf16.msra.mxu1 %v14284_v3  ;;  %9101 = vmatprep.subr.bf16.mxu0 %v14299_v4  ;;  %v14378_v3 = vcombine.low %v5950_v54, %v5958_v55  ;;  %v14380_v4 = vcombine.low %v5951_v56, %v5959_v53  ;;  %v14397_v12 = vcombine.high %v5967_v1, %v5975_v2  ;;  %v15805_v54 = vld [vmem:[#allocation17 + $0xac] ss:$16 sps:$4 sm:$0xff]   ;;  %v15800_v55 = vld [vmem:[#allocation17 + $0xa0] ss:$16 sps:$4 sm:$0xff]   ;;  %v15803_v56 = vld [vmem:[#allocation17 + $0xa8] ss:$16 sps:$4 sm:$0xff]  }
 0xbb0   : > { %9183 = vmatprep.subr.bf16.mxu1 %v14301_v6  ;;  %v14395_v6 = vcombine.high %v5966_v63, %v5974_v0  ;;  %v15808_v53 = vld [vmem:[#allocation17 + $0xc4] ss:$16 sps:$4 sm:$0xff]  }
 0xbb2   : > { %9102 = vmatpush1.bf16.msra.mxu0 %v14298_v11  ;;  %v5991_v11 = vld [vmem:[#allocation15 + $0xff8] sm:$0xff] }
 0xbb3   : > { %9184 = vmatpush1.bf16.msra.mxu1 %v14300_v13  ;;  %9103 = vmatprep.subr.bf16.mxu0 %v14315_v14  ;;  %v14394_v13 = vcombine.low %v5966_v63, %v5974_v0  ;;  %v14396_v14 = vcombine.low %v5967_v1, %v5975_v2  ;;  %v14413_v16 = vcombine.high %v5983_v10, %v5991_v11  ;;  %v15817_v63 = vld [vmem:[#allocation17 + $0xec] ss:$16 sps:$4 sm:$0xff]   ;;  %v15812_v0 = vld [vmem:[#allocation17 + $0xe0] ss:$16 sps:$4 sm:$0xff]   ;;  %v15815_v1 = vld [vmem:[#allocation17 + $0xe8] ss:$16 sps:$4 sm:$0xff]  }
 0xbb4   : > { %9185 = vmatprep.subr.bf16.mxu1 %v14317_v52  ;;  %v14411_v52 = vcombine.high %v5982_v8, %v5990_v9  ;;  %v14412_v25 = vcombine.low %v5983_v10, %v5991_v11  ;;  %v15820_v2 = vld [vmem:[#allocation17 + $0x104] ss:$16 sps:$4 sm:$0xff]   ;;  %v15829_v8 = vld [vmem:[#allocation17 + $0x12c] ss:$16 sps:$4 sm:$0xff]   ;;  %v15824_v9 = vld [vmem:[#allocation17 + $0x120] ss:$16 sps:$4 sm:$0xff]  }
 0xbb5   : > { %v15827_v10 = vld [vmem:[#allocation17 + $0x128] ss:$16 sps:$4 sm:$0xff]   ;;  %v15832_v11 = vld [vmem:[#allocation17 + $0x144] ss:$16 sps:$4 sm:$0xff]  }
 0xbb6   : > { %9104 = vmatpush1.bf16.msra.mxu0 %v14314_v46  ;;  %v15775_v46 = vld [vmem:[#allocation17 + $0xc] ss:$16 sps:$4 sm:$0xff]  }
 0xbb7   : > { %9186 = vmatpush1.bf16.msra.mxu1 %v14316_v30  ;;  %9105 = vmatprep.subr.bf16.mxu0 %v14331_v33  ;;  %v9209_v30 = vmax.f32 %v17870_v31, 0.0  ;;  %v15770_v33 = vld [vmem:[#allocation17] ss:$16 sps:$4 sm:$0xff]   ;;  %v15787_v31 = vld [vmem:[#allocation17 + $0x4c] ss:$16 sps:$4 sm:$0xff]  }
 0xbb8   : > { %9187 = vmatprep.subr.bf16.mxu1 %v14333_v15  ;;  %v15773_v15 = vld [vmem:[#allocation17 + $0x8] ss:$16 sps:$4 sm:$0xff]  }
 0xbb9   : > { %v9225_v7 = vpack.c.bf16 %v9209_v30, %v9209_v30  ;;  %v15847_v30 = vld [vmem:[#allocation17 + $0x18c] ss:$16 sps:$4 sm:$0xff]  }
 0xbba   : > { %9106 = vmatpush1.bf16.msra.mxu0 %v14330_v36  ;;  %v15779_v36 = vld [vmem:[#allocation17 + $0x28] ss:$16 sps:$4 sm:$0xff]  }
 0xbbb   : > { %9188 = vmatpush1.bf16.msra.mxu1 %v14332_v26  ;;  %9107 = vmatprep.subr.bf16.mxu0 %v14347_v62  ;;  %v15784_v26 = vld [vmem:[#allocation17 + $0x44] ss:$16 sps:$4 sm:$0xff]   ;;  %v15782_v62 = vld [vmem:[#allocation17 + $0x40] ss:$16 sps:$4 sm:$0xff]  }
 0xbbc   : > { %9189 = vmatprep.subr.bf16.mxu1 %v14349_v39  ;;  %v15785_v39 = vld [vmem:[#allocation17 + $0x48] ss:$16 sps:$4 sm:$0xff]  }
 0xbbe   : > { %9108 = vmatpush1.bf16.msra.mxu0 %v14346_v47  ;;  %v15799_v47 = vld [vmem:[#allocation17 + $0x8c] ss:$16 sps:$4 sm:$0xff]  }
 0xbbf   : > { %9190 = vmatpush1.bf16.msra.mxu1 %v14348_v50  ;;  %9109 = vmatprep.subr.bf16.mxu0 %v14363_v51  ;;  %v15794_v50 = vld [vmem:[#allocation17 + $0x80] ss:$16 sps:$4 sm:$0xff]   ;;  %v15797_v51 = vld [vmem:[#allocation17 + $0x88] ss:$16 sps:$4 sm:$0xff]  }
 0xbc0   : > { %9191 = vmatprep.subr.bf16.mxu1 %v14365_v24  ;;  %v15802_v24 = vld [vmem:[#allocation17 + $0xa4] ss:$16 sps:$4 sm:$0xff]  }
 0xbc2   : > { %9110 = vmatpush1.bf16.msra.mxu0 %v14362_v58  ;;  %v15811_v58 = vld [vmem:[#allocation17 + $0xcc] ss:$16 sps:$4 sm:$0xff]  }
 0xbc3   : > { %9192 = vmatpush1.bf16.msra.mxu1 %v14364_v59  ;;  %9111 = vmatprep.subr.bf16.mxu0 %v14379_v60  ;;  %v15806_v59 = vld [vmem:[#allocation17 + $0xc0] ss:$16 sps:$4 sm:$0xff]   ;;  %v15809_v60 = vld [vmem:[#allocation17 + $0xc8] ss:$16 sps:$4 sm:$0xff]  }
 0xbc4   : > { %9193 = vmatprep.subr.bf16.mxu1 %v14381_v61  ;;  %v15814_v61 = vld [vmem:[#allocation17 + $0xe4] ss:$16 sps:$4 sm:$0xff]  }
 0xbc6   : > { %9112 = vmatpush1.bf16.msra.mxu0 %v14378_v3  ;;  %v15823_v3 = vld [vmem:[#allocation17 + $0x10c] ss:$16 sps:$4 sm:$0xff]  }
 0xbc7   : > { %9194 = vmatpush1.bf16.msra.mxu1 %v14380_v4  ;;  %9113 = vmatprep.subr.bf16.mxu0 %v14395_v6  ;;  %v15818_v4 = vld [vmem:[#allocation17 + $0x100] ss:$16 sps:$4 sm:$0xff]   ;;  %v15821_v6 = vld [vmem:[#allocation17 + $0x108] ss:$16 sps:$4 sm:$0xff]  }
 0xbc8   : > { %9195 = vmatprep.subr.bf16.mxu1 %v14397_v12  ;;  %v15826_v12 = vld [vmem:[#allocation17 + $0x124] ss:$16 sps:$4 sm:$0xff]  }
 0xbca   : > { %9114 = vmatpush1.bf16.msra.mxu0 %v14394_v13  ;;  %v15835_v13 = vld [vmem:[#allocation17 + $0x14c] ss:$16 sps:$4 sm:$0xff]  }
 0xbcb   : > { %9196 = vmatpush1.bf16.msra.mxu1 %v14396_v14  ;;  %9115 = vmatprep.subr.bf16.mxu0 %v14411_v52  ;;  %v15830_v14 = vld [vmem:[#allocation17 + $0x140] ss:$16 sps:$4 sm:$0xff]   ;;  %v15833_v52 = vld [vmem:[#allocation17 + $0x148] ss:$16 sps:$4 sm:$0xff]  }
 0xbcc   : > { %9197 = vmatprep.subr.bf16.mxu1 %v14413_v16  ;;  %v15838_v16 = vld [vmem:[#allocation17 + $0x164] ss:$16 sps:$4 sm:$0xff]  }
 0xbce   : > { %9116 = vmatpush1.bf16.msra.mxu0 %v14410_v38  ;;  %v15841_v38 = vld [vmem:[#allocation17 + $0x16c] ss:$16 sps:$4 sm:$0xff]  }
 0xbcf   : > { %9198 = vmatpush1.bf16.msra.mxu1 %v14412_v25  ;;  %12312 = vmatprep.subr.bf16.mxu0 %v15772_v29  ;;  %v15836_v25 = vld [vmem:[#allocation17 + $0x160] ss:$16 sps:$4 sm:$0xff]   ;;  %v15839_v29 = vld [vmem:[#allocation17 + $0x168] ss:$16 sps:$4 sm:$0xff]  }
 0xbd0   : > { %12640 = vmatprep.subr.bf16.mxu1 %v15775_v46  ;;  %v15844_v46 = vld [vmem:[#allocation17 + $0x184] ss:$16 sps:$4 sm:$0xff]  }
 0xbd1   : > { %9118 = vmatmul.mubr.bf16.vlgmr.msra.gmra.mrb[60].mxu0 %v17848_v5 }
 0xbd2   : > { %9200 = vmatmul.mubr.bf16.vlgmr.msra.gmra.mrb[60].mxu1 %v17848_v5  ;;  %12313 = vmatpush1.bf16.msra.mxu0 %v15770_v33  ;;  %v15788_v5 = vld [vmem:[#allocation17 + $0x60] ss:$16 sps:$4 sm:$0xff]  }
 0xbd3   : > { %12344 = vmatprep.mubr.bf16.mxu0 %v9225_v7  ;;  %12641 = vmatpush1.bf16.msra.mxu1 %v15773_v15  ;;  %v15842_v33 = vld [vmem:[#allocation17 + $0x180] ss:$16 sps:$4 sm:$0xff]   ;;  %v15845_v15 = vld [vmem:[#allocation17 + $0x188] ss:$16 sps:$4 sm:$0xff]  }
 0xbd4   : > { %12672 = vmatprep.mubr.bf16.mxu1 %v9225_v7  ;;  %12314 = vmatprep.subr.bf16.mxu0 %v15778_v44  ;;  %v15850_v44 = vld [vmem:[#allocation17 + $0x1a4] ss:$16 sps:$4 sm:$0xff]   ;;  %v15853_v7 = vld [vmem:[#allocation17 + $0x1ac] ss:$16 sps:$4 sm:$0xff]  }
 0xbd5   : > { %12642 = vmatprep.subr.bf16.mxu1 %v15781_v34  ;;  %v15848_v34 = vld [vmem:[#allocation17 + $0x1a0] ss:$16 sps:$4 sm:$0xff]  }
 0xbd6   : > { %12315 = vmatpush1.bf16.msra.mxu0 %v15776_v35  ;;  %v15851_v35 = vld [vmem:[#allocation17 + $0x1a8] ss:$16 sps:$4 sm:$0xff]  }
 0xbd7   : > { %12643 = vmatpush1.bf16.msra.mxu1 %v15779_v36  ;;  %12316 = vmatprep.subr.bf16.mxu0 %v15784_v26  ;;  %v15856_v36 = vld [vmem:[#allocation17 + $0x1c4] ss:$16 sps:$4 sm:$0xff]   ;;  %v15859_v26 = vld [vmem:[#allocation17 + $0x1cc] ss:$16 sps:$4 sm:$0xff]  }
 0xbd8   : > { %12644 = vmatprep.subr.bf16.mxu1 %v15787_v31  ;;  %v15854_v31 = vld [vmem:[#allocation17 + $0x1c0] ss:$16 sps:$4 sm:$0xff]  }
 0xbda   : > { %12317 = vmatpush1.bf16.msra.mxu0 %v15782_v62  ;;  %v15857_v62 = vld [vmem:[#allocation17 + $0x1c8] ss:$16 sps:$4 sm:$0xff]  }
 0xbdb   : > { %12645 = vmatpush1.bf16.msra.mxu1 %v15785_v39  ;;  %12318 = vmatprep.subr.bf16.mxu0 %v15790_v42  ;;  %v15862_v39 = vld [vmem:[#allocation17 + $0x1e4] ss:$16 sps:$4 sm:$0xff]   ;;  %v15865_v42 = vld [vmem:[#allocation17 + $0x1ec] ss:$16 sps:$4 sm:$0xff]  }
 0xbdc   : > { %12646 = vmatprep.subr.bf16.mxu1 %v15793_v17  ;;  %v15860_v17 = vld [vmem:[#allocation17 + $0x1e0] ss:$16 sps:$4 sm:$0xff]  }
 0xbde   : > { %12319 = vmatpush1.bf16.msra.mxu0 %v15788_v5  ;;  %v9208_v5 = vmax.f32 %v17866_v27, 0.0  ;;  %v15872_v27 = vld [vmem:[#allocation17 + $0x220] ss:$16 sps:$4 sm:$0xff]  }
 0xbdf   : > { %12647 = vmatpush1.bf16.msra.mxu1 %v15791_v20  ;;  %12320 = vmatprep.subr.bf16.mxu0 %v15796_v19  ;;  %v15863_v20 = vld [vmem:[#allocation17 + $0x1e8] ss:$16 sps:$4 sm:$0xff]   ;;  %v15868_v19 = vld [vmem:[#allocation17 + $0x204] ss:$16 sps:$4 sm:$0xff]  }
 0xbe0   : > { %12648 = vmatprep.subr.bf16.mxu1 %v15799_v47  ;;  %v15871_v47 = vld [vmem:[#allocation17 + $0x20c] ss:$16 sps:$4 sm:$0xff]  }
 0xbe2   : > { %12321 = vmatpush1.bf16.msra.mxu0 %v15794_v50  ;;  %v9211_v50 = vmax.f32 %v17872_v32, 0.0  ;;  %v15883_v32 = vld [vmem:[#allocation17 + $0x24c] ss:$16 sps:$4 sm:$0xff]  }
 0xbe3   : > { %12649 = vmatpush1.bf16.msra.mxu1 %v15797_v51  ;;  %12322 = vmatprep.subr.bf16.mxu0 %v15802_v24  ;;  %v15866_v51 = vld [vmem:[#allocation17 + $0x200] ss:$16 sps:$4 sm:$0xff]   ;;  %v9224_v24 = vpack.c.bf16 %v9208_v5, %v9208_v5 }
 0xbe4   : > { %12650 = vmatprep.subr.bf16.mxu1 %v15805_v54  ;;  %v15869_v54 = vld [vmem:[#allocation17 + $0x208] ss:$16 sps:$4 sm:$0xff]   ;;  %v15920_v5 = vld [vmem:[#allocation17 + $0x320] ss:$16 sps:$4 sm:$0xff]  }
 0xbe6   : > { %12323 = vmatpush1.bf16.msra.mxu0 %v15800_v55  ;;  %v15874_v55 = vld [vmem:[#allocation17 + $0x224] ss:$16 sps:$4 sm:$0xff]  }
 0xbe7   : > { %12651 = vmatpush1.bf16.msra.mxu1 %v15803_v56  ;;  %12324 = vmatprep.subr.bf16.mxu0 %v15808_v53  ;;  %v9227_v56 = vpack.c.bf16 %v9211_v50, %v9211_v50  ;;  %v15877_v53 = vld [vmem:[#allocation17 + $0x22c] ss:$16 sps:$4 sm:$0xff]   ;;  %v15926_v50 = vld [vmem:[#allocation17 + $0x340] ss:$16 sps:$4 sm:$0xff]  }
 0xbe8   : > { %12652 = vmatprep.subr.bf16.mxu1 %v15811_v58  ;;  %v15875_v58 = vld [vmem:[#allocation17 + $0x228] ss:$16 sps:$4 sm:$0xff]  }
 0xbea   : > { %12325 = vmatpush1.bf16.msra.mxu0 %v15806_v59  ;;  %v15880_v59 = vld [vmem:[#allocation17 + $0x244] ss:$16 sps:$4 sm:$0xff]  }
 0xbeb   : > { %12653 = vmatpush1.bf16.msra.mxu1 %v15809_v60  ;;  %12326 = vmatprep.subr.bf16.mxu0 %v15814_v61  ;;  %v15878_v60 = vld [vmem:[#allocation17 + $0x240] ss:$16 sps:$4 sm:$0xff]   ;;  %v15881_v61 = vld [vmem:[#allocation17 + $0x248] ss:$16 sps:$4 sm:$0xff]  }
 0xbec   : > { %12654 = vmatprep.subr.bf16.mxu1 %v15817_v63  ;;  %v15886_v63 = vld [vmem:[#allocation17 + $0x264] ss:$16 sps:$4 sm:$0xff]  }
 0xbee   : > { %12327 = vmatpush1.bf16.msra.mxu0 %v15812_v0  ;;  %v15889_v0 = vld [vmem:[#allocation17 + $0x26c] ss:$16 sps:$4 sm:$0xff]  }
 0xbef   : > { %12655 = vmatpush1.bf16.msra.mxu1 %v15815_v1  ;;  %12328 = vmatprep.subr.bf16.mxu0 %v15820_v2  ;;  %v15884_v1 = vld [vmem:[#allocation17 + $0x260] ss:$16 sps:$4 sm:$0xff]   ;;  %v15887_v2 = vld [vmem:[#allocation17 + $0x268] ss:$16 sps:$4 sm:$0xff]  }
 0xbf0   : > { %12656 = vmatprep.subr.bf16.mxu1 %v15823_v3  ;;  %v15892_v3 = vld [vmem:[#allocation17 + $0x284] ss:$16 sps:$4 sm:$0xff]  }
 0xbf2   : > { %12329 = vmatpush1.bf16.msra.mxu0 %v15818_v4  ;;  %v15895_v4 = vld [vmem:[#allocation17 + $0x28c] ss:$16 sps:$4 sm:$0xff]  }
 0xbf3   : > { %12657 = vmatpush1.bf16.msra.mxu1 %v15821_v6  ;;  %12330 = vmatprep.subr.bf16.mxu0 %v15826_v12  ;;  %v15890_v6 = vld [vmem:[#allocation17 + $0x280] ss:$16 sps:$4 sm:$0xff]   ;;  %v15893_v12 = vld [vmem:[#allocation17 + $0x288] ss:$16 sps:$4 sm:$0xff]  }
 0xbf4   : > { %12658 = vmatprep.subr.bf16.mxu1 %v15829_v8  ;;  %v15898_v8 = vld [vmem:[#allocation17 + $0x2a4] ss:$16 sps:$4 sm:$0xff]  }
 0xbf6   : > { %12331 = vmatpush1.bf16.msra.mxu0 %v15824_v9  ;;  %v15901_v9 = vld [vmem:[#allocation17 + $0x2ac] ss:$16 sps:$4 sm:$0xff]  }
 0xbf7   : > { %12659 = vmatpush1.bf16.msra.mxu1 %v15827_v10  ;;  %12332 = vmatprep.subr.bf16.mxu0 %v15832_v11  ;;  %v15896_v10 = vld [vmem:[#allocation17 + $0x2a0] ss:$16 sps:$4 sm:$0xff]   ;;  %v15899_v11 = vld [vmem:[#allocation17 + $0x2a8] ss:$16 sps:$4 sm:$0xff]  }
 0xbf8   : > { %12660 = vmatprep.subr.bf16.mxu1 %v15835_v13  ;;  %v15904_v13 = vld [vmem:[#allocation17 + $0x2c4] ss:$16 sps:$4 sm:$0xff]  }
 0xbfa   : > { %12333 = vmatpush1.bf16.msra.mxu0 %v15830_v14 }
 0xbfb   : > { %12661 = vmatpush1.bf16.msra.mxu1 %v15833_v52  ;;  %12334 = vmatprep.subr.bf16.mxu0 %v15838_v16  ;;  %v15907_v52 = vld [vmem:[#allocation17 + $0x2cc] ss:$16 sps:$4 sm:$0xff]  }
 0xbfc   : > { %12662 = vmatprep.subr.bf16.mxu1 %v15841_v38 }
 0xbfe   : > { %12335 = vmatpush1.bf16.msra.mxu0 %v15836_v25 }
 0xbff   : > { %12663 = vmatpush1.bf16.msra.mxu1 %v15839_v29  ;;  %12336 = vmatprep.subr.bf16.mxu0 %v15844_v46  ;;  %v15902_v46 = vld [vmem:[#allocation17 + $0x2c0] ss:$16 sps:$4 sm:$0xff]  }
 0xc00   : > { %12664 = vmatprep.subr.bf16.mxu1 %v15847_v30 }
 0xc02   : > { %12337 = vmatpush1.bf16.msra.mxu0 %v15842_v33 }
 0xc03   : > { %12665 = vmatpush1.bf16.msra.mxu1 %v15845_v15  ;;  %12338 = vmatprep.subr.bf16.mxu0 %v15850_v44  ;;  %v15905_v15 = vld [vmem:[#allocation17 + $0x2c8] ss:$16 sps:$4 sm:$0xff]   ;;  %v15910_v44 = vld [vmem:[#allocation17 + $0x2e4] ss:$16 sps:$4 sm:$0xff]  }
 0xc04   : > { %12666 = vmatprep.subr.bf16.mxu1 %v15853_v7 }
 0xc06   : > { %12339 = vmatpush1.bf16.msra.mxu0 %v15848_v34  ;;  %v15913_v34 = vld [vmem:[#allocation17 + $0x2ec] ss:$16 sps:$4 sm:$0xff]  }
 0xc07   : > { %12667 = vmatpush1.bf16.msra.mxu1 %v15851_v35  ;;  %12340 = vmatprep.subr.bf16.mxu0 %v15856_v36  ;;  %v15908_v35 = vld [vmem:[#allocation17 + $0x2e0] ss:$16 sps:$4 sm:$0xff]   ;;  %v15911_v36 = vld [vmem:[#allocation17 + $0x2e8] ss:$16 sps:$4 sm:$0xff]  }
 0xc08   : > { %12668 = vmatprep.subr.bf16.mxu1 %v15859_v26  ;;  %v15916_v26 = vld [vmem:[#allocation17 + $0x304] ss:$16 sps:$4 sm:$0xff]  }
 0xc0a   : > { %12341 = vmatpush1.bf16.msra.mxu0 %v15854_v31  ;;  %v15919_v31 = vld [vmem:[#allocation17 + $0x30c] ss:$16 sps:$4 sm:$0xff]  }
 0xc0b   : > { %12669 = vmatpush1.bf16.msra.mxu1 %v15857_v62  ;;  %12342 = vmatprep.subr.bf16.mxu0 %v15862_v39  ;;  %v15914_v62 = vld [vmem:[#allocation17 + $0x300] ss:$16 sps:$4 sm:$0xff]   ;;  %v15917_v39 = vld [vmem:[#allocation17 + $0x308] ss:$16 sps:$4 sm:$0xff]  }
 0xc0c   : > { %12670 = vmatprep.subr.bf16.mxu1 %v15865_v42  ;;  %v15922_v42 = vld [vmem:[#allocation17 + $0x324] ss:$16 sps:$4 sm:$0xff]  }
 0xc0e   : > { %12343 = vmatpush1.bf16.msra.mxu0 %v15860_v17  ;;  %v15925_v17 = vld [vmem:[#allocation17 + $0x32c] ss:$16 sps:$4 sm:$0xff]  }
 0xc0f   : > { %12671 = vmatpush1.bf16.msra.mxu1 %v15863_v20  ;;  %12353 = vmatprep.subr.bf16.mxu0 %v15868_v19  ;;  %v15923_v20 = vld [vmem:[#allocation17 + $0x328] ss:$16 sps:$4 sm:$0xff]   ;;  %v15928_v19 = vld [vmem:[#allocation17 + $0x344] ss:$16 sps:$4 sm:$0xff]  }
 0xc10   : > { %12681 = vmatprep.subr.bf16.mxu1 %v15871_v47  ;;  %v15931_v47 = vld [vmem:[#allocation17 + $0x34c] ss:$16 sps:$4 sm:$0xff]  }
 0xc11   : > { %12345 = vmatmul.mubr.bf16.vlgmr.msra.gmra.mrb[64].mxu0 %v9224_v24 }
 0xc12   : > { %12673 = vmatmul.mubr.bf16.vlgmr.msra.gmra.mrb[64].mxu1 %v9224_v24  ;;  %12354 = vmatpush1.bf16.msra.mxu0 %v15866_v51  ;;  %v15929_v51 = vld [vmem:[#allocation17 + $0x348] ss:$16 sps:$4 sm:$0xff]   ;;  %v15934_v24 = vld [vmem:[#allocation17 + $0x364] ss:$16 sps:$4 sm:$0xff]  }
 0xc13   : > { %12385 = vmatprep.mubr.bf16.mxu0 %v9227_v56  ;;  %12682 = vmatpush1.bf16.msra.mxu1 %v15869_v54  ;;  %v15937_v54 = vld [vmem:[#allocation17 + $0x36c] ss:$16 sps:$4 sm:$0xff]  }
 0xc14   : > { %12713 = vmatprep.mubr.bf16.mxu1 %v9227_v56  ;;  %12355 = vmatprep.subr.bf16.mxu0 %v15874_v55  ;;  %v15932_v55 = vld [vmem:[#allocation17 + $0x360] ss:$16 sps:$4 sm:$0xff]   ;;  %v15935_v56 = vld [vmem:[#allocation17 + $0x368] ss:$16 sps:$4 sm:$0xff]  }
 0xc15   : > { %12683 = vmatprep.subr.bf16.mxu1 %v15877_v53  ;;  %v15940_v53 = vld [vmem:[#allocation17 + $0x384] ss:$16 sps:$4 sm:$0xff]  }
 0xc16   : > { %12356 = vmatpush1.bf16.msra.mxu0 %v15872_v27  ;;  %v15943_v27 = vld [vmem:[#allocation17 + $0x38c] ss:$16 sps:$4 sm:$0xff]  }
 0xc17   : > { %12684 = vmatpush1.bf16.msra.mxu1 %v15875_v58  ;;  %12357 = vmatprep.subr.bf16.mxu0 %v15880_v59  ;;  %v15938_v58 = vld [vmem:[#allocation17 + $0x380] ss:$16 sps:$4 sm:$0xff]   ;;  %v15941_v59 = vld [vmem:[#allocation17 + $0x388] ss:$16 sps:$4 sm:$0xff]  }
 0xc18   : > { %12685 = vmatprep.subr.bf16.mxu1 %v15883_v32  ;;  %v15946_v32 = vld [vmem:[#allocation17 + $0x3a4] ss:$16 sps:$4 sm:$0xff]  }
 0xc1a   : > { %12358 = vmatpush1.bf16.msra.mxu0 %v15878_v60  ;;  %v15949_v60 = vld [vmem:[#allocation17 + $0x3ac] ss:$16 sps:$4 sm:$0xff]  }
 0xc1b   : > { %12686 = vmatpush1.bf16.msra.mxu1 %v15881_v61  ;;  %12359 = vmatprep.subr.bf16.mxu0 %v15886_v63  ;;  %v15944_v61 = vld [vmem:[#allocation17 + $0x3a0] ss:$16 sps:$4 sm:$0xff]   ;;  %v15947_v63 = vld [vmem:[#allocation17 + $0x3a8] ss:$16 sps:$4 sm:$0xff]  }
 0xc1c   : > { %12687 = vmatprep.subr.bf16.mxu1 %v15889_v0  ;;  %v15952_v0 = vld [vmem:[#allocation17 + $0x3c4] ss:$16 sps:$4 sm:$0xff]  }
 0xc1e   : > { %12360 = vmatpush1.bf16.msra.mxu0 %v15884_v1  ;;  %v15955_v1 = vld [vmem:[#allocation17 + $0x3cc] ss:$16 sps:$4 sm:$0xff]  }
 0xc1f   : > { %12688 = vmatpush1.bf16.msra.mxu1 %v15887_v2  ;;  %12361 = vmatprep.subr.bf16.mxu0 %v15892_v3  ;;  %v15950_v2 = vld [vmem:[#allocation17 + $0x3c0] ss:$16 sps:$4 sm:$0xff]   ;;  %v15953_v3 = vld [vmem:[#allocation17 + $0x3c8] ss:$16 sps:$4 sm:$0xff]  }
 0xc20   : > { %12689 = vmatprep.subr.bf16.mxu1 %v15895_v4  ;;  %v15958_v4 = vld [vmem:[#allocation17 + $0x3e4] ss:$16 sps:$4 sm:$0xff]  }
 0xc22   : > { %12362 = vmatpush1.bf16.msra.mxu0 %v15890_v6  ;;  %v15961_v6 = vld [vmem:[#allocation17 + $0x3ec] ss:$16 sps:$4 sm:$0xff]  }
 0xc23   : > { %12690 = vmatpush1.bf16.msra.mxu1 %v15893_v12  ;;  %12363 = vmatprep.subr.bf16.mxu0 %v15898_v8  ;;  %v15956_v12 = vld [vmem:[#allocation17 + $0x3e0] ss:$16 sps:$4 sm:$0xff]   ;;  %v9210_v8 = vmax.f32 %v17868_v45, 0.0 }
 0xc24   : > { %v17895_v14 = vpop.f32.mrb[56].mxu0  ;;  %12691 = vmatprep.subr.bf16.mxu1 %v15901_v9  ;;  %v15959_v9 = vld [vmem:[#allocation17 + $0x3e8] ss:$16 sps:$4 sm:$0xff]   ;;  %v15968_v45 = vld [vmem:[#allocation17 + $0x420] ss:$16 sps:$4 sm:$0xff]  }
 0xc25   : > { %v17897_v16 = vpop.f32.mrb[56].mxu1  ;;  %v17899_v38 = vpop.f32.mrb[57].mxu0 }
 0xc26   : > { %v17901_v25 = vpop.f32.mrb[57].mxu1  ;;  %v8959_v29 = vpop.f32.mrb[58].mxu0  ;;  %12364 = vmatpush1.bf16.msra.mxu0 %v15896_v10  ;;  %v15964_v10 = vld [vmem:[#allocation17 + $0x404] ss:$16 sps:$4 sm:$0xff]  }
 0xc27   : > { %v9041_v30 = vpop.f32.mrb[58].mxu1  ;;  %12692 = vmatpush1.bf16.msra.mxu1 %v15899_v11  ;;  %v8960_v33 = vpop.f32.mrb[59].mxu0  ;;  %12365 = vmatprep.subr.bf16.mxu0 %v15904_v13  ;;  %v15967_v11 = vld [vmem:[#allocation17 + $0x40c] ss:$16 sps:$4 sm:$0xff]   ;;  %v9213_v13 = vmax.f32 %v17886_v49, 0.0  ;;  %v9226_v29 = vpack.c.bf16 %v9210_v8, %v9210_v8 }
 0xc28   : > { %v9042_v7 = vpop.f32.mrb[59].mxu1  ;;  %12693 = vmatprep.subr.bf16.mxu1 %v15907_v52  ;;  %v15962_v52 = vld [vmem:[#allocation17 + $0x400] ss:$16 sps:$4 sm:$0xff]   ;;  %v15970_v30 = vld [vmem:[#allocation17 + $0x424] ss:$16 sps:$4 sm:$0xff]  }
 0xc29   : > { %v9229_v33 = vpack.c.bf16 %v9213_v13, %v9213_v13  ;;  %v15976_v7 = vld [vmem:[#allocation17 + $0x444] ss:$16 sps:$4 sm:$0xff]   ;;  %v15979_v49 = vld [vmem:[#allocation17 + $0x44c] ss:$16 sps:$4 sm:$0xff]  }
 0xc2a   : > { %12366 = vmatpush1.bf16.msra.mxu0 %v15902_v46  ;;  %v15965_v46 = vld [vmem:[#allocation17 + $0x408] ss:$16 sps:$4 sm:$0xff]   ;;  %v16030_v8 = vld [vmem:[#allocation17 + $0x564] ss:$16 sps:$4 sm:$0xff]  }
 0xc2b   : > { %12694 = vmatpush1.bf16.msra.mxu1 %v15905_v15  ;;  %12367 = vmatprep.subr.bf16.mxu0 %v15910_v44  ;;  %v15973_v15 = vld [vmem:[#allocation17 + $0x42c] ss:$16 sps:$4 sm:$0xff]   ;;  %v15971_v44 = vld [vmem:[#allocation17 + $0x428] ss:$16 sps:$4 sm:$0xff]   ;;  %v16036_v13 = vld [vmem:[#allocation17 + $0x584] ss:$16 sps:$4 sm:$0xff]  }
 0xc2c   : > { %12695 = vmatprep.subr.bf16.mxu1 %v15913_v34  ;;  %v15974_v34 = vld [vmem:[#allocation17 + $0x440] ss:$16 sps:$4 sm:$0xff]  }
 0xc2e   : > { %12368 = vmatpush1.bf16.msra.mxu0 %v15908_v35  ;;  %v15977_v35 = vld [vmem:[#allocation17 + $0x448] ss:$16 sps:$4 sm:$0xff]  }
 0xc2f   : > { %12696 = vmatpush1.bf16.msra.mxu1 %v15911_v36  ;;  %12369 = vmatprep.subr.bf16.mxu0 %v15916_v26  ;;  %v15982_v36 = vld [vmem:[#allocation17 + $0x464] ss:$16 sps:$4 sm:$0xff]   ;;  %v15985_v26 = vld [vmem:[#allocation17 + $0x46c] ss:$16 sps:$4 sm:$0xff]  }
 0xc30   : > { %12697 = vmatprep.subr.bf16.mxu1 %v15919_v31  ;;  %v15980_v31 = vld [vmem:[#allocation17 + $0x460] ss:$16 sps:$4 sm:$0xff]  }
 0xc32   : > { %12370 = vmatpush1.bf16.msra.mxu0 %v15914_v62  ;;  %v15983_v62 = vld [vmem:[#allocation17 + $0x468] ss:$16 sps:$4 sm:$0xff]  }
 0xc33   : > { %12698 = vmatpush1.bf16.msra.mxu1 %v15917_v39  ;;  %12371 = vmatprep.subr.bf16.mxu0 %v15922_v42  ;;  %v15988_v39 = vld [vmem:[#allocation17 + $0x484] ss:$16 sps:$4 sm:$0xff]   ;;  %v15991_v42 = vld [vmem:[#allocation17 + $0x48c] ss:$16 sps:$4 sm:$0xff]  }
 0xc34   : > { %12699 = vmatprep.subr.bf16.mxu1 %v15925_v17  ;;  %v15986_v17 = vld [vmem:[#allocation17 + $0x480] ss:$16 sps:$4 sm:$0xff]  }
 0xc36   : > { %12372 = vmatpush1.bf16.msra.mxu0 %v15920_v5  ;;  %v15989_v5 = vld [vmem:[#allocation17 + $0x488] ss:$16 sps:$4 sm:$0xff]  }
 0xc37   : > { %12700 = vmatpush1.bf16.msra.mxu1 %v15923_v20  ;;  %12373 = vmatprep.subr.bf16.mxu0 %v15928_v19  ;;  %v15994_v20 = vld [vmem:[#allocation17 + $0x4a4] ss:$16 sps:$4 sm:$0xff]   ;;  %v15997_v19 = vld [vmem:[#allocation17 + $0x4ac] ss:$16 sps:$4 sm:$0xff]  }
 0xc38   : > { %12701 = vmatprep.subr.bf16.mxu1 %v15931_v47  ;;  %v15992_v47 = vld [vmem:[#allocation17 + $0x4a0] ss:$16 sps:$4 sm:$0xff]  }
 0xc3a   : > { %12374 = vmatpush1.bf16.msra.mxu0 %v15926_v50  ;;  %v15995_v50 = vld [vmem:[#allocation17 + $0x4a8] ss:$16 sps:$4 sm:$0xff]  }
 0xc3b   : > { %12702 = vmatpush1.bf16.msra.mxu1 %v15929_v51  ;;  %12375 = vmatprep.subr.bf16.mxu0 %v15934_v24  ;;  %v16000_v51 = vld [vmem:[#allocation17 + $0x4c4] ss:$16 sps:$4 sm:$0xff]   ;;  %v16003_v24 = vld [vmem:[#allocation17 + $0x4cc] ss:$16 sps:$4 sm:$0xff]  }
 0xc3c   : > { %12703 = vmatprep.subr.bf16.mxu1 %v15937_v54  ;;  %v15998_v54 = vld [vmem:[#allocation17 + $0x4c0] ss:$16 sps:$4 sm:$0xff]  }
 0xc3e   : > { %12376 = vmatpush1.bf16.msra.mxu0 %v15932_v55  ;;  %v16001_v55 = vld [vmem:[#allocation17 + $0x4c8] ss:$16 sps:$4 sm:$0xff]  }
 0xc3f   : > { %12704 = vmatpush1.bf16.msra.mxu1 %v15935_v56  ;;  %12377 = vmatprep.subr.bf16.mxu0 %v15940_v53  ;;  %v16006_v56 = vld [vmem:[#allocation17 + $0x4e4] ss:$16 sps:$4 sm:$0xff]   ;;  %v16009_v53 = vld [vmem:[#allocation17 + $0x4ec] ss:$16 sps:$4 sm:$0xff]  }
 0xc40   : > { %12705 = vmatprep.subr.bf16.mxu1 %v15943_v27  ;;  %v16004_v27 = vld [vmem:[#allocation17 + $0x4e0] ss:$16 sps:$4 sm:$0xff]  }
 0xc42   : > { %12378 = vmatpush1.bf16.msra.mxu0 %v15938_v58  ;;  %v16007_v58 = vld [vmem:[#allocation17 + $0x4e8] ss:$16 sps:$4 sm:$0xff]  }
 0xc43   : > { %12706 = vmatpush1.bf16.msra.mxu1 %v15941_v59  ;;  %12379 = vmatprep.subr.bf16.mxu0 %v15946_v32  ;;  %v16012_v59 = vld [vmem:[#allocation17 + $0x504] ss:$16 sps:$4 sm:$0xff]   ;;  %v16015_v32 = vld [vmem:[#allocation17 + $0x50c] ss:$16 sps:$4 sm:$0xff]  }
 0xc44   : > { %12707 = vmatprep.subr.bf16.mxu1 %v15949_v60  ;;  %v16010_v60 = vld [vmem:[#allocation17 + $0x500] ss:$16 sps:$4 sm:$0xff]  }
 0xc46   : > { %12380 = vmatpush1.bf16.msra.mxu0 %v15944_v61  ;;  %v16013_v61 = vld [vmem:[#allocation17 + $0x508] ss:$16 sps:$4 sm:$0xff]  }
 0xc47   : > { %12708 = vmatpush1.bf16.msra.mxu1 %v15947_v63  ;;  %12381 = vmatprep.subr.bf16.mxu0 %v15952_v0  ;;  %v16018_v63 = vld [vmem:[#allocation17 + $0x524] ss:$16 sps:$4 sm:$0xff]   ;;  %v16021_v0 = vld [vmem:[#allocation17 + $0x52c] ss:$16 sps:$4 sm:$0xff]  }
 0xc48   : > { %12709 = vmatprep.subr.bf16.mxu1 %v15955_v1  ;;  %v16016_v1 = vld [vmem:[#allocation17 + $0x520] ss:$16 sps:$4 sm:$0xff]  }
 0xc4a   : > { %12382 = vmatpush1.bf16.msra.mxu0 %v15950_v2  ;;  %v16019_v2 = vld [vmem:[#allocation17 + $0x528] ss:$16 sps:$4 sm:$0xff]  }
 0xc4b   : > { %12710 = vmatpush1.bf16.msra.mxu1 %v15953_v3  ;;  %12383 = vmatprep.subr.bf16.mxu0 %v15958_v4  ;;  %v16024_v3 = vld [vmem:[#allocation17 + $0x544] ss:$16 sps:$4 sm:$0xff]   ;;  %v16027_v4 = vld [vmem:[#allocation17 + $0x54c] ss:$16 sps:$4 sm:$0xff]  }
 0xc4c   : > { %12711 = vmatprep.subr.bf16.mxu1 %v15961_v6  ;;  %v16022_v6 = vld [vmem:[#allocation17 + $0x540] ss:$16 sps:$4 sm:$0xff]  }
 0xc4e   : > { %12384 = vmatpush1.bf16.msra.mxu0 %v15956_v12  ;;  %v16025_v12 = vld [vmem:[#allocation17 + $0x548] ss:$16 sps:$4 sm:$0xff]  }
 0xc4f   : > { %12712 = vmatpush1.bf16.msra.mxu1 %v15959_v9  ;;  %12394 = vmatprep.subr.bf16.mxu0 %v15964_v10  ;;  %v16033_v9 = vld [vmem:[#allocation17 + $0x56c] ss:$16 sps:$4 sm:$0xff]   ;;  %v16028_v10 = vld [vmem:[#allocation17 + $0x560] ss:$16 sps:$4 sm:$0xff]  }
 0xc50   : > { %12722 = vmatprep.subr.bf16.mxu1 %v15967_v11  ;;  %v16031_v11 = vld [vmem:[#allocation17 + $0x568] ss:$16 sps:$4 sm:$0xff]  }
 0xc51   : > { %12386 = vmatmul.mubr.bf16.vlgmr.msra.gmra.mrb[64].mxu0 %v9226_v29 }
 0xc52   : > { %12714 = vmatmul.mubr.bf16.vlgmr.msra.gmra.mrb[64].mxu1 %v9226_v29  ;;  %12395 = vmatpush1.bf16.msra.mxu0 %v15962_v52  ;;  %v16039_v52 = vld [vmem:[#allocation17 + $0x58c] ss:$16 sps:$4 sm:$0xff]   ;;  %v16034_v29 = vld [vmem:[#allocation17 + $0x580] ss:$16 sps:$4 sm:$0xff]  }
 0xc53   : > { %12426 = vmatprep.mubr.bf16.mxu0 %v9229_v33  ;;  %12723 = vmatpush1.bf16.msra.mxu1 %v15965_v46  ;;  %v16037_v46 = vld [vmem:[#allocation17 + $0x588] ss:$16 sps:$4 sm:$0xff]  }
 0xc54   : > { %12754 = vmatprep.mubr.bf16.mxu1 %v9229_v33  ;;  %12396 = vmatprep.subr.bf16.mxu0 %v15970_v30  ;;  %v16042_v30 = vld [vmem:[#allocation17 + $0x5a4] ss:$16 sps:$4 sm:$0xff]   ;;  %v16045_v33 = vld [vmem:[#allocation17 + $0x5ac] ss:$16 sps:$4 sm:$0xff]  }
 0xc55   : > { %12724 = vmatprep.subr.bf16.mxu1 %v15973_v15  ;;  %v16040_v15 = vld [vmem:[#allocation17 + $0x5a0] ss:$16 sps:$4 sm:$0xff]  }
 0xc56   : > { %12397 = vmatpush1.bf16.msra.mxu0 %v15968_v45  ;;  %v16043_v45 = vld [vmem:[#allocation17 + $0x5a8] ss:$16 sps:$4 sm:$0xff]  }
 0xc57   : > { %12725 = vmatpush1.bf16.msra.mxu1 %v15971_v44  ;;  %12398 = vmatprep.subr.bf16.mxu0 %v15976_v7  ;;  %v16048_v44 = vld [vmem:[#allocation17 + $0x5c4] ss:$16 sps:$4 sm:$0xff]   ;;  %v16051_v7 = vld [vmem:[#allocation17 + $0x5cc] ss:$16 sps:$4 sm:$0xff]  }
 0xc58   : > { %12726 = vmatprep.subr.bf16.mxu1 %v15979_v49  ;;  %v16046_v49 = vld [vmem:[#allocation17 + $0x5c0] ss:$16 sps:$4 sm:$0xff]  }
 0xc5a   : > { %12399 = vmatpush1.bf16.msra.mxu0 %v15974_v34  ;;  %v16049_v34 = vld [vmem:[#allocation17 + $0x5c8] ss:$16 sps:$4 sm:$0xff]  }
 0xc5b   : > { %12727 = vmatpush1.bf16.msra.mxu1 %v15977_v35  ;;  %12400 = vmatprep.subr.bf16.mxu0 %v15982_v36  ;;  %v16054_v35 = vld [vmem:[#allocation17 + $0x5e4] ss:$16 sps:$4 sm:$0xff]   ;;  %v16057_v36 = vld [vmem:[#allocation17 + $0x5ec] ss:$16 sps:$4 sm:$0xff]  }
 0xc5c   : > { %12728 = vmatprep.subr.bf16.mxu1 %v15985_v26  ;;  %v16052_v26 = vld [vmem:[#allocation17 + $0x5e0] ss:$16 sps:$4 sm:$0xff]  }
 0xc5e   : > { %12401 = vmatpush1.bf16.msra.mxu0 %v15980_v31  ;;  %v9212_v31 = vmax.f32 %v17882_v28, 0.0  ;;  %v16064_v28 = vld [vmem:[#allocation17 + $0x620] ss:$16 sps:$4 sm:$0xff]  }
 0xc5f   : > { %12729 = vmatpush1.bf16.msra.mxu1 %v15983_v62  ;;  %12402 = vmatprep.subr.bf16.mxu0 %v15988_v39  ;;  %v16055_v62 = vld [vmem:[#allocation17 + $0x5e8] ss:$16 sps:$4 sm:$0xff]   ;;  %v16060_v39 = vld [vmem:[#allocation17 + $0x604] ss:$16 sps:$4 sm:$0xff]  }
 0xc60   : > { %12730 = vmatprep.subr.bf16.mxu1 %v15991_v42  ;;  %v16063_v42 = vld [vmem:[#allocation17 + $0x60c] ss:$16 sps:$4 sm:$0xff]  }
 0xc62   : > { %12403 = vmatpush1.bf16.msra.mxu0 %v15986_v17  ;;  %v9215_v17 = vmax.f32 %v17888_v57, 0.0  ;;  %v16075_v57 = vld [vmem:[#allocation17 + $0x64c] ss:$16 sps:$4 sm:$0xff]  }
 0xc63   : > { %12731 = vmatpush1.bf16.msra.mxu1 %v15989_v5  ;;  %12404 = vmatprep.subr.bf16.mxu0 %v15994_v20  ;;  %v16058_v5 = vld [vmem:[#allocation17 + $0x600] ss:$16 sps:$4 sm:$0xff]   ;;  %v9228_v20 = vpack.c.bf16 %v9212_v31, %v9212_v31 }
 0xc64   : > { %12732 = vmatprep.subr.bf16.mxu1 %v15997_v19  ;;  %v16061_v19 = vld [vmem:[#allocation17 + $0x608] ss:$16 sps:$4 sm:$0xff]   ;;  %v16112_v31 = vld [vmem:[#allocation17 + $0x720] ss:$16 sps:$4 sm:$0xff]  }
 0xc66   : > { %12405 = vmatpush1.bf16.msra.mxu0 %v15992_v47  ;;  %v16066_v47 = vld [vmem:[#allocation17 + $0x624] ss:$16 sps:$4 sm:$0xff]  }
 0xc67   : > { %12733 = vmatpush1.bf16.msra.mxu1 %v15995_v50  ;;  %12406 = vmatprep.subr.bf16.mxu0 %v16000_v51  ;;  %v9231_v50 = vpack.c.bf16 %v9215_v17, %v9215_v17  ;;  %v16069_v51 = vld [vmem:[#allocation17 + $0x62c] ss:$16 sps:$4 sm:$0xff]   ;;  %v16118_v17 = vld [vmem:[#allocation17 + $0x740] ss:$16 sps:$4 sm:$0xff]  }
 0xc68   : > { %12734 = vmatprep.subr.bf16.mxu1 %v16003_v24  ;;  %v16067_v24 = vld [vmem:[#allocation17 + $0x628] ss:$16 sps:$4 sm:$0xff]  }
 0xc6a   : > { %12407 = vmatpush1.bf16.msra.mxu0 %v15998_v54  ;;  %v16072_v54 = vld [vmem:[#allocation17 + $0x644] ss:$16 sps:$4 sm:$0xff]  }
 0xc6b   : > { %12735 = vmatpush1.bf16.msra.mxu1 %v16001_v55  ;;  %12408 = vmatprep.subr.bf16.mxu0 %v16006_v56  ;;  %v16070_v55 = vld [vmem:[#allocation17 + $0x640] ss:$16 sps:$4 sm:$0xff]   ;;  %v16073_v56 = vld [vmem:[#allocation17 + $0x648] ss:$16 sps:$4 sm:$0xff]  }
 0xc6c   : > { %12736 = vmatprep.subr.bf16.mxu1 %v16009_v53  ;;  %v16078_v53 = vld [vmem:[#allocation17 + $0x664] ss:$16 sps:$4 sm:$0xff]  }
 0xc6e   : > { %12409 = vmatpush1.bf16.msra.mxu0 %v16004_v27  ;;  %v16081_v27 = vld [vmem:[#allocation17 + $0x66c] ss:$16 sps:$4 sm:$0xff]  }
 0xc6f   : > { %12737 = vmatpush1.bf16.msra.mxu1 %v16007_v58  ;;  %12410 = vmatprep.subr.bf16.mxu0 %v16012_v59  ;;  %v16076_v58 = vld [vmem:[#allocation17 + $0x660] ss:$16 sps:$4 sm:$0xff]   ;;  %v16079_v59 = vld [vmem:[#allocation17 + $0x668] ss:$16 sps:$4 sm:$0xff]  }
 0xc70   : > { %12738 = vmatprep.subr.bf16.mxu1 %v16015_v32  ;;  %v16084_v32 = vld [vmem:[#allocation17 + $0x684] ss:$16 sps:$4 sm:$0xff]  }
 0xc72   : > { %12411 = vmatpush1.bf16.msra.mxu0 %v16010_v60  ;;  %v16087_v60 = vld [vmem:[#allocation17 + $0x68c] ss:$16 sps:$4 sm:$0xff]  }
 0xc73   : > { %12739 = vmatpush1.bf16.msra.mxu1 %v16013_v61  ;;  %12412 = vmatprep.subr.bf16.mxu0 %v16018_v63  ;;  %v16082_v61 = vld [vmem:[#allocation17 + $0x680] ss:$16 sps:$4 sm:$0xff]   ;;  %v16085_v63 = vld [vmem:[#allocation17 + $0x688] ss:$16 sps:$4 sm:$0xff]  }
 0xc74   : > { %12740 = vmatprep.subr.bf16.mxu1 %v16021_v0  ;;  %v16090_v0 = vld [vmem:[#allocation17 + $0x6a4] ss:$16 sps:$4 sm:$0xff]  }
 0xc76   : > { %12413 = vmatpush1.bf16.msra.mxu0 %v16016_v1  ;;  %v16093_v1 = vld [vmem:[#allocation17 + $0x6ac] ss:$16 sps:$4 sm:$0xff]  }
 0xc77   : > { %12741 = vmatpush1.bf16.msra.mxu1 %v16019_v2  ;;  %12414 = vmatprep.subr.bf16.mxu0 %v16024_v3  ;;  %v16088_v2 = vld [vmem:[#allocation17 + $0x6a0] ss:$16 sps:$4 sm:$0xff]   ;;  %v16091_v3 = vld [vmem:[#allocation17 + $0x6a8] ss:$16 sps:$4 sm:$0xff]  }
 0xc78   : > { %12742 = vmatprep.subr.bf16.mxu1 %v16027_v4  ;;  %v16096_v4 = vld [vmem:[#allocation17 + $0x6c4] ss:$16 sps:$4 sm:$0xff]  }
 0xc7a   : > { %12415 = vmatpush1.bf16.msra.mxu0 %v16022_v6 }
 0xc7b   : > { %12743 = vmatpush1.bf16.msra.mxu1 %v16025_v12  ;;  %12416 = vmatprep.subr.bf16.mxu0 %v16030_v8  ;;  %v16099_v12 = vld [vmem:[#allocation17 + $0x6cc] ss:$16 sps:$4 sm:$0xff]  }
 0xc7c   : > { %12744 = vmatprep.subr.bf16.mxu1 %v16033_v9 }
 0xc7e   : > { %12417 = vmatpush1.bf16.msra.mxu0 %v16028_v10 }
 0xc7f   : > { %12745 = vmatpush1.bf16.msra.mxu1 %v16031_v11  ;;  %12418 = vmatprep.subr.bf16.mxu0 %v16036_v13  ;;  %v16094_v13 = vld [vmem:[#allocation17 + $0x6c0] ss:$16 sps:$4 sm:$0xff]  }
 0xc80   : > { %12746 = vmatprep.subr.bf16.mxu1 %v16039_v52 }
 0xc82   : > { %12419 = vmatpush1.bf16.msra.mxu0 %v16034_v29 }
 0xc83   : > { %12747 = vmatpush1.bf16.msra.mxu1 %v16037_v46  ;;  %12420 = vmatprep.subr.bf16.mxu0 %v16042_v30  ;;  %v16097_v46 = vld [vmem:[#allocation17 + $0x6c8] ss:$16 sps:$4 sm:$0xff]   ;;  %v16102_v30 = vld [vmem:[#allocation17 + $0x6e4] ss:$16 sps:$4 sm:$0xff]  }
 0xc84   : > { %12748 = vmatprep.subr.bf16.mxu1 %v16045_v33 }
 0xc86   : > { %12421 = vmatpush1.bf16.msra.mxu0 %v16040_v15  ;;  %v16105_v15 = vld [vmem:[#allocation17 + $0x6ec] ss:$16 sps:$4 sm:$0xff]  }
 0xc87   : > { %12749 = vmatpush1.bf16.msra.mxu1 %v16043_v45  ;;  %12422 = vmatprep.subr.bf16.mxu0 %v16048_v44  ;;  %v16100_v45 = vld [vmem:[#allocation17 + $0x6e0] ss:$16 sps:$4 sm:$0xff]   ;;  %v16103_v44 = vld [vmem:[#allocation17 + $0x6e8] ss:$16 sps:$4 sm:$0xff]  }
 0xc88   : > { %12750 = vmatprep.subr.bf16.mxu1 %v16051_v7  ;;  %v16108_v7 = vld [vmem:[#allocation17 + $0x704] ss:$16 sps:$4 sm:$0xff]  }
 0xc8a   : > { %12423 = vmatpush1.bf16.msra.mxu0 %v16046_v49  ;;  %v16111_v49 = vld [vmem:[#allocation17 + $0x70c] ss:$16 sps:$4 sm:$0xff]  }
 0xc8b   : > { %12751 = vmatpush1.bf16.msra.mxu1 %v16049_v34  ;;  %12424 = vmatprep.subr.bf16.mxu0 %v16054_v35  ;;  %v16106_v34 = vld [vmem:[#allocation17 + $0x700] ss:$16 sps:$4 sm:$0xff]   ;;  %v16109_v35 = vld [vmem:[#allocation17 + $0x708] ss:$16 sps:$4 sm:$0xff]  }
 0xc8c   : > { %12752 = vmatprep.subr.bf16.mxu1 %v16057_v36  ;;  %v16114_v36 = vld [vmem:[#allocation17 + $0x724] ss:$16 sps:$4 sm:$0xff]  }
 0xc8e   : > { %12425 = vmatpush1.bf16.msra.mxu0 %v16052_v26  ;;  %v16117_v26 = vld [vmem:[#allocation17 + $0x72c] ss:$16 sps:$4 sm:$0xff]  }
 0xc8f   : > { %12753 = vmatpush1.bf16.msra.mxu1 %v16055_v62  ;;  %12435 = vmatprep.subr.bf16.mxu0 %v16060_v39  ;;  %v16115_v62 = vld [vmem:[#allocation17 + $0x728] ss:$16 sps:$4 sm:$0xff]   ;;  %v16120_v39 = vld [vmem:[#allocation17 + $0x744] ss:$16 sps:$4 sm:$0xff]  }
 0xc90   : > { %12763 = vmatprep.subr.bf16.mxu1 %v16063_v42  ;;  %v16123_v42 = vld [vmem:[#allocation17 + $0x74c] ss:$16 sps:$4 sm:$0xff]  }
 0xc91   : > { %12427 = vmatmul.mubr.bf16.vlgmr.msra.gmra.mrb[64].mxu0 %v9228_v20 }
 0xc92   : > { %12755 = vmatmul.mubr.bf16.vlgmr.msra.gmra.mrb[64].mxu1 %v9228_v20  ;;  %12436 = vmatpush1.bf16.msra.mxu0 %v16058_v5  ;;  %v16121_v5 = vld [vmem:[#allocation17 + $0x748] ss:$16 sps:$4 sm:$0xff]   ;;  %v16126_v20 = vld [vmem:[#allocation17 + $0x764] ss:$16 sps:$4 sm:$0xff]  }
 0xc93   : > { %12467 = vmatprep.mubr.bf16.mxu0 %v9231_v50  ;;  %12764 = vmatpush1.bf16.msra.mxu1 %v16061_v19  ;;  %v16129_v19 = vld [vmem:[#allocation17 + $0x76c] ss:$16 sps:$4 sm:$0xff]  }
 0xc94   : > { %12795 = vmatprep.mubr.bf16.mxu1 %v9231_v50  ;;  %12437 = vmatprep.subr.bf16.mxu0 %v16066_v47  ;;  %v16124_v47 = vld [vmem:[#allocation17 + $0x760] ss:$16 sps:$4 sm:$0xff]   ;;  %v16127_v50 = vld [vmem:[#allocation17 + $0x768] ss:$16 sps:$4 sm:$0xff]  }
 0xc95   : > { %12765 = vmatprep.subr.bf16.mxu1 %v16069_v51  ;;  %v16132_v51 = vld [vmem:[#allocation17 + $0x784] ss:$16 sps:$4 sm:$0xff]  }
 0xc96   : > { %12438 = vmatpush1.bf16.msra.mxu0 %v16064_v28  ;;  %v16135_v28 = vld [vmem:[#allocation17 + $0x78c] ss:$16 sps:$4 sm:$0xff]  }
 0xc97   : > { %12766 = vmatpush1.bf16.msra.mxu1 %v16067_v24  ;;  %12439 = vmatprep.subr.bf16.mxu0 %v16072_v54  ;;  %v16130_v24 = vld [vmem:[#allocation17 + $0x780] ss:$16 sps:$4 sm:$0xff]   ;;  %v16133_v54 = vld [vmem:[#allocation17 + $0x788] ss:$16 sps:$4 sm:$0xff]  }
 0xc98   : > { %12767 = vmatprep.subr.bf16.mxu1 %v16075_v57  ;;  %v16138_v57 = vld [vmem:[#allocation17 + $0x7a4] ss:$16 sps:$4 sm:$0xff]  }
 0xc9a   : > { %12440 = vmatpush1.bf16.msra.mxu0 %v16070_v55  ;;  %v16141_v55 = vld [vmem:[#allocation17 + $0x7ac] ss:$16 sps:$4 sm:$0xff]  }
 0xc9b   : > { %12768 = vmatpush1.bf16.msra.mxu1 %v16073_v56  ;;  %12441 = vmatprep.subr.bf16.mxu0 %v16078_v53  ;;  %v16136_v56 = vld [vmem:[#allocation17 + $0x7a0] ss:$16 sps:$4 sm:$0xff]   ;;  %v16139_v53 = vld [vmem:[#allocation17 + $0x7a8] ss:$16 sps:$4 sm:$0xff]  }
 0xc9c   : > { %12769 = vmatprep.subr.bf16.mxu1 %v16081_v27  ;;  %v16144_v27 = vld [vmem:[#allocation17 + $0x7c4] ss:$16 sps:$4 sm:$0xff]  }
 0xc9e   : > { %12442 = vmatpush1.bf16.msra.mxu0 %v16076_v58  ;;  %v16147_v58 = vld [vmem:[#allocation17 + $0x7cc] ss:$16 sps:$4 sm:$0xff]  }
 0xc9f   : > { %12770 = vmatpush1.bf16.msra.mxu1 %v16079_v59  ;;  %12443 = vmatprep.subr.bf16.mxu0 %v16084_v32  ;;  %v16142_v59 = vld [vmem:[#allocation17 + $0x7c0] ss:$16 sps:$4 sm:$0xff]   ;;  %v16145_v32 = vld [vmem:[#allocation17 + $0x7c8] ss:$16 sps:$4 sm:$0xff]  }
 0xca0   : > { %12771 = vmatprep.subr.bf16.mxu1 %v16087_v60  ;;  %v16150_v60 = vld [vmem:[#allocation17 + $0x7e4] ss:$16 sps:$4 sm:$0xff]  }
 0xca2   : > { %12444 = vmatpush1.bf16.msra.mxu0 %v16082_v61  ;;  %v16153_v61 = vld [vmem:[#allocation17 + $0x7ec] ss:$16 sps:$4 sm:$0xff]  }
 0xca3   : > { %12772 = vmatpush1.bf16.msra.mxu1 %v16085_v63  ;;  %12445 = vmatprep.subr.bf16.mxu0 %v16090_v0  ;;  %v16148_v63 = vld [vmem:[#allocation17 + $0x7e0] ss:$16 sps:$4 sm:$0xff]   ;;  %v9214_v0 = vmax.f32 %v17884_v48, 0.0 }
 0xca4   : > { %v17907_v6 = vpop.f32.mrb[60].mxu0  ;;  %12773 = vmatprep.subr.bf16.mxu1 %v16093_v1  ;;  %v16151_v1 = vld [vmem:[#allocation17 + $0x7e8] ss:$16 sps:$4 sm:$0xff]   ;;  %v16160_v48 = vld [vmem:[#allocation17 + $0x820] ss:$16 sps:$4 sm:$0xff]  }
 0xca5   : > { %v17909_v8 = vpop.f32.mrb[60].mxu1  ;;  %v17911_v9 = vpop.f32.mrb[61].mxu0 }
 0xca6   : > { %v17913_v10 = vpop.f32.mrb[61].mxu1  ;;  %v9123_v11 = vpop.f32.mrb[62].mxu0  ;;  %12446 = vmatpush1.bf16.msra.mxu0 %v16088_v2  ;;  %v16156_v2 = vld [vmem:[#allocation17 + $0x804] ss:$16 sps:$4 sm:$0xff]  }
 0xca7   : > { %v9205_v52 = vpop.f32.mrb[62].mxu1  ;;  %12774 = vmatpush1.bf16.msra.mxu1 %v16091_v3  ;;  %v9124_v29 = vpop.f32.mrb[63].mxu0  ;;  %12447 = vmatprep.subr.bf16.mxu0 %v16096_v4  ;;  %v16159_v3 = vld [vmem:[#allocation17 + $0x80c] ss:$16 sps:$4 sm:$0xff]   ;;  %v9217_v4 = vmax.f32 %v17899_v38, 0.0  ;;  %v9230_v11 = vpack.c.bf16 %v9214_v0, %v9214_v0 }
 0xca8   : > { %v9206_v33 = vpop.f32.mrb[63].mxu1  ;;  %12775 = vmatprep.subr.bf16.mxu1 %v16099_v12  ;;  %v16154_v12 = vld [vmem:[#allocation17 + $0x800] ss:$16 sps:$4 sm:$0xff]   ;;  %v16162_v52 = vld [vmem:[#allocation17 + $0x824] ss:$16 sps:$4 sm:$0xff]  }
 0xca9   : > { %v9233_v29 = vpack.c.bf16 %v9217_v4, %v9217_v4  ;;  %v16168_v33 = vld [vmem:[#allocation17 + $0x844] ss:$16 sps:$4 sm:$0xff]   ;;  %v16171_v38 = vld [vmem:[#allocation17 + $0x84c] ss:$16 sps:$4 sm:$0xff]  }
 0xcaa   : > { %12448 = vmatpush1.bf16.msra.mxu0 %v16094_v13  ;;  %v16157_v13 = vld [vmem:[#allocation17 + $0x808] ss:$16 sps:$4 sm:$0xff]   ;;  %v16222_v0 = vld [vmem:[#allocation17 + $0x964] ss:$16 sps:$4 sm:$0xff]  }
 0xcab   : > { %12776 = vmatpush1.bf16.msra.mxu1 %v16097_v46  ;;  %12449 = vmatprep.subr.bf16.mxu0 %v16102_v30  ;;  %v16165_v46 = vld [vmem:[#allocation17 + $0x82c] ss:$16 sps:$4 sm:$0xff]   ;;  %v16163_v30 = vld [vmem:[#allocation17 + $0x828] ss:$16 sps:$4 sm:$0xff]   ;;  %v16228_v4 = vld [vmem:[#allocation17 + $0x984] ss:$16 sps:$4 sm:$0xff]  }
 0xcac   : > { %12777 = vmatprep.subr.bf16.mxu1 %v16105_v15  ;;  %v16166_v15 = vld [vmem:[#allocation17 + $0x840] ss:$16 sps:$4 sm:$0xff]  }
 0xcae   : > { %12450 = vmatpush1.bf16.msra.mxu0 %v16100_v45  ;;  %v16169_v45 = vld [vmem:[#allocation17 + $0x848] ss:$16 sps:$4 sm:$0xff]  }
 0xcaf   : > { %12778 = vmatpush1.bf16.msra.mxu1 %v16103_v44  ;;  %12451 = vmatprep.subr.bf16.mxu0 %v16108_v7  ;;  %v16174_v44 = vld [vmem:[#allocation17 + $0x864] ss:$16 sps:$4 sm:$0xff]   ;;  %v16177_v7 = vld [vmem:[#allocation17 + $0x86c] ss:$16 sps:$4 sm:$0xff]  }
 0xcb0   : > { %12779 = vmatprep.subr.bf16.mxu1 %v16111_v49  ;;  %v16172_v49 = vld [vmem:[#allocation17 + $0x860] ss:$16 sps:$4 sm:$0xff]  }
 0xcb2   : > { %12452 = vmatpush1.bf16.msra.mxu0 %v16106_v34  ;;  %v16175_v34 = vld [vmem:[#allocation17 + $0x868] ss:$16 sps:$4 sm:$0xff]  }
 0xcb3   : > { %12780 = vmatpush1.bf16.msra.mxu1 %v16109_v35  ;;  %12453 = vmatprep.subr.bf16.mxu0 %v16114_v36  ;;  %v16180_v35 = vld [vmem:[#allocation17 + $0x884] ss:$16 sps:$4 sm:$0xff]   ;;  %v16183_v36 = vld [vmem:[#allocation17 + $0x88c] ss:$16 sps:$4 sm:$0xff]  }
 0xcb4   : > { %12781 = vmatprep.subr.bf16.mxu1 %v16117_v26  ;;  %v16178_v26 = vld [vmem:[#allocation17 + $0x880] ss:$16 sps:$4 sm:$0xff]  }
 0xcb6   : > { %12454 = vmatpush1.bf16.msra.mxu0 %v16112_v31  ;;  %v16181_v31 = vld [vmem:[#allocation17 + $0x888] ss:$16 sps:$4 sm:$0xff]  }
 0xcb7   : > { %12782 = vmatpush1.bf16.msra.mxu1 %v16115_v62  ;;  %12455 = vmatprep.subr.bf16.mxu0 %v16120_v39  ;;  %v16186_v62 = vld [vmem:[#allocation17 + $0x8a4] ss:$16 sps:$4 sm:$0xff]   ;;  %v16189_v39 = vld [vmem:[#allocation17 + $0x8ac] ss:$16 sps:$4 sm:$0xff]  }
 0xcb8   : > { %12783 = vmatprep.subr.bf16.mxu1 %v16123_v42  ;;  %v16184_v42 = vld [vmem:[#allocation17 + $0x8a0] ss:$16 sps:$4 sm:$0xff]  }
 0xcba   : > { %12456 = vmatpush1.bf16.msra.mxu0 %v16118_v17  ;;  %v16187_v17 = vld [vmem:[#allocation17 + $0x8a8] ss:$16 sps:$4 sm:$0xff]  }
 0xcbb   : > { %12784 = vmatpush1.bf16.msra.mxu1 %v16121_v5  ;;  %12457 = vmatprep.subr.bf16.mxu0 %v16126_v20  ;;  %v16192_v5 = vld [vmem:[#allocation17 + $0x8c4] ss:$16 sps:$4 sm:$0xff]   ;;  %v16195_v20 = vld [vmem:[#allocation17 + $0x8cc] ss:$16 sps:$4 sm:$0xff]  }
 0xcbc   : > { %12785 = vmatprep.subr.bf16.mxu1 %v16129_v19  ;;  %v16190_v19 = vld [vmem:[#allocation17 + $0x8c0] ss:$16 sps:$4 sm:$0xff]  }
 0xcbe   : > { %12458 = vmatpush1.bf16.msra.mxu0 %v16124_v47  ;;  %v16193_v47 = vld [vmem:[#allocation17 + $0x8c8] ss:$16 sps:$4 sm:$0xff]  }
 0xcbf   : > { %12786 = vmatpush1.bf16.msra.mxu1 %v16127_v50  ;;  %12459 = vmatprep.subr.bf16.mxu0 %v16132_v51  ;;  %v16198_v50 = vld [vmem:[#allocation17 + $0x8e4] ss:$16 sps:$4 sm:$0xff]   ;;  %v16201_v51 = vld [vmem:[#allocation17 + $0x8ec] ss:$16 sps:$4 sm:$0xff]  }
 0xcc0   : > { %12787 = vmatprep.subr.bf16.mxu1 %v16135_v28  ;;  %v16196_v28 = vld [vmem:[#allocation17 + $0x8e0] ss:$16 sps:$4 sm:$0xff]  }
 0xcc2   : > { %12460 = vmatpush1.bf16.msra.mxu0 %v16130_v24  ;;  %v16199_v24 = vld [vmem:[#allocation17 + $0x8e8] ss:$16 sps:$4 sm:$0xff]  }
 0xcc3   : > { %12788 = vmatpush1.bf16.msra.mxu1 %v16133_v54  ;;  %12461 = vmatprep.subr.bf16.mxu0 %v16138_v57  ;;  %v16204_v54 = vld [vmem:[#allocation17 + $0x904] ss:$16 sps:$4 sm:$0xff]   ;;  %v16207_v57 = vld [vmem:[#allocation17 + $0x90c] ss:$16 sps:$4 sm:$0xff]  }
 0xcc4   : > { %12789 = vmatprep.subr.bf16.mxu1 %v16141_v55  ;;  %v16202_v55 = vld [vmem:[#allocation17 + $0x900] ss:$16 sps:$4 sm:$0xff]  }
 0xcc6   : > { %12462 = vmatpush1.bf16.msra.mxu0 %v16136_v56  ;;  %v16205_v56 = vld [vmem:[#allocation17 + $0x908] ss:$16 sps:$4 sm:$0xff]  }
 0xcc7   : > { %12790 = vmatpush1.bf16.msra.mxu1 %v16139_v53  ;;  %12463 = vmatprep.subr.bf16.mxu0 %v16144_v27  ;;  %v16210_v53 = vld [vmem:[#allocation17 + $0x924] ss:$16 sps:$4 sm:$0xff]   ;;  %v16213_v27 = vld [vmem:[#allocation17 + $0x92c] ss:$16 sps:$4 sm:$0xff]  }
 0xcc8   : > { %12791 = vmatprep.subr.bf16.mxu1 %v16147_v58  ;;  %v16208_v58 = vld [vmem:[#allocation17 + $0x920] ss:$16 sps:$4 sm:$0xff]  }
 0xcca   : > { %12464 = vmatpush1.bf16.msra.mxu0 %v16142_v59  ;;  %v16211_v59 = vld [vmem:[#allocation17 + $0x928] ss:$16 sps:$4 sm:$0xff]  }
 0xccb   : > { %12792 = vmatpush1.bf16.msra.mxu1 %v16145_v32  ;;  %12465 = vmatprep.subr.bf16.mxu0 %v16150_v60  ;;  %v16216_v32 = vld [vmem:[#allocation17 + $0x944] ss:$16 sps:$4 sm:$0xff]   ;;  %v16219_v60 = vld [vmem:[#allocation17 + $0x94c] ss:$16 sps:$4 sm:$0xff]  }
 0xccc   : > { %12793 = vmatprep.subr.bf16.mxu1 %v16153_v61  ;;  %v16214_v61 = vld [vmem:[#allocation17 + $0x940] ss:$16 sps:$4 sm:$0xff]  }
 0xcce   : > { %12466 = vmatpush1.bf16.msra.mxu0 %v16148_v63  ;;  %v16217_v63 = vld [vmem:[#allocation17 + $0x948] ss:$16 sps:$4 sm:$0xff]  }
 0xccf   : > { %12794 = vmatpush1.bf16.msra.mxu1 %v16151_v1  ;;  %12476 = vmatprep.subr.bf16.mxu0 %v16156_v2  ;;  %v16225_v1 = vld [vmem:[#allocation17 + $0x96c] ss:$16 sps:$4 sm:$0xff]   ;;  %v16220_v2 = vld [vmem:[#allocation17 + $0x960] ss:$16 sps:$4 sm:$0xff]  }
 0xcd0   : > { %12804 = vmatprep.subr.bf16.mxu1 %v16159_v3  ;;  %v16223_v3 = vld [vmem:[#allocation17 + $0x968] ss:$16 sps:$4 sm:$0xff]  }
 0xcd1   : > { %12468 = vmatmul.mubr.bf16.vlgmr.msra.gmra.mrb[64].mxu0 %v9230_v11 }
 0xcd2   : > { %12796 = vmatmul.mubr.bf16.vlgmr.msra.gmra.mrb[64].mxu1 %v9230_v11  ;;  %12477 = vmatpush1.bf16.msra.mxu0 %v16154_v12  ;;  %v16231_v12 = vld [vmem:[#allocation17 + $0x98c] ss:$16 sps:$4 sm:$0xff]   ;;  %v16226_v11 = vld [vmem:[#allocation17 + $0x980] ss:$16 sps:$4 sm:$0xff]  }
 0xcd3   : > { %12508 = vmatprep.mubr.bf16.mxu0 %v9233_v29  ;;  %12805 = vmatpush1.bf16.msra.mxu1 %v16157_v13  ;;  %v16229_v13 = vld [vmem:[#allocation17 + $0x988] ss:$16 sps:$4 sm:$0xff]  }
 0xcd4   : > { %12836 = vmatprep.mubr.bf16.mxu1 %v9233_v29  ;;  %12478 = vmatprep.subr.bf16.mxu0 %v16162_v52  ;;  %v16234_v52 = vld [vmem:[#allocation17 + $0x9a4] ss:$16 sps:$4 sm:$0xff]   ;;  %v16237_v29 = vld [vmem:[#allocation17 + $0x9ac] ss:$16 sps:$4 sm:$0xff]  }
 0xcd5   : > { %12806 = vmatprep.subr.bf16.mxu1 %v16165_v46  ;;  %v16232_v46 = vld [vmem:[#allocation17 + $0x9a0] ss:$16 sps:$4 sm:$0xff]  }
 0xcd6   : > { %12479 = vmatpush1.bf16.msra.mxu0 %v16160_v48  ;;  %v16235_v48 = vld [vmem:[#allocation17 + $0x9a8] ss:$16 sps:$4 sm:$0xff]  }
 0xcd7   : > { %12807 = vmatpush1.bf16.msra.mxu1 %v16163_v30  ;;  %12480 = vmatprep.subr.bf16.mxu0 %v16168_v33  ;;  %v16240_v30 = vld [vmem:[#allocation17 + $0x9c4] ss:$16 sps:$4 sm:$0xff]   ;;  %v16243_v33 = vld [vmem:[#allocation17 + $0x9cc] ss:$16 sps:$4 sm:$0xff]  }
 0xcd8   : > { %12808 = vmatprep.subr.bf16.mxu1 %v16171_v38  ;;  %v16238_v38 = vld [vmem:[#allocation17 + $0x9c0] ss:$16 sps:$4 sm:$0xff]  }
 0xcda   : > { %12481 = vmatpush1.bf16.msra.mxu0 %v16166_v15  ;;  %v16241_v15 = vld [vmem:[#allocation17 + $0x9c8] ss:$16 sps:$4 sm:$0xff]  }
 0xcdb   : > { %12809 = vmatpush1.bf16.msra.mxu1 %v16169_v45  ;;  %12482 = vmatprep.subr.bf16.mxu0 %v16174_v44  ;;  %v16246_v45 = vld [vmem:[#allocation17 + $0x9e4] ss:$16 sps:$4 sm:$0xff]   ;;  %v16249_v44 = vld [vmem:[#allocation17 + $0x9ec] ss:$16 sps:$4 sm:$0xff]  }
 0xcdc   : > { %12810 = vmatprep.subr.bf16.mxu1 %v16177_v7  ;;  %v16244_v7 = vld [vmem:[#allocation17 + $0x9e0] ss:$16 sps:$4 sm:$0xff]  }
 0xcde   : > { %12483 = vmatpush1.bf16.msra.mxu0 %v16172_v49  ;;  %v9216_v49 = vmax.f32 %v17895_v14, 0.0  ;;  %v16256_v14 = vld [vmem:[#allocation17 + $0xa20] ss:$16 sps:$4 sm:$0xff]  }
 0xcdf   : > { %12811 = vmatpush1.bf16.msra.mxu1 %v16175_v34  ;;  %12484 = vmatprep.subr.bf16.mxu0 %v16180_v35  ;;  %v16247_v34 = vld [vmem:[#allocation17 + $0x9e8] ss:$16 sps:$4 sm:$0xff]   ;;  %v16252_v35 = vld [vmem:[#allocation17 + $0xa04] ss:$16 sps:$4 sm:$0xff]  }
 0xce0   : > { %12812 = vmatprep.subr.bf16.mxu1 %v16183_v36  ;;  %v16255_v36 = vld [vmem:[#allocation17 + $0xa0c] ss:$16 sps:$4 sm:$0xff]  }
 0xce2   : > { %12485 = vmatpush1.bf16.msra.mxu0 %v16178_v26  ;;  %v9219_v26 = vmax.f32 %v17901_v25, 0.0  ;;  %v16267_v25 = vld [vmem:[#allocation17 + $0xa4c] ss:$16 sps:$4 sm:$0xff]  }
 0xce3   : > { %12813 = vmatpush1.bf16.msra.mxu1 %v16181_v31  ;;  %12486 = vmatprep.subr.bf16.mxu0 %v16186_v62  ;;  %v16250_v31 = vld [vmem:[#allocation17 + $0xa00] ss:$16 sps:$4 sm:$0xff]   ;;  %v9232_v62 = vpack.c.bf16 %v9216_v49, %v9216_v49 }
 0xce4   : > { %12814 = vmatprep.subr.bf16.mxu1 %v16189_v39  ;;  %v16253_v39 = vld [vmem:[#allocation17 + $0xa08] ss:$16 sps:$4 sm:$0xff]   ;;  %v16316_v49 = vld [vmem:[#allocation17 + $0xb60] ss:$16 sps:$4 sm:$0xff]  }
 0xce6   : > { %12487 = vmatpush1.bf16.msra.mxu0 %v16184_v42  ;;  %v16258_v42 = vld [vmem:[#allocation17 + $0xa24] ss:$16 sps:$4 sm:$0xff]  }
 0xce7   : > { %12815 = vmatpush1.bf16.msra.mxu1 %v16187_v17  ;;  %12488 = vmatprep.subr.bf16.mxu0 %v16192_v5  ;;  %v9235_v17 = vpack.c.bf16 %v9219_v26, %v9219_v26  ;;  %v16261_v5 = vld [vmem:[#allocation17 + $0xa2c] ss:$16 sps:$4 sm:$0xff]   ;;  %v16322_v26 = vld [vmem:[#allocation17 + $0xb80] ss:$16 sps:$4 sm:$0xff]  }
 0xce8   : > { %12816 = vmatprep.subr.bf16.mxu1 %v16195_v20  ;;  %v16259_v20 = vld [vmem:[#allocation17 + $0xa28] ss:$16 sps:$4 sm:$0xff]  }
 0xcea   : > { %12489 = vmatpush1.bf16.msra.mxu0 %v16190_v19  ;;  %v16264_v19 = vld [vmem:[#allocation17 + $0xa44] ss:$16 sps:$4 sm:$0xff]  }
 0xceb   : > { %12817 = vmatpush1.bf16.msra.mxu1 %v16193_v47  ;;  %12490 = vmatprep.subr.bf16.mxu0 %v16198_v50  ;;  %v16262_v47 = vld [vmem:[#allocation17 + $0xa40] ss:$16 sps:$4 sm:$0xff]   ;;  %v16265_v50 = vld [vmem:[#allocation17 + $0xa48] ss:$16 sps:$4 sm:$0xff]  }
 0xcec   : > { %12818 = vmatprep.subr.bf16.mxu1 %v16201_v51  ;;  %v16270_v51 = vld [vmem:[#allocation17 + $0xa64] ss:$16 sps:$4 sm:$0xff]  }
 0xcee   : > { %12491 = vmatpush1.bf16.msra.mxu0 %v16196_v28  ;;  %v16273_v28 = vld [vmem:[#allocation17 + $0xa6c] ss:$16 sps:$4 sm:$0xff]  }
 0xcef   : > { %12819 = vmatpush1.bf16.msra.mxu1 %v16199_v24  ;;  %12492 = vmatprep.subr.bf16.mxu0 %v16204_v54  ;;  %v16268_v24 = vld [vmem:[#allocation17 + $0xa60] ss:$16 sps:$4 sm:$0xff]   ;;  %v16271_v54 = vld [vmem:[#allocation17 + $0xa68] ss:$16 sps:$4 sm:$0xff]  }
 0xcf0   : > { %12820 = vmatprep.subr.bf16.mxu1 %v16207_v57  ;;  %v16276_v57 = vld [vmem:[#allocation17 + $0xa84] ss:$16 sps:$4 sm:$0xff]  }
 0xcf2   : > { %12493 = vmatpush1.bf16.msra.mxu0 %v16202_v55  ;;  %v16279_v55 = vld [vmem:[#allocation17 + $0xa8c] ss:$16 sps:$4 sm:$0xff]  }
 0xcf3   : > { %12821 = vmatpush1.bf16.msra.mxu1 %v16205_v56  ;;  %12494 = vmatprep.subr.bf16.mxu0 %v16210_v53  ;;  %v16274_v56 = vld [vmem:[#allocation17 + $0xa80] ss:$16 sps:$4 sm:$0xff]   ;;  %v16277_v53 = vld [vmem:[#allocation17 + $0xa88] ss:$16 sps:$4 sm:$0xff]  }
 0xcf4   : > { %12822 = vmatprep.subr.bf16.mxu1 %v16213_v27  ;;  %v16282_v27 = vld [vmem:[#allocation17 + $0xaa4] ss:$16 sps:$4 sm:$0xff]  }
 0xcf6   : > { %12495 = vmatpush1.bf16.msra.mxu0 %v16208_v58  ;;  %v16285_v58 = vld [vmem:[#allocation17 + $0xaac] ss:$16 sps:$4 sm:$0xff]  }
 0xcf7   : > { %12823 = vmatpush1.bf16.msra.mxu1 %v16211_v59  ;;  %12496 = vmatprep.subr.bf16.mxu0 %v16216_v32  ;;  %v16280_v59 = vld [vmem:[#allocation17 + $0xaa0] ss:$16 sps:$4 sm:$0xff]   ;;  %v16283_v32 = vld [vmem:[#allocation17 + $0xaa8] ss:$16 sps:$4 sm:$0xff]  }
 0xcf8   : > { %12824 = vmatprep.subr.bf16.mxu1 %v16219_v60  ;;  %v16288_v60 = vld [vmem:[#allocation17 + $0xac4] ss:$16 sps:$4 sm:$0xff]  }
 0xcfa   : > { %12497 = vmatpush1.bf16.msra.mxu0 %v16214_v61  ;;  %v16291_v61 = vld [vmem:[#allocation17 + $0xacc] ss:$16 sps:$4 sm:$0xff]  }
 0xcfb   : > { %12825 = vmatpush1.bf16.msra.mxu1 %v16217_v63  ;;  %12498 = vmatprep.subr.bf16.mxu0 %v16222_v0  ;;  %v16286_v63 = vld [vmem:[#allocation17 + $0xac0] ss:$16 sps:$4 sm:$0xff]   ;;  %v16289_v0 = vld [vmem:[#allocation17 + $0xac8] ss:$16 sps:$4 sm:$0xff]  }
 0xcfc   : > { %12826 = vmatprep.subr.bf16.mxu1 %v16225_v1  ;;  %v16294_v1 = vld [vmem:[#allocation17 + $0xae4] ss:$16 sps:$4 sm:$0xff]  }
 0xcfe   : > { %12499 = vmatpush1.bf16.msra.mxu0 %v16220_v2  ;;  %v16297_v2 = vld [vmem:[#allocation17 + $0xaec] ss:$16 sps:$4 sm:$0xff]  }
 0xcff   : > { %12827 = vmatpush1.bf16.msra.mxu1 %v16223_v3  ;;  %12500 = vmatprep.subr.bf16.mxu0 %v16228_v4  ;;  %v16292_v3 = vld [vmem:[#allocation17 + $0xae0] ss:$16 sps:$4 sm:$0xff]   ;;  %v16295_v4 = vld [vmem:[#allocation17 + $0xae8] ss:$16 sps:$4 sm:$0xff]  }
 0xd00   : > { %12828 = vmatprep.subr.bf16.mxu1 %v16231_v12  ;;  %v16300_v12 = vld [vmem:[#allocation17 + $0xb04] ss:$16 sps:$4 sm:$0xff]  }
 0xd02   : > { %12501 = vmatpush1.bf16.msra.mxu0 %v16226_v11  ;;  %v16303_v11 = vld [vmem:[#allocation17 + $0xb0c] ss:$16 sps:$4 sm:$0xff]  }
 0xd03   : > { %12829 = vmatpush1.bf16.msra.mxu1 %v16229_v13  ;;  %12502 = vmatprep.subr.bf16.mxu0 %v16234_v52  ;;  %v16298_v13 = vld [vmem:[#allocation17 + $0xb00] ss:$16 sps:$4 sm:$0xff]   ;;  %v16301_v52 = vld [vmem:[#allocation17 + $0xb08] ss:$16 sps:$4 sm:$0xff]  }
 0xd04   : > { %12830 = vmatprep.subr.bf16.mxu1 %v16237_v29  ;;  %v16306_v29 = vld [vmem:[#allocation17 + $0xb24] ss:$16 sps:$4 sm:$0xff]  }
 0xd06   : > { %12503 = vmatpush1.bf16.msra.mxu0 %v16232_v46  ;;  %v16309_v46 = vld [vmem:[#allocation17 + $0xb2c] ss:$16 sps:$4 sm:$0xff]  }
 0xd07   : > { %12831 = vmatpush1.bf16.msra.mxu1 %v16235_v48  ;;  %12504 = vmatprep.subr.bf16.mxu0 %v16240_v30  ;;  %v16304_v48 = vld [vmem:[#allocation17 + $0xb20] ss:$16 sps:$4 sm:$0xff]   ;;  %v16307_v30 = vld [vmem:[#allocation17 + $0xb28] ss:$16 sps:$4 sm:$0xff]  }
 0xd08   : > { %12832 = vmatprep.subr.bf16.mxu1 %v16243_v33  ;;  %v16312_v33 = vld [vmem:[#allocation17 + $0xb44] ss:$16 sps:$4 sm:$0xff]  }
 0xd0a   : > { %12505 = vmatpush1.bf16.msra.mxu0 %v16238_v38  ;;  %v16315_v38 = vld [vmem:[#allocation17 + $0xb4c] ss:$16 sps:$4 sm:$0xff]  }
 0xd0b   : > { %12833 = vmatpush1.bf16.msra.mxu1 %v16241_v15  ;;  %12506 = vmatprep.subr.bf16.mxu0 %v16246_v45  ;;  %v16310_v15 = vld [vmem:[#allocation17 + $0xb40] ss:$16 sps:$4 sm:$0xff]   ;;  %v16313_v45 = vld [vmem:[#allocation17 + $0xb48] ss:$16 sps:$4 sm:$0xff]  }
 0xd0c   : > { %12834 = vmatprep.subr.bf16.mxu1 %v16249_v44  ;;  %v16318_v44 = vld [vmem:[#allocation17 + $0xb64] ss:$16 sps:$4 sm:$0xff]  }
 0xd0e   : > { %12507 = vmatpush1.bf16.msra.mxu0 %v16244_v7  ;;  %v16321_v7 = vld [vmem:[#allocation17 + $0xb6c] ss:$16 sps:$4 sm:$0xff]  }
 0xd0f   : > { %12835 = vmatpush1.bf16.msra.mxu1 %v16247_v34  ;;  %12517 = vmatprep.subr.bf16.mxu0 %v16252_v35  ;;  %v16319_v34 = vld [vmem:[#allocation17 + $0xb68] ss:$16 sps:$4 sm:$0xff]   ;;  %v16324_v35 = vld [vmem:[#allocation17 + $0xb84] ss:$16 sps:$4 sm:$0xff]  }
 0xd10   : > { %12845 = vmatprep.subr.bf16.mxu1 %v16255_v36  ;;  %v16327_v36 = vld [vmem:[#allocation17 + $0xb8c] ss:$16 sps:$4 sm:$0xff]  }
 0xd11   : > { %12509 = vmatmul.mubr.bf16.vlgmr.msra.gmra.mrb[64].mxu0 %v9232_v62 }
 0xd12   : > { %12837 = vmatmul.mubr.bf16.vlgmr.msra.gmra.mrb[64].mxu1 %v9232_v62  ;;  %12518 = vmatpush1.bf16.msra.mxu0 %v16250_v31  ;;  %v16325_v31 = vld [vmem:[#allocation17 + $0xb88] ss:$16 sps:$4 sm:$0xff]   ;;  %v16330_v62 = vld [vmem:[#allocation17 + $0xba4] ss:$16 sps:$4 sm:$0xff]  }
 0xd13   : > { %12549 = vmatprep.mubr.bf16.mxu0 %v9235_v17  ;;  %12846 = vmatpush1.bf16.msra.mxu1 %v16253_v39  ;;  %v16333_v39 = vld [vmem:[#allocation17 + $0xbac] ss:$16 sps:$4 sm:$0xff]  }
 0xd14   : > { %12877 = vmatprep.mubr.bf16.mxu1 %v9235_v17  ;;  %12519 = vmatprep.subr.bf16.mxu0 %v16258_v42  ;;  %v16328_v42 = vld [vmem:[#allocation17 + $0xba0] ss:$16 sps:$4 sm:$0xff]   ;;  %v16331_v17 = vld [vmem:[#allocation17 + $0xba8] ss:$16 sps:$4 sm:$0xff]  }
 0xd15   : > { %12847 = vmatprep.subr.bf16.mxu1 %v16261_v5  ;;  %v16336_v5 = vld [vmem:[#allocation17 + $0xbc4] ss:$16 sps:$4 sm:$0xff]  }
 0xd16   : > { %12520 = vmatpush1.bf16.msra.mxu0 %v16256_v14  ;;  %v16339_v14 = vld [vmem:[#allocation17 + $0xbcc] ss:$16 sps:$4 sm:$0xff]  }
 0xd17   : > { %12848 = vmatpush1.bf16.msra.mxu1 %v16259_v20  ;;  %12521 = vmatprep.subr.bf16.mxu0 %v16264_v19  ;;  %v16334_v20 = vld [vmem:[#allocation17 + $0xbc0] ss:$16 sps:$4 sm:$0xff]   ;;  %v16337_v19 = vld [vmem:[#allocation17 + $0xbc8] ss:$16 sps:$4 sm:$0xff]  }
 0xd18   : > { %12849 = vmatprep.subr.bf16.mxu1 %v16267_v25  ;;  %v16342_v25 = vld [vmem:[#allocation17 + $0xbe4] ss:$16 sps:$4 sm:$0xff]  }
 0xd1a   : > { %12522 = vmatpush1.bf16.msra.mxu0 %v16262_v47  ;;  %v16345_v47 = vld [vmem:[#allocation17 + $0xbec] ss:$16 sps:$4 sm:$0xff]  }
 0xd1b   : > { %12850 = vmatpush1.bf16.msra.mxu1 %v16265_v50  ;;  %12523 = vmatprep.subr.bf16.mxu0 %v16270_v51  ;;  %v16340_v50 = vld [vmem:[#allocation17 + $0xbe0] ss:$16 sps:$4 sm:$0xff]   ;;  %v9218_v51 = vmax.f32 %v17897_v16, 0.0 }
 0xd1c   : > { %12851 = vmatprep.subr.bf16.mxu1 %v16273_v28  ;;  %v16343_v28 = vld [vmem:[#allocation17 + $0xbe8] ss:$16 sps:$4 sm:$0xff]   ;;  %v16352_v16 = vld [vmem:[#allocation17 + $0xc20] ss:$16 sps:$4 sm:$0xff]  }
 0xd1e   : > { %12524 = vmatpush1.bf16.msra.mxu0 %v16268_v24  ;;  %v16348_v24 = vld [vmem:[#allocation17 + $0xc04] ss:$16 sps:$4 sm:$0xff]  }
 0xd1f   : > { %12852 = vmatpush1.bf16.msra.mxu1 %v16271_v54  ;;  %12525 = vmatprep.subr.bf16.mxu0 %v16276_v57  ;;  %v16351_v54 = vld [vmem:[#allocation17 + $0xc0c] ss:$16 sps:$4 sm:$0xff]   ;;  %v9221_v57 = vmax.f32 %v17911_v9, 0.0 }
 0xd20   : > { %12853 = vmatprep.subr.bf16.mxu1 %v16279_v55  ;;  %v16346_v55 = vld [vmem:[#allocation17 + $0xc00] ss:$16 sps:$4 sm:$0xff]   ;;  %v16363_v9 = vld [vmem:[#allocation17 + $0xc4c] ss:$16 sps:$4 sm:$0xff]  }
 0xd22   : > { %12526 = vmatpush1.bf16.msra.mxu0 %v16274_v56  ;;  %v9234_v56 = vpack.c.bf16 %v9218_v51, %v9218_v51  ;;  %v16420_v51 = vld [vmem:[#allocation17 + $0xd84] ss:$16 sps:$4 sm:$0xff]  }
 0xd23   : > { %12854 = vmatpush1.bf16.msra.mxu1 %v16277_v53  ;;  %12527 = vmatprep.subr.bf16.mxu0 %v16282_v27  ;;  %v16349_v53 = vld [vmem:[#allocation17 + $0xc08] ss:$16 sps:$4 sm:$0xff]   ;;  %v16354_v27 = vld [vmem:[#allocation17 + $0xc24] ss:$16 sps:$4 sm:$0xff]  }
 0xd24   : > { %12855 = vmatprep.subr.bf16.mxu1 %v16285_v58  ;;  %v9237_v58 = vpack.c.bf16 %v9221_v57, %v9221_v57  ;;  %v16426_v57 = vld [vmem:[#allocation17 + $0xda4] ss:$16 sps:$4 sm:$0xff]  }
 0xd26   : > { %12528 = vmatpush1.bf16.msra.mxu0 %v16280_v59  ;;  %v16357_v59 = vld [vmem:[#allocation17 + $0xc2c] ss:$16 sps:$4 sm:$0xff]  }
 0xd27   : > { %12856 = vmatpush1.bf16.msra.mxu1 %v16283_v32  ;;  %12529 = vmatprep.subr.bf16.mxu0 %v16288_v60  ;;  %v16355_v32 = vld [vmem:[#allocation17 + $0xc28] ss:$16 sps:$4 sm:$0xff]   ;;  %v16360_v60 = vld [vmem:[#allocation17 + $0xc44] ss:$16 sps:$4 sm:$0xff]  }
 0xd28   : > { %12857 = vmatprep.subr.bf16.mxu1 %v16291_v61  ;;  %v16358_v61 = vld [vmem:[#allocation17 + $0xc40] ss:$16 sps:$4 sm:$0xff]  }
 0xd2a   : > { %12530 = vmatpush1.bf16.msra.mxu0 %v16286_v63  ;;  %v16361_v63 = vld [vmem:[#allocation17 + $0xc48] ss:$16 sps:$4 sm:$0xff]  }
 0xd2b   : > { %12858 = vmatpush1.bf16.msra.mxu1 %v16289_v0  ;;  %12531 = vmatprep.subr.bf16.mxu0 %v16294_v1  ;;  %v16366_v0 = vld [vmem:[#allocation17 + $0xc64] ss:$16 sps:$4 sm:$0xff]   ;;  %v16369_v1 = vld [vmem:[#allocation17 + $0xc6c] ss:$16 sps:$4 sm:$0xff]  }
 0xd2c   : > { %12859 = vmatprep.subr.bf16.mxu1 %v16297_v2  ;;  %v16364_v2 = vld [vmem:[#allocation17 + $0xc60] ss:$16 sps:$4 sm:$0xff]  }
 0xd2e   : > { %12532 = vmatpush1.bf16.msra.mxu0 %v16292_v3  ;;  %v16367_v3 = vld [vmem:[#allocation17 + $0xc68] ss:$16 sps:$4 sm:$0xff]  }
 0xd2f   : > { %12860 = vmatpush1.bf16.msra.mxu1 %v16295_v4  ;;  %12533 = vmatprep.subr.bf16.mxu0 %v16300_v12  ;;  %v16372_v4 = vld [vmem:[#allocation17 + $0xc84] ss:$16 sps:$4 sm:$0xff]   ;;  %v16375_v12 = vld [vmem:[#allocation17 + $0xc8c] ss:$16 sps:$4 sm:$0xff]  }
 0xd30   : > { %12861 = vmatprep.subr.bf16.mxu1 %v16303_v11  ;;  %v16370_v11 = vld [vmem:[#allocation17 + $0xc80] ss:$16 sps:$4 sm:$0xff]  }
 0xd32   : > { %12534 = vmatpush1.bf16.msra.mxu0 %v16298_v13  ;;  %v16373_v13 = vld [vmem:[#allocation17 + $0xc88] ss:$16 sps:$4 sm:$0xff]  }
 0xd33   : > { %12862 = vmatpush1.bf16.msra.mxu1 %v16301_v52  ;;  %12535 = vmatprep.subr.bf16.mxu0 %v16306_v29  ;;  %v16378_v52 = vld [vmem:[#allocation17 + $0xca4] ss:$16 sps:$4 sm:$0xff]   ;;  %v16381_v29 = vld [vmem:[#allocation17 + $0xcac] ss:$16 sps:$4 sm:$0xff]  }
 0xd34   : > { %12863 = vmatprep.subr.bf16.mxu1 %v16309_v46  ;;  %v16376_v46 = vld [vmem:[#allocation17 + $0xca0] ss:$16 sps:$4 sm:$0xff]  }
 0xd36   : > { %12536 = vmatpush1.bf16.msra.mxu0 %v16304_v48  ;;  %v16379_v48 = vld [vmem:[#allocation17 + $0xca8] ss:$16 sps:$4 sm:$0xff]  }
 0xd37   : > { %12864 = vmatpush1.bf16.msra.mxu1 %v16307_v30  ;;  %12537 = vmatprep.subr.bf16.mxu0 %v16312_v33  ;;  %v16384_v30 = vld [vmem:[#allocation17 + $0xcc4] ss:$16 sps:$4 sm:$0xff]   ;;  %v16387_v33 = vld [vmem:[#allocation17 + $0xccc] ss:$16 sps:$4 sm:$0xff]  }
 0xd38   : > { %12865 = vmatprep.subr.bf16.mxu1 %v16315_v38  ;;  %v16382_v38 = vld [vmem:[#allocation17 + $0xcc0] ss:$16 sps:$4 sm:$0xff]  }
 0xd3a   : > { %12538 = vmatpush1.bf16.msra.mxu0 %v16310_v15  ;;  %v16385_v15 = vld [vmem:[#allocation17 + $0xcc8] ss:$16 sps:$4 sm:$0xff]  }
 0xd3b   : > { %12866 = vmatpush1.bf16.msra.mxu1 %v16313_v45  ;;  %12539 = vmatprep.subr.bf16.mxu0 %v16318_v44  ;;  %v16390_v45 = vld [vmem:[#allocation17 + $0xce4] ss:$16 sps:$4 sm:$0xff]   ;;  %v16393_v44 = vld [vmem:[#allocation17 + $0xcec] ss:$16 sps:$4 sm:$0xff]  }
 0xd3c   : > { %12867 = vmatprep.subr.bf16.mxu1 %v16321_v7  ;;  %v16388_v7 = vld [vmem:[#allocation17 + $0xce0] ss:$16 sps:$4 sm:$0xff]  }
 0xd3e   : > { %12540 = vmatpush1.bf16.msra.mxu0 %v16316_v49  ;;  %v16391_v49 = vld [vmem:[#allocation17 + $0xce8] ss:$16 sps:$4 sm:$0xff]  }
 0xd3f   : > { %12868 = vmatpush1.bf16.msra.mxu1 %v16319_v34  ;;  %12541 = vmatprep.subr.bf16.mxu0 %v16324_v35  ;;  %v16396_v34 = vld [vmem:[#allocation17 + $0xd04] ss:$16 sps:$4 sm:$0xff]   ;;  %v16399_v35 = vld [vmem:[#allocation17 + $0xd0c] ss:$16 sps:$4 sm:$0xff]  }
 0xd40   : > { %12869 = vmatprep.subr.bf16.mxu1 %v16327_v36  ;;  %v16394_v36 = vld [vmem:[#allocation17 + $0xd00] ss:$16 sps:$4 sm:$0xff]  }
 0xd42   : > { %12542 = vmatpush1.bf16.msra.mxu0 %v16322_v26  ;;  %v16397_v26 = vld [vmem:[#allocation17 + $0xd08] ss:$16 sps:$4 sm:$0xff]  }
 0xd43   : > { %12870 = vmatpush1.bf16.msra.mxu1 %v16325_v31  ;;  %12543 = vmatprep.subr.bf16.mxu0 %v16330_v62  ;;  %v16402_v31 = vld [vmem:[#allocation17 + $0xd24] ss:$16 sps:$4 sm:$0xff]   ;;  %v16405_v62 = vld [vmem:[#allocation17 + $0xd2c] ss:$16 sps:$4 sm:$0xff]  }
 0xd44   : > { %12871 = vmatprep.subr.bf16.mxu1 %v16333_v39  ;;  %v16400_v39 = vld [vmem:[#allocation17 + $0xd20] ss:$16 sps:$4 sm:$0xff]  }
 0xd46   : > { %12544 = vmatpush1.bf16.msra.mxu0 %v16328_v42  ;;  %v16403_v42 = vld [vmem:[#allocation17 + $0xd28] ss:$16 sps:$4 sm:$0xff]  }
 0xd47   : > { %12872 = vmatpush1.bf16.msra.mxu1 %v16331_v17  ;;  %12545 = vmatprep.subr.bf16.mxu0 %v16336_v5  ;;  %v16408_v17 = vld [vmem:[#allocation17 + $0xd44] ss:$16 sps:$4 sm:$0xff]   ;;  %v16411_v5 = vld [vmem:[#allocation17 + $0xd4c] ss:$16 sps:$4 sm:$0xff]  }
 0xd48   : > { %12873 = vmatprep.subr.bf16.mxu1 %v16339_v14  ;;  %v16406_v14 = vld [vmem:[#allocation17 + $0xd40] ss:$16 sps:$4 sm:$0xff]  }
 0xd4a   : > { %12546 = vmatpush1.bf16.msra.mxu0 %v16334_v20  ;;  %v16409_v20 = vld [vmem:[#allocation17 + $0xd48] ss:$16 sps:$4 sm:$0xff]  }
 0xd4b   : > { %12874 = vmatpush1.bf16.msra.mxu1 %v16337_v19  ;;  %12547 = vmatprep.subr.bf16.mxu0 %v16342_v25  ;;  %v16414_v19 = vld [vmem:[#allocation17 + $0xd64] ss:$16 sps:$4 sm:$0xff]   ;;  %v16417_v25 = vld [vmem:[#allocation17 + $0xd6c] ss:$16 sps:$4 sm:$0xff]  }
 0xd4c   : > { %12875 = vmatprep.subr.bf16.mxu1 %v16345_v47  ;;  %v16412_v47 = vld [vmem:[#allocation17 + $0xd60] ss:$16 sps:$4 sm:$0xff]  }
 0xd4e   : > { %12548 = vmatpush1.bf16.msra.mxu0 %v16340_v50  ;;  %v16415_v50 = vld [vmem:[#allocation17 + $0xd68] ss:$16 sps:$4 sm:$0xff]  }
 0xd4f   : > { %12876 = vmatpush1.bf16.msra.mxu1 %v16343_v28  ;;  %12558 = vmatprep.subr.bf16.mxu0 %v16348_v24  ;;  %v16423_v28 = vld [vmem:[#allocation17 + $0xd8c] ss:$16 sps:$4 sm:$0xff]   ;;  %v16418_v24 = vld [vmem:[#allocation17 + $0xd80] ss:$16 sps:$4 sm:$0xff]  }
 0xd50   : > { %12886 = vmatprep.subr.bf16.mxu1 %v16351_v54  ;;  %v16421_v54 = vld [vmem:[#allocation17 + $0xd88] ss:$16 sps:$4 sm:$0xff]  }
 0xd51   : > { %12550 = vmatmul.mubr.bf16.vlgmr.msra.gmra.mrb[64].mxu0 %v9234_v56 }
 0xd52   : > { %12878 = vmatmul.mubr.bf16.vlgmr.msra.gmra.mrb[64].mxu1 %v9234_v56  ;;  %12559 = vmatpush1.bf16.msra.mxu0 %v16346_v55  ;;  %v16429_v55 = vld [vmem:[#allocation17 + $0xdac] ss:$16 sps:$4 sm:$0xff]   ;;  %v16424_v56 = vld [vmem:[#allocation17 + $0xda0] ss:$16 sps:$4 sm:$0xff]  }
 0xd53   : > { %12590 = vmatprep.mubr.bf16.mxu0 %v9237_v58  ;;  %12887 = vmatpush1.bf16.msra.mxu1 %v16349_v53  ;;  %v16427_v53 = vld [vmem:[#allocation17 + $0xda8] ss:$16 sps:$4 sm:$0xff]  }
 0xd54   : > { %12918 = vmatprep.mubr.bf16.mxu1 %v9237_v58  ;;  %12560 = vmatprep.subr.bf16.mxu0 %v16354_v27  ;;  %v16432_v27 = vld [vmem:[#allocation17 + $0xdc4] ss:$16 sps:$4 sm:$0xff]   ;;  %v16435_v58 = vld [vmem:[#allocation17 + $0xdcc] ss:$16 sps:$4 sm:$0xff]  }
 0xd55   : > { %12888 = vmatprep.subr.bf16.mxu1 %v16357_v59  ;;  %v16430_v59 = vld [vmem:[#allocation17 + $0xdc0] ss:$16 sps:$4 sm:$0xff]  }
 0xd56   : > { %12561 = vmatpush1.bf16.msra.mxu0 %v16352_v16  ;;  %v16433_v16 = vld [vmem:[#allocation17 + $0xdc8] ss:$16 sps:$4 sm:$0xff]  }
 0xd57   : > { %12889 = vmatpush1.bf16.msra.mxu1 %v16355_v32  ;;  %12562 = vmatprep.subr.bf16.mxu0 %v16360_v60  ;;  %v16438_v32 = vld [vmem:[#allocation17 + $0xde4] ss:$16 sps:$4 sm:$0xff]   ;;  %v16441_v60 = vld [vmem:[#allocation17 + $0xdec] ss:$16 sps:$4 sm:$0xff]  }
 0xd58   : > { %12890 = vmatprep.subr.bf16.mxu1 %v16363_v9  ;;  %v16436_v9 = vld [vmem:[#allocation17 + $0xde0] ss:$16 sps:$4 sm:$0xff]  }
 0xd5a   : > { %12563 = vmatpush1.bf16.msra.mxu0 %v16358_v61  ;;  %v9220_v61 = vmax.f32 %v17907_v6, 0.0  ;;  %v16448_v6 = vld [vmem:[#allocation17 + $0xe20] ss:$16 sps:$4 sm:$0xff]  }
 0xd5b   : > { %12891 = vmatpush1.bf16.msra.mxu1 %v16361_v63  ;;  %12564 = vmatprep.subr.bf16.mxu0 %v16366_v0  ;;  %v16439_v63 = vld [vmem:[#allocation17 + $0xde8] ss:$16 sps:$4 sm:$0xff]   ;;  %v16444_v0 = vld [vmem:[#allocation17 + $0xe04] ss:$16 sps:$4 sm:$0xff]  }
 0xd5c   : > { %12892 = vmatprep.subr.bf16.mxu1 %v16369_v1  ;;  %v16447_v1 = vld [vmem:[#allocation17 + $0xe0c] ss:$16 sps:$4 sm:$0xff]  }
 0xd5e   : > { %12565 = vmatpush1.bf16.msra.mxu0 %v16364_v2  ;;  %v9223_v2 = vmax.f32 %v17913_v10, 0.0  ;;  %v16459_v10 = vld [vmem:[#allocation17 + $0xe4c] ss:$16 sps:$4 sm:$0xff]  }
 0xd5f   : > { %12893 = vmatpush1.bf16.msra.mxu1 %v16367_v3  ;;  %12566 = vmatprep.subr.bf16.mxu0 %v16372_v4  ;;  %v16442_v3 = vld [vmem:[#allocation17 + $0xe00] ss:$16 sps:$4 sm:$0xff]   ;;  %v9236_v4 = vpack.c.bf16 %v9220_v61, %v9220_v61 }
 0xd60   : > { %12894 = vmatprep.subr.bf16.mxu1 %v16375_v12  ;;  %v16445_v12 = vld [vmem:[#allocation17 + $0xe08] ss:$16 sps:$4 sm:$0xff]   ;;  %v16514_v61 = vld [vmem:[#allocation17 + $0xf80] ss:$16 sps:$4 sm:$0xff]  }
 0xd62   : > { %12567 = vmatpush1.bf16.msra.mxu0 %v16370_v11  ;;  %v16450_v11 = vld [vmem:[#allocation17 + $0xe24] ss:$16 sps:$4 sm:$0xff]  }
 0xd63   : > { %12895 = vmatpush1.bf16.msra.mxu1 %v16373_v13  ;;  %12568 = vmatprep.subr.bf16.mxu0 %v16378_v52  ;;  %v9239_v13 = vpack.c.bf16 %v9223_v2, %v9223_v2  ;;  %v16453_v52 = vld [vmem:[#allocation17 + $0xe2c] ss:$16 sps:$4 sm:$0xff]   ;;  %v16520_v2 = vld [vmem:[#allocation17 + $0xfa0] ss:$16 sps:$4 sm:$0xff]  }
 0xd64   : > { %12896 = vmatprep.subr.bf16.mxu1 %v16381_v29  ;;  %v16451_v29 = vld [vmem:[#allocation17 + $0xe28] ss:$16 sps:$4 sm:$0xff]  }
 0xd66   : > { %12569 = vmatpush1.bf16.msra.mxu0 %v16376_v46  ;;  %v16456_v46 = vld [vmem:[#allocation17 + $0xe44] ss:$16 sps:$4 sm:$0xff]  }
 0xd67   : > { %12897 = vmatpush1.bf16.msra.mxu1 %v16379_v48  ;;  %12570 = vmatprep.subr.bf16.mxu0 %v16384_v30  ;;  %v16454_v48 = vld [vmem:[#allocation17 + $0xe40] ss:$16 sps:$4 sm:$0xff]   ;;  %v16457_v30 = vld [vmem:[#allocation17 + $0xe48] ss:$16 sps:$4 sm:$0xff]  }
 0xd68   : > { %12898 = vmatprep.subr.bf16.mxu1 %v16387_v33  ;;  %v16462_v33 = vld [vmem:[#allocation17 + $0xe64] ss:$16 sps:$4 sm:$0xff]  }
 0xd6a   : > { %12571 = vmatpush1.bf16.msra.mxu0 %v16382_v38  ;;  %v16465_v38 = vld [vmem:[#allocation17 + $0xe6c] ss:$16 sps:$4 sm:$0xff]  }
 0xd6b   : > { %12899 = vmatpush1.bf16.msra.mxu1 %v16385_v15  ;;  %12572 = vmatprep.subr.bf16.mxu0 %v16390_v45  ;;  %v16460_v15 = vld [vmem:[#allocation17 + $0xe60] ss:$16 sps:$4 sm:$0xff]   ;;  %v16463_v45 = vld [vmem:[#allocation17 + $0xe68] ss:$16 sps:$4 sm:$0xff]  }
 0xd6c   : > { %12900 = vmatprep.subr.bf16.mxu1 %v16393_v44  ;;  %v16468_v44 = vld [vmem:[#allocation17 + $0xe84] ss:$16 sps:$4 sm:$0xff]  }
 0xd6e   : > { %12573 = vmatpush1.bf16.msra.mxu0 %v16388_v7  ;;  %v16471_v7 = vld [vmem:[#allocation17 + $0xe8c] ss:$16 sps:$4 sm:$0xff]  }
 0xd6f   : > { %12901 = vmatpush1.bf16.msra.mxu1 %v16391_v49  ;;  %12574 = vmatprep.subr.bf16.mxu0 %v16396_v34  ;;  %v16466_v49 = vld [vmem:[#allocation17 + $0xe80] ss:$16 sps:$4 sm:$0xff]   ;;  %v16469_v34 = vld [vmem:[#allocation17 + $0xe88] ss:$16 sps:$4 sm:$0xff]  }
 0xd70   : > { %12902 = vmatprep.subr.bf16.mxu1 %v16399_v35  ;;  %v16474_v35 = vld [vmem:[#allocation17 + $0xea4] ss:$16 sps:$4 sm:$0xff]  }
 0xd72   : > { %12575 = vmatpush1.bf16.msra.mxu0 %v16394_v36  ;;  %v16477_v36 = vld [vmem:[#allocation17 + $0xeac] ss:$16 sps:$4 sm:$0xff]  }
 0xd73   : > { %12903 = vmatpush1.bf16.msra.mxu1 %v16397_v26  ;;  %12576 = vmatprep.subr.bf16.mxu0 %v16402_v31  ;;  %v16472_v26 = vld [vmem:[#allocation17 + $0xea0] ss:$16 sps:$4 sm:$0xff]   ;;  %v16475_v31 = vld [vmem:[#allocation17 + $0xea8] ss:$16 sps:$4 sm:$0xff]  }
 0xd74   : > { %12904 = vmatprep.subr.bf16.mxu1 %v16405_v62  ;;  %v16480_v62 = vld [vmem:[#allocation17 + $0xec4] ss:$16 sps:$4 sm:$0xff]  }
 0xd76   : > { %12577 = vmatpush1.bf16.msra.mxu0 %v16400_v39  ;;  %v16483_v39 = vld [vmem:[#allocation17 + $0xecc] ss:$16 sps:$4 sm:$0xff]  }
 0xd77   : > { %12905 = vmatpush1.bf16.msra.mxu1 %v16403_v42  ;;  %12578 = vmatprep.subr.bf16.mxu0 %v16408_v17  ;;  %v16478_v42 = vld [vmem:[#allocation17 + $0xec0] ss:$16 sps:$4 sm:$0xff]   ;;  %v16481_v17 = vld [vmem:[#allocation17 + $0xec8] ss:$16 sps:$4 sm:$0xff]  }
 0xd78   : > { %12906 = vmatprep.subr.bf16.mxu1 %v16411_v5  ;;  %v16486_v5 = vld [vmem:[#allocation17 + $0xee4] ss:$16 sps:$4 sm:$0xff]  }
 0xd7a   : > { %12579 = vmatpush1.bf16.msra.mxu0 %v16406_v14  ;;  %v16489_v14 = vld [vmem:[#allocation17 + $0xeec] ss:$16 sps:$4 sm:$0xff]  }
 0xd7b   : > { %12907 = vmatpush1.bf16.msra.mxu1 %v16409_v20  ;;  %12580 = vmatprep.subr.bf16.mxu0 %v16414_v19  ;;  %v16484_v20 = vld [vmem:[#allocation17 + $0xee0] ss:$16 sps:$4 sm:$0xff]   ;;  %v16487_v19 = vld [vmem:[#allocation17 + $0xee8] ss:$16 sps:$4 sm:$0xff]  }
 0xd7c   : > { %12908 = vmatprep.subr.bf16.mxu1 %v16417_v25  ;;  %v16492_v25 = vld [vmem:[#allocation17 + $0xf04] ss:$16 sps:$4 sm:$0xff]  }
 0xd7e   : > { %12581 = vmatpush1.bf16.msra.mxu0 %v16412_v47  ;;  %v16495_v47 = vld [vmem:[#allocation17 + $0xf0c] ss:$16 sps:$4 sm:$0xff]  }
 0xd7f   : > { %12909 = vmatpush1.bf16.msra.mxu1 %v16415_v50  ;;  %12582 = vmatprep.subr.bf16.mxu0 %v16420_v51  ;;  %v16490_v50 = vld [vmem:[#allocation17 + $0xf00] ss:$16 sps:$4 sm:$0xff]   ;;  %v16493_v51 = vld [vmem:[#allocation17 + $0xf08] ss:$16 sps:$4 sm:$0xff]  }
 0xd80   : > { %12910 = vmatprep.subr.bf16.mxu1 %v16423_v28  ;;  %v16498_v28 = vld [vmem:[#allocation17 + $0xf24] ss:$16 sps:$4 sm:$0xff]  }
 0xd82   : > { %12583 = vmatpush1.bf16.msra.mxu0 %v16418_v24  ;;  %v16501_v24 = vld [vmem:[#allocation17 + $0xf2c] ss:$16 sps:$4 sm:$0xff]  }
 0xd83   : > { %12911 = vmatpush1.bf16.msra.mxu1 %v16421_v54  ;;  %12584 = vmatprep.subr.bf16.mxu0 %v16426_v57  ;;  %v16496_v54 = vld [vmem:[#allocation17 + $0xf20] ss:$16 sps:$4 sm:$0xff]   ;;  %v16499_v57 = vld [vmem:[#allocation17 + $0xf28] ss:$16 sps:$4 sm:$0xff]  }
 0xd84   : > { %12912 = vmatprep.subr.bf16.mxu1 %v16429_v55  ;;  %v16504_v55 = vld [vmem:[#allocation17 + $0xf44] ss:$16 sps:$4 sm:$0xff]  }
 0xd86   : > { %12585 = vmatpush1.bf16.msra.mxu0 %v16424_v56  ;;  %v16507_v56 = vld [vmem:[#allocation17 + $0xf4c] ss:$16 sps:$4 sm:$0xff]  }
 0xd87   : > { %12913 = vmatpush1.bf16.msra.mxu1 %v16427_v53  ;;  %12586 = vmatprep.subr.bf16.mxu0 %v16432_v27  ;;  %v16502_v53 = vld [vmem:[#allocation17 + $0xf40] ss:$16 sps:$4 sm:$0xff]   ;;  %v16505_v27 = vld [vmem:[#allocation17 + $0xf48] ss:$16 sps:$4 sm:$0xff]  }
 0xd88   : > { %12914 = vmatprep.subr.bf16.mxu1 %v16435_v58  ;;  %v16510_v58 = vld [vmem:[#allocation17 + $0xf64] ss:$16 sps:$4 sm:$0xff]  }
 0xd8a   : > { %12587 = vmatpush1.bf16.msra.mxu0 %v16430_v59  ;;  %v16513_v59 = vld [vmem:[#allocation17 + $0xf6c] ss:$16 sps:$4 sm:$0xff]  }
 0xd8b   : > { %12915 = vmatpush1.bf16.msra.mxu1 %v16433_v16  ;;  %12588 = vmatprep.subr.bf16.mxu0 %v16438_v32  ;;  %v16508_v16 = vld [vmem:[#allocation17 + $0xf60] ss:$16 sps:$4 sm:$0xff]   ;;  %v16511_v32 = vld [vmem:[#allocation17 + $0xf68] ss:$16 sps:$4 sm:$0xff]  }
 0xd8c   : > { %12916 = vmatprep.subr.bf16.mxu1 %v16441_v60  ;;  %v16516_v60 = vld [vmem:[#allocation17 + $0xf84] ss:$16 sps:$4 sm:$0xff]  }
 0xd8e   : > { %12589 = vmatpush1.bf16.msra.mxu0 %v16436_v9  ;;  %v16519_v9 = vld [vmem:[#allocation17 + $0xf8c] ss:$16 sps:$4 sm:$0xff]  }
 0xd8f   : > { %12917 = vmatpush1.bf16.msra.mxu1 %v16439_v63  ;;  %12599 = vmatprep.subr.bf16.mxu0 %v16444_v0  ;;  %v16517_v63 = vld [vmem:[#allocation17 + $0xf88] ss:$16 sps:$4 sm:$0xff]   ;;  %v16522_v0 = vld [vmem:[#allocation17 + $0xfa4] ss:$16 sps:$4 sm:$0xff]  }
 0xd90   : > { %12927 = vmatprep.subr.bf16.mxu1 %v16447_v1  ;;  %v16525_v1 = vld [vmem:[#allocation17 + $0xfac] ss:$16 sps:$4 sm:$0xff]  }
 0xd91   : > { %12591 = vmatmul.mubr.bf16.vlgmr.msra.gmra.mrb[64].mxu0 %v9236_v4 }
 0xd92   : > { %12919 = vmatmul.mubr.bf16.vlgmr.msra.gmra.mrb[64].mxu1 %v9236_v4  ;;  %12600 = vmatpush1.bf16.msra.mxu0 %v16442_v3  ;;  %v16523_v3 = vld [vmem:[#allocation17 + $0xfa8] ss:$16 sps:$4 sm:$0xff]   ;;  %v16528_v4 = vld [vmem:[#allocation17 + $0xfc4] ss:$16 sps:$4 sm:$0xff]  }
 0xd93   : > { %12631 = vmatprep.mubr.bf16.mxu0 %v9239_v13  ;;  %12928 = vmatpush1.bf16.msra.mxu1 %v16445_v12  ;;  %v16531_v12 = vld [vmem:[#allocation17 + $0xfcc] ss:$16 sps:$4 sm:$0xff]  }
 0xd94   : > { %12959 = vmatprep.mubr.bf16.mxu1 %v9239_v13  ;;  %12601 = vmatprep.subr.bf16.mxu0 %v16450_v11  ;;  %v16526_v11 = vld [vmem:[#allocation17 + $0xfc0] ss:$16 sps:$4 sm:$0xff]   ;;  %v16529_v13 = vld [vmem:[#allocation17 + $0xfc8] ss:$16 sps:$4 sm:$0xff]  }
 0xd95   : > { %12929 = vmatprep.subr.bf16.mxu1 %v16453_v52  ;;  %v16534_v52 = vld [vmem:[#allocation17 + $0xfe4] ss:$16 sps:$4 sm:$0xff]  }
 0xd96   : > { %12602 = vmatpush1.bf16.msra.mxu0 %v16448_v6  ;;  %v16537_v6 = vld [vmem:[#allocation17 + $0xfec] ss:$16 sps:$4 sm:$0xff]  }
 0xd97   : > { %12930 = vmatpush1.bf16.msra.mxu1 %v16451_v29  ;;  %12603 = vmatprep.subr.bf16.mxu0 %v16456_v46  ;;  %v16532_v29 = vld [vmem:[#allocation17 + $0xfe0] ss:$16 sps:$4 sm:$0xff]   ;;  %v9222_v46 = vmax.f32 %v17909_v8, 0.0 }
 0xd98   : > { %12931 = vmatprep.subr.bf16.mxu1 %v16459_v10  ;;  %v16535_v10 = vld [vmem:[#allocation17 + $0xfe8] ss:$16 sps:$4 sm:$0xff]  }
 0xd9a   : > { %12604 = vmatpush1.bf16.msra.mxu0 %v16454_v48  ;;  %v9238_v48 = vpack.c.bf16 %v9222_v46, %v9222_v46 }
 0xd9b   : > { %12932 = vmatpush1.bf16.msra.mxu1 %v16457_v30  ;;  %12605 = vmatprep.subr.bf16.mxu0 %v16462_v33 }
 0xd9c   : > { %12933 = vmatprep.subr.bf16.mxu1 %v16465_v38 }
 0xd9e   : > { %12606 = vmatpush1.bf16.msra.mxu0 %v16460_v15 }
 0xd9f   : > { %12934 = vmatpush1.bf16.msra.mxu1 %v16463_v45  ;;  %12607 = vmatprep.subr.bf16.mxu0 %v16468_v44 }
 0xda0   : > { %12935 = vmatprep.subr.bf16.mxu1 %v16471_v7 }
 0xda2   : > { %12608 = vmatpush1.bf16.msra.mxu0 %v16466_v49 }
 0xda3   : > { %12936 = vmatpush1.bf16.msra.mxu1 %v16469_v34  ;;  %12609 = vmatprep.subr.bf16.mxu0 %v16474_v35 }
 0xda4   : > { %12937 = vmatprep.subr.bf16.mxu1 %v16477_v36 }
 0xda6   : > { %12610 = vmatpush1.bf16.msra.mxu0 %v16472_v26 }
 0xda7   : > { %12938 = vmatpush1.bf16.msra.mxu1 %v16475_v31  ;;  %12611 = vmatprep.subr.bf16.mxu0 %v16480_v62 }
 0xda8   : > { %12939 = vmatprep.subr.bf16.mxu1 %v16483_v39 }
 0xdaa   : > { %12612 = vmatpush1.bf16.msra.mxu0 %v16478_v42 }
 0xdab   : > { %12940 = vmatpush1.bf16.msra.mxu1 %v16481_v17  ;;  %12613 = vmatprep.subr.bf16.mxu0 %v16486_v5 }
 0xdac   : > { %12941 = vmatprep.subr.bf16.mxu1 %v16489_v14 }
 0xdae   : > { %12614 = vmatpush1.bf16.msra.mxu0 %v16484_v20 }
 0xdaf   : > { %12942 = vmatpush1.bf16.msra.mxu1 %v16487_v19  ;;  %12615 = vmatprep.subr.bf16.mxu0 %v16492_v25 }
 0xdb0   : > { %12943 = vmatprep.subr.bf16.mxu1 %v16495_v47 }
 0xdb2   : > { %12616 = vmatpush1.bf16.msra.mxu0 %v16490_v50 }
 0xdb3   : > { %12944 = vmatpush1.bf16.msra.mxu1 %v16493_v51  ;;  %12617 = vmatprep.subr.bf16.mxu0 %v16498_v28 }
 0xdb4   : > { %12945 = vmatprep.subr.bf16.mxu1 %v16501_v24 }
 0xdb6   : > { %12618 = vmatpush1.bf16.msra.mxu0 %v16496_v54 }
 0xdb7   : > { %12946 = vmatpush1.bf16.msra.mxu1 %v16499_v57  ;;  %12619 = vmatprep.subr.bf16.mxu0 %v16504_v55 }
 0xdb8   : > { %12947 = vmatprep.subr.bf16.mxu1 %v16507_v56 }
 0xdba   : > { %12620 = vmatpush1.bf16.msra.mxu0 %v16502_v53 }
 0xdbb   : > { %12948 = vmatpush1.bf16.msra.mxu1 %v16505_v27  ;;  %12621 = vmatprep.subr.bf16.mxu0 %v16510_v58 }
 0xdbc   : > { %12949 = vmatprep.subr.bf16.mxu1 %v16513_v59 }
 0xdbe   : > { %12622 = vmatpush1.bf16.msra.mxu0 %v16508_v16 }
 0xdbf   : > { %12950 = vmatpush1.bf16.msra.mxu1 %v16511_v32  ;;  %12623 = vmatprep.subr.bf16.mxu0 %v16516_v60 }
 0xdc0   : > { %12951 = vmatprep.subr.bf16.mxu1 %v16519_v9 }
 0xdc2   : > { %12624 = vmatpush1.bf16.msra.mxu0 %v16514_v61 }
 0xdc3   : > { %12952 = vmatpush1.bf16.msra.mxu1 %v16517_v63  ;;  %12625 = vmatprep.subr.bf16.mxu0 %v16522_v0 }
 0xdc4   : > { %12953 = vmatprep.subr.bf16.mxu1 %v16525_v1 }
 0xdc6   : > { %12626 = vmatpush1.bf16.msra.mxu0 %v16520_v2 }
 0xdc7   : > { %12954 = vmatpush1.bf16.msra.mxu1 %v16523_v3  ;;  %12627 = vmatprep.subr.bf16.mxu0 %v16528_v4 }
 0xdc8   : > { %12955 = vmatprep.subr.bf16.mxu1 %v16531_v12 }
 0xdca   : > { %12628 = vmatpush1.bf16.msra.mxu0 %v16526_v11 }
 0xdcb   : > { %12956 = vmatpush1.bf16.msra.mxu1 %v16529_v13  ;;  %12629 = vmatprep.subr.bf16.mxu0 %v16534_v52 }
 0xdcc   : > { %12957 = vmatprep.subr.bf16.mxu1 %v16537_v6 }
 0xdce   : > { %12630 = vmatpush1.bf16.msra.mxu0 %v16532_v29 }
 0xdcf   : > { %12958 = vmatpush1.bf16.msra.mxu1 %v16535_v10 }
 0xdd1   : > { %12632 = vmatmul.mubr.bf16.vlgmr.msra.gmra.mrb[64].mxu0 %v9238_v48 }
 0xdd2   : > { %12960 = vmatmul.mubr.bf16.vlgmr.msra.gmra.mrb[64].mxu1 %v9238_v48 }
 0xea4   : > { %v12633_v30 = vpop.f32.mrb[64].mxu0 }
 0xea5   : > { %v15073_v33 = vadd.f32 %v12633_v30, %v17822_v41  ;;  %v12961_v38 = vpop.f32.mrb[64].mxu1  ;;  %v12635_v15 = vpop.f32.mrb[65].mxu0 }
 0xea6   : > { %v15074_v45 = vadd.f32 %v12635_v15, %v17820_v40  ;;  %v12963_v44 = vpop.f32.mrb[65].mxu1  ;;  %v12637_v7 = vpop.f32.mrb[66].mxu0  ;;  %v15075_v34 = vadd.f32 %v12961_v38, %v17824_v43 }
 0xea7   : > { %v12965_v49 = vpop.f32.mrb[66].mxu1  ;;  %v12638_v8 = vpop.f32.mrb[67].mxu0  ;;  %v15076_v26 = vadd.f32 %v12963_v44, %v17826_v18 }
 0xea8   : > { %v12970_v35 = vadd.f32 %v15074_v45, %v15073_v33  ;;  %v12966_v36 = vpop.f32.mrb[67].mxu1 }
 0xeaa   : > { %v12971_v31 = vadd.f32 %v15075_v34, %v12970_v35 }
 0xeac   : > { %v12972_v62 = vadd.f32 %v15076_v26, %v12971_v31 }
 0xeae   : > { %12973 = vadd.xlane.f32.xlu0 %v12972_v62 }
 0xf3b   : > { %v12974_v41 = vpop.xlane.xlu0 %12973 }
 0xf3c   : > { %v12975_v39 = vmul.f32 0.001953125, %v12974_v41 }
 0xf3e   : > { %v12976_v42 = vsub.f32 %v15073_v33, %v12975_v39  ;;  %v12977_v40 = vsub.f32 %v15074_v45, %v12975_v39  ;;  %v12978_v17 = vsub.f32 %v15075_v34, %v12975_v39  ;;  %v12979_v5 = vsub.f32 %v15076_v26, %v12975_v39 }
 0xf40   : > { %v12980_v14 = vmul.f32 %v12976_v42, %v12976_v42  ;;  %v12981_v43 = vmul.f32 %v12977_v40, %v12977_v40  ;;  %v12982_v20 = vmul.f32 %v12978_v17, %v12978_v17  ;;  %v12983_v25 = vmul.f32 %v12979_v5, %v12979_v5 }
 0xf42   : > { %v12984_v19 = vadd.f32 %v12981_v43, %v12980_v14 }
 0xf44   : > { %v12985_v18 = vadd.f32 %v12984_v19, %v12982_v20 }
 0xf46   : > { %v12986_v47 = vadd.f32 %v12985_v18, %v12983_v25 }
 0xf48   : > { %12987 = vadd.xlane.f32.xlu0 %v12986_v47 }
 0xf49   : > { %16901 = shalt.err (!%p16898_p8)
}
 0xf4a   : > { %s16902_s13 = scalar_lea.hbm %s17934_s24, 512  ;;  %s16906_s5 = scalar_lea.hbm %s18103_s18, 1024 }
 0xf4b   : > { %p16903_p12 = scmp.ne.s32.totalorder %s17934_s24, %s16902_s13  ;;  %p16907_p0 = scmp.lt.u32.totalorder %s17934_s24, %s18103_s18 }
 0xf4c   : > { %p16908_p7 = scmp.lt.u32.totalorder %s16906_s5, %s16902_s13  ;;  %p16910_p2 = scmp.lt.u32.totalorder %s16902_s13, %s17934_s24 }
 0xf4d   : > { %p16904_p1 = pnand %p16903_p12, %p18104_p4 }
 0xf4e   : > { %p16909_p5 = por %p16908_p7, %p16907_p0 }
 0xf4f   : > { %p16905_p3 = pneg %p16904_p1 }
 0xf50   : > { %p16911_p13 = por %p16910_p2, %p16909_p5 }
 0xf52   : > { %p16912_p6 = pnand %p16911_p13, %p16905_p3 }
 0xf54   : > { %16915 = shalt.err (!%p16912_p6)
}
 0xf55   : > { %s17049_s14 = smov 4   ;;  %v12968_v24 = vld [vmem:[#allocation18] sm:$0xf]  ;;  %v12969_v54 = vld [vmem:[#allocation20] sm:$0xf]  ;;  %s18105_s0 = sld [smem:[#allocation43_spill]] }
 0xf56   : > { %15238 = dma.vmem_to_hbm [thread:$0]  (%p18104_p4), %s17937_s7, 512, %s17934_s24, %s13056_s20, %s17045_s27, %s17045_s27, %s17049_s14   ;;  %v13000_v57 = vrot.slane %v12968_v24, %v17802_v22  ;;  %v13004_v55 = vrot.slane %v12968_v24, %v17800_v21  ;;  %v13008_v56 = vrot.slane %v12968_v24, %v17806_v37  ;;  %v13012_v53 = vrot.slane %v12968_v24, %v17804_v23 }
 0xf57   : > { %v13025_v58 = vrot.slane %v12969_v54, %v17802_v22  ;;  %v13029_v59 = vrot.slane %v12969_v54, %v17800_v21  ;;  %v13033_v16 = vrot.slane %v12969_v54, %v17806_v37  ;;  %v13037_v32 = vrot.slane %v12969_v54, %v17804_v23  ;;  %s611_s27 = scalar_lea.vmem [#allocation21], %s13345_s1  ;;  %s13051_s1 = scalar_lea.sflag [#allocation5], %s17490_s12 }
 0xf58   : > { %s13072_s24 = sshll.u32 %s611_s27, 4  ;;  %s17050_s17 = smov [#allocation21]   ;;  %s17982_s24 = int_to_ptr.vmem [resolvable:$true] %s13072_s24 }
 0xf59   : > { %s16916_s13 = scalar_lea.vmem %s17982_s24, 512  ;;  %s16920_s4 = sshll.u32 %s17050_s17, 4  ;;  %s16921_s4 = int_to_ptr.vmem [resolvable:$false] %s16920_s4 }
 0xf5a   : > { %p16917_p10 = scmp.ne.s32.totalorder %s17982_s24, %s16916_s13  ;;  %p16923_p8 = scmp.lt.s32.totalorder %s17982_s24, %s16921_s4 }
 0xf5b   : > { %s17980_s6 = scalar_lea.hbm %s18105_s0, %s14939_s28  ;;  %s16922_s28 = scalar_lea.vmem %s16921_s4, 1024 }
 0xf5c   : > { %p16918_p11 = pnand %p16917_p10, %p18104_p4  ;;  %p16924_p12 = scmp.lt.s32.totalorder %s16922_s28, %s16916_s13 }
 0xf5e   : > { %p16919_p9 = pneg %p16918_p11  ;;  %p16925_p1 = por %p16924_p12, %p16923_p8 }
 0xf60   : > { %p16926_p3 = pnand %p16925_p1, %p16919_p9 }
 0xfd5   : > { %v12988_v50 = vpop.xlane.xlu0 %12987 }
 0xfd6   : > { %v12989_v51 = vmul.f32 0.001953125, %v12988_v50 }
 0xfd8   : > { %v12990_v28 = vadd.f32 1e-05, %v12989_v51 }
 0xfda   : > { %16572 = vrsqrt.f32 %v12990_v28 }
 0xfe4   : > { %v16573_v27 = vpop.eup %16572 }
 0xfe5   : > { %v12992_v60 = vmul.f32 %v16573_v27, %v12976_v42  ;;  %v12993_v9 = vmul.f32 %v16573_v27, %v12977_v40  ;;  %v12994_v61 = vmul.f32 %v16573_v27, %v12978_v17  ;;  %v12995_v63 = vmul.f32 %v16573_v27, %v12979_v5 }
 0xfe7   : > { %v13017_v0 = vmul.f32 %v13000_v57, %v12992_v60  ;;  %v13018_v1 = vmul.f32 %v13004_v55, %v12993_v9  ;;  %v13019_v2 = vmul.f32 %v13008_v56, %v12994_v61  ;;  %v13020_v22 = vmul.f32 %v13012_v53, %v12995_v63 }
 0xfe9   : > { %v13042_v3 = vadd.f32 %v13025_v58, %v13017_v0  ;;  %v13043_v21 = vadd.f32 %v13029_v59, %v13018_v1  ;;  %v13044_v4 = vadd.f32 %v13033_v16, %v13019_v2  ;;  %v13045_v37 = vadd.f32 %v13037_v32, %v13020_v22 }
 0xfeb   : > { %13046 = vst [vmem:[%s611_s27] sm:$0xff] %v13042_v3  ;;  %13047 = vst [vmem:[%s611_s27 + $0x8] sm:$0xff] %v13043_v21 }
 0xfec   : > { %13048 = vst [vmem:[%s611_s27 + $0x10] sm:$0xff] %v13044_v4  ;;  %13049 = vst [vmem:[%s611_s27 + $0x18] sm:$0xff] %v13045_v37 }
 0xfed   : > { %16929 = shalt.err (!%p16926_p3)
}
 0xfee   : > { %s16930_s12 = scalar_lea.hbm %s17980_s6, 512  ;;  %s16934_s2 = scalar_lea.hbm %s18105_s0, 1024 }
 0xfef   : > { %p16931_p0 = scmp.ne.s32.totalorder %s17980_s6, %s16930_s12  ;;  %p16935_p2 = scmp.lt.u32.totalorder %s17980_s6, %s18105_s0 }
 0xff0   : > { %p16936_p13 = scmp.lt.u32.totalorder %s16934_s2, %s16930_s12  ;;  %p16938_p10 = scmp.lt.u32.totalorder %s16930_s12, %s17980_s6 }
 0xff1   : > { %p16932_p7 = pnand %p16931_p0, %p18104_p4 }
 0xff2   : > { %p16937_p6 = por %p16936_p13, %p16935_p2 }
 0xff3   : > { %p16933_p5 = pneg %p16932_p7 }
 0xff4   : > { %p16939_p11 = por %p16938_p10, %p16937_p6 }
 0xff6   : > { %p16940_p9 = pnand %p16939_p11, %p16933_p5 }
 0xff8   : > { %16943 = shalt.err (!%p16940_p9)
}
 0xff9   : > { %15237 = dma.vmem_to_hbm [thread:$0]  (%p18104_p4), %s17982_s24, 512, %s17980_s6, %s13051_s1  }
 0xffa PF: > { %s13101_s27 = sand.u32 1, %s17006_s21   ;;  %p18106_p8 = scmp.ne.s32.totalorder %s18082_s19, 0 }
 0xffb   : > { %p18107_p12 = scmp.ge.s32.totalorder %s17026_s26, 2  ;;  %s13102_s7 = scalar_lea.sflag [#allocation5], %s13101_s27 }
 0xffd   : > { %p15277_p1 = pnand %p18107_p12, %p18106_p8 }
 0xfff   : > { %16997 = dma.done.wait (!%p15277_p1), %s13102_s7, 512  }
0x1000   : > { %16999 = vsyncadd (!%p15277_p1), %s13102_s7, 4294966784  ;;  %s13111_s20 = scalar_lea.sflag [#allocation23], %s13101_s27 }
0x1001   : > { %17001 = dma.done.wait (!%p15277_p1), %s13111_s20, 512  }
0x1002   : > { %17003 = vsyncadd (!%p15277_p1), %s13111_s20, 4294966784  ;;  %s39_s26 = sadd.s32 1, %s17026_s26   ;;  %s18108_s21 = smov %s17010_s22 }
0x1003   : > { %p36_p3 = scmp.ge.s32.totalorder %s39_s26, 4   ;;  %s18109_s22 = smov %s17014_s23 }
0x1004   : > { %s18110_s23 = smov %s17406_s30  ;;  %s18111_s24 = smov %s17022_s25 }
0x1005   : > { %s18112_s25 = smov %s18114_s15  ;;  %38 = sbr.rel (!%p36_p3) target bundleno = 25 (0x19), region = 187 }
0x100c   :  { %13116 = vsyncpa [#allocation4], 1 }
0x100d   :  { %13118 = vsyncpa [#allocation4 + $0x1], 1 }
0x100e   :  { %13119 = vsyncpa [#allocation7], 1 }
0x100f   :  { %13121 = vsyncpa [#allocation7 + $0x1], 1 }
0x1010   :  { %13122 = vsyncpa [#allocation10], 1 }
0x1011   :  { %13123 = vsyncpa [#allocation13], 1 }
0x1012   :  { %13124 = vsyncpa [#allocation16], 1 }
0x1013   :  { %13125 = vsyncpa [#allocation19], 1 }
0x1014   :  { %13126 = vsyncpa [#allocation5], 1 }
0x1015   :  { %13128 = vsyncpa [#allocation5 + $0x1], 1 }
0x1016   :  { %13129 = vsyncpa [#allocation23], 1 }
0x1017   :  { %13131 = vsyncpa [#allocation23 + $0x1], 1 }

</bundles_post_ra>
